<compile_context>
chip_gen: v7x
topology: tpu7x:2x2x1
jax: 0.10.0
libtpu: 0.0.40
codegen_flags: <defaults>
</compile_context>

<pallas_src>
import functools

import jax
import jax.numpy as jnp
import numpy as np
from jax.experimental import pallas as pl
from jax.experimental.pallas import tpu as pltpu

LEAKY_SLOPE = 0.2
BN_EPS = 1e-5
_K = 4              # conv kernel size (all layers)
_TAPS = _K * _K     # 16


# ----------------------------------------------------------------------------
# Static one-hot "row gather" operators.  SEL[t, out_pixel, in_pixel] = 1 iff
# conv tap t of output pixel reads that input pixel (all-zero rows encode the
# zero padding at the borders).  Applied inside the kernel as MXU matmuls so
# im2col patches are built in VMEM and intermediate activations are never
# duplicated 16x in HBM.
# ----------------------------------------------------------------------------
def _conv_gather_onehot(h_in, w_in, h_out, w_out, k, stride, pad):
    g = np.zeros((k * k, h_out * w_out, h_in * w_in), np.float32)
    for i in range(k):
        for j in range(k):
            for ho in range(h_out):
                hi = stride * ho + i - pad
                if not 0 <= hi < h_in:
                    continue
                for wo in range(w_out):
                    wi = stride * wo + j - pad
                    if 0 <= wi < w_in:
                        g[i * k + j, ho * w_out + wo, hi * w_in + wi] = 1.0
    return g


_SEL2 = _conv_gather_onehot(16, 16, 8, 8, _K, 2, 1)   # (16, 64, 256)
_SEL3 = _conv_gather_onehot(8, 8, 4, 4, _K, 2, 1)     # (16, 16, 64)


# ----------------------------------------------------------------------------
# Fused whole-network kernel
# ----------------------------------------------------------------------------
def _disc_kernel(p1_ref, w1_ref, sel2_ref, w2_ref, gamma2_ref, beta2_ref,
                 sel3_ref, w3_ref, gamma3_ref, beta3_ref, w4_ref, out_ref,
                 *, n_batch):
    f32 = jnp.float32
    bf16 = jnp.bfloat16

    def leaky(v):
        return jnp.where(v > 0, v, LEAKY_SLOPE * v)

    def conv_taps(x_bf16, sel_ref, w_ref, m_out, c_out):
        # conv == sum over the k*k taps of (one-hot gather) @ x @ W_tap.
        # Both matmuls run on the MXU with bf16 operands, f32 accumulation.
        acc = jnp.zeros((m_out, c_out), f32)
        for t in range(_TAPS):
            gathered = jnp.dot(sel_ref[t], x_bf16, preferred_element_type=f32)
            acc = acc + jnp.dot(gathered.astype(bf16), w_ref[t],
                                preferred_element_type=f32)
        return acc

    def batchnorm_leaky(accs, gamma, beta, rows_per_sample):
        # BatchNorm2d (training-mode, biased batch stats over N*H*W) fused
        # with LeakyReLU.  Single pass: sum & sum-of-squares in f32,
        # var = E[x^2] - mean^2 clamped >= 0.
        cnt = float(rows_per_sample * len(accs))
        s = sum(jnp.sum(a, axis=0, keepdims=True) for a in accs)
        ss = sum(jnp.sum(a * a, axis=0, keepdims=True) for a in accs)
        mean = s * (1.0 / cnt)
        var = jnp.maximum(ss * (1.0 / cnt) - mean * mean, 0.0)
        scale = gamma * jax.lax.rsqrt(var + BN_EPS)
        shift = beta - mean * scale
        return [leaky(a * scale + shift) for a in accs]

    # ---- layer 1: Conv(1->64, k4 s2 p1) as one GEMM + LeakyReLU -------------
    # Patches come from the tiny network input only; K zero-padded 16 -> 128.
    y1 = jnp.dot(p1_ref[...], w1_ref[...], preferred_element_type=f32)
    y1 = leaky(y1).astype(bf16)                       # (N*256, 64)

    # ---- layer 2: Conv(64->128, k4 s2 p1) + BN + LeakyReLU ------------------
    acc2 = [conv_taps(y1[n * 256:(n + 1) * 256, :], sel2_ref, w2_ref, 64, 128)
            for n in range(n_batch)]
    y2 = [a.astype(bf16)
          for a in batchnorm_leaky(acc2, gamma2_ref[...], beta2_ref[...], 64)]

    # ---- layer 3: Conv(128->256, k4 s2 p1) + BN + LeakyReLU -----------------
    acc3 = [conv_taps(y2[n], sel3_ref, w3_ref, 16, 256)
            for n in range(n_batch)]
    y3 = batchnorm_leaky(acc3, gamma3_ref[...], beta3_ref[...], 16)

    # ---- layer 4: Conv(256->1, k4 valid) == per-sample dot + Sigmoid --------
    # Folded here as a VPU multiply/reduce so the width-1 result never becomes
    # a lane-sparse HBM tensor; sigmoid via EUP exp + approx reciprocal.
    w4 = w4_ref[...]                                   # (16, 256) f32
    for n in range(n_batch):
        z = jnp.sum(jnp.sum(y3[n] * w4, axis=1, keepdims=True),
                    axis=0, keepdims=True)             # (1, 1) logit
        sig = pl.reciprocal(1.0 + jnp.exp(-z), approx=True)
        out_ref[pl.ds(n, 1), :] = jnp.broadcast_to(sig, (1, 128))


def _disc_pallas(inputs, n_batch):
    kernel = functools.partial(_disc_kernel, n_batch=n_batch)

    def full_spec(a):
        nd = a.ndim
        return pl.BlockSpec(a.shape, lambda i, _nd=nd: (0,) * _nd)

    return pl.pallas_call(
        kernel,
        out_shape=jax.ShapeDtypeStruct((n_batch, 128), jnp.float32),
        grid=(1,),
        in_specs=[full_spec(a) for a in inputs],
        out_specs=pl.BlockSpec((n_batch, 128), lambda i: (0, 0)),
        compiler_params=pltpu.CompilerParams(
            # Whole net (weights + gather operators + activations) is ~3 MiB
            # with double buffering; set the budget deliberately.
            vmem_limit_bytes=32 * 1024 * 1024,
            dimension_semantics=("arbitrary",),
        ),
    )(*inputs)


# ----------------------------------------------------------------------------
# Wrapper-side plumbing (only touches the tiny network input / weights)
# ----------------------------------------------------------------------------
def im2col(x, k, stride, pad):
    N, C, H, W = x.shape
    xp = jnp.pad(x, ((0, 0), (0, 0), (pad, pad), (pad, pad)))
    Ho = (H + 2 * pad - k) // stride + 1
    Wo = (W + 2 * pad - k) // stride + 1
    cols = []
    for i in range(k):
        for j in range(k):
            cols.append(xp[:, :, i:i + stride * Ho:stride, j:j + stride * Wo:stride])
    p = jnp.stack(cols, axis=0).reshape(k, k, N, C, Ho, Wo)
    p = p.transpose(2, 4, 5, 3, 0, 1).reshape(N * Ho * Wo, C * k * k)
    return p


def init_params(key):
    ks = jax.random.split(key, 4)
    return {
        "w1": 0.02 * jax.random.normal(ks[0], (64, 1, 4, 4), jnp.float32),
        "w2": 0.02 * jax.random.normal(ks[1], (128, 64, 4, 4), jnp.float32),
        "g2": jnp.ones((1, 128), jnp.float32),
        "b2": jnp.zeros((1, 128), jnp.float32),
        "w3": 0.02 * jax.random.normal(ks[2], (256, 128, 4, 4), jnp.float32),
        "g3": jnp.ones((1, 256), jnp.float32),
        "b3": jnp.zeros((1, 256), jnp.float32),
        "w4": 0.02 * jax.random.normal(ks[3], (1, 256, 4, 4), jnp.float32),
    }


@jax.jit
def discriminator_forward(params, x):
    N = x.shape[0]
    assert x.shape[1:] == (1, 32, 32), "DCGAN discriminator expects 1x32x32 input"
    bf16 = jnp.bfloat16

    # Layer-1 im2col of the (tiny) network input only; K padded 16 -> 128.
    p1 = im2col(x, _K, 2, 1)                                      # (N*256, 16)
    p1 = jnp.pad(p1, ((0, 0), (0, 128 - _TAPS))).astype(bf16)     # (N*256, 128)
    w1 = jnp.pad(params["w1"].reshape(64, _TAPS).T,
                 ((0, 128 - _TAPS), (0, 0))).astype(bf16)         # (128, 64)

    # Per-tap weights: (Co, Ci, kh, kw) -> (kh*kw, Ci, Co), bf16 for the MXU.
    w2 = jnp.transpose(params["w2"], (2, 3, 1, 0)).reshape(_TAPS, 64, 128).astype(bf16)
    w3 = jnp.transpose(params["w3"], (2, 3, 1, 0)).reshape(_TAPS, 128, 256).astype(bf16)
    # Final 4x4 valid conv == dot over (16 pixels, 256 channels); kept f32.
    w4 = jnp.transpose(params["w4"][0], (1, 2, 0)).reshape(_TAPS, 256)

    sel2 = jnp.asarray(_SEL2, bf16)
    sel3 = jnp.asarray(_SEL3, bf16)

    out = _disc_pallas(
        (p1, w1, sel2, w2, params["g2"], params["b2"],
         sel3, w3, params["g3"], params["b3"], w4),
        n_batch=N,
    )
    return out[:, :1].reshape(N, 1, 1, 1)


# ----------------------------------------------------------------------------
# Pure-JAX reference mirroring the kernel's precision (bf16 conv operands,
# f32 accumulation / BN / activations, f32 final conv) for a correctness check.
# ----------------------------------------------------------------------------
def _ref_forward(params, x):
    def conv(lhs, w, s, p, low_precision=True):
        if low_precision:
            lhs, w = lhs.astype(jnp.bfloat16), w.astype(jnp.bfloat16)
        return jax.lax.conv_general_dilated(
            lhs, w, (s, s), [(p, p), (p, p)],
            dimension_numbers=("NCHW", "OIHW", "NCHW"),
            preferred_element_type=jnp.float32)

    def bn(h, g, b):
        mean = jnp.mean(h, axis=(0, 2, 3), keepdims=True)
        var = jnp.mean(jnp.square(h - mean), axis=(0, 2, 3), keepdims=True)
        hn = (h - mean) * jax.lax.rsqrt(var + BN_EPS)
        return hn * g.reshape(1, -1, 1, 1) + b.reshape(1, -1, 1, 1)

    lrelu = lambda v: jnp.where(v > 0, v, LEAKY_SLOPE * v)
    h = lrelu(conv(x, params["w1"], 2, 1))
    h = lrelu(bn(conv(h, params["w2"], 2, 1), params["g2"], params["b2"]))
    h = lrelu(bn(conv(h, params["w3"], 2, 1), params["g3"], params["b3"]))
    return jax.nn.sigmoid(conv(h, params["w4"], 1, 0, low_precision=False))


if __name__ == "__main__":
    key = jax.random.PRNGKey(0)
    pkey, xkey = jax.random.split(key)
    params = init_params(pkey)
    x = jax.random.normal(xkey, (2, 1, 32, 32), jnp.float32)  # N=2, 1x32x32

    out = jax.block_until_ready(discriminator_forward(params, x))
    assert out.shape == (2, 1, 1, 1), out.shape

    ref = jax.block_until_ready(_ref_forward(params, x))
    # Tolerance covers bf16 MXU operands + EUP approx reciprocal in the sigmoid.
    np.testing.assert_allclose(np.asarray(out), np.asarray(ref),
                               rtol=1e-2, atol=1e-2)

    print("KERNEL_OK")
</pallas_src>

<mosaic_0001>
module attributes {stable_mosaic.version = 11 : i64} {
  func.func @_disc_kernel(%arg0: i32, %arg1: memref<512x128xbf16, #tpu.memory_space<vmem>>, %arg2: memref<128x64xbf16, #tpu.memory_space<vmem>>, %arg3: memref<16x64x256xbf16, #tpu.memory_space<vmem>>, %arg4: memref<16x64x128xbf16, #tpu.memory_space<vmem>>, %arg5: memref<1x128xf32, #tpu.memory_space<vmem>>, %arg6: memref<1x128xf32, #tpu.memory_space<vmem>>, %arg7: memref<16x16x64xbf16, #tpu.memory_space<vmem>>, %arg8: memref<16x128x256xbf16, #tpu.memory_space<vmem>>, %arg9: memref<1x256xf32, #tpu.memory_space<vmem>>, %arg10: memref<1x256xf32, #tpu.memory_space<vmem>>, %arg11: memref<16x256xf32, #tpu.memory_space<vmem>>, %arg12: memref<2x128xf32, #tpu.memory_space<vmem>>) attributes {dimension_semantics = [#tpu.dimension_semantics<arbitrary>], iteration_bounds = array<i64: 1>, scalar_prefetch = 0 : i64, scratch_operands = 0 : i64, tpu.core_type = #tpu.core_type<tc>, window_params = [{pipeline_mode = #tpu.pipeline_mode<synchronous>, transform_indices = @transform_0, window_bounds = array<i64: 512, 128>}, {pipeline_mode = #tpu.pipeline_mode<synchronous>, transform_indices = @transform_1, window_bounds = array<i64: 128, 64>}, {pipeline_mode = #tpu.pipeline_mode<synchronous>, transform_indices = @transform_2, window_bounds = array<i64: 16, 64, 256>}, {pipeline_mode = #tpu.pipeline_mode<synchronous>, transform_indices = @transform_3, window_bounds = array<i64: 16, 64, 128>}, {pipeline_mode = #tpu.pipeline_mode<synchronous>, transform_indices = @transform_4, window_bounds = array<i64: 1, 128>}, {pipeline_mode = #tpu.pipeline_mode<synchronous>, transform_indices = @transform_5, window_bounds = array<i64: 1, 128>}, {pipeline_mode = #tpu.pipeline_mode<synchronous>, transform_indices = @transform_6, window_bounds = array<i64: 16, 16, 64>}, {pipeline_mode = #tpu.pipeline_mode<synchronous>, transform_indices = @transform_7, window_bounds = array<i64: 16, 128, 256>}, {pipeline_mode = #tpu.pipeline_mode<synchronous>, transform_indices = @transform_8, window_bounds = array<i64: 1, 256>}, {pipeline_mode = #tpu.pipeline_mode<synchronous>, transform_indices = @transform_9, window_bounds = array<i64: 1, 256>}, {pipeline_mode = #tpu.pipeline_mode<synchronous>, transform_indices = @transform_10, window_bounds = array<i64: 16, 256>}, {pipeline_mode = #tpu.pipeline_mode<synchronous>, transform_indices = @transform_11, window_bounds = array<i64: 2, 128>}]} {
    %c0 = arith.constant 0 : index
    %c0_0 = arith.constant 0 : index
    %0 = vector.load %arg1[%c0, %c0_0] : memref<512x128xbf16, #tpu.memory_space<vmem>>, vector<512x128xbf16>
    %c0_1 = arith.constant 0 : index
    %c0_2 = arith.constant 0 : index
    %1 = vector.load %arg2[%c0_1, %c0_2] : memref<128x64xbf16, #tpu.memory_space<vmem>>, vector<128x64xbf16>
    %cst = arith.constant dense<0.000000e+00> : vector<512x64xf32>
    %2 = tpu.matmul %0, %1, %cst {dimension_numbers = #tpu.dot_dimension_numbers<[1], [0], [0], [1], [0, 0, 1, 1], [], []>} : vector<512x128xbf16>, vector<128x64xbf16>, vector<512x64xf32> -> vector<512x64xf32>
    %cst_3 = arith.constant 0.000000e+00 : f32
    %3 = vector.broadcast %cst_3 : f32 to vector<512x64xf32>
    %4 = arith.cmpf ogt, %2, %3 : vector<512x64xf32>
    %cst_4 = arith.constant 2.000000e-01 : f32
    %5 = vector.broadcast %cst_4 : f32 to vector<512x64xf32>
    %6 = arith.mulf %5, %2 : vector<512x64xf32>
    %7 = arith.select %4, %2, %6 : vector<512x64xi1>, vector<512x64xf32>
    %8 = arith.truncf %7 : vector<512x64xf32> to vector<512x64xbf16>
    %9 = vector.extract_strided_slice %8 {offsets = [0, 0], sizes = [256, 64], strides = [1, 1]} : vector<512x64xbf16> to vector<256x64xbf16>
    %cst_5 = arith.constant 0.000000e+00 : f32
    %10 = vector.broadcast %cst_5 : f32 to vector<64x128xf32>
    %c0_6 = arith.constant 0 : index
    %c0_7 = arith.constant 0 : index
    %c0_8 = arith.constant 0 : index
    %11 = vector.load %arg3[%c0_6, %c0_7, %c0_8] : memref<16x64x256xbf16, #tpu.memory_space<vmem>>, vector<1x64x256xbf16>
    %12 = vector.shape_cast %11 : vector<1x64x256xbf16> to vector<64x256xbf16>
    %cst_9 = arith.constant dense<0.000000e+00> : vector<64x64xf32>
    %13 = tpu.matmul %12, %9, %cst_9 {dimension_numbers = #tpu.dot_dimension_numbers<[1], [0], [0], [1], [0, 0, 1, 1], [], []>} : vector<64x256xbf16>, vector<256x64xbf16>, vector<64x64xf32> -> vector<64x64xf32>
    %14 = arith.truncf %13 : vector<64x64xf32> to vector<64x64xbf16>
    %c0_10 = arith.constant 0 : index
    %c0_11 = arith.constant 0 : index
    %c0_12 = arith.constant 0 : index
    %15 = vector.load %arg4[%c0_10, %c0_11, %c0_12] : memref<16x64x128xbf16, #tpu.memory_space<vmem>>, vector<1x64x128xbf16>
    %16 = vector.shape_cast %15 : vector<1x64x128xbf16> to vector<64x128xbf16>
    %cst_13 = arith.constant dense<0.000000e+00> : vector<64x128xf32>
    %17 = tpu.matmul %14, %16, %cst_13 {dimension_numbers = #tpu.dot_dimension_numbers<[1], [0], [0], [1], [0, 0, 1, 1], [], []>} : vector<64x64xbf16>, vector<64x128xbf16>, vector<64x128xf32> -> vector<64x128xf32>
    %18 = arith.addf %10, %17 : vector<64x128xf32>
    %c1 = arith.constant 1 : index
    %c0_14 = arith.constant 0 : index
    %c0_15 = arith.constant 0 : index
    %19 = vector.load %arg3[%c1, %c0_14, %c0_15] : memref<16x64x256xbf16, #tpu.memory_space<vmem>>, vector<1x64x256xbf16>
    %20 = vector.shape_cast %19 : vector<1x64x256xbf16> to vector<64x256xbf16>
    %cst_16 = arith.constant dense<0.000000e+00> : vector<64x64xf32>
    %21 = tpu.matmul %20, %9, %cst_16 {dimension_numbers = #tpu.dot_dimension_numbers<[1], [0], [0], [1], [0, 0, 1, 1], [], []>} : vector<64x256xbf16>, vector<256x64xbf16>, vector<64x64xf32> -> vector<64x64xf32>
    %22 = arith.truncf %21 : vector<64x64xf32> to vector<64x64xbf16>
    %c1_17 = arith.constant 1 : index
    %c0_18 = arith.constant 0 : index
    %c0_19 = arith.constant 0 : index
    %23 = vector.load %arg4[%c1_17, %c0_18, %c0_19] : memref<16x64x128xbf16, #tpu.memory_space<vmem>>, vector<1x64x128xbf16>
    %24 = vector.shape_cast %23 : vector<1x64x128xbf16> to vector<64x128xbf16>
    %cst_20 = arith.constant dense<0.000000e+00> : vector<64x128xf32>
    %25 = tpu.matmul %22, %24, %cst_20 {dimension_numbers = #tpu.dot_dimension_numbers<[1], [0], [0], [1], [0, 0, 1, 1], [], []>} : vector<64x64xbf16>, vector<64x128xbf16>, vector<64x128xf32> -> vector<64x128xf32>
    %26 = arith.addf %18, %25 : vector<64x128xf32>
    %c2 = arith.constant 2 : index
    %c0_21 = arith.constant 0 : index
    %c0_22 = arith.constant 0 : index
    %27 = vector.load %arg3[%c2, %c0_21, %c0_22] : memref<16x64x256xbf16, #tpu.memory_space<vmem>>, vector<1x64x256xbf16>
    %28 = vector.shape_cast %27 : vector<1x64x256xbf16> to vector<64x256xbf16>
    %cst_23 = arith.constant dense<0.000000e+00> : vector<64x64xf32>
    %29 = tpu.matmul %28, %9, %cst_23 {dimension_numbers = #tpu.dot_dimension_numbers<[1], [0], [0], [1], [0, 0, 1, 1], [], []>} : vector<64x256xbf16>, vector<256x64xbf16>, vector<64x64xf32> -> vector<64x64xf32>
    %30 = arith.truncf %29 : vector<64x64xf32> to vector<64x64xbf16>
    %c2_24 = arith.constant 2 : index
    %c0_25 = arith.constant 0 : index
    %c0_26 = arith.constant 0 : index
    %31 = vector.load %arg4[%c2_24, %c0_25, %c0_26] : memref<16x64x128xbf16, #tpu.memory_space<vmem>>, vector<1x64x128xbf16>
    %32 = vector.shape_cast %31 : vector<1x64x128xbf16> to vector<64x128xbf16>
    %cst_27 = arith.constant dense<0.000000e+00> : vector<64x128xf32>
    %33 = tpu.matmul %30, %32, %cst_27 {dimension_numbers = #tpu.dot_dimension_numbers<[1], [0], [0], [1], [0, 0, 1, 1], [], []>} : vector<64x64xbf16>, vector<64x128xbf16>, vector<64x128xf32> -> vector<64x128xf32>
    %34 = arith.addf %26, %33 : vector<64x128xf32>
    %c3 = arith.constant 3 : index
    %c0_28 = arith.constant 0 : index
    %c0_29 = arith.constant 0 : index
    %35 = vector.load %arg3[%c3, %c0_28, %c0_29] : memref<16x64x256xbf16, #tpu.memory_space<vmem>>, vector<1x64x256xbf16>
    %36 = vector.shape_cast %35 : vector<1x64x256xbf16> to vector<64x256xbf16>
    %cst_30 = arith.constant dense<0.000000e+00> : vector<64x64xf32>
    %37 = tpu.matmul %36, %9, %cst_30 {dimension_numbers = #tpu.dot_dimension_numbers<[1], [0], [0], [1], [0, 0, 1, 1], [], []>} : vector<64x256xbf16>, vector<256x64xbf16>, vector<64x64xf32> -> vector<64x64xf32>
    %38 = arith.truncf %37 : vector<64x64xf32> to vector<64x64xbf16>
    %c3_31 = arith.constant 3 : index
    %c0_32 = arith.constant 0 : index
    %c0_33 = arith.constant 0 : index
    %39 = vector.load %arg4[%c3_31, %c0_32, %c0_33] : memref<16x64x128xbf16, #tpu.memory_space<vmem>>, vector<1x64x128xbf16>
    %40 = vector.shape_cast %39 : vector<1x64x128xbf16> to vector<64x128xbf16>
    %cst_34 = arith.constant dense<0.000000e+00> : vector<64x128xf32>
    %41 = tpu.matmul %38, %40, %cst_34 {dimension_numbers = #tpu.dot_dimension_numbers<[1], [0], [0], [1], [0, 0, 1, 1], [], []>} : vector<64x64xbf16>, vector<64x128xbf16>, vector<64x128xf32> -> vector<64x128xf32>
    %42 = arith.addf %34, %41 : vector<64x128xf32>
    %c4 = arith.constant 4 : index
    %c0_35 = arith.constant 0 : index
    %c0_36 = arith.constant 0 : index
    %43 = vector.load %arg3[%c4, %c0_35, %c0_36] : memref<16x64x256xbf16, #tpu.memory_space<vmem>>, vector<1x64x256xbf16>
    %44 = vector.shape_cast %43 : vector<1x64x256xbf16> to vector<64x256xbf16>
    %cst_37 = arith.constant dense<0.000000e+00> : vector<64x64xf32>
    %45 = tpu.matmul %44, %9, %cst_37 {dimension_numbers = #tpu.dot_dimension_numbers<[1], [0], [0], [1], [0, 0, 1, 1], [], []>} : vector<64x256xbf16>, vector<256x64xbf16>, vector<64x64xf32> -> vector<64x64xf32>
    %46 = arith.truncf %45 : vector<64x64xf32> to vector<64x64xbf16>
    %c4_38 = arith.constant 4 : index
    %c0_39 = arith.constant 0 : index
    %c0_40 = arith.constant 0 : index
    %47 = vector.load %arg4[%c4_38, %c0_39, %c0_40] : memref<16x64x128xbf16, #tpu.memory_space<vmem>>, vector<1x64x128xbf16>
    %48 = vector.shape_cast %47 : vector<1x64x128xbf16> to vector<64x128xbf16>
    %cst_41 = arith.constant dense<0.000000e+00> : vector<64x128xf32>
    %49 = tpu.matmul %46, %48, %cst_41 {dimension_numbers = #tpu.dot_dimension_numbers<[1], [0], [0], [1], [0, 0, 1, 1], [], []>} : vector<64x64xbf16>, vector<64x128xbf16>, vector<64x128xf32> -> vector<64x128xf32>
    %50 = arith.addf %42, %49 : vector<64x128xf32>
    %c5 = arith.constant 5 : index
    %c0_42 = arith.constant 0 : index
    %c0_43 = arith.constant 0 : index
    %51 = vector.load %arg3[%c5, %c0_42, %c0_43] : memref<16x64x256xbf16, #tpu.memory_space<vmem>>, vector<1x64x256xbf16>
    %52 = vector.shape_cast %51 : vector<1x64x256xbf16> to vector<64x256xbf16>
    %cst_44 = arith.constant dense<0.000000e+00> : vector<64x64xf32>
    %53 = tpu.matmul %52, %9, %cst_44 {dimension_numbers = #tpu.dot_dimension_numbers<[1], [0], [0], [1], [0, 0, 1, 1], [], []>} : vector<64x256xbf16>, vector<256x64xbf16>, vector<64x64xf32> -> vector<64x64xf32>
    %54 = arith.truncf %53 : vector<64x64xf32> to vector<64x64xbf16>
    %c5_45 = arith.constant 5 : index
    %c0_46 = arith.constant 0 : index
    %c0_47 = arith.constant 0 : index
    %55 = vector.load %arg4[%c5_45, %c0_46, %c0_47] : memref<16x64x128xbf16, #tpu.memory_space<vmem>>, vector<1x64x128xbf16>
    %56 = vector.shape_cast %55 : vector<1x64x128xbf16> to vector<64x128xbf16>
    %cst_48 = arith.constant dense<0.000000e+00> : vector<64x128xf32>
    %57 = tpu.matmul %54, %56, %cst_48 {dimension_numbers = #tpu.dot_dimension_numbers<[1], [0], [0], [1], [0, 0, 1, 1], [], []>} : vector<64x64xbf16>, vector<64x128xbf16>, vector<64x128xf32> -> vector<64x128xf32>
    %58 = arith.addf %50, %57 : vector<64x128xf32>
    %c6 = arith.constant 6 : index
    %c0_49 = arith.constant 0 : index
    %c0_50 = arith.constant 0 : index
    %59 = vector.load %arg3[%c6, %c0_49, %c0_50] : memref<16x64x256xbf16, #tpu.memory_space<vmem>>, vector<1x64x256xbf16>
    %60 = vector.shape_cast %59 : vector<1x64x256xbf16> to vector<64x256xbf16>
    %cst_51 = arith.constant dense<0.000000e+00> : vector<64x64xf32>
    %61 = tpu.matmul %60, %9, %cst_51 {dimension_numbers = #tpu.dot_dimension_numbers<[1], [0], [0], [1], [0, 0, 1, 1], [], []>} : vector<64x256xbf16>, vector<256x64xbf16>, vector<64x64xf32> -> vector<64x64xf32>
    %62 = arith.truncf %61 : vector<64x64xf32> to vector<64x64xbf16>
    %c6_52 = arith.constant 6 : index
    %c0_53 = arith.constant 0 : index
    %c0_54 = arith.constant 0 : index
    %63 = vector.load %arg4[%c6_52, %c0_53, %c0_54] : memref<16x64x128xbf16, #tpu.memory_space<vmem>>, vector<1x64x128xbf16>
    %64 = vector.shape_cast %63 : vector<1x64x128xbf16> to vector<64x128xbf16>
    %cst_55 = arith.constant dense<0.000000e+00> : vector<64x128xf32>
    %65 = tpu.matmul %62, %64, %cst_55 {dimension_numbers = #tpu.dot_dimension_numbers<[1], [0], [0], [1], [0, 0, 1, 1], [], []>} : vector<64x64xbf16>, vector<64x128xbf16>, vector<64x128xf32> -> vector<64x128xf32>
    %66 = arith.addf %58, %65 : vector<64x128xf32>
    %c7 = arith.constant 7 : index
    %c0_56 = arith.constant 0 : index
    %c0_57 = arith.constant 0 : index
    %67 = vector.load %arg3[%c7, %c0_56, %c0_57] : memref<16x64x256xbf16, #tpu.memory_space<vmem>>, vector<1x64x256xbf16>
    %68 = vector.shape_cast %67 : vector<1x64x256xbf16> to vector<64x256xbf16>
    %cst_58 = arith.constant dense<0.000000e+00> : vector<64x64xf32>
    %69 = tpu.matmul %68, %9, %cst_58 {dimension_numbers = #tpu.dot_dimension_numbers<[1], [0], [0], [1], [0, 0, 1, 1], [], []>} : vector<64x256xbf16>, vector<256x64xbf16>, vector<64x64xf32> -> vector<64x64xf32>
    %70 = arith.truncf %69 : vector<64x64xf32> to vector<64x64xbf16>
    %c7_59 = arith.constant 7 : index
    %c0_60 = arith.constant 0 : index
    %c0_61 = arith.constant 0 : index
    %71 = vector.load %arg4[%c7_59, %c0_60, %c0_61] : memref<16x64x128xbf16, #tpu.memory_space<vmem>>, vector<1x64x128xbf16>
    %72 = vector.shape_cast %71 : vector<1x64x128xbf16> to vector<64x128xbf16>
    %cst_62 = arith.constant dense<0.000000e+00> : vector<64x128xf32>
    %73 = tpu.matmul %70, %72, %cst_62 {dimension_numbers = #tpu.dot_dimension_numbers<[1], [0], [0], [1], [0, 0, 1, 1], [], []>} : vector<64x64xbf16>, vector<64x128xbf16>, vector<64x128xf32> -> vector<64x128xf32>
    %74 = arith.addf %66, %73 : vector<64x128xf32>
    %c8 = arith.constant 8 : index
    %c0_63 = arith.constant 0 : index
    %c0_64 = arith.constant 0 : index
    %75 = vector.load %arg3[%c8, %c0_63, %c0_64] : memref<16x64x256xbf16, #tpu.memory_space<vmem>>, vector<1x64x256xbf16>
    %76 = vector.shape_cast %75 : vector<1x64x256xbf16> to vector<64x256xbf16>
    %cst_65 = arith.constant dense<0.000000e+00> : vector<64x64xf32>
    %77 = tpu.matmul %76, %9, %cst_65 {dimension_numbers = #tpu.dot_dimension_numbers<[1], [0], [0], [1], [0, 0, 1, 1], [], []>} : vector<64x256xbf16>, vector<256x64xbf16>, vector<64x64xf32> -> vector<64x64xf32>
    %78 = arith.truncf %77 : vector<64x64xf32> to vector<64x64xbf16>
    %c8_66 = arith.constant 8 : index
    %c0_67 = arith.constant 0 : index
    %c0_68 = arith.constant 0 : index
    %79 = vector.load %arg4[%c8_66, %c0_67, %c0_68] : memref<16x64x128xbf16, #tpu.memory_space<vmem>>, vector<1x64x128xbf16>
    %80 = vector.shape_cast %79 : vector<1x64x128xbf16> to vector<64x128xbf16>
    %cst_69 = arith.constant dense<0.000000e+00> : vector<64x128xf32>
    %81 = tpu.matmul %78, %80, %cst_69 {dimension_numbers = #tpu.dot_dimension_numbers<[1], [0], [0], [1], [0, 0, 1, 1], [], []>} : vector<64x64xbf16>, vector<64x128xbf16>, vector<64x128xf32> -> vector<64x128xf32>
    %82 = arith.addf %74, %81 : vector<64x128xf32>
    %c9 = arith.constant 9 : index
    %c0_70 = arith.constant 0 : index
    %c0_71 = arith.constant 0 : index
    %83 = vector.load %arg3[%c9, %c0_70, %c0_71] : memref<16x64x256xbf16, #tpu.memory_space<vmem>>, vector<1x64x256xbf16>
    %84 = vector.shape_cast %83 : vector<1x64x256xbf16> to vector<64x256xbf16>
    %cst_72 = arith.constant dense<0.000000e+00> : vector<64x64xf32>
    %85 = tpu.matmul %84, %9, %cst_72 {dimension_numbers = #tpu.dot_dimension_numbers<[1], [0], [0], [1], [0, 0, 1, 1], [], []>} : vector<64x256xbf16>, vector<256x64xbf16>, vector<64x64xf32> -> vector<64x64xf32>
    %86 = arith.truncf %85 : vector<64x64xf32> to vector<64x64xbf16>
    %c9_73 = arith.constant 9 : index
    %c0_74 = arith.constant 0 : index
    %c0_75 = arith.constant 0 : index
    %87 = vector.load %arg4[%c9_73, %c0_74, %c0_75] : memref<16x64x128xbf16, #tpu.memory_space<vmem>>, vector<1x64x128xbf16>
    %88 = vector.shape_cast %87 : vector<1x64x128xbf16> to vector<64x128xbf16>
    %cst_76 = arith.constant dense<0.000000e+00> : vector<64x128xf32>
    %89 = tpu.matmul %86, %88, %cst_76 {dimension_numbers = #tpu.dot_dimension_numbers<[1], [0], [0], [1], [0, 0, 1, 1], [], []>} : vector<64x64xbf16>, vector<64x128xbf16>, vector<64x128xf32> -> vector<64x128xf32>
    %90 = arith.addf %82, %89 : vector<64x128xf32>
    %c10 = arith.constant 10 : index
    %c0_77 = arith.constant 0 : index
    %c0_78 = arith.constant 0 : index
    %91 = vector.load %arg3[%c10, %c0_77, %c0_78] : memref<16x64x256xbf16, #tpu.memory_space<vmem>>, vector<1x64x256xbf16>
    %92 = vector.shape_cast %91 : vector<1x64x256xbf16> to vector<64x256xbf16>
    %cst_79 = arith.constant dense<0.000000e+00> : vector<64x64xf32>
    %93 = tpu.matmul %92, %9, %cst_79 {dimension_numbers = #tpu.dot_dimension_numbers<[1], [0], [0], [1], [0, 0, 1, 1], [], []>} : vector<64x256xbf16>, vector<256x64xbf16>, vector<64x64xf32> -> vector<64x64xf32>
    %94 = arith.truncf %93 : vector<64x64xf32> to vector<64x64xbf16>
    %c10_80 = arith.constant 10 : index
    %c0_81 = arith.constant 0 : index
    %c0_82 = arith.constant 0 : index
    %95 = vector.load %arg4[%c10_80, %c0_81, %c0_82] : memref<16x64x128xbf16, #tpu.memory_space<vmem>>, vector<1x64x128xbf16>
    %96 = vector.shape_cast %95 : vector<1x64x128xbf16> to vector<64x128xbf16>
    %cst_83 = arith.constant dense<0.000000e+00> : vector<64x128xf32>
    %97 = tpu.matmul %94, %96, %cst_83 {dimension_numbers = #tpu.dot_dimension_numbers<[1], [0], [0], [1], [0, 0, 1, 1], [], []>} : vector<64x64xbf16>, vector<64x128xbf16>, vector<64x128xf32> -> vector<64x128xf32>
    %98 = arith.addf %90, %97 : vector<64x128xf32>
    %c11 = arith.constant 11 : index
    %c0_84 = arith.constant 0 : index
    %c0_85 = arith.constant 0 : index
    %99 = vector.load %arg3[%c11, %c0_84, %c0_85] : memref<16x64x256xbf16, #tpu.memory_space<vmem>>, vector<1x64x256xbf16>
    %100 = vector.shape_cast %99 : vector<1x64x256xbf16> to vector<64x256xbf16>
    %cst_86 = arith.constant dense<0.000000e+00> : vector<64x64xf32>
    %101 = tpu.matmul %100, %9, %cst_86 {dimension_numbers = #tpu.dot_dimension_numbers<[1], [0], [0], [1], [0, 0, 1, 1], [], []>} : vector<64x256xbf16>, vector<256x64xbf16>, vector<64x64xf32> -> vector<64x64xf32>
    %102 = arith.truncf %101 : vector<64x64xf32> to vector<64x64xbf16>
    %c11_87 = arith.constant 11 : index
    %c0_88 = arith.constant 0 : index
    %c0_89 = arith.constant 0 : index
    %103 = vector.load %arg4[%c11_87, %c0_88, %c0_89] : memref<16x64x128xbf16, #tpu.memory_space<vmem>>, vector<1x64x128xbf16>
    %104 = vector.shape_cast %103 : vector<1x64x128xbf16> to vector<64x128xbf16>
    %cst_90 = arith.constant dense<0.000000e+00> : vector<64x128xf32>
    %105 = tpu.matmul %102, %104, %cst_90 {dimension_numbers = #tpu.dot_dimension_numbers<[1], [0], [0], [1], [0, 0, 1, 1], [], []>} : vector<64x64xbf16>, vector<64x128xbf16>, vector<64x128xf32> -> vector<64x128xf32>
    %106 = arith.addf %98, %105 : vector<64x128xf32>
    %c12 = arith.constant 12 : index
    %c0_91 = arith.constant 0 : index
    %c0_92 = arith.constant 0 : index
    %107 = vector.load %arg3[%c12, %c0_91, %c0_92] : memref<16x64x256xbf16, #tpu.memory_space<vmem>>, vector<1x64x256xbf16>
    %108 = vector.shape_cast %107 : vector<1x64x256xbf16> to vector<64x256xbf16>
    %cst_93 = arith.constant dense<0.000000e+00> : vector<64x64xf32>
    %109 = tpu.matmul %108, %9, %cst_93 {dimension_numbers = #tpu.dot_dimension_numbers<[1], [0], [0], [1], [0, 0, 1, 1], [], []>} : vector<64x256xbf16>, vector<256x64xbf16>, vector<64x64xf32> -> vector<64x64xf32>
    %110 = arith.truncf %109 : vector<64x64xf32> to vector<64x64xbf16>
    %c12_94 = arith.constant 12 : index
    %c0_95 = arith.constant 0 : index
    %c0_96 = arith.constant 0 : index
    %111 = vector.load %arg4[%c12_94, %c0_95, %c0_96] : memref<16x64x128xbf16, #tpu.memory_space<vmem>>, vector<1x64x128xbf16>
    %112 = vector.shape_cast %111 : vector<1x64x128xbf16> to vector<64x128xbf16>
    %cst_97 = arith.constant dense<0.000000e+00> : vector<64x128xf32>
    %113 = tpu.matmul %110, %112, %cst_97 {dimension_numbers = #tpu.dot_dimension_numbers<[1], [0], [0], [1], [0, 0, 1, 1], [], []>} : vector<64x64xbf16>, vector<64x128xbf16>, vector<64x128xf32> -> vector<64x128xf32>
    %114 = arith.addf %106, %113 : vector<64x128xf32>
    %c13 = arith.constant 13 : index
    %c0_98 = arith.constant 0 : index
    %c0_99 = arith.constant 0 : index
    %115 = vector.load %arg3[%c13, %c0_98, %c0_99] : memref<16x64x256xbf16, #tpu.memory_space<vmem>>, vector<1x64x256xbf16>
    %116 = vector.shape_cast %115 : vector<1x64x256xbf16> to vector<64x256xbf16>
    %cst_100 = arith.constant dense<0.000000e+00> : vector<64x64xf32>
    %117 = tpu.matmul %116, %9, %cst_100 {dimension_numbers = #tpu.dot_dimension_numbers<[1], [0], [0], [1], [0, 0, 1, 1], [], []>} : vector<64x256xbf16>, vector<256x64xbf16>, vector<64x64xf32> -> vector<64x64xf32>
    %118 = arith.truncf %117 : vector<64x64xf32> to vector<64x64xbf16>
    %c13_101 = arith.constant 13 : index
    %c0_102 = arith.constant 0 : index
    %c0_103 = arith.constant 0 : index
    %119 = vector.load %arg4[%c13_101, %c0_102, %c0_103] : memref<16x64x128xbf16, #tpu.memory_space<vmem>>, vector<1x64x128xbf16>
    %120 = vector.shape_cast %119 : vector<1x64x128xbf16> to vector<64x128xbf16>
    %cst_104 = arith.constant dense<0.000000e+00> : vector<64x128xf32>
    %121 = tpu.matmul %118, %120, %cst_104 {dimension_numbers = #tpu.dot_dimension_numbers<[1], [0], [0], [1], [0, 0, 1, 1], [], []>} : vector<64x64xbf16>, vector<64x128xbf16>, vector<64x128xf32> -> vector<64x128xf32>
    %122 = arith.addf %114, %121 : vector<64x128xf32>
    %c14 = arith.constant 14 : index
    %c0_105 = arith.constant 0 : index
    %c0_106 = arith.constant 0 : index
    %123 = vector.load %arg3[%c14, %c0_105, %c0_106] : memref<16x64x256xbf16, #tpu.memory_space<vmem>>, vector<1x64x256xbf16>
    %124 = vector.shape_cast %123 : vector<1x64x256xbf16> to vector<64x256xbf16>
    %cst_107 = arith.constant dense<0.000000e+00> : vector<64x64xf32>
    %125 = tpu.matmul %124, %9, %cst_107 {dimension_numbers = #tpu.dot_dimension_numbers<[1], [0], [0], [1], [0, 0, 1, 1], [], []>} : vector<64x256xbf16>, vector<256x64xbf16>, vector<64x64xf32> -> vector<64x64xf32>
    %126 = arith.truncf %125 : vector<64x64xf32> to vector<64x64xbf16>
    %c14_108 = arith.constant 14 : index
    %c0_109 = arith.constant 0 : index
    %c0_110 = arith.constant 0 : index
    %127 = vector.load %arg4[%c14_108, %c0_109, %c0_110] : memref<16x64x128xbf16, #tpu.memory_space<vmem>>, vector<1x64x128xbf16>
    %128 = vector.shape_cast %127 : vector<1x64x128xbf16> to vector<64x128xbf16>
    %cst_111 = arith.constant dense<0.000000e+00> : vector<64x128xf32>
    %129 = tpu.matmul %126, %128, %cst_111 {dimension_numbers = #tpu.dot_dimension_numbers<[1], [0], [0], [1], [0, 0, 1, 1], [], []>} : vector<64x64xbf16>, vector<64x128xbf16>, vector<64x128xf32> -> vector<64x128xf32>
    %130 = arith.addf %122, %129 : vector<64x128xf32>
    %c15 = arith.constant 15 : index
    %c0_112 = arith.constant 0 : index
    %c0_113 = arith.constant 0 : index
    %131 = vector.load %arg3[%c15, %c0_112, %c0_113] : memref<16x64x256xbf16, #tpu.memory_space<vmem>>, vector<1x64x256xbf16>
    %132 = vector.shape_cast %131 : vector<1x64x256xbf16> to vector<64x256xbf16>
    %cst_114 = arith.constant dense<0.000000e+00> : vector<64x64xf32>
    %133 = tpu.matmul %132, %9, %cst_114 {dimension_numbers = #tpu.dot_dimension_numbers<[1], [0], [0], [1], [0, 0, 1, 1], [], []>} : vector<64x256xbf16>, vector<256x64xbf16>, vector<64x64xf32> -> vector<64x64xf32>
    %134 = arith.truncf %133 : vector<64x64xf32> to vector<64x64xbf16>
    %c15_115 = arith.constant 15 : index
    %c0_116 = arith.constant 0 : index
    %c0_117 = arith.constant 0 : index
    %135 = vector.load %arg4[%c15_115, %c0_116, %c0_117] : memref<16x64x128xbf16, #tpu.memory_space<vmem>>, vector<1x64x128xbf16>
    %136 = vector.shape_cast %135 : vector<1x64x128xbf16> to vector<64x128xbf16>
    %cst_118 = arith.constant dense<0.000000e+00> : vector<64x128xf32>
    %137 = tpu.matmul %134, %136, %cst_118 {dimension_numbers = #tpu.dot_dimension_numbers<[1], [0], [0], [1], [0, 0, 1, 1], [], []>} : vector<64x64xbf16>, vector<64x128xbf16>, vector<64x128xf32> -> vector<64x128xf32>
    %138 = arith.addf %130, %137 : vector<64x128xf32>
    %139 = vector.extract_strided_slice %8 {offsets = [256, 0], sizes = [256, 64], strides = [1, 1]} : vector<512x64xbf16> to vector<256x64xbf16>
    %cst_119 = arith.constant 0.000000e+00 : f32
    %140 = vector.broadcast %cst_119 : f32 to vector<64x128xf32>
    %c0_120 = arith.constant 0 : index
    %c0_121 = arith.constant 0 : index
    %c0_122 = arith.constant 0 : index
    %141 = vector.load %arg3[%c0_120, %c0_121, %c0_122] : memref<16x64x256xbf16, #tpu.memory_space<vmem>>, vector<1x64x256xbf16>
    %142 = vector.shape_cast %141 : vector<1x64x256xbf16> to vector<64x256xbf16>
    %cst_123 = arith.constant dense<0.000000e+00> : vector<64x64xf32>
    %143 = tpu.matmul %142, %139, %cst_123 {dimension_numbers = #tpu.dot_dimension_numbers<[1], [0], [0], [1], [0, 0, 1, 1], [], []>} : vector<64x256xbf16>, vector<256x64xbf16>, vector<64x64xf32> -> vector<64x64xf32>
    %144 = arith.truncf %143 : vector<64x64xf32> to vector<64x64xbf16>
    %c0_124 = arith.constant 0 : index
    %c0_125 = arith.constant 0 : index
    %c0_126 = arith.constant 0 : index
    %145 = vector.load %arg4[%c0_124, %c0_125, %c0_126] : memref<16x64x128xbf16, #tpu.memory_space<vmem>>, vector<1x64x128xbf16>
    %146 = vector.shape_cast %145 : vector<1x64x128xbf16> to vector<64x128xbf16>
    %cst_127 = arith.constant dense<0.000000e+00> : vector<64x128xf32>
    %147 = tpu.matmul %144, %146, %cst_127 {dimension_numbers = #tpu.dot_dimension_numbers<[1], [0], [0], [1], [0, 0, 1, 1], [], []>} : vector<64x64xbf16>, vector<64x128xbf16>, vector<64x128xf32> -> vector<64x128xf32>
    %148 = arith.addf %140, %147 : vector<64x128xf32>
    %c1_128 = arith.constant 1 : index
    %c0_129 = arith.constant 0 : index
    %c0_130 = arith.constant 0 : index
    %149 = vector.load %arg3[%c1_128, %c0_129, %c0_130] : memref<16x64x256xbf16, #tpu.memory_space<vmem>>, vector<1x64x256xbf16>
    %150 = vector.shape_cast %149 : vector<1x64x256xbf16> to vector<64x256xbf16>
    %cst_131 = arith.constant dense<0.000000e+00> : vector<64x64xf32>
    %151 = tpu.matmul %150, %139, %cst_131 {dimension_numbers = #tpu.dot_dimension_numbers<[1], [0], [0], [1], [0, 0, 1, 1], [], []>} : vector<64x256xbf16>, vector<256x64xbf16>, vector<64x64xf32> -> vector<64x64xf32>
    %152 = arith.truncf %151 : vector<64x64xf32> to vector<64x64xbf16>
    %c1_132 = arith.constant 1 : index
    %c0_133 = arith.constant 0 : index
    %c0_134 = arith.constant 0 : index
    %153 = vector.load %arg4[%c1_132, %c0_133, %c0_134] : memref<16x64x128xbf16, #tpu.memory_space<vmem>>, vector<1x64x128xbf16>
    %154 = vector.shape_cast %153 : vector<1x64x128xbf16> to vector<64x128xbf16>
    %cst_135 = arith.constant dense<0.000000e+00> : vector<64x128xf32>
    %155 = tpu.matmul %152, %154, %cst_135 {dimension_numbers = #tpu.dot_dimension_numbers<[1], [0], [0], [1], [0, 0, 1, 1], [], []>} : vector<64x64xbf16>, vector<64x128xbf16>, vector<64x128xf32> -> vector<64x128xf32>
    %156 = arith.addf %148, %155 : vector<64x128xf32>
    %c2_136 = arith.constant 2 : index
    %c0_137 = arith.constant 0 : index
    %c0_138 = arith.constant 0 : index
    %157 = vector.load %arg3[%c2_136, %c0_137, %c0_138] : memref<16x64x256xbf16, #tpu.memory_space<vmem>>, vector<1x64x256xbf16>
    %158 = vector.shape_cast %157 : vector<1x64x256xbf16> to vector<64x256xbf16>
    %cst_139 = arith.constant dense<0.000000e+00> : vector<64x64xf32>
    %159 = tpu.matmul %158, %139, %cst_139 {dimension_numbers = #tpu.dot_dimension_numbers<[1], [0], [0], [1], [0, 0, 1, 1], [], []>} : vector<64x256xbf16>, vector<256x64xbf16>, vector<64x64xf32> -> vector<64x64xf32>
    %160 = arith.truncf %159 : vector<64x64xf32> to vector<64x64xbf16>
    %c2_140 = arith.constant 2 : index
    %c0_141 = arith.constant 0 : index
    %c0_142 = arith.constant 0 : index
    %161 = vector.load %arg4[%c2_140, %c0_141, %c0_142] : memref<16x64x128xbf16, #tpu.memory_space<vmem>>, vector<1x64x128xbf16>
    %162 = vector.shape_cast %161 : vector<1x64x128xbf16> to vector<64x128xbf16>
    %cst_143 = arith.constant dense<0.000000e+00> : vector<64x128xf32>
    %163 = tpu.matmul %160, %162, %cst_143 {dimension_numbers = #tpu.dot_dimension_numbers<[1], [0], [0], [1], [0, 0, 1, 1], [], []>} : vector<64x64xbf16>, vector<64x128xbf16>, vector<64x128xf32> -> vector<64x128xf32>
    %164 = arith.addf %156, %163 : vector<64x128xf32>
    %c3_144 = arith.constant 3 : index
    %c0_145 = arith.constant 0 : index
    %c0_146 = arith.constant 0 : index
    %165 = vector.load %arg3[%c3_144, %c0_145, %c0_146] : memref<16x64x256xbf16, #tpu.memory_space<vmem>>, vector<1x64x256xbf16>
    %166 = vector.shape_cast %165 : vector<1x64x256xbf16> to vector<64x256xbf16>
    %cst_147 = arith.constant dense<0.000000e+00> : vector<64x64xf32>
    %167 = tpu.matmul %166, %139, %cst_147 {dimension_numbers = #tpu.dot_dimension_numbers<[1], [0], [0], [1], [0, 0, 1, 1], [], []>} : vector<64x256xbf16>, vector<256x64xbf16>, vector<64x64xf32> -> vector<64x64xf32>
    %168 = arith.truncf %167 : vector<64x64xf32> to vector<64x64xbf16>
    %c3_148 = arith.constant 3 : index
    %c0_149 = arith.constant 0 : index
    %c0_150 = arith.constant 0 : index
    %169 = vector.load %arg4[%c3_148, %c0_149, %c0_150] : memref<16x64x128xbf16, #tpu.memory_space<vmem>>, vector<1x64x128xbf16>
    %170 = vector.shape_cast %169 : vector<1x64x128xbf16> to vector<64x128xbf16>
    %cst_151 = arith.constant dense<0.000000e+00> : vector<64x128xf32>
    %171 = tpu.matmul %168, %170, %cst_151 {dimension_numbers = #tpu.dot_dimension_numbers<[1], [0], [0], [1], [0, 0, 1, 1], [], []>} : vector<64x64xbf16>, vector<64x128xbf16>, vector<64x128xf32> -> vector<64x128xf32>
    %172 = arith.addf %164, %171 : vector<64x128xf32>
    %c4_152 = arith.constant 4 : index
    %c0_153 = arith.constant 0 : index
    %c0_154 = arith.constant 0 : index
    %173 = vector.load %arg3[%c4_152, %c0_153, %c0_154] : memref<16x64x256xbf16, #tpu.memory_space<vmem>>, vector<1x64x256xbf16>
    %174 = vector.shape_cast %173 : vector<1x64x256xbf16> to vector<64x256xbf16>
    %cst_155 = arith.constant dense<0.000000e+00> : vector<64x64xf32>
    %175 = tpu.matmul %174, %139, %cst_155 {dimension_numbers = #tpu.dot_dimension_numbers<[1], [0], [0], [1], [0, 0, 1, 1], [], []>} : vector<64x256xbf16>, vector<256x64xbf16>, vector<64x64xf32> -> vector<64x64xf32>
    %176 = arith.truncf %175 : vector<64x64xf32> to vector<64x64xbf16>
    %c4_156 = arith.constant 4 : index
    %c0_157 = arith.constant 0 : index
    %c0_158 = arith.constant 0 : index
    %177 = vector.load %arg4[%c4_156, %c0_157, %c0_158] : memref<16x64x128xbf16, #tpu.memory_space<vmem>>, vector<1x64x128xbf16>
    %178 = vector.shape_cast %177 : vector<1x64x128xbf16> to vector<64x128xbf16>
    %cst_159 = arith.constant dense<0.000000e+00> : vector<64x128xf32>
    %179 = tpu.matmul %176, %178, %cst_159 {dimension_numbers = #tpu.dot_dimension_numbers<[1], [0], [0], [1], [0, 0, 1, 1], [], []>} : vector<64x64xbf16>, vector<64x128xbf16>, vector<64x128xf32> -> vector<64x128xf32>
    %180 = arith.addf %172, %179 : vector<64x128xf32>
    %c5_160 = arith.constant 5 : index
    %c0_161 = arith.constant 0 : index
    %c0_162 = arith.constant 0 : index
    %181 = vector.load %arg3[%c5_160, %c0_161, %c0_162] : memref<16x64x256xbf16, #tpu.memory_space<vmem>>, vector<1x64x256xbf16>
    %182 = vector.shape_cast %181 : vector<1x64x256xbf16> to vector<64x256xbf16>
    %cst_163 = arith.constant dense<0.000000e+00> : vector<64x64xf32>
    %183 = tpu.matmul %182, %139, %cst_163 {dimension_numbers = #tpu.dot_dimension_numbers<[1], [0], [0], [1], [0, 0, 1, 1], [], []>} : vector<64x256xbf16>, vector<256x64xbf16>, vector<64x64xf32> -> vector<64x64xf32>
    %184 = arith.truncf %183 : vector<64x64xf32> to vector<64x64xbf16>
    %c5_164 = arith.constant 5 : index
    %c0_165 = arith.constant 0 : index
    %c0_166 = arith.constant 0 : index
    %185 = vector.load %arg4[%c5_164, %c0_165, %c0_166] : memref<16x64x128xbf16, #tpu.memory_space<vmem>>, vector<1x64x128xbf16>
    %186 = vector.shape_cast %185 : vector<1x64x128xbf16> to vector<64x128xbf16>
    %cst_167 = arith.constant dense<0.000000e+00> : vector<64x128xf32>
    %187 = tpu.matmul %184, %186, %cst_167 {dimension_numbers = #tpu.dot_dimension_numbers<[1], [0], [0], [1], [0, 0, 1, 1], [], []>} : vector<64x64xbf16>, vector<64x128xbf16>, vector<64x128xf32> -> vector<64x128xf32>
    %188 = arith.addf %180, %187 : vector<64x128xf32>
    %c6_168 = arith.constant 6 : index
    %c0_169 = arith.constant 0 : index
    %c0_170 = arith.constant 0 : index
    %189 = vector.load %arg3[%c6_168, %c0_169, %c0_170] : memref<16x64x256xbf16, #tpu.memory_space<vmem>>, vector<1x64x256xbf16>
    %190 = vector.shape_cast %189 : vector<1x64x256xbf16> to vector<64x256xbf16>
    %cst_171 = arith.constant dense<0.000000e+00> : vector<64x64xf32>
    %191 = tpu.matmul %190, %139, %cst_171 {dimension_numbers = #tpu.dot_dimension_numbers<[1], [0], [0], [1], [0, 0, 1, 1], [], []>} : vector<64x256xbf16>, vector<256x64xbf16>, vector<64x64xf32> -> vector<64x64xf32>
    %192 = arith.truncf %191 : vector<64x64xf32> to vector<64x64xbf16>
    %c6_172 = arith.constant 6 : index
    %c0_173 = arith.constant 0 : index
    %c0_174 = arith.constant 0 : index
    %193 = vector.load %arg4[%c6_172, %c0_173, %c0_174] : memref<16x64x128xbf16, #tpu.memory_space<vmem>>, vector<1x64x128xbf16>
    %194 = vector.shape_cast %193 : vector<1x64x128xbf16> to vector<64x128xbf16>
    %cst_175 = arith.constant dense<0.000000e+00> : vector<64x128xf32>
    %195 = tpu.matmul %192, %194, %cst_175 {dimension_numbers = #tpu.dot_dimension_numbers<[1], [0], [0], [1], [0, 0, 1, 1], [], []>} : vector<64x64xbf16>, vector<64x128xbf16>, vector<64x128xf32> -> vector<64x128xf32>
    %196 = arith.addf %188, %195 : vector<64x128xf32>
    %c7_176 = arith.constant 7 : index
    %c0_177 = arith.constant 0 : index
    %c0_178 = arith.constant 0 : index
    %197 = vector.load %arg3[%c7_176, %c0_177, %c0_178] : memref<16x64x256xbf16, #tpu.memory_space<vmem>>, vector<1x64x256xbf16>
    %198 = vector.shape_cast %197 : vector<1x64x256xbf16> to vector<64x256xbf16>
    %cst_179 = arith.constant dense<0.000000e+00> : vector<64x64xf32>
    %199 = tpu.matmul %198, %139, %cst_179 {dimension_numbers = #tpu.dot_dimension_numbers<[1], [0], [0], [1], [0, 0, 1, 1], [], []>} : vector<64x256xbf16>, vector<256x64xbf16>, vector<64x64xf32> -> vector<64x64xf32>
    %200 = arith.truncf %199 : vector<64x64xf32> to vector<64x64xbf16>
    %c7_180 = arith.constant 7 : index
    %c0_181 = arith.constant 0 : index
    %c0_182 = arith.constant 0 : index
    %201 = vector.load %arg4[%c7_180, %c0_181, %c0_182] : memref<16x64x128xbf16, #tpu.memory_space<vmem>>, vector<1x64x128xbf16>
    %202 = vector.shape_cast %201 : vector<1x64x128xbf16> to vector<64x128xbf16>
    %cst_183 = arith.constant dense<0.000000e+00> : vector<64x128xf32>
    %203 = tpu.matmul %200, %202, %cst_183 {dimension_numbers = #tpu.dot_dimension_numbers<[1], [0], [0], [1], [0, 0, 1, 1], [], []>} : vector<64x64xbf16>, vector<64x128xbf16>, vector<64x128xf32> -> vector<64x128xf32>
    %204 = arith.addf %196, %203 : vector<64x128xf32>
    %c8_184 = arith.constant 8 : index
    %c0_185 = arith.constant 0 : index
    %c0_186 = arith.constant 0 : index
    %205 = vector.load %arg3[%c8_184, %c0_185, %c0_186] : memref<16x64x256xbf16, #tpu.memory_space<vmem>>, vector<1x64x256xbf16>
    %206 = vector.shape_cast %205 : vector<1x64x256xbf16> to vector<64x256xbf16>
    %cst_187 = arith.constant dense<0.000000e+00> : vector<64x64xf32>
    %207 = tpu.matmul %206, %139, %cst_187 {dimension_numbers = #tpu.dot_dimension_numbers<[1], [0], [0], [1], [0, 0, 1, 1], [], []>} : vector<64x256xbf16>, vector<256x64xbf16>, vector<64x64xf32> -> vector<64x64xf32>
    %208 = arith.truncf %207 : vector<64x64xf32> to vector<64x64xbf16>
    %c8_188 = arith.constant 8 : index
    %c0_189 = arith.constant 0 : index
    %c0_190 = arith.constant 0 : index
    %209 = vector.load %arg4[%c8_188, %c0_189, %c0_190] : memref<16x64x128xbf16, #tpu.memory_space<vmem>>, vector<1x64x128xbf16>
    %210 = vector.shape_cast %209 : vector<1x64x128xbf16> to vector<64x128xbf16>
    %cst_191 = arith.constant dense<0.000000e+00> : vector<64x128xf32>
    %211 = tpu.matmul %208, %210, %cst_191 {dimension_numbers = #tpu.dot_dimension_numbers<[1], [0], [0], [1], [0, 0, 1, 1], [], []>} : vector<64x64xbf16>, vector<64x128xbf16>, vector<64x128xf32> -> vector<64x128xf32>
    %212 = arith.addf %204, %211 : vector<64x128xf32>
    %c9_192 = arith.constant 9 : index
    %c0_193 = arith.constant 0 : index
    %c0_194 = arith.constant 0 : index
    %213 = vector.load %arg3[%c9_192, %c0_193, %c0_194] : memref<16x64x256xbf16, #tpu.memory_space<vmem>>, vector<1x64x256xbf16>
    %214 = vector.shape_cast %213 : vector<1x64x256xbf16> to vector<64x256xbf16>
    %cst_195 = arith.constant dense<0.000000e+00> : vector<64x64xf32>
    %215 = tpu.matmul %214, %139, %cst_195 {dimension_numbers = #tpu.dot_dimension_numbers<[1], [0], [0], [1], [0, 0, 1, 1], [], []>} : vector<64x256xbf16>, vector<256x64xbf16>, vector<64x64xf32> -> vector<64x64xf32>
    %216 = arith.truncf %215 : vector<64x64xf32> to vector<64x64xbf16>
    %c9_196 = arith.constant 9 : index
    %c0_197 = arith.constant 0 : index
    %c0_198 = arith.constant 0 : index
    %217 = vector.load %arg4[%c9_196, %c0_197, %c0_198] : memref<16x64x128xbf16, #tpu.memory_space<vmem>>, vector<1x64x128xbf16>
    %218 = vector.shape_cast %217 : vector<1x64x128xbf16> to vector<64x128xbf16>
    %cst_199 = arith.constant dense<0.000000e+00> : vector<64x128xf32>
    %219 = tpu.matmul %216, %218, %cst_199 {dimension_numbers = #tpu.dot_dimension_numbers<[1], [0], [0], [1], [0, 0, 1, 1], [], []>} : vector<64x64xbf16>, vector<64x128xbf16>, vector<64x128xf32> -> vector<64x128xf32>
    %220 = arith.addf %212, %219 : vector<64x128xf32>
    %c10_200 = arith.constant 10 : index
    %c0_201 = arith.constant 0 : index
    %c0_202 = arith.constant 0 : index
    %221 = vector.load %arg3[%c10_200, %c0_201, %c0_202] : memref<16x64x256xbf16, #tpu.memory_space<vmem>>, vector<1x64x256xbf16>
    %222 = vector.shape_cast %221 : vector<1x64x256xbf16> to vector<64x256xbf16>
    %cst_203 = arith.constant dense<0.000000e+00> : vector<64x64xf32>
    %223 = tpu.matmul %222, %139, %cst_203 {dimension_numbers = #tpu.dot_dimension_numbers<[1], [0], [0], [1], [0, 0, 1, 1], [], []>} : vector<64x256xbf16>, vector<256x64xbf16>, vector<64x64xf32> -> vector<64x64xf32>
    %224 = arith.truncf %223 : vector<64x64xf32> to vector<64x64xbf16>
    %c10_204 = arith.constant 10 : index
    %c0_205 = arith.constant 0 : index
    %c0_206 = arith.constant 0 : index
    %225 = vector.load %arg4[%c10_204, %c0_205, %c0_206] : memref<16x64x128xbf16, #tpu.memory_space<vmem>>, vector<1x64x128xbf16>
    %226 = vector.shape_cast %225 : vector<1x64x128xbf16> to vector<64x128xbf16>
    %cst_207 = arith.constant dense<0.000000e+00> : vector<64x128xf32>
    %227 = tpu.matmul %224, %226, %cst_207 {dimension_numbers = #tpu.dot_dimension_numbers<[1], [0], [0], [1], [0, 0, 1, 1], [], []>} : vector<64x64xbf16>, vector<64x128xbf16>, vector<64x128xf32> -> vector<64x128xf32>
    %228 = arith.addf %220, %227 : vector<64x128xf32>
    %c11_208 = arith.constant 11 : index
    %c0_209 = arith.constant 0 : index
    %c0_210 = arith.constant 0 : index
    %229 = vector.load %arg3[%c11_208, %c0_209, %c0_210] : memref<16x64x256xbf16, #tpu.memory_space<vmem>>, vector<1x64x256xbf16>
    %230 = vector.shape_cast %229 : vector<1x64x256xbf16> to vector<64x256xbf16>
    %cst_211 = arith.constant dense<0.000000e+00> : vector<64x64xf32>
    %231 = tpu.matmul %230, %139, %cst_211 {dimension_numbers = #tpu.dot_dimension_numbers<[1], [0], [0], [1], [0, 0, 1, 1], [], []>} : vector<64x256xbf16>, vector<256x64xbf16>, vector<64x64xf32> -> vector<64x64xf32>
    %232 = arith.truncf %231 : vector<64x64xf32> to vector<64x64xbf16>
    %c11_212 = arith.constant 11 : index
    %c0_213 = arith.constant 0 : index
    %c0_214 = arith.constant 0 : index
    %233 = vector.load %arg4[%c11_212, %c0_213, %c0_214] : memref<16x64x128xbf16, #tpu.memory_space<vmem>>, vector<1x64x128xbf16>
    %234 = vector.shape_cast %233 : vector<1x64x128xbf16> to vector<64x128xbf16>
    %cst_215 = arith.constant dense<0.000000e+00> : vector<64x128xf32>
    %235 = tpu.matmul %232, %234, %cst_215 {dimension_numbers = #tpu.dot_dimension_numbers<[1], [0], [0], [1], [0, 0, 1, 1], [], []>} : vector<64x64xbf16>, vector<64x128xbf16>, vector<64x128xf32> -> vector<64x128xf32>
    %236 = arith.addf %228, %235 : vector<64x128xf32>
    %c12_216 = arith.constant 12 : index
    %c0_217 = arith.constant 0 : index
    %c0_218 = arith.constant 0 : index
    %237 = vector.load %arg3[%c12_216, %c0_217, %c0_218] : memref<16x64x256xbf16, #tpu.memory_space<vmem>>, vector<1x64x256xbf16>
    %238 = vector.shape_cast %237 : vector<1x64x256xbf16> to vector<64x256xbf16>
    %cst_219 = arith.constant dense<0.000000e+00> : vector<64x64xf32>
    %239 = tpu.matmul %238, %139, %cst_219 {dimension_numbers = #tpu.dot_dimension_numbers<[1], [0], [0], [1], [0, 0, 1, 1], [], []>} : vector<64x256xbf16>, vector<256x64xbf16>, vector<64x64xf32> -> vector<64x64xf32>
    %240 = arith.truncf %239 : vector<64x64xf32> to vector<64x64xbf16>
    %c12_220 = arith.constant 12 : index
    %c0_221 = arith.constant 0 : index
    %c0_222 = arith.constant 0 : index
    %241 = vector.load %arg4[%c12_220, %c0_221, %c0_222] : memref<16x64x128xbf16, #tpu.memory_space<vmem>>, vector<1x64x128xbf16>
    %242 = vector.shape_cast %241 : vector<1x64x128xbf16> to vector<64x128xbf16>
    %cst_223 = arith.constant dense<0.000000e+00> : vector<64x128xf32>
    %243 = tpu.matmul %240, %242, %cst_223 {dimension_numbers = #tpu.dot_dimension_numbers<[1], [0], [0], [1], [0, 0, 1, 1], [], []>} : vector<64x64xbf16>, vector<64x128xbf16>, vector<64x128xf32> -> vector<64x128xf32>
    %244 = arith.addf %236, %243 : vector<64x128xf32>
    %c13_224 = arith.constant 13 : index
    %c0_225 = arith.constant 0 : index
    %c0_226 = arith.constant 0 : index
    %245 = vector.load %arg3[%c13_224, %c0_225, %c0_226] : memref<16x64x256xbf16, #tpu.memory_space<vmem>>, vector<1x64x256xbf16>
    %246 = vector.shape_cast %245 : vector<1x64x256xbf16> to vector<64x256xbf16>
    %cst_227 = arith.constant dense<0.000000e+00> : vector<64x64xf32>
    %247 = tpu.matmul %246, %139, %cst_227 {dimension_numbers = #tpu.dot_dimension_numbers<[1], [0], [0], [1], [0, 0, 1, 1], [], []>} : vector<64x256xbf16>, vector<256x64xbf16>, vector<64x64xf32> -> vector<64x64xf32>
    %248 = arith.truncf %247 : vector<64x64xf32> to vector<64x64xbf16>
    %c13_228 = arith.constant 13 : index
    %c0_229 = arith.constant 0 : index
    %c0_230 = arith.constant 0 : index
    %249 = vector.load %arg4[%c13_228, %c0_229, %c0_230] : memref<16x64x128xbf16, #tpu.memory_space<vmem>>, vector<1x64x128xbf16>
    %250 = vector.shape_cast %249 : vector<1x64x128xbf16> to vector<64x128xbf16>
    %cst_231 = arith.constant dense<0.000000e+00> : vector<64x128xf32>
    %251 = tpu.matmul %248, %250, %cst_231 {dimension_numbers = #tpu.dot_dimension_numbers<[1], [0], [0], [1], [0, 0, 1, 1], [], []>} : vector<64x64xbf16>, vector<64x128xbf16>, vector<64x128xf32> -> vector<64x128xf32>
    %252 = arith.addf %244, %251 : vector<64x128xf32>
    %c14_232 = arith.constant 14 : index
    %c0_233 = arith.constant 0 : index
    %c0_234 = arith.constant 0 : index
    %253 = vector.load %arg3[%c14_232, %c0_233, %c0_234] : memref<16x64x256xbf16, #tpu.memory_space<vmem>>, vector<1x64x256xbf16>
    %254 = vector.shape_cast %253 : vector<1x64x256xbf16> to vector<64x256xbf16>
    %cst_235 = arith.constant dense<0.000000e+00> : vector<64x64xf32>
    %255 = tpu.matmul %254, %139, %cst_235 {dimension_numbers = #tpu.dot_dimension_numbers<[1], [0], [0], [1], [0, 0, 1, 1], [], []>} : vector<64x256xbf16>, vector<256x64xbf16>, vector<64x64xf32> -> vector<64x64xf32>
    %256 = arith.truncf %255 : vector<64x64xf32> to vector<64x64xbf16>
    %c14_236 = arith.constant 14 : index
    %c0_237 = arith.constant 0 : index
    %c0_238 = arith.constant 0 : index
    %257 = vector.load %arg4[%c14_236, %c0_237, %c0_238] : memref<16x64x128xbf16, #tpu.memory_space<vmem>>, vector<1x64x128xbf16>
    %258 = vector.shape_cast %257 : vector<1x64x128xbf16> to vector<64x128xbf16>
    %cst_239 = arith.constant dense<0.000000e+00> : vector<64x128xf32>
    %259 = tpu.matmul %256, %258, %cst_239 {dimension_numbers = #tpu.dot_dimension_numbers<[1], [0], [0], [1], [0, 0, 1, 1], [], []>} : vector<64x64xbf16>, vector<64x128xbf16>, vector<64x128xf32> -> vector<64x128xf32>
    %260 = arith.addf %252, %259 : vector<64x128xf32>
    %c15_240 = arith.constant 15 : index
    %c0_241 = arith.constant 0 : index
    %c0_242 = arith.constant 0 : index
    %261 = vector.load %arg3[%c15_240, %c0_241, %c0_242] : memref<16x64x256xbf16, #tpu.memory_space<vmem>>, vector<1x64x256xbf16>
    %262 = vector.shape_cast %261 : vector<1x64x256xbf16> to vector<64x256xbf16>
    %cst_243 = arith.constant dense<0.000000e+00> : vector<64x64xf32>
    %263 = tpu.matmul %262, %139, %cst_243 {dimension_numbers = #tpu.dot_dimension_numbers<[1], [0], [0], [1], [0, 0, 1, 1], [], []>} : vector<64x256xbf16>, vector<256x64xbf16>, vector<64x64xf32> -> vector<64x64xf32>
    %264 = arith.truncf %263 : vector<64x64xf32> to vector<64x64xbf16>
    %c15_244 = arith.constant 15 : index
    %c0_245 = arith.constant 0 : index
    %c0_246 = arith.constant 0 : index
    %265 = vector.load %arg4[%c15_244, %c0_245, %c0_246] : memref<16x64x128xbf16, #tpu.memory_space<vmem>>, vector<1x64x128xbf16>
    %266 = vector.shape_cast %265 : vector<1x64x128xbf16> to vector<64x128xbf16>
    %cst_247 = arith.constant dense<0.000000e+00> : vector<64x128xf32>
    %267 = tpu.matmul %264, %266, %cst_247 {dimension_numbers = #tpu.dot_dimension_numbers<[1], [0], [0], [1], [0, 0, 1, 1], [], []>} : vector<64x64xbf16>, vector<64x128xbf16>, vector<64x128xf32> -> vector<64x128xf32>
    %268 = arith.addf %260, %267 : vector<64x128xf32>
    %c0_248 = arith.constant 0 : index
    %c0_249 = arith.constant 0 : index
    %269 = vector.load %arg5[%c0_248, %c0_249] : memref<1x128xf32, #tpu.memory_space<vmem>>, vector<1x128xf32>
    %c0_250 = arith.constant 0 : index
    %c0_251 = arith.constant 0 : index
    %270 = vector.load %arg6[%c0_250, %c0_251] : memref<1x128xf32, #tpu.memory_space<vmem>>, vector<1x128xf32>
    %cst_252 = arith.constant dense<0.000000e+00> : vector<128xf32>
    %271 = vector.multi_reduction <add>, %138, %cst_252 [0] : vector<64x128xf32> to vector<128xf32>
    %272 = vector.shape_cast %271 : vector<128xf32> to vector<1x128xf32>
    %cst_253 = arith.constant 0.000000e+00 : f32
    %273 = vector.broadcast %cst_253 : f32 to vector<1x128xf32>
    %274 = arith.addf %273, %272 : vector<1x128xf32>
    %cst_254 = arith.constant dense<0.000000e+00> : vector<128xf32>
    %275 = vector.multi_reduction <add>, %268, %cst_254 [0] : vector<64x128xf32> to vector<128xf32>
    %276 = vector.shape_cast %275 : vector<128xf32> to vector<1x128xf32>
    %277 = arith.addf %274, %276 : vector<1x128xf32>
    %278 = arith.mulf %138, %138 : vector<64x128xf32>
    %cst_255 = arith.constant dense<0.000000e+00> : vector<128xf32>
    %279 = vector.multi_reduction <add>, %278, %cst_255 [0] : vector<64x128xf32> to vector<128xf32>
    %280 = vector.shape_cast %279 : vector<128xf32> to vector<1x128xf32>
    %cst_256 = arith.constant 0.000000e+00 : f32
    %281 = vector.broadcast %cst_256 : f32 to vector<1x128xf32>
    %282 = arith.addf %281, %280 : vector<1x128xf32>
    %283 = arith.mulf %268, %268 : vector<64x128xf32>
    %cst_257 = arith.constant dense<0.000000e+00> : vector<128xf32>
    %284 = vector.multi_reduction <add>, %283, %cst_257 [0] : vector<64x128xf32> to vector<128xf32>
    %285 = vector.shape_cast %284 : vector<128xf32> to vector<1x128xf32>
    %286 = arith.addf %282, %285 : vector<1x128xf32>
    %cst_258 = arith.constant 7.812500e-03 : f32
    %287 = vector.broadcast %cst_258 : f32 to vector<1x128xf32>
    %288 = arith.mulf %277, %287 : vector<1x128xf32>
    %cst_259 = arith.constant 7.812500e-03 : f32
    %289 = vector.broadcast %cst_259 : f32 to vector<1x128xf32>
    %290 = arith.mulf %286, %289 : vector<1x128xf32>
    %291 = arith.mulf %288, %288 : vector<1x128xf32>
    %292 = arith.subf %290, %291 : vector<1x128xf32>
    %cst_260 = arith.constant 0.000000e+00 : f32
    %293 = vector.broadcast %cst_260 : f32 to vector<1x128xf32>
    %294 = arith.maximumf %292, %293 : vector<1x128xf32>
    %cst_261 = arith.constant 9.99999974E-6 : f32
    %295 = vector.broadcast %cst_261 : f32 to vector<1x128xf32>
    %296 = arith.addf %294, %295 : vector<1x128xf32>
    %297 = math.rsqrt %296 : vector<1x128xf32>
    %298 = arith.mulf %269, %297 : vector<1x128xf32>
    %299 = arith.mulf %288, %298 : vector<1x128xf32>
    %300 = arith.subf %270, %299 : vector<1x128xf32>
    %301 = vector.broadcast %298 : vector<1x128xf32> to vector<64x128xf32>
    %302 = arith.mulf %138, %301 : vector<64x128xf32>
    %303 = vector.broadcast %300 : vector<1x128xf32> to vector<64x128xf32>
    %304 = arith.addf %302, %303 : vector<64x128xf32>
    %cst_262 = arith.constant 0.000000e+00 : f32
    %305 = vector.broadcast %cst_262 : f32 to vector<64x128xf32>
    %306 = arith.cmpf ogt, %304, %305 : vector<64x128xf32>
    %cst_263 = arith.constant 2.000000e-01 : f32
    %307 = vector.broadcast %cst_263 : f32 to vector<64x128xf32>
    %308 = arith.mulf %307, %304 : vector<64x128xf32>
    %309 = arith.select %306, %304, %308 : vector<64x128xi1>, vector<64x128xf32>
    %310 = vector.broadcast %298 : vector<1x128xf32> to vector<64x128xf32>
    %311 = arith.mulf %268, %310 : vector<64x128xf32>
    %312 = vector.broadcast %300 : vector<1x128xf32> to vector<64x128xf32>
    %313 = arith.addf %311, %312 : vector<64x128xf32>
    %cst_264 = arith.constant 0.000000e+00 : f32
    %314 = vector.broadcast %cst_264 : f32 to vector<64x128xf32>
    %315 = arith.cmpf ogt, %313, %314 : vector<64x128xf32>
    %cst_265 = arith.constant 2.000000e-01 : f32
    %316 = vector.broadcast %cst_265 : f32 to vector<64x128xf32>
    %317 = arith.mulf %316, %313 : vector<64x128xf32>
    %318 = arith.select %315, %313, %317 : vector<64x128xi1>, vector<64x128xf32>
    %319 = arith.truncf %309 : vector<64x128xf32> to vector<64x128xbf16>
    %320 = arith.truncf %318 : vector<64x128xf32> to vector<64x128xbf16>
    %cst_266 = arith.constant 0.000000e+00 : f32
    %321 = vector.broadcast %cst_266 : f32 to vector<16x256xf32>
    %c0_267 = arith.constant 0 : index
    %c0_268 = arith.constant 0 : index
    %c0_269 = arith.constant 0 : index
    %322 = vector.load %arg7[%c0_267, %c0_268, %c0_269] : memref<16x16x64xbf16, #tpu.memory_space<vmem>>, vector<1x16x64xbf16>
    %323 = vector.shape_cast %322 : vector<1x16x64xbf16> to vector<16x64xbf16>
    %cst_270 = arith.constant dense<0.000000e+00> : vector<16x128xf32>
    %324 = tpu.matmul %323, %319, %cst_270 {dimension_numbers = #tpu.dot_dimension_numbers<[1], [0], [0], [1], [0, 0, 1, 1], [], []>} : vector<16x64xbf16>, vector<64x128xbf16>, vector<16x128xf32> -> vector<16x128xf32>
    %325 = arith.truncf %324 : vector<16x128xf32> to vector<16x128xbf16>
    %c0_271 = arith.constant 0 : index
    %c0_272 = arith.constant 0 : index
    %c0_273 = arith.constant 0 : index
    %326 = vector.load %arg8[%c0_271, %c0_272, %c0_273] : memref<16x128x256xbf16, #tpu.memory_space<vmem>>, vector<1x128x256xbf16>
    %327 = vector.shape_cast %326 : vector<1x128x256xbf16> to vector<128x256xbf16>
    %cst_274 = arith.constant dense<0.000000e+00> : vector<16x256xf32>
    %328 = tpu.matmul %325, %327, %cst_274 {dimension_numbers = #tpu.dot_dimension_numbers<[1], [0], [0], [1], [0, 0, 1, 1], [], []>} : vector<16x128xbf16>, vector<128x256xbf16>, vector<16x256xf32> -> vector<16x256xf32>
    %329 = arith.addf %321, %328 : vector<16x256xf32>
    %c1_275 = arith.constant 1 : index
    %c0_276 = arith.constant 0 : index
    %c0_277 = arith.constant 0 : index
    %330 = vector.load %arg7[%c1_275, %c0_276, %c0_277] : memref<16x16x64xbf16, #tpu.memory_space<vmem>>, vector<1x16x64xbf16>
    %331 = vector.shape_cast %330 : vector<1x16x64xbf16> to vector<16x64xbf16>
    %cst_278 = arith.constant dense<0.000000e+00> : vector<16x128xf32>
    %332 = tpu.matmul %331, %319, %cst_278 {dimension_numbers = #tpu.dot_dimension_numbers<[1], [0], [0], [1], [0, 0, 1, 1], [], []>} : vector<16x64xbf16>, vector<64x128xbf16>, vector<16x128xf32> -> vector<16x128xf32>
    %333 = arith.truncf %332 : vector<16x128xf32> to vector<16x128xbf16>
    %c1_279 = arith.constant 1 : index
    %c0_280 = arith.constant 0 : index
    %c0_281 = arith.constant 0 : index
    %334 = vector.load %arg8[%c1_279, %c0_280, %c0_281] : memref<16x128x256xbf16, #tpu.memory_space<vmem>>, vector<1x128x256xbf16>
    %335 = vector.shape_cast %334 : vector<1x128x256xbf16> to vector<128x256xbf16>
    %cst_282 = arith.constant dense<0.000000e+00> : vector<16x256xf32>
    %336 = tpu.matmul %333, %335, %cst_282 {dimension_numbers = #tpu.dot_dimension_numbers<[1], [0], [0], [1], [0, 0, 1, 1], [], []>} : vector<16x128xbf16>, vector<128x256xbf16>, vector<16x256xf32> -> vector<16x256xf32>
    %337 = arith.addf %329, %336 : vector<16x256xf32>
    %c2_283 = arith.constant 2 : index
    %c0_284 = arith.constant 0 : index
    %c0_285 = arith.constant 0 : index
    %338 = vector.load %arg7[%c2_283, %c0_284, %c0_285] : memref<16x16x64xbf16, #tpu.memory_space<vmem>>, vector<1x16x64xbf16>
    %339 = vector.shape_cast %338 : vector<1x16x64xbf16> to vector<16x64xbf16>
    %cst_286 = arith.constant dense<0.000000e+00> : vector<16x128xf32>
    %340 = tpu.matmul %339, %319, %cst_286 {dimension_numbers = #tpu.dot_dimension_numbers<[1], [0], [0], [1], [0, 0, 1, 1], [], []>} : vector<16x64xbf16>, vector<64x128xbf16>, vector<16x128xf32> -> vector<16x128xf32>
    %341 = arith.truncf %340 : vector<16x128xf32> to vector<16x128xbf16>
    %c2_287 = arith.constant 2 : index
    %c0_288 = arith.constant 0 : index
    %c0_289 = arith.constant 0 : index
    %342 = vector.load %arg8[%c2_287, %c0_288, %c0_289] : memref<16x128x256xbf16, #tpu.memory_space<vmem>>, vector<1x128x256xbf16>
    %343 = vector.shape_cast %342 : vector<1x128x256xbf16> to vector<128x256xbf16>
    %cst_290 = arith.constant dense<0.000000e+00> : vector<16x256xf32>
    %344 = tpu.matmul %341, %343, %cst_290 {dimension_numbers = #tpu.dot_dimension_numbers<[1], [0], [0], [1], [0, 0, 1, 1], [], []>} : vector<16x128xbf16>, vector<128x256xbf16>, vector<16x256xf32> -> vector<16x256xf32>
    %345 = arith.addf %337, %344 : vector<16x256xf32>
    %c3_291 = arith.constant 3 : index
    %c0_292 = arith.constant 0 : index
    %c0_293 = arith.constant 0 : index
    %346 = vector.load %arg7[%c3_291, %c0_292, %c0_293] : memref<16x16x64xbf16, #tpu.memory_space<vmem>>, vector<1x16x64xbf16>
    %347 = vector.shape_cast %346 : vector<1x16x64xbf16> to vector<16x64xbf16>
    %cst_294 = arith.constant dense<0.000000e+00> : vector<16x128xf32>
    %348 = tpu.matmul %347, %319, %cst_294 {dimension_numbers = #tpu.dot_dimension_numbers<[1], [0], [0], [1], [0, 0, 1, 1], [], []>} : vector<16x64xbf16>, vector<64x128xbf16>, vector<16x128xf32> -> vector<16x128xf32>
    %349 = arith.truncf %348 : vector<16x128xf32> to vector<16x128xbf16>
    %c3_295 = arith.constant 3 : index
    %c0_296 = arith.constant 0 : index
    %c0_297 = arith.constant 0 : index
    %350 = vector.load %arg8[%c3_295, %c0_296, %c0_297] : memref<16x128x256xbf16, #tpu.memory_space<vmem>>, vector<1x128x256xbf16>
    %351 = vector.shape_cast %350 : vector<1x128x256xbf16> to vector<128x256xbf16>
    %cst_298 = arith.constant dense<0.000000e+00> : vector<16x256xf32>
    %352 = tpu.matmul %349, %351, %cst_298 {dimension_numbers = #tpu.dot_dimension_numbers<[1], [0], [0], [1], [0, 0, 1, 1], [], []>} : vector<16x128xbf16>, vector<128x256xbf16>, vector<16x256xf32> -> vector<16x256xf32>
    %353 = arith.addf %345, %352 : vector<16x256xf32>
    %c4_299 = arith.constant 4 : index
    %c0_300 = arith.constant 0 : index
    %c0_301 = arith.constant 0 : index
    %354 = vector.load %arg7[%c4_299, %c0_300, %c0_301] : memref<16x16x64xbf16, #tpu.memory_space<vmem>>, vector<1x16x64xbf16>
    %355 = vector.shape_cast %354 : vector<1x16x64xbf16> to vector<16x64xbf16>
    %cst_302 = arith.constant dense<0.000000e+00> : vector<16x128xf32>
    %356 = tpu.matmul %355, %319, %cst_302 {dimension_numbers = #tpu.dot_dimension_numbers<[1], [0], [0], [1], [0, 0, 1, 1], [], []>} : vector<16x64xbf16>, vector<64x128xbf16>, vector<16x128xf32> -> vector<16x128xf32>
    %357 = arith.truncf %356 : vector<16x128xf32> to vector<16x128xbf16>
    %c4_303 = arith.constant 4 : index
    %c0_304 = arith.constant 0 : index
    %c0_305 = arith.constant 0 : index
    %358 = vector.load %arg8[%c4_303, %c0_304, %c0_305] : memref<16x128x256xbf16, #tpu.memory_space<vmem>>, vector<1x128x256xbf16>
    %359 = vector.shape_cast %358 : vector<1x128x256xbf16> to vector<128x256xbf16>
    %cst_306 = arith.constant dense<0.000000e+00> : vector<16x256xf32>
    %360 = tpu.matmul %357, %359, %cst_306 {dimension_numbers = #tpu.dot_dimension_numbers<[1], [0], [0], [1], [0, 0, 1, 1], [], []>} : vector<16x128xbf16>, vector<128x256xbf16>, vector<16x256xf32> -> vector<16x256xf32>
    %361 = arith.addf %353, %360 : vector<16x256xf32>
    %c5_307 = arith.constant 5 : index
    %c0_308 = arith.constant 0 : index
    %c0_309 = arith.constant 0 : index
    %362 = vector.load %arg7[%c5_307, %c0_308, %c0_309] : memref<16x16x64xbf16, #tpu.memory_space<vmem>>, vector<1x16x64xbf16>
    %363 = vector.shape_cast %362 : vector<1x16x64xbf16> to vector<16x64xbf16>
    %cst_310 = arith.constant dense<0.000000e+00> : vector<16x128xf32>
    %364 = tpu.matmul %363, %319, %cst_310 {dimension_numbers = #tpu.dot_dimension_numbers<[1], [0], [0], [1], [0, 0, 1, 1], [], []>} : vector<16x64xbf16>, vector<64x128xbf16>, vector<16x128xf32> -> vector<16x128xf32>
    %365 = arith.truncf %364 : vector<16x128xf32> to vector<16x128xbf16>
    %c5_311 = arith.constant 5 : index
    %c0_312 = arith.constant 0 : index
    %c0_313 = arith.constant 0 : index
    %366 = vector.load %arg8[%c5_311, %c0_312, %c0_313] : memref<16x128x256xbf16, #tpu.memory_space<vmem>>, vector<1x128x256xbf16>
    %367 = vector.shape_cast %366 : vector<1x128x256xbf16> to vector<128x256xbf16>
    %cst_314 = arith.constant dense<0.000000e+00> : vector<16x256xf32>
    %368 = tpu.matmul %365, %367, %cst_314 {dimension_numbers = #tpu.dot_dimension_numbers<[1], [0], [0], [1], [0, 0, 1, 1], [], []>} : vector<16x128xbf16>, vector<128x256xbf16>, vector<16x256xf32> -> vector<16x256xf32>
    %369 = arith.addf %361, %368 : vector<16x256xf32>
    %c6_315 = arith.constant 6 : index
    %c0_316 = arith.constant 0 : index
    %c0_317 = arith.constant 0 : index
    %370 = vector.load %arg7[%c6_315, %c0_316, %c0_317] : memref<16x16x64xbf16, #tpu.memory_space<vmem>>, vector<1x16x64xbf16>
    %371 = vector.shape_cast %370 : vector<1x16x64xbf16> to vector<16x64xbf16>
    %cst_318 = arith.constant dense<0.000000e+00> : vector<16x128xf32>
    %372 = tpu.matmul %371, %319, %cst_318 {dimension_numbers = #tpu.dot_dimension_numbers<[1], [0], [0], [1], [0, 0, 1, 1], [], []>} : vector<16x64xbf16>, vector<64x128xbf16>, vector<16x128xf32> -> vector<16x128xf32>
    %373 = arith.truncf %372 : vector<16x128xf32> to vector<16x128xbf16>
    %c6_319 = arith.constant 6 : index
    %c0_320 = arith.constant 0 : index
    %c0_321 = arith.constant 0 : index
    %374 = vector.load %arg8[%c6_319, %c0_320, %c0_321] : memref<16x128x256xbf16, #tpu.memory_space<vmem>>, vector<1x128x256xbf16>
    %375 = vector.shape_cast %374 : vector<1x128x256xbf16> to vector<128x256xbf16>
    %cst_322 = arith.constant dense<0.000000e+00> : vector<16x256xf32>
    %376 = tpu.matmul %373, %375, %cst_322 {dimension_numbers = #tpu.dot_dimension_numbers<[1], [0], [0], [1], [0, 0, 1, 1], [], []>} : vector<16x128xbf16>, vector<128x256xbf16>, vector<16x256xf32> -> vector<16x256xf32>
    %377 = arith.addf %369, %376 : vector<16x256xf32>
    %c7_323 = arith.constant 7 : index
    %c0_324 = arith.constant 0 : index
    %c0_325 = arith.constant 0 : index
    %378 = vector.load %arg7[%c7_323, %c0_324, %c0_325] : memref<16x16x64xbf16, #tpu.memory_space<vmem>>, vector<1x16x64xbf16>
    %379 = vector.shape_cast %378 : vector<1x16x64xbf16> to vector<16x64xbf16>
    %cst_326 = arith.constant dense<0.000000e+00> : vector<16x128xf32>
    %380 = tpu.matmul %379, %319, %cst_326 {dimension_numbers = #tpu.dot_dimension_numbers<[1], [0], [0], [1], [0, 0, 1, 1], [], []>} : vector<16x64xbf16>, vector<64x128xbf16>, vector<16x128xf32> -> vector<16x128xf32>
    %381 = arith.truncf %380 : vector<16x128xf32> to vector<16x128xbf16>
    %c7_327 = arith.constant 7 : index
    %c0_328 = arith.constant 0 : index
    %c0_329 = arith.constant 0 : index
    %382 = vector.load %arg8[%c7_327, %c0_328, %c0_329] : memref<16x128x256xbf16, #tpu.memory_space<vmem>>, vector<1x128x256xbf16>
    %383 = vector.shape_cast %382 : vector<1x128x256xbf16> to vector<128x256xbf16>
    %cst_330 = arith.constant dense<0.000000e+00> : vector<16x256xf32>
    %384 = tpu.matmul %381, %383, %cst_330 {dimension_numbers = #tpu.dot_dimension_numbers<[1], [0], [0], [1], [0, 0, 1, 1], [], []>} : vector<16x128xbf16>, vector<128x256xbf16>, vector<16x256xf32> -> vector<16x256xf32>
    %385 = arith.addf %377, %384 : vector<16x256xf32>
    %c8_331 = arith.constant 8 : index
    %c0_332 = arith.constant 0 : index
    %c0_333 = arith.constant 0 : index
    %386 = vector.load %arg7[%c8_331, %c0_332, %c0_333] : memref<16x16x64xbf16, #tpu.memory_space<vmem>>, vector<1x16x64xbf16>
    %387 = vector.shape_cast %386 : vector<1x16x64xbf16> to vector<16x64xbf16>
    %cst_334 = arith.constant dense<0.000000e+00> : vector<16x128xf32>
    %388 = tpu.matmul %387, %319, %cst_334 {dimension_numbers = #tpu.dot_dimension_numbers<[1], [0], [0], [1], [0, 0, 1, 1], [], []>} : vector<16x64xbf16>, vector<64x128xbf16>, vector<16x128xf32> -> vector<16x128xf32>
    %389 = arith.truncf %388 : vector<16x128xf32> to vector<16x128xbf16>
    %c8_335 = arith.constant 8 : index
    %c0_336 = arith.constant 0 : index
    %c0_337 = arith.constant 0 : index
    %390 = vector.load %arg8[%c8_335, %c0_336, %c0_337] : memref<16x128x256xbf16, #tpu.memory_space<vmem>>, vector<1x128x256xbf16>
    %391 = vector.shape_cast %390 : vector<1x128x256xbf16> to vector<128x256xbf16>
    %cst_338 = arith.constant dense<0.000000e+00> : vector<16x256xf32>
    %392 = tpu.matmul %389, %391, %cst_338 {dimension_numbers = #tpu.dot_dimension_numbers<[1], [0], [0], [1], [0, 0, 1, 1], [], []>} : vector<16x128xbf16>, vector<128x256xbf16>, vector<16x256xf32> -> vector<16x256xf32>
    %393 = arith.addf %385, %392 : vector<16x256xf32>
    %c9_339 = arith.constant 9 : index
    %c0_340 = arith.constant 0 : index
    %c0_341 = arith.constant 0 : index
    %394 = vector.load %arg7[%c9_339, %c0_340, %c0_341] : memref<16x16x64xbf16, #tpu.memory_space<vmem>>, vector<1x16x64xbf16>
    %395 = vector.shape_cast %394 : vector<1x16x64xbf16> to vector<16x64xbf16>
    %cst_342 = arith.constant dense<0.000000e+00> : vector<16x128xf32>
    %396 = tpu.matmul %395, %319, %cst_342 {dimension_numbers = #tpu.dot_dimension_numbers<[1], [0], [0], [1], [0, 0, 1, 1], [], []>} : vector<16x64xbf16>, vector<64x128xbf16>, vector<16x128xf32> -> vector<16x128xf32>
    %397 = arith.truncf %396 : vector<16x128xf32> to vector<16x128xbf16>
    %c9_343 = arith.constant 9 : index
    %c0_344 = arith.constant 0 : index
    %c0_345 = arith.constant 0 : index
    %398 = vector.load %arg8[%c9_343, %c0_344, %c0_345] : memref<16x128x256xbf16, #tpu.memory_space<vmem>>, vector<1x128x256xbf16>
    %399 = vector.shape_cast %398 : vector<1x128x256xbf16> to vector<128x256xbf16>
    %cst_346 = arith.constant dense<0.000000e+00> : vector<16x256xf32>
    %400 = tpu.matmul %397, %399, %cst_346 {dimension_numbers = #tpu.dot_dimension_numbers<[1], [0], [0], [1], [0, 0, 1, 1], [], []>} : vector<16x128xbf16>, vector<128x256xbf16>, vector<16x256xf32> -> vector<16x256xf32>
    %401 = arith.addf %393, %400 : vector<16x256xf32>
    %c10_347 = arith.constant 10 : index
    %c0_348 = arith.constant 0 : index
    %c0_349 = arith.constant 0 : index
    %402 = vector.load %arg7[%c10_347, %c0_348, %c0_349] : memref<16x16x64xbf16, #tpu.memory_space<vmem>>, vector<1x16x64xbf16>
    %403 = vector.shape_cast %402 : vector<1x16x64xbf16> to vector<16x64xbf16>
    %cst_350 = arith.constant dense<0.000000e+00> : vector<16x128xf32>
    %404 = tpu.matmul %403, %319, %cst_350 {dimension_numbers = #tpu.dot_dimension_numbers<[1], [0], [0], [1], [0, 0, 1, 1], [], []>} : vector<16x64xbf16>, vector<64x128xbf16>, vector<16x128xf32> -> vector<16x128xf32>
    %405 = arith.truncf %404 : vector<16x128xf32> to vector<16x128xbf16>
    %c10_351 = arith.constant 10 : index
    %c0_352 = arith.constant 0 : index
    %c0_353 = arith.constant 0 : index
    %406 = vector.load %arg8[%c10_351, %c0_352, %c0_353] : memref<16x128x256xbf16, #tpu.memory_space<vmem>>, vector<1x128x256xbf16>
    %407 = vector.shape_cast %406 : vector<1x128x256xbf16> to vector<128x256xbf16>
    %cst_354 = arith.constant dense<0.000000e+00> : vector<16x256xf32>
    %408 = tpu.matmul %405, %407, %cst_354 {dimension_numbers = #tpu.dot_dimension_numbers<[1], [0], [0], [1], [0, 0, 1, 1], [], []>} : vector<16x128xbf16>, vector<128x256xbf16>, vector<16x256xf32> -> vector<16x256xf32>
    %409 = arith.addf %401, %408 : vector<16x256xf32>
    %c11_355 = arith.constant 11 : index
    %c0_356 = arith.constant 0 : index
    %c0_357 = arith.constant 0 : index
    %410 = vector.load %arg7[%c11_355, %c0_356, %c0_357] : memref<16x16x64xbf16, #tpu.memory_space<vmem>>, vector<1x16x64xbf16>
    %411 = vector.shape_cast %410 : vector<1x16x64xbf16> to vector<16x64xbf16>
    %cst_358 = arith.constant dense<0.000000e+00> : vector<16x128xf32>
    %412 = tpu.matmul %411, %319, %cst_358 {dimension_numbers = #tpu.dot_dimension_numbers<[1], [0], [0], [1], [0, 0, 1, 1], [], []>} : vector<16x64xbf16>, vector<64x128xbf16>, vector<16x128xf32> -> vector<16x128xf32>
    %413 = arith.truncf %412 : vector<16x128xf32> to vector<16x128xbf16>
    %c11_359 = arith.constant 11 : index
    %c0_360 = arith.constant 0 : index
    %c0_361 = arith.constant 0 : index
    %414 = vector.load %arg8[%c11_359, %c0_360, %c0_361] : memref<16x128x256xbf16, #tpu.memory_space<vmem>>, vector<1x128x256xbf16>
    %415 = vector.shape_cast %414 : vector<1x128x256xbf16> to vector<128x256xbf16>
    %cst_362 = arith.constant dense<0.000000e+00> : vector<16x256xf32>
    %416 = tpu.matmul %413, %415, %cst_362 {dimension_numbers = #tpu.dot_dimension_numbers<[1], [0], [0], [1], [0, 0, 1, 1], [], []>} : vector<16x128xbf16>, vector<128x256xbf16>, vector<16x256xf32> -> vector<16x256xf32>
    %417 = arith.addf %409, %416 : vector<16x256xf32>
    %c12_363 = arith.constant 12 : index
    %c0_364 = arith.constant 0 : index
    %c0_365 = arith.constant 0 : index
    %418 = vector.load %arg7[%c12_363, %c0_364, %c0_365] : memref<16x16x64xbf16, #tpu.memory_space<vmem>>, vector<1x16x64xbf16>
    %419 = vector.shape_cast %418 : vector<1x16x64xbf16> to vector<16x64xbf16>
    %cst_366 = arith.constant dense<0.000000e+00> : vector<16x128xf32>
    %420 = tpu.matmul %419, %319, %cst_366 {dimension_numbers = #tpu.dot_dimension_numbers<[1], [0], [0], [1], [0, 0, 1, 1], [], []>} : vector<16x64xbf16>, vector<64x128xbf16>, vector<16x128xf32> -> vector<16x128xf32>
    %421 = arith.truncf %420 : vector<16x128xf32> to vector<16x128xbf16>
    %c12_367 = arith.constant 12 : index
    %c0_368 = arith.constant 0 : index
    %c0_369 = arith.constant 0 : index
    %422 = vector.load %arg8[%c12_367, %c0_368, %c0_369] : memref<16x128x256xbf16, #tpu.memory_space<vmem>>, vector<1x128x256xbf16>
    %423 = vector.shape_cast %422 : vector<1x128x256xbf16> to vector<128x256xbf16>
    %cst_370 = arith.constant dense<0.000000e+00> : vector<16x256xf32>
    %424 = tpu.matmul %421, %423, %cst_370 {dimension_numbers = #tpu.dot_dimension_numbers<[1], [0], [0], [1], [0, 0, 1, 1], [], []>} : vector<16x128xbf16>, vector<128x256xbf16>, vector<16x256xf32> -> vector<16x256xf32>
    %425 = arith.addf %417, %424 : vector<16x256xf32>
    %c13_371 = arith.constant 13 : index
    %c0_372 = arith.constant 0 : index
    %c0_373 = arith.constant 0 : index
    %426 = vector.load %arg7[%c13_371, %c0_372, %c0_373] : memref<16x16x64xbf16, #tpu.memory_space<vmem>>, vector<1x16x64xbf16>
    %427 = vector.shape_cast %426 : vector<1x16x64xbf16> to vector<16x64xbf16>
    %cst_374 = arith.constant dense<0.000000e+00> : vector<16x128xf32>
    %428 = tpu.matmul %427, %319, %cst_374 {dimension_numbers = #tpu.dot_dimension_numbers<[1], [0], [0], [1], [0, 0, 1, 1], [], []>} : vector<16x64xbf16>, vector<64x128xbf16>, vector<16x128xf32> -> vector<16x128xf32>
    %429 = arith.truncf %428 : vector<16x128xf32> to vector<16x128xbf16>
    %c13_375 = arith.constant 13 : index
    %c0_376 = arith.constant 0 : index
    %c0_377 = arith.constant 0 : index
    %430 = vector.load %arg8[%c13_375, %c0_376, %c0_377] : memref<16x128x256xbf16, #tpu.memory_space<vmem>>, vector<1x128x256xbf16>
    %431 = vector.shape_cast %430 : vector<1x128x256xbf16> to vector<128x256xbf16>
    %cst_378 = arith.constant dense<0.000000e+00> : vector<16x256xf32>
    %432 = tpu.matmul %429, %431, %cst_378 {dimension_numbers = #tpu.dot_dimension_numbers<[1], [0], [0], [1], [0, 0, 1, 1], [], []>} : vector<16x128xbf16>, vector<128x256xbf16>, vector<16x256xf32> -> vector<16x256xf32>
    %433 = arith.addf %425, %432 : vector<16x256xf32>
    %c14_379 = arith.constant 14 : index
    %c0_380 = arith.constant 0 : index
    %c0_381 = arith.constant 0 : index
    %434 = vector.load %arg7[%c14_379, %c0_380, %c0_381] : memref<16x16x64xbf16, #tpu.memory_space<vmem>>, vector<1x16x64xbf16>
    %435 = vector.shape_cast %434 : vector<1x16x64xbf16> to vector<16x64xbf16>
    %cst_382 = arith.constant dense<0.000000e+00> : vector<16x128xf32>
    %436 = tpu.matmul %435, %319, %cst_382 {dimension_numbers = #tpu.dot_dimension_numbers<[1], [0], [0], [1], [0, 0, 1, 1], [], []>} : vector<16x64xbf16>, vector<64x128xbf16>, vector<16x128xf32> -> vector<16x128xf32>
    %437 = arith.truncf %436 : vector<16x128xf32> to vector<16x128xbf16>
    %c14_383 = arith.constant 14 : index
    %c0_384 = arith.constant 0 : index
    %c0_385 = arith.constant 0 : index
    %438 = vector.load %arg8[%c14_383, %c0_384, %c0_385] : memref<16x128x256xbf16, #tpu.memory_space<vmem>>, vector<1x128x256xbf16>
    %439 = vector.shape_cast %438 : vector<1x128x256xbf16> to vector<128x256xbf16>
    %cst_386 = arith.constant dense<0.000000e+00> : vector<16x256xf32>
    %440 = tpu.matmul %437, %439, %cst_386 {dimension_numbers = #tpu.dot_dimension_numbers<[1], [0], [0], [1], [0, 0, 1, 1], [], []>} : vector<16x128xbf16>, vector<128x256xbf16>, vector<16x256xf32> -> vector<16x256xf32>
    %441 = arith.addf %433, %440 : vector<16x256xf32>
    %c15_387 = arith.constant 15 : index
    %c0_388 = arith.constant 0 : index
    %c0_389 = arith.constant 0 : index
    %442 = vector.load %arg7[%c15_387, %c0_388, %c0_389] : memref<16x16x64xbf16, #tpu.memory_space<vmem>>, vector<1x16x64xbf16>
    %443 = vector.shape_cast %442 : vector<1x16x64xbf16> to vector<16x64xbf16>
    %cst_390 = arith.constant dense<0.000000e+00> : vector<16x128xf32>
    %444 = tpu.matmul %443, %319, %cst_390 {dimension_numbers = #tpu.dot_dimension_numbers<[1], [0], [0], [1], [0, 0, 1, 1], [], []>} : vector<16x64xbf16>, vector<64x128xbf16>, vector<16x128xf32> -> vector<16x128xf32>
    %445 = arith.truncf %444 : vector<16x128xf32> to vector<16x128xbf16>
    %c15_391 = arith.constant 15 : index
    %c0_392 = arith.constant 0 : index
    %c0_393 = arith.constant 0 : index
    %446 = vector.load %arg8[%c15_391, %c0_392, %c0_393] : memref<16x128x256xbf16, #tpu.memory_space<vmem>>, vector<1x128x256xbf16>
    %447 = vector.shape_cast %446 : vector<1x128x256xbf16> to vector<128x256xbf16>
    %cst_394 = arith.constant dense<0.000000e+00> : vector<16x256xf32>
    %448 = tpu.matmul %445, %447, %cst_394 {dimension_numbers = #tpu.dot_dimension_numbers<[1], [0], [0], [1], [0, 0, 1, 1], [], []>} : vector<16x128xbf16>, vector<128x256xbf16>, vector<16x256xf32> -> vector<16x256xf32>
    %449 = arith.addf %441, %448 : vector<16x256xf32>
    %cst_395 = arith.constant 0.000000e+00 : f32
    %450 = vector.broadcast %cst_395 : f32 to vector<16x256xf32>
    %c0_396 = arith.constant 0 : index
    %c0_397 = arith.constant 0 : index
    %c0_398 = arith.constant 0 : index
    %451 = vector.load %arg7[%c0_396, %c0_397, %c0_398] : memref<16x16x64xbf16, #tpu.memory_space<vmem>>, vector<1x16x64xbf16>
    %452 = vector.shape_cast %451 : vector<1x16x64xbf16> to vector<16x64xbf16>
    %cst_399 = arith.constant dense<0.000000e+00> : vector<16x128xf32>
    %453 = tpu.matmul %452, %320, %cst_399 {dimension_numbers = #tpu.dot_dimension_numbers<[1], [0], [0], [1], [0, 0, 1, 1], [], []>} : vector<16x64xbf16>, vector<64x128xbf16>, vector<16x128xf32> -> vector<16x128xf32>
    %454 = arith.truncf %453 : vector<16x128xf32> to vector<16x128xbf16>
    %c0_400 = arith.constant 0 : index
    %c0_401 = arith.constant 0 : index
    %c0_402 = arith.constant 0 : index
    %455 = vector.load %arg8[%c0_400, %c0_401, %c0_402] : memref<16x128x256xbf16, #tpu.memory_space<vmem>>, vector<1x128x256xbf16>
    %456 = vector.shape_cast %455 : vector<1x128x256xbf16> to vector<128x256xbf16>
    %cst_403 = arith.constant dense<0.000000e+00> : vector<16x256xf32>
    %457 = tpu.matmul %454, %456, %cst_403 {dimension_numbers = #tpu.dot_dimension_numbers<[1], [0], [0], [1], [0, 0, 1, 1], [], []>} : vector<16x128xbf16>, vector<128x256xbf16>, vector<16x256xf32> -> vector<16x256xf32>
    %458 = arith.addf %450, %457 : vector<16x256xf32>
    %c1_404 = arith.constant 1 : index
    %c0_405 = arith.constant 0 : index
    %c0_406 = arith.constant 0 : index
    %459 = vector.load %arg7[%c1_404, %c0_405, %c0_406] : memref<16x16x64xbf16, #tpu.memory_space<vmem>>, vector<1x16x64xbf16>
    %460 = vector.shape_cast %459 : vector<1x16x64xbf16> to vector<16x64xbf16>
    %cst_407 = arith.constant dense<0.000000e+00> : vector<16x128xf32>
    %461 = tpu.matmul %460, %320, %cst_407 {dimension_numbers = #tpu.dot_dimension_numbers<[1], [0], [0], [1], [0, 0, 1, 1], [], []>} : vector<16x64xbf16>, vector<64x128xbf16>, vector<16x128xf32> -> vector<16x128xf32>
    %462 = arith.truncf %461 : vector<16x128xf32> to vector<16x128xbf16>
    %c1_408 = arith.constant 1 : index
    %c0_409 = arith.constant 0 : index
    %c0_410 = arith.constant 0 : index
    %463 = vector.load %arg8[%c1_408, %c0_409, %c0_410] : memref<16x128x256xbf16, #tpu.memory_space<vmem>>, vector<1x128x256xbf16>
    %464 = vector.shape_cast %463 : vector<1x128x256xbf16> to vector<128x256xbf16>
    %cst_411 = arith.constant dense<0.000000e+00> : vector<16x256xf32>
    %465 = tpu.matmul %462, %464, %cst_411 {dimension_numbers = #tpu.dot_dimension_numbers<[1], [0], [0], [1], [0, 0, 1, 1], [], []>} : vector<16x128xbf16>, vector<128x256xbf16>, vector<16x256xf32> -> vector<16x256xf32>
    %466 = arith.addf %458, %465 : vector<16x256xf32>
    %c2_412 = arith.constant 2 : index
    %c0_413 = arith.constant 0 : index
    %c0_414 = arith.constant 0 : index
    %467 = vector.load %arg7[%c2_412, %c0_413, %c0_414] : memref<16x16x64xbf16, #tpu.memory_space<vmem>>, vector<1x16x64xbf16>
    %468 = vector.shape_cast %467 : vector<1x16x64xbf16> to vector<16x64xbf16>
    %cst_415 = arith.constant dense<0.000000e+00> : vector<16x128xf32>
    %469 = tpu.matmul %468, %320, %cst_415 {dimension_numbers = #tpu.dot_dimension_numbers<[1], [0], [0], [1], [0, 0, 1, 1], [], []>} : vector<16x64xbf16>, vector<64x128xbf16>, vector<16x128xf32> -> vector<16x128xf32>
    %470 = arith.truncf %469 : vector<16x128xf32> to vector<16x128xbf16>
    %c2_416 = arith.constant 2 : index
    %c0_417 = arith.constant 0 : index
    %c0_418 = arith.constant 0 : index
    %471 = vector.load %arg8[%c2_416, %c0_417, %c0_418] : memref<16x128x256xbf16, #tpu.memory_space<vmem>>, vector<1x128x256xbf16>
    %472 = vector.shape_cast %471 : vector<1x128x256xbf16> to vector<128x256xbf16>
    %cst_419 = arith.constant dense<0.000000e+00> : vector<16x256xf32>
    %473 = tpu.matmul %470, %472, %cst_419 {dimension_numbers = #tpu.dot_dimension_numbers<[1], [0], [0], [1], [0, 0, 1, 1], [], []>} : vector<16x128xbf16>, vector<128x256xbf16>, vector<16x256xf32> -> vector<16x256xf32>
    %474 = arith.addf %466, %473 : vector<16x256xf32>
    %c3_420 = arith.constant 3 : index
    %c0_421 = arith.constant 0 : index
    %c0_422 = arith.constant 0 : index
    %475 = vector.load %arg7[%c3_420, %c0_421, %c0_422] : memref<16x16x64xbf16, #tpu.memory_space<vmem>>, vector<1x16x64xbf16>
    %476 = vector.shape_cast %475 : vector<1x16x64xbf16> to vector<16x64xbf16>
    %cst_423 = arith.constant dense<0.000000e+00> : vector<16x128xf32>
    %477 = tpu.matmul %476, %320, %cst_423 {dimension_numbers = #tpu.dot_dimension_numbers<[1], [0], [0], [1], [0, 0, 1, 1], [], []>} : vector<16x64xbf16>, vector<64x128xbf16>, vector<16x128xf32> -> vector<16x128xf32>
    %478 = arith.truncf %477 : vector<16x128xf32> to vector<16x128xbf16>
    %c3_424 = arith.constant 3 : index
    %c0_425 = arith.constant 0 : index
    %c0_426 = arith.constant 0 : index
    %479 = vector.load %arg8[%c3_424, %c0_425, %c0_426] : memref<16x128x256xbf16, #tpu.memory_space<vmem>>, vector<1x128x256xbf16>
    %480 = vector.shape_cast %479 : vector<1x128x256xbf16> to vector<128x256xbf16>
    %cst_427 = arith.constant dense<0.000000e+00> : vector<16x256xf32>
    %481 = tpu.matmul %478, %480, %cst_427 {dimension_numbers = #tpu.dot_dimension_numbers<[1], [0], [0], [1], [0, 0, 1, 1], [], []>} : vector<16x128xbf16>, vector<128x256xbf16>, vector<16x256xf32> -> vector<16x256xf32>
    %482 = arith.addf %474, %481 : vector<16x256xf32>
    %c4_428 = arith.constant 4 : index
    %c0_429 = arith.constant 0 : index
    %c0_430 = arith.constant 0 : index
    %483 = vector.load %arg7[%c4_428, %c0_429, %c0_430] : memref<16x16x64xbf16, #tpu.memory_space<vmem>>, vector<1x16x64xbf16>
    %484 = vector.shape_cast %483 : vector<1x16x64xbf16> to vector<16x64xbf16>
    %cst_431 = arith.constant dense<0.000000e+00> : vector<16x128xf32>
    %485 = tpu.matmul %484, %320, %cst_431 {dimension_numbers = #tpu.dot_dimension_numbers<[1], [0], [0], [1], [0, 0, 1, 1], [], []>} : vector<16x64xbf16>, vector<64x128xbf16>, vector<16x128xf32> -> vector<16x128xf32>
    %486 = arith.truncf %485 : vector<16x128xf32> to vector<16x128xbf16>
    %c4_432 = arith.constant 4 : index
    %c0_433 = arith.constant 0 : index
    %c0_434 = arith.constant 0 : index
    %487 = vector.load %arg8[%c4_432, %c0_433, %c0_434] : memref<16x128x256xbf16, #tpu.memory_space<vmem>>, vector<1x128x256xbf16>
    %488 = vector.shape_cast %487 : vector<1x128x256xbf16> to vector<128x256xbf16>
    %cst_435 = arith.constant dense<0.000000e+00> : vector<16x256xf32>
    %489 = tpu.matmul %486, %488, %cst_435 {dimension_numbers = #tpu.dot_dimension_numbers<[1], [0], [0], [1], [0, 0, 1, 1], [], []>} : vector<16x128xbf16>, vector<128x256xbf16>, vector<16x256xf32> -> vector<16x256xf32>
    %490 = arith.addf %482, %489 : vector<16x256xf32>
    %c5_436 = arith.constant 5 : index
    %c0_437 = arith.constant 0 : index
    %c0_438 = arith.constant 0 : index
    %491 = vector.load %arg7[%c5_436, %c0_437, %c0_438] : memref<16x16x64xbf16, #tpu.memory_space<vmem>>, vector<1x16x64xbf16>
    %492 = vector.shape_cast %491 : vector<1x16x64xbf16> to vector<16x64xbf16>
    %cst_439 = arith.constant dense<0.000000e+00> : vector<16x128xf32>
    %493 = tpu.matmul %492, %320, %cst_439 {dimension_numbers = #tpu.dot_dimension_numbers<[1], [0], [0], [1], [0, 0, 1, 1], [], []>} : vector<16x64xbf16>, vector<64x128xbf16>, vector<16x128xf32> -> vector<16x128xf32>
    %494 = arith.truncf %493 : vector<16x128xf32> to vector<16x128xbf16>
    %c5_440 = arith.constant 5 : index
    %c0_441 = arith.constant 0 : index
    %c0_442 = arith.constant 0 : index
    %495 = vector.load %arg8[%c5_440, %c0_441, %c0_442] : memref<16x128x256xbf16, #tpu.memory_space<vmem>>, vector<1x128x256xbf16>
    %496 = vector.shape_cast %495 : vector<1x128x256xbf16> to vector<128x256xbf16>
    %cst_443 = arith.constant dense<0.000000e+00> : vector<16x256xf32>
    %497 = tpu.matmul %494, %496, %cst_443 {dimension_numbers = #tpu.dot_dimension_numbers<[1], [0], [0], [1], [0, 0, 1, 1], [], []>} : vector<16x128xbf16>, vector<128x256xbf16>, vector<16x256xf32> -> vector<16x256xf32>
    %498 = arith.addf %490, %497 : vector<16x256xf32>
    %c6_444 = arith.constant 6 : index
    %c0_445 = arith.constant 0 : index
    %c0_446 = arith.constant 0 : index
    %499 = vector.load %arg7[%c6_444, %c0_445, %c0_446] : memref<16x16x64xbf16, #tpu.memory_space<vmem>>, vector<1x16x64xbf16>
    %500 = vector.shape_cast %499 : vector<1x16x64xbf16> to vector<16x64xbf16>
    %cst_447 = arith.constant dense<0.000000e+00> : vector<16x128xf32>
    %501 = tpu.matmul %500, %320, %cst_447 {dimension_numbers = #tpu.dot_dimension_numbers<[1], [0], [0], [1], [0, 0, 1, 1], [], []>} : vector<16x64xbf16>, vector<64x128xbf16>, vector<16x128xf32> -> vector<16x128xf32>
    %502 = arith.truncf %501 : vector<16x128xf32> to vector<16x128xbf16>
    %c6_448 = arith.constant 6 : index
    %c0_449 = arith.constant 0 : index
    %c0_450 = arith.constant 0 : index
    %503 = vector.load %arg8[%c6_448, %c0_449, %c0_450] : memref<16x128x256xbf16, #tpu.memory_space<vmem>>, vector<1x128x256xbf16>
    %504 = vector.shape_cast %503 : vector<1x128x256xbf16> to vector<128x256xbf16>
    %cst_451 = arith.constant dense<0.000000e+00> : vector<16x256xf32>
    %505 = tpu.matmul %502, %504, %cst_451 {dimension_numbers = #tpu.dot_dimension_numbers<[1], [0], [0], [1], [0, 0, 1, 1], [], []>} : vector<16x128xbf16>, vector<128x256xbf16>, vector<16x256xf32> -> vector<16x256xf32>
    %506 = arith.addf %498, %505 : vector<16x256xf32>
    %c7_452 = arith.constant 7 : index
    %c0_453 = arith.constant 0 : index
    %c0_454 = arith.constant 0 : index
    %507 = vector.load %arg7[%c7_452, %c0_453, %c0_454] : memref<16x16x64xbf16, #tpu.memory_space<vmem>>, vector<1x16x64xbf16>
    %508 = vector.shape_cast %507 : vector<1x16x64xbf16> to vector<16x64xbf16>
    %cst_455 = arith.constant dense<0.000000e+00> : vector<16x128xf32>
    %509 = tpu.matmul %508, %320, %cst_455 {dimension_numbers = #tpu.dot_dimension_numbers<[1], [0], [0], [1], [0, 0, 1, 1], [], []>} : vector<16x64xbf16>, vector<64x128xbf16>, vector<16x128xf32> -> vector<16x128xf32>
    %510 = arith.truncf %509 : vector<16x128xf32> to vector<16x128xbf16>
    %c7_456 = arith.constant 7 : index
    %c0_457 = arith.constant 0 : index
    %c0_458 = arith.constant 0 : index
    %511 = vector.load %arg8[%c7_456, %c0_457, %c0_458] : memref<16x128x256xbf16, #tpu.memory_space<vmem>>, vector<1x128x256xbf16>
    %512 = vector.shape_cast %511 : vector<1x128x256xbf16> to vector<128x256xbf16>
    %cst_459 = arith.constant dense<0.000000e+00> : vector<16x256xf32>
    %513 = tpu.matmul %510, %512, %cst_459 {dimension_numbers = #tpu.dot_dimension_numbers<[1], [0], [0], [1], [0, 0, 1, 1], [], []>} : vector<16x128xbf16>, vector<128x256xbf16>, vector<16x256xf32> -> vector<16x256xf32>
    %514 = arith.addf %506, %513 : vector<16x256xf32>
    %c8_460 = arith.constant 8 : index
    %c0_461 = arith.constant 0 : index
    %c0_462 = arith.constant 0 : index
    %515 = vector.load %arg7[%c8_460, %c0_461, %c0_462] : memref<16x16x64xbf16, #tpu.memory_space<vmem>>, vector<1x16x64xbf16>
    %516 = vector.shape_cast %515 : vector<1x16x64xbf16> to vector<16x64xbf16>
    %cst_463 = arith.constant dense<0.000000e+00> : vector<16x128xf32>
    %517 = tpu.matmul %516, %320, %cst_463 {dimension_numbers = #tpu.dot_dimension_numbers<[1], [0], [0], [1], [0, 0, 1, 1], [], []>} : vector<16x64xbf16>, vector<64x128xbf16>, vector<16x128xf32> -> vector<16x128xf32>
    %518 = arith.truncf %517 : vector<16x128xf32> to vector<16x128xbf16>
    %c8_464 = arith.constant 8 : index
    %c0_465 = arith.constant 0 : index
    %c0_466 = arith.constant 0 : index
    %519 = vector.load %arg8[%c8_464, %c0_465, %c0_466] : memref<16x128x256xbf16, #tpu.memory_space<vmem>>, vector<1x128x256xbf16>
    %520 = vector.shape_cast %519 : vector<1x128x256xbf16> to vector<128x256xbf16>
    %cst_467 = arith.constant dense<0.000000e+00> : vector<16x256xf32>
    %521 = tpu.matmul %518, %520, %cst_467 {dimension_numbers = #tpu.dot_dimension_numbers<[1], [0], [0], [1], [0, 0, 1, 1], [], []>} : vector<16x128xbf16>, vector<128x256xbf16>, vector<16x256xf32> -> vector<16x256xf32>
    %522 = arith.addf %514, %521 : vector<16x256xf32>
    %c9_468 = arith.constant 9 : index
    %c0_469 = arith.constant 0 : index
    %c0_470 = arith.constant 0 : index
    %523 = vector.load %arg7[%c9_468, %c0_469, %c0_470] : memref<16x16x64xbf16, #tpu.memory_space<vmem>>, vector<1x16x64xbf16>
    %524 = vector.shape_cast %523 : vector<1x16x64xbf16> to vector<16x64xbf16>
    %cst_471 = arith.constant dense<0.000000e+00> : vector<16x128xf32>
    %525 = tpu.matmul %524, %320, %cst_471 {dimension_numbers = #tpu.dot_dimension_numbers<[1], [0], [0], [1], [0, 0, 1, 1], [], []>} : vector<16x64xbf16>, vector<64x128xbf16>, vector<16x128xf32> -> vector<16x128xf32>
    %526 = arith.truncf %525 : vector<16x128xf32> to vector<16x128xbf16>
    %c9_472 = arith.constant 9 : index
    %c0_473 = arith.constant 0 : index
    %c0_474 = arith.constant 0 : index
    %527 = vector.load %arg8[%c9_472, %c0_473, %c0_474] : memref<16x128x256xbf16, #tpu.memory_space<vmem>>, vector<1x128x256xbf16>
    %528 = vector.shape_cast %527 : vector<1x128x256xbf16> to vector<128x256xbf16>
    %cst_475 = arith.constant dense<0.000000e+00> : vector<16x256xf32>
    %529 = tpu.matmul %526, %528, %cst_475 {dimension_numbers = #tpu.dot_dimension_numbers<[1], [0], [0], [1], [0, 0, 1, 1], [], []>} : vector<16x128xbf16>, vector<128x256xbf16>, vector<16x256xf32> -> vector<16x256xf32>
    %530 = arith.addf %522, %529 : vector<16x256xf32>
    %c10_476 = arith.constant 10 : index
    %c0_477 = arith.constant 0 : index
    %c0_478 = arith.constant 0 : index
    %531 = vector.load %arg7[%c10_476, %c0_477, %c0_478] : memref<16x16x64xbf16, #tpu.memory_space<vmem>>, vector<1x16x64xbf16>
    %532 = vector.shape_cast %531 : vector<1x16x64xbf16> to vector<16x64xbf16>
    %cst_479 = arith.constant dense<0.000000e+00> : vector<16x128xf32>
    %533 = tpu.matmul %532, %320, %cst_479 {dimension_numbers = #tpu.dot_dimension_numbers<[1], [0], [0], [1], [0, 0, 1, 1], [], []>} : vector<16x64xbf16>, vector<64x128xbf16>, vector<16x128xf32> -> vector<16x128xf32>
    %534 = arith.truncf %533 : vector<16x128xf32> to vector<16x128xbf16>
    %c10_480 = arith.constant 10 : index
    %c0_481 = arith.constant 0 : index
    %c0_482 = arith.constant 0 : index
    %535 = vector.load %arg8[%c10_480, %c0_481, %c0_482] : memref<16x128x256xbf16, #tpu.memory_space<vmem>>, vector<1x128x256xbf16>
    %536 = vector.shape_cast %535 : vector<1x128x256xbf16> to vector<128x256xbf16>
    %cst_483 = arith.constant dense<0.000000e+00> : vector<16x256xf32>
    %537 = tpu.matmul %534, %536, %cst_483 {dimension_numbers = #tpu.dot_dimension_numbers<[1], [0], [0], [1], [0, 0, 1, 1], [], []>} : vector<16x128xbf16>, vector<128x256xbf16>, vector<16x256xf32> -> vector<16x256xf32>
    %538 = arith.addf %530, %537 : vector<16x256xf32>
    %c11_484 = arith.constant 11 : index
    %c0_485 = arith.constant 0 : index
    %c0_486 = arith.constant 0 : index
    %539 = vector.load %arg7[%c11_484, %c0_485, %c0_486] : memref<16x16x64xbf16, #tpu.memory_space<vmem>>, vector<1x16x64xbf16>
    %540 = vector.shape_cast %539 : vector<1x16x64xbf16> to vector<16x64xbf16>
    %cst_487 = arith.constant dense<0.000000e+00> : vector<16x128xf32>
    %541 = tpu.matmul %540, %320, %cst_487 {dimension_numbers = #tpu.dot_dimension_numbers<[1], [0], [0], [1], [0, 0, 1, 1], [], []>} : vector<16x64xbf16>, vector<64x128xbf16>, vector<16x128xf32> -> vector<16x128xf32>
    %542 = arith.truncf %541 : vector<16x128xf32> to vector<16x128xbf16>
    %c11_488 = arith.constant 11 : index
    %c0_489 = arith.constant 0 : index
    %c0_490 = arith.constant 0 : index
    %543 = vector.load %arg8[%c11_488, %c0_489, %c0_490] : memref<16x128x256xbf16, #tpu.memory_space<vmem>>, vector<1x128x256xbf16>
    %544 = vector.shape_cast %543 : vector<1x128x256xbf16> to vector<128x256xbf16>
    %cst_491 = arith.constant dense<0.000000e+00> : vector<16x256xf32>
    %545 = tpu.matmul %542, %544, %cst_491 {dimension_numbers = #tpu.dot_dimension_numbers<[1], [0], [0], [1], [0, 0, 1, 1], [], []>} : vector<16x128xbf16>, vector<128x256xbf16>, vector<16x256xf32> -> vector<16x256xf32>
    %546 = arith.addf %538, %545 : vector<16x256xf32>
    %c12_492 = arith.constant 12 : index
    %c0_493 = arith.constant 0 : index
    %c0_494 = arith.constant 0 : index
    %547 = vector.load %arg7[%c12_492, %c0_493, %c0_494] : memref<16x16x64xbf16, #tpu.memory_space<vmem>>, vector<1x16x64xbf16>
    %548 = vector.shape_cast %547 : vector<1x16x64xbf16> to vector<16x64xbf16>
    %cst_495 = arith.constant dense<0.000000e+00> : vector<16x128xf32>
    %549 = tpu.matmul %548, %320, %cst_495 {dimension_numbers = #tpu.dot_dimension_numbers<[1], [0], [0], [1], [0, 0, 1, 1], [], []>} : vector<16x64xbf16>, vector<64x128xbf16>, vector<16x128xf32> -> vector<16x128xf32>
    %550 = arith.truncf %549 : vector<16x128xf32> to vector<16x128xbf16>
    %c12_496 = arith.constant 12 : index
    %c0_497 = arith.constant 0 : index
    %c0_498 = arith.constant 0 : index
    %551 = vector.load %arg8[%c12_496, %c0_497, %c0_498] : memref<16x128x256xbf16, #tpu.memory_space<vmem>>, vector<1x128x256xbf16>
    %552 = vector.shape_cast %551 : vector<1x128x256xbf16> to vector<128x256xbf16>
    %cst_499 = arith.constant dense<0.000000e+00> : vector<16x256xf32>
    %553 = tpu.matmul %550, %552, %cst_499 {dimension_numbers = #tpu.dot_dimension_numbers<[1], [0], [0], [1], [0, 0, 1, 1], [], []>} : vector<16x128xbf16>, vector<128x256xbf16>, vector<16x256xf32> -> vector<16x256xf32>
    %554 = arith.addf %546, %553 : vector<16x256xf32>
    %c13_500 = arith.constant 13 : index
    %c0_501 = arith.constant 0 : index
    %c0_502 = arith.constant 0 : index
    %555 = vector.load %arg7[%c13_500, %c0_501, %c0_502] : memref<16x16x64xbf16, #tpu.memory_space<vmem>>, vector<1x16x64xbf16>
    %556 = vector.shape_cast %555 : vector<1x16x64xbf16> to vector<16x64xbf16>
    %cst_503 = arith.constant dense<0.000000e+00> : vector<16x128xf32>
    %557 = tpu.matmul %556, %320, %cst_503 {dimension_numbers = #tpu.dot_dimension_numbers<[1], [0], [0], [1], [0, 0, 1, 1], [], []>} : vector<16x64xbf16>, vector<64x128xbf16>, vector<16x128xf32> -> vector<16x128xf32>
    %558 = arith.truncf %557 : vector<16x128xf32> to vector<16x128xbf16>
    %c13_504 = arith.constant 13 : index
    %c0_505 = arith.constant 0 : index
    %c0_506 = arith.constant 0 : index
    %559 = vector.load %arg8[%c13_504, %c0_505, %c0_506] : memref<16x128x256xbf16, #tpu.memory_space<vmem>>, vector<1x128x256xbf16>
    %560 = vector.shape_cast %559 : vector<1x128x256xbf16> to vector<128x256xbf16>
    %cst_507 = arith.constant dense<0.000000e+00> : vector<16x256xf32>
    %561 = tpu.matmul %558, %560, %cst_507 {dimension_numbers = #tpu.dot_dimension_numbers<[1], [0], [0], [1], [0, 0, 1, 1], [], []>} : vector<16x128xbf16>, vector<128x256xbf16>, vector<16x256xf32> -> vector<16x256xf32>
    %562 = arith.addf %554, %561 : vector<16x256xf32>
    %c14_508 = arith.constant 14 : index
    %c0_509 = arith.constant 0 : index
    %c0_510 = arith.constant 0 : index
    %563 = vector.load %arg7[%c14_508, %c0_509, %c0_510] : memref<16x16x64xbf16, #tpu.memory_space<vmem>>, vector<1x16x64xbf16>
    %564 = vector.shape_cast %563 : vector<1x16x64xbf16> to vector<16x64xbf16>
    %cst_511 = arith.constant dense<0.000000e+00> : vector<16x128xf32>
    %565 = tpu.matmul %564, %320, %cst_511 {dimension_numbers = #tpu.dot_dimension_numbers<[1], [0], [0], [1], [0, 0, 1, 1], [], []>} : vector<16x64xbf16>, vector<64x128xbf16>, vector<16x128xf32> -> vector<16x128xf32>
    %566 = arith.truncf %565 : vector<16x128xf32> to vector<16x128xbf16>
    %c14_512 = arith.constant 14 : index
    %c0_513 = arith.constant 0 : index
    %c0_514 = arith.constant 0 : index
    %567 = vector.load %arg8[%c14_512, %c0_513, %c0_514] : memref<16x128x256xbf16, #tpu.memory_space<vmem>>, vector<1x128x256xbf16>
    %568 = vector.shape_cast %567 : vector<1x128x256xbf16> to vector<128x256xbf16>
    %cst_515 = arith.constant dense<0.000000e+00> : vector<16x256xf32>
    %569 = tpu.matmul %566, %568, %cst_515 {dimension_numbers = #tpu.dot_dimension_numbers<[1], [0], [0], [1], [0, 0, 1, 1], [], []>} : vector<16x128xbf16>, vector<128x256xbf16>, vector<16x256xf32> -> vector<16x256xf32>
    %570 = arith.addf %562, %569 : vector<16x256xf32>
    %c15_516 = arith.constant 15 : index
    %c0_517 = arith.constant 0 : index
    %c0_518 = arith.constant 0 : index
    %571 = vector.load %arg7[%c15_516, %c0_517, %c0_518] : memref<16x16x64xbf16, #tpu.memory_space<vmem>>, vector<1x16x64xbf16>
    %572 = vector.shape_cast %571 : vector<1x16x64xbf16> to vector<16x64xbf16>
    %cst_519 = arith.constant dense<0.000000e+00> : vector<16x128xf32>
    %573 = tpu.matmul %572, %320, %cst_519 {dimension_numbers = #tpu.dot_dimension_numbers<[1], [0], [0], [1], [0, 0, 1, 1], [], []>} : vector<16x64xbf16>, vector<64x128xbf16>, vector<16x128xf32> -> vector<16x128xf32>
    %574 = arith.truncf %573 : vector<16x128xf32> to vector<16x128xbf16>
    %c15_520 = arith.constant 15 : index
    %c0_521 = arith.constant 0 : index
    %c0_522 = arith.constant 0 : index
    %575 = vector.load %arg8[%c15_520, %c0_521, %c0_522] : memref<16x128x256xbf16, #tpu.memory_space<vmem>>, vector<1x128x256xbf16>
    %576 = vector.shape_cast %575 : vector<1x128x256xbf16> to vector<128x256xbf16>
    %cst_523 = arith.constant dense<0.000000e+00> : vector<16x256xf32>
    %577 = tpu.matmul %574, %576, %cst_523 {dimension_numbers = #tpu.dot_dimension_numbers<[1], [0], [0], [1], [0, 0, 1, 1], [], []>} : vector<16x128xbf16>, vector<128x256xbf16>, vector<16x256xf32> -> vector<16x256xf32>
    %578 = arith.addf %570, %577 : vector<16x256xf32>
    %c0_524 = arith.constant 0 : index
    %c0_525 = arith.constant 0 : index
    %579 = vector.load %arg9[%c0_524, %c0_525] : memref<1x256xf32, #tpu.memory_space<vmem>>, vector<1x256xf32>
    %c0_526 = arith.constant 0 : index
    %c0_527 = arith.constant 0 : index
    %580 = vector.load %arg10[%c0_526, %c0_527] : memref<1x256xf32, #tpu.memory_space<vmem>>, vector<1x256xf32>
    %cst_528 = arith.constant dense<0.000000e+00> : vector<256xf32>
    %581 = vector.multi_reduction <add>, %449, %cst_528 [0] : vector<16x256xf32> to vector<256xf32>
    %582 = vector.shape_cast %581 : vector<256xf32> to vector<1x256xf32>
    %cst_529 = arith.constant 0.000000e+00 : f32
    %583 = vector.broadcast %cst_529 : f32 to vector<1x256xf32>
    %584 = arith.addf %583, %582 : vector<1x256xf32>
    %cst_530 = arith.constant dense<0.000000e+00> : vector<256xf32>
    %585 = vector.multi_reduction <add>, %578, %cst_530 [0] : vector<16x256xf32> to vector<256xf32>
    %586 = vector.shape_cast %585 : vector<256xf32> to vector<1x256xf32>
    %587 = arith.addf %584, %586 : vector<1x256xf32>
    %588 = arith.mulf %449, %449 : vector<16x256xf32>
    %cst_531 = arith.constant dense<0.000000e+00> : vector<256xf32>
    %589 = vector.multi_reduction <add>, %588, %cst_531 [0] : vector<16x256xf32> to vector<256xf32>
    %590 = vector.shape_cast %589 : vector<256xf32> to vector<1x256xf32>
    %cst_532 = arith.constant 0.000000e+00 : f32
    %591 = vector.broadcast %cst_532 : f32 to vector<1x256xf32>
    %592 = arith.addf %591, %590 : vector<1x256xf32>
    %593 = arith.mulf %578, %578 : vector<16x256xf32>
    %cst_533 = arith.constant dense<0.000000e+00> : vector<256xf32>
    %594 = vector.multi_reduction <add>, %593, %cst_533 [0] : vector<16x256xf32> to vector<256xf32>
    %595 = vector.shape_cast %594 : vector<256xf32> to vector<1x256xf32>
    %596 = arith.addf %592, %595 : vector<1x256xf32>
    %cst_534 = arith.constant 3.125000e-02 : f32
    %597 = vector.broadcast %cst_534 : f32 to vector<1x256xf32>
    %598 = arith.mulf %587, %597 : vector<1x256xf32>
    %cst_535 = arith.constant 3.125000e-02 : f32
    %599 = vector.broadcast %cst_535 : f32 to vector<1x256xf32>
    %600 = arith.mulf %596, %599 : vector<1x256xf32>
    %601 = arith.mulf %598, %598 : vector<1x256xf32>
    %602 = arith.subf %600, %601 : vector<1x256xf32>
    %cst_536 = arith.constant 0.000000e+00 : f32
    %603 = vector.broadcast %cst_536 : f32 to vector<1x256xf32>
    %604 = arith.maximumf %602, %603 : vector<1x256xf32>
    %cst_537 = arith.constant 9.99999974E-6 : f32
    %605 = vector.broadcast %cst_537 : f32 to vector<1x256xf32>
    %606 = arith.addf %604, %605 : vector<1x256xf32>
    %607 = math.rsqrt %606 : vector<1x256xf32>
    %608 = arith.mulf %579, %607 : vector<1x256xf32>
    %609 = arith.mulf %598, %608 : vector<1x256xf32>
    %610 = arith.subf %580, %609 : vector<1x256xf32>
    %611 = vector.broadcast %608 : vector<1x256xf32> to vector<16x256xf32>
    %612 = arith.mulf %449, %611 : vector<16x256xf32>
    %613 = vector.broadcast %610 : vector<1x256xf32> to vector<16x256xf32>
    %614 = arith.addf %612, %613 : vector<16x256xf32>
    %cst_538 = arith.constant 0.000000e+00 : f32
    %615 = vector.broadcast %cst_538 : f32 to vector<16x256xf32>
    %616 = arith.cmpf ogt, %614, %615 : vector<16x256xf32>
    %cst_539 = arith.constant 2.000000e-01 : f32
    %617 = vector.broadcast %cst_539 : f32 to vector<16x256xf32>
    %618 = arith.mulf %617, %614 : vector<16x256xf32>
    %619 = arith.select %616, %614, %618 : vector<16x256xi1>, vector<16x256xf32>
    %620 = vector.broadcast %608 : vector<1x256xf32> to vector<16x256xf32>
    %621 = arith.mulf %578, %620 : vector<16x256xf32>
    %622 = vector.broadcast %610 : vector<1x256xf32> to vector<16x256xf32>
    %623 = arith.addf %621, %622 : vector<16x256xf32>
    %cst_540 = arith.constant 0.000000e+00 : f32
    %624 = vector.broadcast %cst_540 : f32 to vector<16x256xf32>
    %625 = arith.cmpf ogt, %623, %624 : vector<16x256xf32>
    %cst_541 = arith.constant 2.000000e-01 : f32
    %626 = vector.broadcast %cst_541 : f32 to vector<16x256xf32>
    %627 = arith.mulf %626, %623 : vector<16x256xf32>
    %628 = arith.select %625, %623, %627 : vector<16x256xi1>, vector<16x256xf32>
    %c0_542 = arith.constant 0 : index
    %c0_543 = arith.constant 0 : index
    %629 = vector.load %arg11[%c0_542, %c0_543] : memref<16x256xf32, #tpu.memory_space<vmem>>, vector<16x256xf32>
    %630 = arith.mulf %619, %629 : vector<16x256xf32>
    %cst_544 = arith.constant dense<0.000000e+00> : vector<16xf32>
    %631 = vector.multi_reduction <add>, %630, %cst_544 [1] : vector<16x256xf32> to vector<16xf32>
    %632 = vector.shape_cast %631 : vector<16xf32> to vector<16x1xf32>
    %cst_545 = arith.constant dense<0.000000e+00> : vector<1xf32>
    %633 = vector.multi_reduction <add>, %632, %cst_545 [0] : vector<16x1xf32> to vector<1xf32>
    %634 = vector.shape_cast %633 : vector<1xf32> to vector<1x1xf32>
    %cst_546 = arith.constant 0.000000e+00 : f32
    %635 = vector.broadcast %cst_546 : f32 to vector<1x1xf32>
    %636 = arith.subf %635, %634 : vector<1x1xf32>
    %637 = math.exp %636 : vector<1x1xf32>
    %cst_547 = arith.constant 1.000000e+00 : f32
    %638 = vector.broadcast %cst_547 : f32 to vector<1x1xf32>
    %639 = arith.addf %638, %637 : vector<1x1xf32>
    %640 = tpu.reciprocal %639 {approx = true} : vector<1x1xf32> -> vector<1x1xf32>
    %641 = vector.shape_cast %640 : vector<1x1xf32> to vector<1x1xf32>
    %642 = vector.broadcast %641 : vector<1x1xf32> to vector<1x128xf32>
    %c0_548 = arith.constant 0 : index
    %c0_549 = arith.constant 0 : index
    %643 = vector.load %arg12[%c0_548, %c0_549] : memref<2x128xf32, #tpu.memory_space<vmem>>, vector<1x128xf32>
    tpu.vector_store %arg12[%c0_548, %c0_549], %642 {strides = array<i32>} : memref<2x128xf32, #tpu.memory_space<vmem>>, vector<1x128xf32>,
    %644 = arith.mulf %628, %629 : vector<16x256xf32>
    %cst_550 = arith.constant dense<0.000000e+00> : vector<16xf32>
    %645 = vector.multi_reduction <add>, %644, %cst_550 [1] : vector<16x256xf32> to vector<16xf32>
    %646 = vector.shape_cast %645 : vector<16xf32> to vector<16x1xf32>
    %cst_551 = arith.constant dense<0.000000e+00> : vector<1xf32>
    %647 = vector.multi_reduction <add>, %646, %cst_551 [0] : vector<16x1xf32> to vector<1xf32>
    %648 = vector.shape_cast %647 : vector<1xf32> to vector<1x1xf32>
    %cst_552 = arith.constant 0.000000e+00 : f32
    %649 = vector.broadcast %cst_552 : f32 to vector<1x1xf32>
    %650 = arith.subf %649, %648 : vector<1x1xf32>
    %651 = math.exp %650 : vector<1x1xf32>
    %cst_553 = arith.constant 1.000000e+00 : f32
    %652 = vector.broadcast %cst_553 : f32 to vector<1x1xf32>
    %653 = arith.addf %652, %651 : vector<1x1xf32>
    %654 = tpu.reciprocal %653 {approx = true} : vector<1x1xf32> -> vector<1x1xf32>
    %655 = vector.shape_cast %654 : vector<1x1xf32> to vector<1x1xf32>
    %656 = vector.broadcast %655 : vector<1x1xf32> to vector<1x128xf32>
    %c1_554 = arith.constant 1 : index
    %c0_555 = arith.constant 0 : index
    %657 = vector.load %arg12[%c1_554, %c0_555] : memref<2x128xf32, #tpu.memory_space<vmem>>, vector<1x128xf32>
    tpu.vector_store %arg12[%c1_554, %c0_555], %656 {strides = array<i32>} : memref<2x128xf32, #tpu.memory_space<vmem>>, vector<1x128xf32>,
    return
  }
  func.func @transform_0(%arg0: i32) -> (i32, i32) {
    %c0_i32 = arith.constant 0 : i32
    %c0_i32_0 = arith.constant 0 : i32
    %c0_i32_1 = arith.constant 0 : i32
    return %c0_i32, %c0_i32_0 : i32, i32
  }
  func.func @transform_1(%arg0: i32) -> (i32, i32) {
    %c0_i32 = arith.constant 0 : i32
    %c0_i32_0 = arith.constant 0 : i32
    %c0_i32_1 = arith.constant 0 : i32
    return %c0_i32, %c0_i32_0 : i32, i32
  }
  func.func @transform_2(%arg0: i32) -> (i32, i32, i32) {
    %c0_i32 = arith.constant 0 : i32
    %c0_i32_0 = arith.constant 0 : i32
    %c0_i32_1 = arith.constant 0 : i32
    %c0_i32_2 = arith.constant 0 : i32
    return %c0_i32, %c0_i32_0, %c0_i32_1 : i32, i32, i32
  }
  func.func @transform_3(%arg0: i32) -> (i32, i32, i32) {
    %c0_i32 = arith.constant 0 : i32
    %c0_i32_0 = arith.constant 0 : i32
    %c0_i32_1 = arith.constant 0 : i32
    %c0_i32_2 = arith.constant 0 : i32
    return %c0_i32, %c0_i32_0, %c0_i32_1 : i32, i32, i32
  }
  func.func @transform_4(%arg0: i32) -> (i32, i32) {
    %c0_i32 = arith.constant 0 : i32
    %c0_i32_0 = arith.constant 0 : i32
    %c0_i32_1 = arith.constant 0 : i32
    return %c0_i32, %c0_i32_0 : i32, i32
  }
  func.func @transform_5(%arg0: i32) -> (i32, i32) {
    %c0_i32 = arith.constant 0 : i32
    %c0_i32_0 = arith.constant 0 : i32
    %c0_i32_1 = arith.constant 0 : i32
    return %c0_i32, %c0_i32_0 : i32, i32
  }
  func.func @transform_6(%arg0: i32) -> (i32, i32, i32) {
    %c0_i32 = arith.constant 0 : i32
    %c0_i32_0 = arith.constant 0 : i32
    %c0_i32_1 = arith.constant 0 : i32
    %c0_i32_2 = arith.constant 0 : i32
    return %c0_i32, %c0_i32_0, %c0_i32_1 : i32, i32, i32
  }
  func.func @transform_7(%arg0: i32) -> (i32, i32, i32) {
    %c0_i32 = arith.constant 0 : i32
    %c0_i32_0 = arith.constant 0 : i32
    %c0_i32_1 = arith.constant 0 : i32
    %c0_i32_2 = arith.constant 0 : i32
    return %c0_i32, %c0_i32_0, %c0_i32_1 : i32, i32, i32
  }
  func.func @transform_8(%arg0: i32) -> (i32, i32) {
    %c0_i32 = arith.constant 0 : i32
    %c0_i32_0 = arith.constant 0 : i32
    %c0_i32_1 = arith.constant 0 : i32
    return %c0_i32, %c0_i32_0 : i32, i32
  }
  func.func @transform_9(%arg0: i32) -> (i32, i32) {
    %c0_i32 = arith.constant 0 : i32
    %c0_i32_0 = arith.constant 0 : i32
    %c0_i32_1 = arith.constant 0 : i32
    return %c0_i32, %c0_i32_0 : i32, i32
  }
  func.func @transform_10(%arg0: i32) -> (i32, i32) {
    %c0_i32 = arith.constant 0 : i32
    %c0_i32_0 = arith.constant 0 : i32
    %c0_i32_1 = arith.constant 0 : i32
    return %c0_i32, %c0_i32_0 : i32, i32
  }
  func.func @transform_11(%arg0: i32) -> (i32, i32) {
    %c0_i32 = arith.constant 0 : i32
    %c0_i32_0 = arith.constant 0 : i32
    %c0_i32_1 = arith.constant 0 : i32
    return %c0_i32, %c0_i32_0 : i32, i32
  }
}

</mosaic_0001>

<bundles_post_ra>
// kernel: discriminator_forward.1
= control target key start
LH: loop header
LB: loop body
LE: loop exit
PB: predicated region body
PF: predicated region fallthrough
CT: control target
= control target key end

     0   :  { %s22830_s1 = inlined_call_operand.vmem [shape: bf16[128,64], index: 1, kind: input, shape index: {}]   ;;  %s22831_s0 = inlined_call_operand.vmem [shape: bf16[512,128], index: 0, kind: input, shape index: {}]   ;;  %s22832_s2 = inlined_call_operand.vmem [shape: bf16[16,64,256], index: 2, kind: input, shape index: {}]   ;;  %s22833_s3 = inlined_call_operand.vmem [shape: bf16[16,64,128], index: 3, kind: input, shape index: {}]   ;;  %s22834_s6 = inlined_call_operand.vmem [shape: bf16[16,16,64], index: 6, kind: input, shape index: {}]   ;;  %s22835_s4 = inlined_call_operand.vmem [shape: f32[1,128], index: 4, kind: input, shape index: {}]   ;;  %s22836_s5 = inlined_call_operand.vmem [shape: f32[1,128], index: 5, kind: input, shape index: {}]   ;;  %s22837_s7 = inlined_call_operand.vmem [shape: bf16[16,128,256], index: 7, kind: input, shape index: {}]   ;;  %s22838_s8 = inlined_call_operand.vmem [shape: f32[1,256], index: 8, kind: input, shape index: {}]   ;;  %s22839_s9 = inlined_call_operand.vmem [shape: f32[1,256], index: 9, kind: input, shape index: {}]   ;;  %s22840_s10 = inlined_call_operand.vmem [shape: f32[16,256], index: 10, kind: input, shape index: {}]   ;;  %s22841_s11 = inlined_call_operand.vmem [shape: f32[2,128], index: 11, kind: output, shape index: {}]  }
   0x1   :  { %v16331_v0 = vld [vmem:[%s22830_s1] sm:$0xff]   ;;  %v16332_v1 = vld [vmem:[%s22830_s1 + $0x8] sm:$0xff]   ;;  %v16333_v2 = vld [vmem:[%s22830_s1 + $0x10] sm:$0xff]  }
   0x2   :  { %14975 = vmatprep.subr.bf16.mxu0 %v16331_v0  ;;  %15951 = vmatprep.subr.bf16.mxu1 %v16331_v0  ;;  %v16334_v3 = vld [vmem:[%s22830_s1 + $0x18] sm:$0xff]   ;;  %v16339_v4 = vld [vmem:[%s22831_s0] sm:$0xff]   ;;  %v16336_v6 = vld [vmem:[%s22830_s1 + $0x28] sm:$0xff]  }
   0x3   :  { %14976 = vmatpush3.bf16.msra.mxu0 %v16331_v0  ;;  %15959 = vmatpush3.bf16.msra.mxu1 %v16331_v0  ;;  %v16335_v5 = vld [vmem:[%s22830_s1 + $0x20] sm:$0xff]   ;;  %v16349_v7 = vld [vmem:[%s22831_s0 + $0x50] sm:$0xff]   ;;  %v16338_v9 = vld [vmem:[%s22830_s1 + $0x38] sm:$0xff]  }
   0x4   :  { %14977 = vmatprep.subr.bf16.mxu0 %v16332_v1  ;;  %15952 = vmatprep.subr.bf16.mxu1 %v16332_v1  ;;  %v16337_v8 = vld [vmem:[%s22830_s1 + $0x30] sm:$0xff]   ;;  %v16340_v10 = vld [vmem:[%s22831_s0 + $0x8] sm:$0xff]   ;;  %v16350_v11 = vld [vmem:[%s22831_s0 + $0x58] sm:$0xff]  }
   0x5   :  { %14991 = vmatprep.mubr.bf16.mxu0 %v16339_v4  ;;  %15011 = vmatprep.mubr.bf16.mxu1 %v16349_v7  ;;  %v16341_v12 = vld [vmem:[%s22831_s0 + $0x10] sm:$0xff]   ;;  %v16351_v13 = vld [vmem:[%s22831_s0 + $0x60] sm:$0xff]   ;;  %v16342_v14 = vld [vmem:[%s22831_s0 + $0x18] sm:$0xff]  }
   0x6   :  { %v16352_v15 = vld [vmem:[%s22831_s0 + $0x68] sm:$0xff]   ;;  %v16343_v16 = vld [vmem:[%s22831_s0 + $0x20] sm:$0xff]   ;;  %v16353_v17 = vld [vmem:[%s22831_s0 + $0x70] sm:$0xff]  }
   0x7   :  { %14978 = vmatpush3.bf16.msra.mxu0 %v16332_v1  ;;  %15960 = vmatpush3.bf16.msra.mxu1 %v16332_v1  ;;  %v16344_v18 = vld [vmem:[%s22831_s0 + $0x28] sm:$0xff]   ;;  %v16354_v19 = vld [vmem:[%s22831_s0 + $0x78] sm:$0xff]   ;;  %v16345_v20 = vld [vmem:[%s22831_s0 + $0x30] sm:$0xff]  }
   0x8   :  { %14979 = vmatprep.subr.bf16.mxu0 %v16333_v2  ;;  %15953 = vmatprep.subr.bf16.mxu1 %v16333_v2  ;;  %v16346_v21 = vld [vmem:[%s22831_s0 + $0x38] sm:$0xff]   ;;  %v16347_v22 = vld [vmem:[%s22831_s0 + $0x40] sm:$0xff]   ;;  %v16348_v23 = vld [vmem:[%s22831_s0 + $0x48] sm:$0xff]  }
   0x9   :  { %v16355_v24 = vld [vmem:[%s22831_s0 + $0x80] sm:$0xff]   ;;  %v16356_v25 = vld [vmem:[%s22831_s0 + $0x88] sm:$0xff]   ;;  %v16357_v26 = vld [vmem:[%s22831_s0 + $0x90] sm:$0xff]  }
   0xa   :  { %v16358_v27 = vld [vmem:[%s22831_s0 + $0x98] sm:$0xff]   ;;  %v16359_v28 = vld [vmem:[%s22831_s0 + $0xa0] sm:$0xff]   ;;  %v16360_v29 = vld [vmem:[%s22831_s0 + $0xa8] sm:$0xff]  }
   0xb   :  { %14980 = vmatpush3.bf16.msra.mxu0 %v16333_v2  ;;  %15961 = vmatpush3.bf16.msra.mxu1 %v16333_v2  ;;  %v16361_v30 = vld [vmem:[%s22831_s0 + $0xb0] sm:$0xff]   ;;  %v16362_v31 = vld [vmem:[%s22831_s0 + $0xb8] sm:$0xff]   ;;  %v16363_v32 = vld [vmem:[%s22831_s0 + $0xc0] sm:$0xff]  }
   0xc   :  { %14981 = vmatprep.subr.bf16.mxu0 %v16334_v3  ;;  %15954 = vmatprep.subr.bf16.mxu1 %v16334_v3  ;;  %v16364_v33 = vld [vmem:[%s22831_s0 + $0xc8] sm:$0xff]   ;;  %v16365_v34 = vld [vmem:[%s22831_s0 + $0xd0] sm:$0xff]   ;;  %v16366_v35 = vld [vmem:[%s22831_s0 + $0xd8] sm:$0xff]  }
   0xd   :  { %v16367_v36 = vld [vmem:[%s22831_s0 + $0xe0] sm:$0xff]   ;;  %v16368_v37 = vld [vmem:[%s22831_s0 + $0xe8] sm:$0xff]   ;;  %v16369_v38 = vld [vmem:[%s22831_s0 + $0xf0] sm:$0xff]  }
   0xe   :  { %v16370_v39 = vld [vmem:[%s22831_s0 + $0xf8] sm:$0xff]   ;;  %v16373_v40 = vld [vmem:[%s22832_s2 + $0x4] ss:$8 sps:$4 sm:$0xff]  }
   0xf   :  { %14982 = vmatpush3.bf16.msra.mxu0 %v16334_v3  ;;  %15962 = vmatpush3.bf16.msra.mxu1 %v16334_v3  ;;  %v16376_v41 = vld [vmem:[%s22832_s2 + $0xc4] ss:$8 sps:$4 sm:$0xff]  }
  0x10   :  { %14983 = vmatprep.subr.bf16.mxu0 %v16335_v5  ;;  %15955 = vmatprep.subr.bf16.mxu1 %v16335_v5 }
  0x13   :  { %14984 = vmatpush3.bf16.msra.mxu0 %v16335_v5  ;;  %15963 = vmatpush3.bf16.msra.mxu1 %v16335_v5 }
  0x14   :  { %14985 = vmatprep.subr.bf16.mxu0 %v16336_v6  ;;  %15956 = vmatprep.subr.bf16.mxu1 %v16336_v6 }
  0x17   :  { %14986 = vmatpush3.bf16.msra.mxu0 %v16336_v6  ;;  %15964 = vmatpush3.bf16.msra.mxu1 %v16336_v6 }
  0x18   :  { %14987 = vmatprep.subr.bf16.mxu0 %v16337_v8  ;;  %15957 = vmatprep.subr.bf16.mxu1 %v16337_v8 }
  0x1b   :  { %14988 = vmatpush3.bf16.msra.mxu0 %v16337_v8  ;;  %15965 = vmatpush3.bf16.msra.mxu1 %v16337_v8 }
  0x1c   :  { %14989 = vmatprep.subr.bf16.mxu0 %v16338_v9  ;;  %15958 = vmatprep.subr.bf16.mxu1 %v16338_v9 }
  0x1f   :  { %14990 = vmatpush3.bf16.msra.mxu0 %v16338_v9  ;;  %15966 = vmatpush3.bf16.msra.mxu1 %v16338_v9 }
  0x22   :  { %14992 = vmatmul.mubr.bf16.vlgmr.msra.gmra.mrb[0].mxu0 %v16340_v10  ;;  %15012 = vmatmul.mubr.bf16.vlgmr.msra.gmra.mrb[0].mxu1 %v16350_v11 }
  0x23   :  { %14995 = vmatprep.mubr.bf16.mxu0 %v16341_v12  ;;  %15015 = vmatprep.mubr.bf16.mxu1 %v16351_v13 }
  0x2a   :  { %14996 = vmatmul.mubr.bf16.gmra.mrb[4].mxu0 %v16342_v14  ;;  %15016 = vmatmul.mubr.bf16.gmra.mrb[4].mxu1 %v16352_v15 }
  0x2b   :  { %14999 = vmatprep.mubr.bf16.mxu0 %v16343_v16  ;;  %15019 = vmatprep.mubr.bf16.mxu1 %v16353_v17 }
  0x32   :  { %15000 = vmatmul.mubr.bf16.gmra.mrb[8].mxu0 %v16344_v18  ;;  %15020 = vmatmul.mubr.bf16.gmra.mrb[8].mxu1 %v16354_v19 }
  0x33   :  { %15003 = vmatprep.mubr.bf16.mxu0 %v16345_v20  ;;  %15023 = vmatprep.mubr.bf16.mxu1 %v16355_v24 }
  0x3a   :  { %15004 = vmatmul.mubr.bf16.gmra.mrb[12].mxu0 %v16346_v21  ;;  %15024 = vmatmul.mubr.bf16.gmra.mrb[12].mxu1 %v16356_v25 }
  0x3b   :  { %15007 = vmatprep.mubr.bf16.mxu0 %v16347_v22  ;;  %15027 = vmatprep.mubr.bf16.mxu1 %v16357_v26 }
  0x42   :  { %15008 = vmatmul.mubr.bf16.gmra.mrb[16].mxu0 %v16348_v23  ;;  %15028 = vmatmul.mubr.bf16.gmra.mrb[16].mxu1 %v16358_v27 }
  0x43   :  { %15031 = vmatprep.mubr.bf16.mxu1 %v16359_v28  ;;  %1644 = vmatprep.mubr.bf16.mxu0 %v16376_v41 }
  0x4a   :  { %15032 = vmatmul.mubr.bf16.gmra.mrb[20].mxu1 %v16360_v29 }
  0x4b   :  { %15035 = vmatprep.mubr.bf16.mxu1 %v16361_v30 }
  0x52   :  { %15036 = vmatmul.mubr.bf16.gmra.mrb[24].mxu1 %v16362_v31 }
  0x53   :  { %15039 = vmatprep.mubr.bf16.mxu1 %v16363_v32 }
  0x5a   :  { %15040 = vmatmul.mubr.bf16.gmra.mrb[28].mxu1 %v16364_v33 }
  0x5b   :  { %15043 = vmatprep.mubr.bf16.mxu1 %v16365_v34 }
  0x62   :  { %15044 = vmatmul.mubr.bf16.gmra.mrb[32].mxu1 %v16366_v35 }
  0x63   :  { %15047 = vmatprep.mubr.bf16.mxu1 %v16367_v36 }
  0x6a   :  { %15048 = vmatmul.mubr.bf16.gmra.mrb[36].mxu1 %v16368_v37 }
  0x6b   :  { %15051 = vmatprep.mubr.bf16.mxu1 %v16369_v38 }
  0x72   :  { %15052 = vmatmul.mubr.bf16.gmra.mrb[40].mxu1 %v16370_v39 }
  0x73   :  { %952 = vmatprep.mubr.bf16.mxu1 %v16373_v40 }
  0xf5   :  { %v14993_v42 = vpop.f32.mrb[0].mxu0  ;;  %v15013_v43 = vpop.f32.mrb[0].mxu1 }
  0xf6   :  { %vm650_vm0 = vcmp.gt.f32.partialorder %v14993_v42, 0.0  ;;  %v714_v44 = vmul.f32 0.2, %v14993_v42  ;;  %v393_v45 = vpop.f32.mrb[1].mxu0  ;;  %vm670_vm1 = vcmp.gt.f32.partialorder %v15013_v43, 0.0  ;;  %v473_v46 = vpop.f32.mrb[1].mxu1 }
  0xf7   :  { %vm648_vm2 = vcmp.gt.f32.partialorder %v393_v45, 0.0  ;;  %v712_v47 = vmul.f32 0.2, %v393_v45  ;;  %v14994_v48 = vpop.f32.mrb[2].mxu0  ;;  %v734_v49 = vmul.f32 0.2, %v15013_v43 }
  0xf8   :  { %v778_v50 = vsel %vm650_vm0, %v14993_v42, %v714_v44  ;;  %vm651_vm3 = vcmp.gt.f32.partialorder %v14994_v48, 0.0  ;;  %v715_v51 = vmul.f32 0.2, %v14994_v48  ;;  %v396_v52 = vpop.f32.mrb[3].mxu0  ;;  %vm668_vm4 = vcmp.gt.f32.partialorder %v473_v46, 0.0  ;;  %v15014_v53 = vpop.f32.mrb[2].mxu1 }
  0xf9   :  { %v776_v54 = vsel %vm648_vm2, %v393_v45, %v712_v47  ;;  %vm649_vm5 = vcmp.gt.f32.partialorder %v396_v52, 0.0  ;;  %v713_v55 = vmul.f32 0.2, %v396_v52  ;;  %v798_v56 = vsel %vm670_vm1, %v15013_v43, %v734_v49  ;;  %v476_v57 = vpop.f32.mrb[3].mxu1 }
  0xfa   :  { %v779_v58 = vsel %vm651_vm3, %v14994_v48, %v715_v51  ;;  %v732_v59 = vmul.f32 0.2, %v473_v46  ;;  %vm671_vm6 = vcmp.gt.f32.partialorder %v15014_v53, 0.0  ;;  %v735_v60 = vmul.f32 0.2, %v15014_v53 }
  0xfb   :  { %v17577_v61 = vpack.c.bf16 %v779_v58, %v778_v50  ;;  %v777_v62 = vsel %vm649_vm5, %v396_v52, %v713_v55  ;;  %vm669_vm7 = vcmp.gt.f32.partialorder %v476_v57, 0.0  ;;  %v733_v63 = vmul.f32 0.2, %v476_v57 }
  0xfc   :  { %v17579_v0 = vpack.c.bf16 %v777_v62, %v776_v54  ;;  %v796_v1 = vsel %vm668_vm4, %v473_v46, %v732_v59  ;;  %v799_v2 = vsel %vm671_vm6, %v15014_v53, %v735_v60 }
  0xfd   :  { %v14997_v3 = vpop.f32.mrb[4].mxu0  ;;  %v17582_v4 = vpack.c.bf16 %v799_v2, %v798_v56  ;;  %v797_v5 = vsel %vm669_vm7, %v476_v57, %v733_v63  ;;  %v15017_v6 = vpop.f32.mrb[4].mxu1 }
  0xfe   :  { %vm654_vm8 = vcmp.gt.f32.partialorder %v14997_v3, 0.0  ;;  %v718_v7 = vmul.f32 0.2, %v14997_v3  ;;  %v409_v8 = vpop.f32.mrb[5].mxu0  ;;  %v17584_v9 = vpack.c.bf16 %v797_v5, %v796_v1  ;;  %vm674_vm9 = vcmp.gt.f32.partialorder %v15017_v6, 0.0  ;;  %v489_v10 = vpop.f32.mrb[5].mxu1 }
  0xff   :  { %vm652_vm10 = vcmp.gt.f32.partialorder %v409_v8, 0.0  ;;  %v716_v11 = vmul.f32 0.2, %v409_v8  ;;  %v14998_v12 = vpop.f32.mrb[6].mxu0  ;;  %v738_v13 = vmul.f32 0.2, %v15017_v6 }
 0x100   :  { %v782_v14 = vsel %vm654_vm8, %v14997_v3, %v718_v7  ;;  %vm655_vm11 = vcmp.gt.f32.partialorder %v14998_v12, 0.0  ;;  %v719_v15 = vmul.f32 0.2, %v14998_v12  ;;  %v412_v16 = vpop.f32.mrb[7].mxu0  ;;  %vm672_vm12 = vcmp.gt.f32.partialorder %v489_v10, 0.0  ;;  %v15018_v17 = vpop.f32.mrb[6].mxu1 }
 0x101   :  { %v780_v18 = vsel %vm652_vm10, %v409_v8, %v716_v11  ;;  %vm653_vm13 = vcmp.gt.f32.partialorder %v412_v16, 0.0  ;;  %v717_v19 = vmul.f32 0.2, %v412_v16  ;;  %v802_v20 = vsel %vm674_vm9, %v15017_v6, %v738_v13  ;;  %v492_v21 = vpop.f32.mrb[7].mxu1 }
 0x102   :  { %v783_v22 = vsel %vm655_vm11, %v14998_v12, %v719_v15  ;;  %v736_v23 = vmul.f32 0.2, %v489_v10  ;;  %vm675_vm14 = vcmp.gt.f32.partialorder %v15018_v17, 0.0  ;;  %v739_v24 = vmul.f32 0.2, %v15018_v17 }
 0x103   :  { %v17586_v25 = vpack.c.bf16 %v783_v22, %v782_v14  ;;  %v781_v26 = vsel %vm653_vm13, %v412_v16, %v717_v19  ;;  %vm673_vm15 = vcmp.gt.f32.partialorder %v492_v21, 0.0  ;;  %v737_v27 = vmul.f32 0.2, %v492_v21 }
 0x104   :  { %v17588_v28 = vpack.c.bf16 %v781_v26, %v780_v18  ;;  %v800_v29 = vsel %vm672_vm12, %v489_v10, %v736_v23  ;;  %v803_v30 = vsel %vm675_vm14, %v15018_v17, %v739_v24 }
 0x105   :  { %v15001_v31 = vpop.f32.mrb[8].mxu0  ;;  %v17591_v32 = vpack.c.bf16 %v803_v30, %v802_v20  ;;  %v801_v33 = vsel %vm673_vm15, %v492_v21, %v737_v27  ;;  %v15021_v34 = vpop.f32.mrb[8].mxu1 }
 0x106   :  { %vm658_vm0 = vcmp.gt.f32.partialorder %v15001_v31, 0.0  ;;  %v722_v35 = vmul.f32 0.2, %v15001_v31  ;;  %v425_v36 = vpop.f32.mrb[9].mxu0  ;;  %v17593_v37 = vpack.c.bf16 %v801_v33, %v800_v29  ;;  %vm678_vm1 = vcmp.gt.f32.partialorder %v15021_v34, 0.0  ;;  %v505_v38 = vpop.f32.mrb[9].mxu1 }
 0x107   :  { %vm656_vm2 = vcmp.gt.f32.partialorder %v425_v36, 0.0  ;;  %v720_v39 = vmul.f32 0.2, %v425_v36  ;;  %v15002_v40 = vpop.f32.mrb[10].mxu0  ;;  %v742_v41 = vmul.f32 0.2, %v15021_v34 }
 0x108   :  { %v786_v42 = vsel %vm658_vm0, %v15001_v31, %v722_v35  ;;  %vm659_vm3 = vcmp.gt.f32.partialorder %v15002_v40, 0.0  ;;  %v723_v43 = vmul.f32 0.2, %v15002_v40  ;;  %v428_v44 = vpop.f32.mrb[11].mxu0  ;;  %vm676_vm4 = vcmp.gt.f32.partialorder %v505_v38, 0.0  ;;  %v15022_v45 = vpop.f32.mrb[10].mxu1 }
 0x109   :  { %v784_v46 = vsel %vm656_vm2, %v425_v36, %v720_v39  ;;  %vm657_vm5 = vcmp.gt.f32.partialorder %v428_v44, 0.0  ;;  %v721_v47 = vmul.f32 0.2, %v428_v44  ;;  %v806_v48 = vsel %vm678_vm1, %v15021_v34, %v742_v41  ;;  %v508_v49 = vpop.f32.mrb[11].mxu1  ;;  %v16371_v33 = vld [vmem:[%s22832_s2] ss:$8 sps:$4 sm:$0xff]  }
 0x10a   :  { %v787_v50 = vsel %vm659_vm3, %v15002_v40, %v723_v43  ;;  %v740_v51 = vmul.f32 0.2, %v505_v38  ;;  %vm679_vm6 = vcmp.gt.f32.partialorder %v15022_v45, 0.0  ;;  %v743_v52 = vmul.f32 0.2, %v15022_v45 }
 0x10b   :  { %v17595_v53 = vpack.c.bf16 %v787_v50, %v786_v42  ;;  %v785_v54 = vsel %vm657_vm5, %v428_v44, %v721_v47  ;;  %vm677_vm7 = vcmp.gt.f32.partialorder %v508_v49, 0.0  ;;  %v741_v55 = vmul.f32 0.2, %v508_v49  ;;  %v16374_v34 = vld [vmem:[%s22832_s2 + $0xc0] ss:$8 sps:$4 sm:$0xff]  }
 0x10c   :  { %v17597_v56 = vpack.c.bf16 %v785_v54, %v784_v46  ;;  %v804_v57 = vsel %vm676_vm4, %v505_v38, %v740_v51  ;;  %v807_v58 = vsel %vm679_vm6, %v15022_v45, %v743_v52  ;;  %v16377_v35 = vld [vmem:[%s22832_s2 + $0x14] ss:$8 sps:$4 sm:$0xff]   ;;  %v16379_v38 = vld [vmem:[%s22832_s2 + $0x10] ss:$8 sps:$4 sm:$0xff]   ;;  %v16383_v40 = vld [vmem:[%s22832_s2 + $0x24] ss:$8 sps:$4 sm:$0xff]  }
 0x10d   :  { %v15005_v59 = vpop.f32.mrb[12].mxu0  ;;  %v17600_v60 = vpack.c.bf16 %v807_v58, %v806_v48  ;;  %v805_v62 = vsel %vm677_vm7, %v508_v49, %v741_v55  ;;  %v16380_v36 = vld [vmem:[%s22832_s2 + $0xd4] ss:$8 sps:$4 sm:$0xff]   ;;  %v16382_v39 = vld [vmem:[%s22832_s2 + $0xd0] ss:$8 sps:$4 sm:$0xff]   ;;  %v15025_v44 = vpop.f32.mrb[12].mxu1 }
 0x10e   :  { %v726_v63 = vmul.f32 0.2, %v15005_v59  ;;  %v441_v1 = vpop.f32.mrb[13].mxu0  ;;  %v17602_v2 = vpack.c.bf16 %v805_v62, %v804_v57  ;;  %vm662_vm8 = vcmp.gt.f32.partialorder %v15005_v59, 0.0  ;;  %v16386_v41 = vld [vmem:[%s22832_s2 + $0xe4] ss:$8 sps:$4 sm:$0xff]  }
 0x10f   :  { %v724_v3 = vmul.f32 0.2, %v441_v1  ;;  %v15006_v5 = vpop.f32.mrb[14].mxu0  ;;  %vm660_vm9 = vcmp.gt.f32.partialorder %v441_v1, 0.0  ;;  %v16385_v42 = vld [vmem:[%s22832_s2 + $0x20] ss:$8 sps:$4 sm:$0xff]  }
 0x110   :  { %vm663_vm10 = vcmp.gt.f32.partialorder %v15006_v5, 0.0  ;;  %v727_v6 = vmul.f32 0.2, %v15006_v5  ;;  %v444_v7 = vpop.f32.mrb[15].mxu0  ;;  %v790_v10 = vsel %vm662_vm8, %v15005_v59, %v726_v63  ;;  %v16388_v43 = vld [vmem:[%s22832_s2 + $0xe0] ss:$8 sps:$4 sm:$0xff]  }
 0x111   :  { %vm661_vm11 = vcmp.gt.f32.partialorder %v444_v7, 0.0  ;;  %v725_v8 = vmul.f32 0.2, %v444_v7  ;;  %v788_v12 = vsel %vm660_vm9, %v441_v1, %v724_v3  ;;  %v16389_v45 = vld [vmem:[%s22832_s2 + $0x34] ss:$8 sps:$4 sm:$0xff]   ;;  %v521_v47 = vpop.f32.mrb[13].mxu1 }
 0x112   :  { %v791_v11 = vsel %vm663_vm10, %v15006_v5, %v727_v6  ;;  %v16392_v46 = vld [vmem:[%s22832_s2 + $0xf4] ss:$8 sps:$4 sm:$0xff]   ;;  %v15026_v48 = vpop.f32.mrb[14].mxu1  ;;  %v746_v50 = vmul.f32 0.2, %v15025_v44  ;;  %vm682_vm0 = vcmp.gt.f32.partialorder %v15025_v44, 0.0 }
 0x113   :  { %v17604_v13 = vpack.c.bf16 %v791_v11, %v790_v10  ;;  %v789_v14 = vsel %vm661_vm11, %v444_v7, %v725_v8  ;;  %v524_v49 = vpop.f32.mrb[15].mxu1  ;;  %v744_v51 = vmul.f32 0.2, %v521_v47  ;;  %v747_v52 = vmul.f32 0.2, %v15026_v48 }
 0x114   :  { %v17606_v15 = vpack.c.bf16 %v789_v14, %v788_v12  ;;  %vm680_vm1 = vcmp.gt.f32.partialorder %v521_v47, 0.0  ;;  %vm683_vm2 = vcmp.gt.f32.partialorder %v15026_v48, 0.0  ;;  %vm681_vm3 = vcmp.gt.f32.partialorder %v524_v49, 0.0  ;;  %v16391_v54 = vld [vmem:[%s22832_s2 + $0x30] ss:$8 sps:$4 sm:$0xff]  }
 0x115   :  { %22927 = vst [vmem:[#allocation2_spill] sm:$0xff] %v17604_v13  ;;  %v15009_v16 = vpop.f32.mrb[16].mxu0  ;;  %v16394_v55 = vld [vmem:[%s22832_s2 + $0xf0] ss:$8 sps:$4 sm:$0xff]   ;;  %v810_v57 = vsel %vm682_vm0, %v15025_v44, %v746_v50  ;;  %v808_v58 = vsel %vm680_vm1, %v521_v47, %v744_v51  ;;  %v811_v59 = vsel %vm683_vm2, %v15026_v48, %v747_v52  ;;  %v745_v62 = vmul.f32 0.2, %v524_v49 }
 0x116   :  { %v730_v17 = vmul.f32 0.2, %v15009_v16  ;;  %v457_v18 = vpop.f32.mrb[17].mxu0  ;;  %vm666_vm12 = vcmp.gt.f32.partialorder %v15009_v16, 0.0  ;;  %v17710_v63 = vpack.c.bf16 %v811_v59, %v810_v57  ;;  %v15029_v3 = vpop.f32.mrb[16].mxu1 }
 0x117   :  { %v728_v19 = vmul.f32 0.2, %v457_v18  ;;  %v15010_v20 = vpop.f32.mrb[18].mxu0  ;;  %vm664_vm13 = vcmp.gt.f32.partialorder %v457_v18, 0.0  ;;  %v809_v1 = vsel %vm681_vm3, %v524_v49, %v745_v62  ;;  %v16397_v5 = vld [vmem:[%s22832_s2 + $0x44] ss:$8 sps:$4 sm:$0xff]  }
 0x118   :  { %vm667_vm14 = vcmp.gt.f32.partialorder %v15010_v20, 0.0  ;;  %v731_v21 = vmul.f32 0.2, %v15010_v20  ;;  %v460_v22 = vpop.f32.mrb[19].mxu0  ;;  %v794_v24 = vsel %vm666_vm12, %v15009_v16, %v730_v17  ;;  %22928 = vst [vmem:[#allocation3_spill] sm:$0xff] %v17710_v63  ;;  %v17720_v7 = vpack.c.bf16 %v809_v1, %v808_v58  ;;  %v537_v8 = vpop.f32.mrb[17].mxu1 }
 0x119   :  { %vm665_vm15 = vcmp.gt.f32.partialorder %v460_v22, 0.0  ;;  %v729_v23 = vmul.f32 0.2, %v460_v22  ;;  %v792_v27 = vsel %vm664_vm13, %v457_v18, %v728_v19  ;;  %v16400_v6 = vld [vmem:[%s22832_s2 + $0x104] ss:$8 sps:$4 sm:$0xff]   ;;  %v15030_v10 = vpop.f32.mrb[18].mxu1 }
 0x11a   :  { %v795_v26 = vsel %vm667_vm14, %v15010_v20, %v731_v21  ;;  %22929 = vst [vmem:[#allocation4_spill] sm:$0xff] %v17720_v7  ;;  %v540_v11 = vpop.f32.mrb[19].mxu1  ;;  %v750_v12 = vmul.f32 0.2, %v15029_v3  ;;  %v748_v14 = vmul.f32 0.2, %v537_v8 }
 0x11b   :  { %v17608_v29 = vpack.c.bf16 %v795_v26, %v794_v24  ;;  %v793_v30 = vsel %vm665_vm15, %v460_v22, %v729_v23  ;;  %v751_v16 = vmul.f32 0.2, %v15030_v10  ;;  %vm686_vm4 = vcmp.gt.f32.partialorder %v15029_v3, 0.0  ;;  %v16395_v17 = vld [vmem:[%s22832_s2 + $0x40] ss:$8 sps:$4 sm:$0xff]  }
 0x11c   :  { %v17610_v31 = vpack.c.bf16 %v793_v30, %v792_v27  ;;  %vm684_vm5 = vcmp.gt.f32.partialorder %v537_v8, 0.0  ;;  %vm687_vm6 = vcmp.gt.f32.partialorder %v15030_v10, 0.0  ;;  %vm685_vm7 = vcmp.gt.f32.partialorder %v540_v11, 0.0  ;;  %v16398_v18 = vld [vmem:[%s22832_s2 + $0x100] ss:$8 sps:$4 sm:$0xff]  }
 0x11d   :  { %v814_v19 = vsel %vm686_vm4, %v15029_v3, %v750_v12  ;;  %v812_v20 = vsel %vm684_vm5, %v537_v8, %v748_v14  ;;  %v815_v21 = vsel %vm687_vm6, %v15030_v10, %v751_v16  ;;  %v749_v22 = vmul.f32 0.2, %v540_v11  ;;  %v16401_v23 = vld [vmem:[%s22832_s2 + $0x54] ss:$8 sps:$4 sm:$0xff]   ;;  %v15033_v30 = vpop.f32.mrb[20].mxu1 }
 0x11e   :  { %13279 = vmatprep.subr.bf16.mxu1 %v17610_v31  ;;  %13423 = vmatprep.subr.bf16.mxu0 %v17610_v31  ;;  %v17737_v24 = vpack.c.bf16 %v815_v21, %v814_v19  ;;  %v16404_v26 = vld [vmem:[%s22832_s2 + $0x114] ss:$8 sps:$4 sm:$0xff]   ;;  %vm690_vm8 = vcmp.gt.f32.partialorder %v15033_v30, 0.0  ;;  %v16407_v47 = vld [vmem:[%s22832_s2 + $0x64] ss:$8 sps:$4 sm:$0xff]  }
 0x11f   :  { %13280 = vmatpush3.bf16.msra.mxu1 %v17579_v0  ;;  %13424 = vmatpush3.bf16.msra.mxu0 %v17579_v0  ;;  %v813_v27 = vsel %vm685_vm7, %v540_v11, %v749_v22  ;;  %v16410_v49 = vld [vmem:[%s22832_s2 + $0x124] ss:$8 sps:$4 sm:$0xff]   ;;  %v16409_v1 = vld [vmem:[%s22832_s2 + $0x60] ss:$8 sps:$4 sm:$0xff]   ;;  %v16413_v11 = vld [vmem:[%s22832_s2 + $0x74] ss:$8 sps:$4 sm:$0xff]  }
 0x120   :  { %13281 = vmatprep.subr.bf16.mxu1 %v17608_v29  ;;  %13425 = vmatprep.subr.bf16.mxu0 %v17608_v29  ;;  %22930 = vst [vmem:[#allocation5_spill] sm:$0xff] %v17737_v24  ;;  %v16412_v3 = vld [vmem:[%s22832_s2 + $0x120] ss:$8 sps:$4 sm:$0xff]   ;;  %v16416_v14 = vld [vmem:[%s22832_s2 + $0x134] ss:$8 sps:$4 sm:$0xff]  }
 0x123   :  { %13282 = vmatpush3.bf16.msra.mxu1 %v17577_v61  ;;  %13426 = vmatpush3.bf16.msra.mxu0 %v17577_v61 }
 0x124   :  { %13283 = vmatprep.subr.bf16.mxu1 %v17584_v9  ;;  %13427 = vmatprep.subr.bf16.mxu0 %v17584_v9 }
 0x127   :  { %13284 = vmatpush3.bf16.msra.mxu1 %v17588_v28  ;;  %13428 = vmatpush3.bf16.msra.mxu0 %v17588_v28 }
 0x128   :  { %13285 = vmatprep.subr.bf16.mxu1 %v17582_v4  ;;  %13429 = vmatprep.subr.bf16.mxu0 %v17582_v4 }
 0x12b   :  { %13286 = vmatpush3.bf16.msra.mxu1 %v17586_v25  ;;  %13430 = vmatpush3.bf16.msra.mxu0 %v17586_v25 }
 0x12c   :  { %13287 = vmatprep.subr.bf16.mxu1 %v17593_v37  ;;  %13431 = vmatprep.subr.bf16.mxu0 %v17593_v37 }
 0x12f   :  { %13288 = vmatpush3.bf16.msra.mxu1 %v17597_v56  ;;  %13432 = vmatpush3.bf16.msra.mxu0 %v17597_v56 }
 0x130   :  { %13289 = vmatprep.subr.bf16.mxu1 %v17591_v32  ;;  %13433 = vmatprep.subr.bf16.mxu0 %v17591_v32 }
 0x133   :  { %13290 = vmatpush3.bf16.msra.mxu1 %v17595_v53  ;;  %13434 = vmatpush3.bf16.msra.mxu0 %v17595_v53 }
 0x134   :  { %13291 = vmatprep.subr.bf16.mxu1 %v17602_v2  ;;  %13435 = vmatprep.subr.bf16.mxu0 %v17602_v2 }
 0x137   :  { %13292 = vmatpush3.bf16.msra.mxu1 %v17606_v15  ;;  %13436 = vmatpush3.bf16.msra.mxu0 %v17606_v15 }
 0x138   :  { %13293 = vmatprep.subr.bf16.mxu1 %v17600_v60  ;;  %13437 = vmatprep.subr.bf16.mxu0 %v17600_v60 }
 0x13b   :  { %13294 = vmatpush3.bf16.msra.mxu1 %v17604_v13  ;;  %13438 = vmatpush3.bf16.msra.mxu0 %v17604_v13 }
 0x13c   :  { %13319 = vmatprep.subr.bf16.mxu1 %v17610_v31  ;;  %13471 = vmatprep.subr.bf16.mxu0 %v17610_v31 }
 0x13e   :  { %953 = vmatmul.mubr.bf16.vlgmr.msra.gmra.mrb[44].mxu1 %v16371_v33  ;;  %1645 = vmatmul.mubr.bf16.vlgmr.msra.gmra.mrb[20].mxu0 %v16374_v34  ;;  %v17743_v33 = vpack.c.bf16 %v813_v27, %v812_v20  ;;  %v553_v34 = vpop.f32.mrb[21].mxu1  ;;  %v16415_v27 = vld [vmem:[%s22832_s2 + $0x70] ss:$8 sps:$4 sm:$0xff]  }
 0x13f   :  { %13320 = vmatpush3.bf16.msra.mxu1 %v17579_v0  ;;  %13472 = vmatpush3.bf16.msra.mxu0 %v17579_v0  ;;  %vm688_vm9 = vcmp.gt.f32.partialorder %v553_v34, 0.0 }
 0x140   :  { %13321 = vmatprep.subr.bf16.mxu1 %v17608_v29  ;;  %13473 = vmatprep.subr.bf16.mxu0 %v17608_v29  ;;  %22931 = vst [vmem:[#allocation6_spill] sm:$0xff] %v17743_v33 }
 0x141   :  { %960 = vmatprep.mubr.bf16.mxu1 %v16377_v35  ;;  %1652 = vmatprep.mubr.bf16.mxu0 %v16380_v36  ;;  %v15034_v35 = vpop.f32.mrb[22].mxu1 }
 0x142   :  { %v556_v36 = vpop.f32.mrb[23].mxu1  ;;  %vm691_vm10 = vcmp.gt.f32.partialorder %v15034_v35, 0.0 }
 0x143   :  { %13322 = vmatpush3.bf16.msra.mxu1 %v17577_v61  ;;  %13474 = vmatpush3.bf16.msra.mxu0 %v17577_v61  ;;  %vm689_vm11 = vcmp.gt.f32.partialorder %v556_v36, 0.0  ;;  %v15037_v51 = vpop.f32.mrb[24].mxu1 }
 0x144   :  { %13323 = vmatprep.subr.bf16.mxu1 %v17584_v9  ;;  %13475 = vmatprep.subr.bf16.mxu0 %v17584_v9  ;;  %v758_v58 = vmul.f32 0.2, %v15037_v51  ;;  %vm694_vm12 = vcmp.gt.f32.partialorder %v15037_v51, 0.0 }
 0x146   :  { %961 = vmatmul.mubr.bf16.gmra.mrb[48].mxu1 %v16379_v38  ;;  %1653 = vmatmul.mubr.bf16.gmra.mrb[24].mxu0 %v16382_v39  ;;  %v754_v38 = vmul.f32 0.2, %v15033_v30  ;;  %v752_v39 = vmul.f32 0.2, %v553_v34 }
 0x147   :  { %13324 = vmatpush3.bf16.msra.mxu1 %v17588_v28  ;;  %13476 = vmatpush3.bf16.msra.mxu0 %v17588_v28 }
 0x148   :  { %13325 = vmatprep.subr.bf16.mxu1 %v17582_v4  ;;  %13477 = vmatprep.subr.bf16.mxu0 %v17582_v4  ;;  %v816_v44 = vsel %vm688_vm9, %v553_v34, %v752_v39  ;;  %v16421_v39 = vld [vmem:[%s22832_s2 + $0x144] ss:$8 sps:$4 sm:$0xff]  }
 0x149   :  { %968 = vmatprep.mubr.bf16.mxu1 %v16383_v40  ;;  %1660 = vmatprep.mubr.bf16.mxu0 %v16386_v41  ;;  %v755_v40 = vmul.f32 0.2, %v15034_v35  ;;  %v16403_v41 = vld [vmem:[%s22832_s2 + $0x50] ss:$8 sps:$4 sm:$0xff]  }
 0x14b   :  { %13326 = vmatpush3.bf16.msra.mxu1 %v17586_v25  ;;  %13478 = vmatpush3.bf16.msra.mxu0 %v17586_v25 }
 0x14c   :  { %13327 = vmatprep.subr.bf16.mxu1 %v17593_v37  ;;  %13479 = vmatprep.subr.bf16.mxu0 %v17593_v37 }
 0x14e   :  { %969 = vmatmul.mubr.bf16.gmra.mrb[52].mxu1 %v16385_v42  ;;  %1661 = vmatmul.mubr.bf16.gmra.mrb[28].mxu0 %v16388_v43  ;;  %v16406_v42 = vld [vmem:[%s22832_s2 + $0x110] ss:$8 sps:$4 sm:$0xff]   ;;  %v818_v43 = vsel %vm690_vm8, %v15033_v30, %v754_v38 }
 0x14f   :  { %13328 = vmatpush3.bf16.msra.mxu1 %v17597_v56  ;;  %13480 = vmatpush3.bf16.msra.mxu0 %v17597_v56  ;;  %v16418_v30 = vld [vmem:[%s22832_s2 + $0x130] ss:$8 sps:$4 sm:$0xff]  }
 0x150   :  { %13329 = vmatprep.subr.bf16.mxu1 %v17591_v32  ;;  %13481 = vmatprep.subr.bf16.mxu0 %v17591_v32 }
 0x151   :  { %976 = vmatprep.mubr.bf16.mxu1 %v16389_v45  ;;  %1668 = vmatprep.mubr.bf16.mxu0 %v16392_v46  ;;  %v819_v45 = vsel %vm691_vm10, %v15034_v35, %v755_v40  ;;  %v753_v46 = vmul.f32 0.2, %v556_v36 }
 0x152   :  { %v17757_v48 = vpack.c.bf16 %v819_v45, %v818_v43 }
 0x153   :  { %13330 = vmatpush3.bf16.msra.mxu1 %v17595_v53  ;;  %13482 = vmatpush3.bf16.msra.mxu0 %v17595_v53  ;;  %v817_v50 = vsel %vm689_vm11, %v556_v36, %v753_v46 }
 0x154   :  { %13331 = vmatprep.subr.bf16.mxu1 %v17602_v2  ;;  %13483 = vmatprep.subr.bf16.mxu0 %v17602_v2  ;;  %22932 = vst [vmem:[#allocation7_spill] sm:$0xff] %v17757_v48  ;;  %v17763_v52 = vpack.c.bf16 %v817_v50, %v816_v44 }
 0x156   :  { %977 = vmatmul.mubr.bf16.gmra.mrb[56].mxu1 %v16391_v54  ;;  %1669 = vmatmul.mubr.bf16.gmra.mrb[32].mxu0 %v16394_v55  ;;  %22933 = vst [vmem:[#allocation8_spill] sm:$0xff] %v17763_v52  ;;  %v569_v54 = vpop.f32.mrb[25].mxu1 }
 0x157   :  { %13332 = vmatpush3.bf16.msra.mxu1 %v17606_v15  ;;  %13484 = vmatpush3.bf16.msra.mxu0 %v17606_v15  ;;  %v15038_v55 = vpop.f32.mrb[26].mxu1  ;;  %v756_v59 = vmul.f32 0.2, %v569_v54  ;;  %vm692_vm13 = vcmp.gt.f32.partialorder %v569_v54, 0.0 }
 0x158   :  { %13333 = vmatprep.subr.bf16.mxu1 %v17600_v60  ;;  %13485 = vmatprep.subr.bf16.mxu0 %v17600_v60  ;;  %v572_v57 = vpop.f32.mrb[27].mxu1  ;;  %v759_v62 = vmul.f32 0.2, %v15038_v55  ;;  %vm695_vm14 = vcmp.gt.f32.partialorder %v15038_v55, 0.0 }
 0x159   :  { %1078 = vmatprep.mubr.bf16.mxu1 %v16397_v5  ;;  %1880 = vmatprep.mubr.bf16.mxu0 %v16400_v6  ;;  %vm693_vm15 = vcmp.gt.f32.partialorder %v572_v57, 0.0  ;;  %v822_v5 = vsel %vm694_vm12, %v15037_v51, %v758_v58  ;;  %v820_v6 = vsel %vm692_vm13, %v569_v54, %v756_v59  ;;  %v757_v10 = vmul.f32 0.2, %v572_v57  ;;  %v16419_v51 = vld [vmem:[%s22832_s2 + $0x140] ss:$8 sps:$4 sm:$0xff]  }
 0x15a   :  { %v823_v8 = vsel %vm695_vm14, %v15038_v55, %v759_v62  ;;  %v16422_v59 = vld [vmem:[%s22832_s2 + $0x154] ss:$8 sps:$4 sm:$0xff]  }
 0x15b   :  { %13334 = vmatpush3.bf16.msra.mxu1 %v17604_v13  ;;  %13486 = vmatpush3.bf16.msra.mxu0 %v17604_v13  ;;  %v17777_v12 = vpack.c.bf16 %v823_v8, %v822_v5  ;;  %v821_v16 = vsel %vm693_vm15, %v572_v57, %v757_v10 }
 0x15c   :  { %13519 = vmatprep.subr.bf16.mxu0 %v17610_v31 }
 0x15d   :  { %22934 = vst [vmem:[#allocation9_spill] sm:$0xff] %v17777_v12 }
 0x15e   :  { %1079 = vmatmul.mubr.bf16.vlgmr.msra.gmra.mrb[60].mxu1 %v16395_v17  ;;  %1881 = vmatmul.mubr.bf16.vlgmr.msra.gmra.mrb[36].mxu0 %v16398_v18  ;;  %v15041_v17 = vpop.f32.mrb[28].mxu1  ;;  %v17783_v18 = vpack.c.bf16 %v821_v16, %v820_v6 }
 0x15f   :  { %13520 = vmatpush3.bf16.msra.mxu0 %v17579_v0  ;;  %1086 = vmatprep.mubr.bf16.mxu1 %v16401_v23  ;;  %v585_v19 = vpop.f32.mrb[29].mxu1  ;;  %v762_v22 = vmul.f32 0.2, %v15041_v17  ;;  %vm698_vm0 = vcmp.gt.f32.partialorder %v15041_v17, 0.0 }
 0x160   :  { %13521 = vmatprep.subr.bf16.mxu0 %v17608_v29  ;;  %1888 = vmatprep.mubr.bf16.mxu0 %v16404_v26  ;;  %22935 = vst [vmem:[#allocation10_spill] sm:$0xff] %v17783_v18  ;;  %v15042_v20 = vpop.f32.mrb[30].mxu1  ;;  %v760_v23 = vmul.f32 0.2, %v585_v19  ;;  %vm696_vm1 = vcmp.gt.f32.partialorder %v585_v19, 0.0 }
 0x161   :  { %v588_v21 = vpop.f32.mrb[31].mxu1  ;;  %v763_v26 = vmul.f32 0.2, %v15042_v20  ;;  %vm699_vm2 = vcmp.gt.f32.partialorder %v15042_v20, 0.0  ;;  %v826_v34 = vsel %vm698_vm0, %v15041_v17, %v762_v22  ;;  %v16424_v17 = vld [vmem:[%s22832_s2 + $0x150] ss:$8 sps:$4 sm:$0xff]  }
 0x162   :  { %vm697_vm3 = vcmp.gt.f32.partialorder %v588_v21, 0.0  ;;  %v824_v35 = vsel %vm696_vm1, %v585_v19, %v760_v23  ;;  %v761_v38 = vmul.f32 0.2, %v588_v21  ;;  %v16425_v23 = vld [vmem:[%s22832_s2 + $0x164] ss:$8 sps:$4 sm:$0xff]   ;;  %vm1148_vm0 = vcmask 523264  }
 0x163   :  { %13522 = vmatpush3.bf16.msra.mxu0 %v17577_v61  ;;  %v827_v36 = vsel %vm699_vm2, %v15042_v20, %v763_v26  ;;  %vm17388_vm1 = vmmov 0  }
 0x164   :  { %13523 = vmatprep.subr.bf16.mxu0 %v17584_v9  ;;  %v17797_v40 = vpack.c.bf16 %v827_v36, %v826_v34 }
 0x166   :  { %1087 = vmatmul.mubr.bf16.gmra.mrb[64].mxu1 %v16403_v41  ;;  %1889 = vmatmul.mubr.bf16.gmra.mrb[40].mxu0 %v16406_v42  ;;  %22936 = vst [vmem:[#allocation11_spill] sm:$0xff] %v17797_v40  ;;  %v825_v41 = vsel %vm697_vm3, %v588_v21, %v761_v38  ;;  %v15045_v42 = vpop.f32.mrb[32].mxu1 }
 0x167   :  { %13524 = vmatpush3.bf16.msra.mxu0 %v17588_v28  ;;  %1094 = vmatprep.mubr.bf16.mxu1 %v16407_v47  ;;  %v17800_v43 = vpack.c.bf16 %v825_v41, %v824_v35  ;;  %v601_v44 = vpop.f32.mrb[33].mxu1  ;;  %v766_v47 = vmul.f32 0.2, %v15045_v42  ;;  %vm702_vm4 = vcmp.gt.f32.partialorder %v15045_v42, 0.0 }
 0x168   :  { %13525 = vmatprep.subr.bf16.mxu0 %v17582_v4  ;;  %1896 = vmatprep.mubr.bf16.mxu0 %v16410_v49  ;;  %v15046_v45 = vpop.f32.mrb[34].mxu1  ;;  %v764_v49 = vmul.f32 0.2, %v601_v44  ;;  %vm700_vm5 = vcmp.gt.f32.partialorder %v601_v44, 0.0 }
 0x169   :  { %22937 = vst [vmem:[#allocation12_spill] sm:$0xff] %v17800_v43  ;;  %v604_v46 = vpop.f32.mrb[35].mxu1  ;;  %v767_v50 = vmul.f32 0.2, %v15046_v45  ;;  %vm703_vm6 = vcmp.gt.f32.partialorder %v15046_v45, 0.0  ;;  %v830_v54 = vsel %vm702_vm4, %v15045_v42, %v766_v47 }
 0x16a   :  { %vm701_vm7 = vcmp.gt.f32.partialorder %v604_v46, 0.0  ;;  %v828_v55 = vsel %vm700_vm5, %v601_v44, %v764_v49  ;;  %v765_v58 = vmul.f32 0.2, %v604_v46  ;;  %v16427_v44 = vld [vmem:[%s22832_s2 + $0x160] ss:$8 sps:$4 sm:$0xff]  }
 0x16b   :  { %13526 = vmatpush3.bf16.msra.mxu0 %v17586_v25  ;;  %v831_v57 = vsel %vm703_vm6, %v15046_v45, %v767_v50  ;;  %v16428_v50 = vld [vmem:[%s22832_s2 + $0x174] ss:$8 sps:$4 sm:$0xff]  }
 0x16c   :  { %13527 = vmatprep.subr.bf16.mxu0 %v17593_v37  ;;  %v17811_v62 = vpack.c.bf16 %v831_v57, %v830_v54  ;;  %v16430_v57 = vld [vmem:[%s22832_s2 + $0x170] ss:$8 sps:$4 sm:$0xff]  }
 0x16e   :  { %1095 = vmatmul.mubr.bf16.gmra.mrb[68].mxu1 %v16409_v1  ;;  %1897 = vmatmul.mubr.bf16.gmra.mrb[44].mxu0 %v16412_v3  ;;  %22938 = vst [vmem:[#allocation13_spill] sm:$0xff] %v17811_v62  ;;  %v829_v1 = vsel %vm701_vm7, %v604_v46, %v765_v58  ;;  %v15049_v3 = vpop.f32.mrb[36].mxu1  ;;  %v16433_v58 = vld [vmem:[%s22832_s2 + $0x184] ss:$8 sps:$4 sm:$0xff]  }
 0x16f   :  { %13528 = vmatpush3.bf16.msra.mxu0 %v17597_v56  ;;  %1102 = vmatprep.mubr.bf16.mxu1 %v16413_v11  ;;  %v17814_v5 = vpack.c.bf16 %v829_v1, %v828_v55  ;;  %v617_v6 = vpop.f32.mrb[37].mxu1  ;;  %v770_v11 = vmul.f32 0.2, %v15049_v3  ;;  %vm706_vm8 = vcmp.gt.f32.partialorder %v15049_v3, 0.0  ;;  %v16434_v1 = vld [vmem:[%s22832_s2 + $0x194] ss:$8 sps:$4 sm:$0xff]  }
 0x170   :  { %13529 = vmatprep.subr.bf16.mxu0 %v17591_v32  ;;  %1904 = vmatprep.mubr.bf16.mxu0 %v16416_v14  ;;  %v15050_v8 = vpop.f32.mrb[38].mxu1  ;;  %v768_v14 = vmul.f32 0.2, %v617_v6  ;;  %vm704_vm9 = vcmp.gt.f32.partialorder %v617_v6, 0.0 }
 0x171   :  { %22939 = vst [vmem:[#allocation14_spill] sm:$0xff] %v17814_v5  ;;  %v620_v10 = vpop.f32.mrb[39].mxu1  ;;  %v771_v16 = vmul.f32 0.2, %v15050_v8  ;;  %vm707_vm10 = vcmp.gt.f32.partialorder %v15050_v8, 0.0  ;;  %v834_v19 = vsel %vm706_vm8, %v15049_v3, %v770_v11  ;;  %v17887_v11 = vld [vmem:[%s22833_s3 + $0x20] sm:$0xff]  }
 0x172   :  { %vm705_vm11 = vcmp.gt.f32.partialorder %v620_v10, 0.0  ;;  %v832_v20 = vsel %vm704_vm9, %v617_v6, %v768_v14  ;;  %v769_v22 = vmul.f32 0.2, %v620_v10  ;;  %v16436_v3 = vld [vmem:[%s22832_s2 + $0x190] ss:$8 sps:$4 sm:$0xff]   ;;  %15055 = vmatprep.subr.bf16.mxu1 %v17887_v11 }
 0x173   :  { %13530 = vmatpush3.bf16.msra.mxu0 %v17595_v53  ;;  %v835_v21 = vsel %vm707_vm10, %v15050_v8, %v771_v16  ;;  %v16437_v6 = vld [vmem:[%s22832_s2 + $0x1a4] ss:$8 sps:$4 sm:$0xff]   ;;  %v16439_v8 = vld [vmem:[%s22832_s2 + $0x1a0] ss:$8 sps:$4 sm:$0xff]   ;;  %v16442_v14 = vld [vmem:[%s22832_s2 + $0x1b0] ss:$8 sps:$4 sm:$0xff]   ;;  %15056 = vmatpush3.bf16.msra.mxu1 %v17887_v11 }
 0x174   :  { %13531 = vmatprep.subr.bf16.mxu0 %v17602_v2  ;;  %v17825_v26 = vpack.c.bf16 %v835_v21, %v834_v19  ;;  %v16445_v16 = vld [vmem:[%s22832_s2 + $0x204] ss:$8 sps:$4 sm:$0xff]   ;;  %v16493_v19 = vld [vmem:[%s22833_s3 + $0x30] sm:$0xff]  }
 0x175   :  { %v16446_v21 = vld [vmem:[%s22832_s2 + $0x214] ss:$8 sps:$4 sm:$0xff]  }
 0x176   :  { %1103 = vmatmul.mubr.bf16.gmra.mrb[72].mxu1 %v16415_v27  ;;  %1905 = vmatmul.mubr.bf16.gmra.mrb[48].mxu0 %v16418_v30  ;;  %22940 = vst [vmem:[#allocation15_spill] sm:$0xff] %v17825_v26  ;;  %v833_v27 = vsel %vm705_vm11, %v620_v10, %v769_v22  ;;  %v15053_v30 = vpop.f32.mrb[40].mxu1  ;;  %v16440_v10 = vld [vmem:[%s22832_s2 + $0x1b4] ss:$8 sps:$4 sm:$0xff]  }
 0x177   :  { %13532 = vmatpush3.bf16.msra.mxu0 %v17606_v15  ;;  %2116 = vmatprep.mubr.bf16.mxu0 %v16421_v39  ;;  %v17828_v34 = vpack.c.bf16 %v833_v27, %v832_v20  ;;  %v633_v35 = vpop.f32.mrb[41].mxu1  ;;  %v774_v39 = vmul.f32 0.2, %v15053_v30  ;;  %vm710_vm12 = vcmp.gt.f32.partialorder %v15053_v30, 0.0  ;;  %v16443_v20 = vld [vmem:[%s22832_s2 + $0x200] ss:$8 sps:$4 sm:$0xff]  }
 0x178   :  { %13533 = vmatprep.subr.bf16.mxu0 %v17600_v60  ;;  %v15054_v36 = vpop.f32.mrb[42].mxu1  ;;  %v772_v41 = vmul.f32 0.2, %v633_v35  ;;  %vm708_vm13 = vcmp.gt.f32.partialorder %v633_v35, 0.0  ;;  %v16494_v22 = vld [vmem:[%s22833_s3 + $0x38] sm:$0xff]  }
 0x179   :  { %22941 = vst [vmem:[#allocation16_spill] sm:$0xff] %v17828_v34  ;;  %v636_v38 = vpop.f32.mrb[43].mxu1  ;;  %v775_v42 = vmul.f32 0.2, %v15054_v36  ;;  %vm711_vm14 = vcmp.gt.f32.partialorder %v15054_v36, 0.0  ;;  %v838_v45 = vsel %vm710_vm12, %v15053_v30, %v774_v39 }
 0x17a   :  { %vm709_vm15 = vcmp.gt.f32.partialorder %v636_v38, 0.0  ;;  %v836_v46 = vsel %vm708_vm13, %v633_v35, %v772_v41  ;;  %v773_v49 = vmul.f32 0.2, %v636_v38  ;;  %v16448_v27 = vld [vmem:[%s22832_s2 + $0x210] ss:$8 sps:$4 sm:$0xff]  }
 0x17b   :  { %13534 = vmatpush3.bf16.msra.mxu0 %v17604_v13  ;;  %v839_v47 = vsel %vm711_vm14, %v15054_v36, %v775_v42  ;;  %v16449_v30 = vld [vmem:[%s22832_s2 + $0x224] ss:$8 sps:$4 sm:$0xff]   ;;  %v16451_v35 = vld [vmem:[%s22832_s2 + $0x220] ss:$8 sps:$4 sm:$0xff]   ;;  %v16452_v36 = vld [vmem:[%s22832_s2 + $0x234] ss:$8 sps:$4 sm:$0xff]  }
 0x17c   :  { %13567 = vmatprep.subr.bf16.mxu0 %v17610_v31  ;;  %v837_v54 = vsel %vm709_vm15, %v636_v38, %v773_v49  ;;  %v16454_v38 = vld [vmem:[%s22832_s2 + $0x230] ss:$8 sps:$4 sm:$0xff]   ;;  %v16457_v39 = vld [vmem:[%s22832_s2 + $0x244] ss:$8 sps:$4 sm:$0xff]   ;;  %v16455_v41 = vld [vmem:[%s22832_s2 + $0x240] ss:$8 sps:$4 sm:$0xff]  }
 0x17d   :  { %v17842_v55 = vpack.c.bf16 %v837_v54, %v836_v46  ;;  %v16458_v42 = vld [vmem:[%s22832_s2 + $0x254] ss:$8 sps:$4 sm:$0xff]   ;;  %v16463_v46 = vld [vmem:[%s22832_s2 + $0x260] ss:$8 sps:$4 sm:$0xff]   ;;  %v16466_v49 = vld [vmem:[%s22832_s2 + $0x270] ss:$8 sps:$4 sm:$0xff]  }
 0x17e   :  { %2117 = vmatmul.mubr.bf16.vlgmr.msra.gmra.mrb[52].mxu0 %v16419_v51  ;;  %v17839_v51 = vpack.c.bf16 %v839_v47, %v838_v45  ;;  %v16461_v45 = vld [vmem:[%s22832_s2 + $0x264] ss:$8 sps:$4 sm:$0xff]   ;;  %v16464_v47 = vld [vmem:[%s22832_s2 + $0x274] ss:$8 sps:$4 sm:$0xff]   ;;  %v16467_v54 = vld [vmem:[%s22832_s2 + $0x280] ss:$8 sps:$4 sm:$0xff]  }
 0x17f   :  { %13568 = vmatpush3.bf16.msra.mxu0 %v17579_v0  ;;  %2124 = vmatprep.mubr.bf16.mxu0 %v16422_v59  ;;  %22943 = vst [vmem:[#allocation18_spill] sm:$0xff] %v17842_v55  ;;  %v16431_v59 = vld [vmem:[%s22832_s2 + $0x180] ss:$8 sps:$4 sm:$0xff]  }
 0x180   :  { %13569 = vmatprep.subr.bf16.mxu0 %v17608_v29  ;;  %22942 = vst [vmem:[#allocation17_spill] sm:$0xff] %v17839_v51 }
 0x183   :  { %13570 = vmatpush3.bf16.msra.mxu0 %v17577_v61 }
 0x184   :  { %13571 = vmatprep.subr.bf16.mxu0 %v17584_v9 }
 0x186   :  { %2125 = vmatmul.mubr.bf16.gmra.mrb[56].mxu0 %v16424_v17  ;;  %v16489_v17 = vld [vmem:[%s22833_s3 + $0x28] sm:$0xff]  }
 0x187   :  { %13572 = vmatpush3.bf16.msra.mxu0 %v17588_v28  ;;  %2132 = vmatprep.mubr.bf16.mxu0 %v16425_v23  ;;  %v17923_v23 = vld [vmem:[%s22833_s3] sm:$0xff]  }
 0x188   :  { %13573 = vmatprep.subr.bf16.mxu0 %v17582_v4  ;;  %15057 = vmatprep.subr.bf16.mxu1 %v16489_v17 }
 0x189   :  { %15058 = vmatpush3.bf16.msra.mxu1 %v16489_v17 }
 0x18a   :  { %15059 = vmatprep.subr.bf16.mxu1 %v16493_v19 }
 0x18b   :  { %13574 = vmatpush3.bf16.msra.mxu0 %v17586_v25 }
 0x18c   :  { %13575 = vmatprep.subr.bf16.mxu0 %v17593_v37 }
 0x18d   :  { %15060 = vmatpush3.bf16.msra.mxu1 %v16493_v19 }
 0x18e   :  { %2133 = vmatmul.mubr.bf16.gmra.mrb[60].mxu0 %v16427_v44  ;;  %15061 = vmatprep.subr.bf16.mxu1 %v16494_v22  ;;  %v16460_v44 = vld [vmem:[%s22832_s2 + $0x250] ss:$8 sps:$4 sm:$0xff]  }
 0x18f   :  { %13576 = vmatpush3.bf16.msra.mxu0 %v17597_v56  ;;  %2140 = vmatprep.mubr.bf16.mxu0 %v16428_v50  ;;  %v16469_v50 = vld [vmem:[%s22832_s2 + $0x284] ss:$8 sps:$4 sm:$0xff]  }
 0x190   :  { %13577 = vmatprep.subr.bf16.mxu0 %v17591_v32 }
 0x191   :  { %15062 = vmatpush3.bf16.msra.mxu1 %v16494_v22 }
 0x192   :  { %15071 = vmatprep.subr.bf16.mxu1 %v17923_v23 }
 0x193   :  { %13578 = vmatpush3.bf16.msra.mxu0 %v17595_v53 }
 0x194   :  { %13579 = vmatprep.subr.bf16.mxu0 %v17602_v2 }
 0x196   :  { %2141 = vmatmul.mubr.bf16.gmra.mrb[64].mxu0 %v16430_v57  ;;  %v16470_v57 = vld [vmem:[%s22832_s2 + $0x294] ss:$8 sps:$4 sm:$0xff]  }
 0x197   :  { %13580 = vmatpush3.bf16.msra.mxu0 %v17606_v15  ;;  %2352 = vmatprep.mubr.bf16.mxu0 %v16433_v58  ;;  %v16472_v58 = vld [vmem:[%s22832_s2 + $0x290] ss:$8 sps:$4 sm:$0xff]  }
 0x198   :  { %13581 = vmatprep.subr.bf16.mxu0 %v17600_v60 }
 0x19b   :  { %13582 = vmatpush3.bf16.msra.mxu0 %v17604_v13 }
 0x19c   :  { %13663 = vmatprep.subr.bf16.mxu0 %v17610_v31 }
 0x19e   :  { %2353 = vmatmul.mubr.bf16.vlgmr.msra.gmra.mrb[68].mxu0 %v16431_v59  ;;  %v16473_v59 = vld [vmem:[%s22832_s2 + $0x2a4] ss:$8 sps:$4 sm:$0xff]  }
 0x19f   :  { %13664 = vmatpush3.bf16.msra.mxu0 %v17579_v0  ;;  %2360 = vmatprep.mubr.bf16.mxu0 %v16434_v1  ;;  %v16475_v1 = vld [vmem:[%s22832_s2 + $0x2a0] ss:$8 sps:$4 sm:$0xff]  }
 0x1a0   :  { %13665 = vmatprep.subr.bf16.mxu0 %v17608_v29 }
 0x1a3   :  { %13666 = vmatpush3.bf16.msra.mxu0 %v17577_v61 }
 0x1a4   :  { %13667 = vmatprep.subr.bf16.mxu0 %v17584_v9 }
 0x1a6   :  { %2361 = vmatmul.mubr.bf16.gmra.mrb[72].mxu0 %v16436_v3  ;;  %v16476_v3 = vld [vmem:[%s22832_s2 + $0x2b4] ss:$8 sps:$4 sm:$0xff]  }
 0x1a7   :  { %13668 = vmatpush3.bf16.msra.mxu0 %v17588_v28  ;;  %2368 = vmatprep.mubr.bf16.mxu0 %v16437_v6 }
 0x1a8   :  { %13669 = vmatprep.subr.bf16.mxu0 %v17582_v4 }
 0x1ab   :  { %13670 = vmatpush3.bf16.msra.mxu0 %v17586_v25 }
 0x1ac   :  { %13671 = vmatprep.subr.bf16.mxu0 %v17593_v37 }
 0x1ae   :  { %2369 = vmatmul.mubr.bf16.gmra.mrb[76].mxu0 %v16439_v8  ;;  %v16478_v8 = vld [vmem:[%s22832_s2 + $0x2b0] ss:$8 sps:$4 sm:$0xff]  }
 0x1af   :  { %13672 = vmatpush3.bf16.msra.mxu0 %v17597_v56  ;;  %2376 = vmatprep.mubr.bf16.mxu0 %v16440_v10 }
 0x1b0   :  { %13673 = vmatprep.subr.bf16.mxu0 %v17591_v32 }
 0x1b3   :  { %13674 = vmatpush3.bf16.msra.mxu0 %v17595_v53 }
 0x1b4   :  { %13675 = vmatprep.subr.bf16.mxu0 %v17602_v2 }
 0x1b6   :  { %2377 = vmatmul.mubr.bf16.gmra.mrb[80].mxu0 %v16442_v14  ;;  %v16481_v14 = vld [vmem:[%s22832_s2 + $0x2c4] ss:$8 sps:$4 sm:$0xff]  }
 0x1b7   :  { %13676 = vmatpush3.bf16.msra.mxu0 %v17606_v15  ;;  %2824 = vmatprep.mubr.bf16.mxu0 %v16445_v16 }
 0x1b8   :  { %13677 = vmatprep.subr.bf16.mxu0 %v17600_v60 }
 0x1bb   :  { %13678 = vmatpush3.bf16.msra.mxu0 %v17604_v13 }
 0x1bc   :  { %13711 = vmatprep.subr.bf16.mxu0 %v17610_v31 }
 0x1be   :  { %2825 = vmatmul.mubr.bf16.vlgmr.msra.gmra.mrb[84].mxu0 %v16443_v20 }
 0x1bf   :  { %13712 = vmatpush3.bf16.msra.mxu0 %v17579_v0  ;;  %2832 = vmatprep.mubr.bf16.mxu0 %v16446_v21 }
 0x1c0   :  { %13713 = vmatprep.subr.bf16.mxu0 %v17608_v29 }
 0x1c3   :  { %13714 = vmatpush3.bf16.msra.mxu0 %v17577_v61 }
 0x1c4   :  { %13715 = vmatprep.subr.bf16.mxu0 %v17584_v9 }
 0x1c6   :  { %2833 = vmatmul.mubr.bf16.gmra.mrb[88].mxu0 %v16448_v27  ;;  %v16479_v27 = vld [vmem:[%s22832_s2 + $0x2c0] ss:$8 sps:$4 sm:$0xff]  }
 0x1c7   :  { %13716 = vmatpush3.bf16.msra.mxu0 %v17588_v28  ;;  %2840 = vmatprep.mubr.bf16.mxu0 %v16449_v30 }
 0x1c8   :  { %13717 = vmatprep.subr.bf16.mxu0 %v17582_v4 }
 0x1cb   :  { %13718 = vmatpush3.bf16.msra.mxu0 %v17586_v25 }
 0x1cc   :  { %13719 = vmatprep.subr.bf16.mxu0 %v17593_v37 }
 0x1ce   :  { %2841 = vmatmul.mubr.bf16.gmra.mrb[92].mxu0 %v16451_v35  ;;  %v16482_v35 = vld [vmem:[%s22832_s2 + $0x2d4] ss:$8 sps:$4 sm:$0xff]  }
 0x1cf   :  { %13720 = vmatpush3.bf16.msra.mxu0 %v17597_v56  ;;  %2848 = vmatprep.mubr.bf16.mxu0 %v16452_v36 }
 0x1d0   :  { %13721 = vmatprep.subr.bf16.mxu0 %v17591_v32 }
 0x1d3   :  { %13722 = vmatpush3.bf16.msra.mxu0 %v17595_v53 }
 0x1d4   :  { %13723 = vmatprep.subr.bf16.mxu0 %v17602_v2 }
 0x1d6   :  { %2849 = vmatmul.mubr.bf16.gmra.mrb[96].mxu0 %v16454_v38 }
 0x1d7   :  { %13724 = vmatpush3.bf16.msra.mxu0 %v17606_v15  ;;  %3060 = vmatprep.mubr.bf16.mxu0 %v16457_v39 }
 0x1d8   :  { %13725 = vmatprep.subr.bf16.mxu0 %v17600_v60 }
 0x1db   :  { %13726 = vmatpush3.bf16.msra.mxu0 %v17604_v13 }
 0x1dc   :  { %13759 = vmatprep.subr.bf16.mxu0 %v17610_v31 }
 0x1de   :  { %3061 = vmatmul.mubr.bf16.vlgmr.msra.gmra.mrb[100].mxu0 %v16455_v41 }
 0x1df   :  { %13760 = vmatpush3.bf16.msra.mxu0 %v17579_v0  ;;  %3068 = vmatprep.mubr.bf16.mxu0 %v16458_v42 }
 0x1e0   :  { %13761 = vmatprep.subr.bf16.mxu0 %v17608_v29 }
 0x1e3   :  { %13762 = vmatpush3.bf16.msra.mxu0 %v17577_v61 }
 0x1e4   :  { %13763 = vmatprep.subr.bf16.mxu0 %v17584_v9 }
 0x1e6   :  { %3069 = vmatmul.mubr.bf16.gmra.mrb[104].mxu0 %v16460_v44 }
 0x1e7   :  { %13764 = vmatpush3.bf16.msra.mxu0 %v17588_v28  ;;  %3076 = vmatprep.mubr.bf16.mxu0 %v16461_v45  ;;  %v16484_v45 = vld [vmem:[%s22832_s2 + $0x2d0] ss:$8 sps:$4 sm:$0xff]  }
 0x1e8   :  { %13765 = vmatprep.subr.bf16.mxu0 %v17582_v4 }
 0x1eb   :  { %13766 = vmatpush3.bf16.msra.mxu0 %v17586_v25 }
 0x1ec   :  { %13767 = vmatprep.subr.bf16.mxu0 %v17593_v37 }
 0x1ee   :  { %3077 = vmatmul.mubr.bf16.gmra.mrb[108].mxu0 %v16463_v46 }
 0x1ef   :  { %13768 = vmatpush3.bf16.msra.mxu0 %v17597_v56  ;;  %3084 = vmatprep.mubr.bf16.mxu0 %v16464_v47 }
 0x1f0   :  { %13769 = vmatprep.subr.bf16.mxu0 %v17591_v32 }
 0x1f3   :  { %13770 = vmatpush3.bf16.msra.mxu0 %v17595_v53 }
 0x1f4   :  { %13771 = vmatprep.subr.bf16.mxu0 %v17602_v2 }
 0x1f6   :  { %3085 = vmatmul.mubr.bf16.gmra.mrb[112].mxu0 %v16466_v49  ;;  %v16485_v49 = vld [vmem:[%s22832_s2 + $0x2e4] ss:$8 sps:$4 sm:$0xff]  }
 0x1f7   :  { %13772 = vmatpush3.bf16.msra.mxu0 %v17606_v15  ;;  %3296 = vmatprep.mubr.bf16.mxu0 %v16469_v50 }
 0x1f8   :  { %13773 = vmatprep.subr.bf16.mxu0 %v17600_v60 }
 0x1fb   :  { %13774 = vmatpush3.bf16.msra.mxu0 %v17604_v13 }
 0x1fc   :  { %13807 = vmatprep.subr.bf16.mxu0 %v17610_v31 }
 0x1fe   :  { %3297 = vmatmul.mubr.bf16.vlgmr.msra.gmra.mrb[116].mxu0 %v16467_v54 }
 0x1ff   :  { %13808 = vmatpush3.bf16.msra.mxu0 %v17579_v0  ;;  %3304 = vmatprep.mubr.bf16.mxu0 %v16470_v57 }
 0x200   :  { %13809 = vmatprep.subr.bf16.mxu0 %v17608_v29 }
 0x203   :  { %13810 = vmatpush3.bf16.msra.mxu0 %v17577_v61 }
 0x204   :  { %13811 = vmatprep.subr.bf16.mxu0 %v17584_v9 }
 0x206   :  { %3305 = vmatmul.mubr.bf16.gmra.mrb[120].mxu0 %v16472_v58 }
 0x207   :  { %13812 = vmatpush3.bf16.msra.mxu0 %v17588_v28  ;;  %3312 = vmatprep.mubr.bf16.mxu0 %v16473_v59 }
 0x208   :  { %13813 = vmatprep.subr.bf16.mxu0 %v17582_v4 }
 0x20b   :  { %13814 = vmatpush3.bf16.msra.mxu0 %v17586_v25 }
 0x20c   :  { %13815 = vmatprep.subr.bf16.mxu0 %v17593_v37 }
 0x20e   :  { %3313 = vmatmul.mubr.bf16.gmra.mrb[124].mxu0 %v16475_v1  ;;  %v16487_v1 = vld [vmem:[%s22832_s2 + $0x2e0] ss:$8 sps:$4 sm:$0xff]  }
 0x20f   :  { %13816 = vmatpush3.bf16.msra.mxu0 %v17597_v56  ;;  %3320 = vmatprep.mubr.bf16.mxu0 %v16476_v3 }
 0x210   :  { %13817 = vmatprep.subr.bf16.mxu0 %v17591_v32 }
 0x211   :  { %v13295_v6 = vpop.f32.mrb[44].mxu1 }
 0x212   :  { %v13296_v10 = vpop.f32.mrb[45].mxu1 }
 0x213   :  { %13818 = vmatpush3.bf16.msra.mxu0 %v17595_v53  ;;  %v18035_v16 = vadd.f32 %v13296_v10, %v13295_v6  ;;  %v13298_v17 = vpop.f32.mrb[46].mxu1  ;;  %v16490_v10 = vld [vmem:[%s22832_s2 + $0x2f4] ss:$8 sps:$4 sm:$0xff]  }
 0x214   :  { %13819 = vmatprep.subr.bf16.mxu0 %v17602_v2  ;;  %v13299_v19 = vpop.f32.mrb[47].mxu1 }
 0x215   :  { %v18038_v20 = vadd.f32 %v13299_v19, %v13298_v17 }
 0x216   :  { %3321 = vmatmul.mubr.bf16.gmra.mrb[128].mxu0 %v16478_v8 }
 0x217   :  { %13820 = vmatpush3.bf16.msra.mxu0 %v17606_v15  ;;  %3532 = vmatprep.mubr.bf16.mxu0 %v16481_v14  ;;  %v985_v21 = vpack.c.bf16 %v18038_v20, %v18035_v16  ;;  %v16511_v16 = vld [vmem:[%s22832_s2 + $0x380] ss:$8 sps:$4 sm:$0xff]   ;;  %v16514_v20 = vld [vmem:[%s22832_s2 + $0x394] ss:$8 sps:$4 sm:$0xff]  }
 0x218   :  { %13821 = vmatprep.subr.bf16.mxu0 %v17600_v60 }
 0x219   :  { %v13301_v22 = vpop.f32.mrb[48].mxu1 }
 0x21a   :  { %v13302_v30 = vpop.f32.mrb[49].mxu1 }
 0x21b   :  { %13822 = vmatpush3.bf16.msra.mxu0 %v17604_v13  ;;  %v18051_v36 = vadd.f32 %v13302_v30, %v13301_v22  ;;  %v13304_v38 = vpop.f32.mrb[50].mxu1  ;;  %v16492_v30 = vld [vmem:[%s22832_s2 + $0x2f0] ss:$8 sps:$4 sm:$0xff]  }
 0x21c   :  { %13903 = vmatprep.subr.bf16.mxu0 %v17610_v31  ;;  %v13305_v39 = vpop.f32.mrb[51].mxu1 }
 0x21d   :  { %v18054_v41 = vadd.f32 %v13305_v39, %v13304_v38  ;;  %v16497_v39 = vld [vmem:[%s22832_s2 + $0x344] ss:$8 sps:$4 sm:$0xff]  }
 0x21e   :  { %3533 = vmatmul.mubr.bf16.vlgmr.msra.gmra.mrb[132].mxu0 %v16479_v27 }
 0x21f   :  { %13904 = vmatpush3.bf16.msra.mxu0 %v17579_v0  ;;  %3540 = vmatprep.mubr.bf16.mxu0 %v16482_v35  ;;  %v986_v42 = vpack.c.bf16 %v18054_v41, %v18051_v36  ;;  %v16516_v36 = vld [vmem:[%s22832_s2 + $0x390] ss:$8 sps:$4 sm:$0xff]   ;;  %v16517_v41 = vld [vmem:[%s22832_s2 + $0x3a4] ss:$8 sps:$4 sm:$0xff]  }
 0x220   :  { %13905 = vmatprep.subr.bf16.mxu0 %v17608_v29 }
 0x221   :  { %v13307_v44 = vpop.f32.mrb[52].mxu1 }
 0x222   :  { %v13308_v46 = vpop.f32.mrb[53].mxu1 }
 0x223   :  { %13906 = vmatpush3.bf16.msra.mxu0 %v17577_v61  ;;  %v18064_v47 = vadd.f32 %v13308_v46, %v13307_v44  ;;  %v13310_v50 = vpop.f32.mrb[54].mxu1 }
 0x224   :  { %13907 = vmatprep.subr.bf16.mxu0 %v17584_v9  ;;  %v13311_v54 = vpop.f32.mrb[55].mxu1 }
 0x225   :  { %v18070_v57 = vadd.f32 %v13311_v54, %v13310_v50  ;;  %v16495_v54 = vld [vmem:[%s22832_s2 + $0x340] ss:$8 sps:$4 sm:$0xff]  }
 0x226   :  { %3541 = vmatmul.mubr.bf16.gmra.mrb[136].mxu0 %v16484_v45 }
 0x227   :  { %13908 = vmatpush3.bf16.msra.mxu0 %v17588_v28  ;;  %3548 = vmatprep.mubr.bf16.mxu0 %v16485_v49  ;;  %v987_v58 = vpack.c.bf16 %v18070_v57, %v18064_v47  ;;  %v16520_v47 = vld [vmem:[%s22832_s2 + $0x3b4] ss:$8 sps:$4 sm:$0xff]   ;;  %v16525_v57 = vld [vmem:[%s22832_s2 + $0x3b0] ss:$8 sps:$4 sm:$0xff]  }
 0x228   :  { %13909 = vmatprep.subr.bf16.mxu0 %v17582_v4 }
 0x229   :  { %v13313_v59 = vpop.f32.mrb[56].mxu1 }
 0x22a   :  { %v13314_v3 = vpop.f32.mrb[57].mxu1 }
 0x22b   :  { %13910 = vmatpush3.bf16.msra.mxu0 %v17586_v25  ;;  %v18080_v6 = vadd.f32 %v13314_v3, %v13313_v59  ;;  %v13316_v8 = vpop.f32.mrb[58].mxu1  ;;  %v16500_v3 = vld [vmem:[%s22832_s2 + $0x354] ss:$8 sps:$4 sm:$0xff]  }
 0x22c   :  { %13911 = vmatprep.subr.bf16.mxu0 %v17593_v37  ;;  %v13317_v14 = vpop.f32.mrb[59].mxu1 }
 0x22d   :  { %v18086_v17 = vadd.f32 %v13317_v14, %v13316_v8 }
 0x22e   :  { %3549 = vmatmul.mubr.bf16.gmra.mrb[140].mxu0 %v16487_v1 }
 0x22f   :  { %13912 = vmatpush3.bf16.msra.mxu0 %v17597_v56  ;;  %v988_v19 = vpack.c.bf16 %v18086_v17, %v18080_v6  ;;  %3556 = vmatprep.mubr.bf16.mxu0 %v16490_v10  ;;  %v16538_v6 = vld [vmem:[%s22833_s3 + $0x40] sm:$0xff]  }
 0x230   :  { %13913 = vmatprep.subr.bf16.mxu0 %v17591_v32  ;;  %v16522_v17 = vld [vmem:[%s22832_s2 + $0x80] ss:$8 sps:$4 sm:$0xff]  }
 0x231   :  { %v13335_v22 = vpop.f32.mrb[60].mxu1 }
 0x232   :  { %v13336_v27 = vpop.f32.mrb[61].mxu1 }
 0x233   :  { %13914 = vmatpush3.bf16.msra.mxu0 %v17595_v53  ;;  %v13337_v35 = vadd.f32 %v13336_v27, %v13335_v22  ;;  %v13338_v38 = vpop.f32.mrb[62].mxu1  ;;  %v16499_v22 = vld [vmem:[%s22833_s3 + $0x8] sm:$0xff]  }
 0x234   :  { %13915 = vmatprep.subr.bf16.mxu0 %v17602_v2  ;;  %v13339_v44 = vpop.f32.mrb[63].mxu1 }
 0x235   :  { %v13340_v45 = vadd.f32 %v13339_v44, %v13338_v38  ;;  %v16503_v44 = vld [vmem:[%s22833_s3 + $0x10] sm:$0xff]  }
 0x236   :  { %3557 = vmatmul.mubr.bf16.gmra.mrb[144].mxu0 %v16492_v30 }
 0x237   :  { %13916 = vmatpush3.bf16.msra.mxu0 %v17606_v15  ;;  %v1111_v46 = vpack.c.bf16 %v13340_v45, %v13337_v35  ;;  %4004 = vmatprep.mubr.bf16.mxu0 %v16497_v39  ;;  %v16502_v35 = vld [vmem:[%s22832_s2 + $0x350] ss:$8 sps:$4 sm:$0xff]  }
 0x238   :  { %13917 = vmatprep.subr.bf16.mxu0 %v17600_v60 }
 0x239   :  { %v13341_v49 = vpop.f32.mrb[64].mxu1  ;;  %15063 = vmatprep.mubr.msk.bf16.mxu1 %vm1148_vm0, %v1111_v46 }
 0x23a   :  { %v13342_v50 = vpop.f32.mrb[65].mxu1 }
 0x23b   :  { %v13343_v59 = vadd.f32 %v13342_v50, %v13341_v49  ;;  %v13344_v1 = vpop.f32.mrb[66].mxu1  ;;  %13918 = vmatpush3.bf16.msra.mxu0 %v17604_v13  ;;  %v16504_v50 = vld [vmem:[%s22833_s3 + $0x18] sm:$0xff]  }
 0x23c   :  { %v13345_v8 = vpop.f32.mrb[67].mxu1  ;;  %13951 = vmatprep.subr.bf16.mxu0 %v17610_v31 }
 0x23d   :  { %v13346_v10 = vadd.f32 %v13345_v8, %v13344_v1  ;;  %v16507_v1 = vld [vmem:[%s22832_s2 + $0x360] ss:$8 sps:$4 sm:$0xff]  }
 0x23e   :  { %4005 = vmatmul.mubr.bf16.vlgmr.msra.gmra.mrb[148].mxu0 %v16495_v54 }
 0x23f   :  { %v1112_v14 = vpack.c.bf16 %v13346_v10, %v13343_v59  ;;  %13952 = vmatpush3.bf16.msra.mxu0 %v17579_v0  ;;  %4012 = vmatprep.mubr.bf16.mxu0 %v16500_v3 }
 0x240   :  { %13953 = vmatprep.subr.bf16.mxu0 %v17608_v29 }
 0x241   :  { %15064 = vmatmul.mubr.msk.bf16.vlgmr.msra.gmra.mrb[76].mxu1 %vm1148_vm0, %v1112_v14  ;;  %v13347_v27 = vpop.f32.mrb[68].mxu1  ;;  %v16508_v14 = vld [vmem:[%s22832_s2 + $0x374] ss:$8 sps:$4 sm:$0xff]  }
 0x242   :  { %15072 = vmatpush3.bf16.msra.mxu1 %v17923_v23  ;;  %v13348_v30 = vpop.f32.mrb[69].mxu1  ;;  %v16505_v23 = vld [vmem:[%s22832_s2 + $0x364] ss:$8 sps:$4 sm:$0xff]  }
 0x243   :  { %13954 = vmatpush3.bf16.msra.mxu0 %v17577_v61  ;;  %15073 = vmatprep.subr.bf16.mxu1 %v16499_v22  ;;  %v13349_v38 = vadd.f32 %v13348_v30, %v13347_v27  ;;  %v13350_v39 = vpop.f32.mrb[70].mxu1  ;;  %v16510_v30 = vld [vmem:[%s22832_s2 + $0x370] ss:$8 sps:$4 sm:$0xff]  }
 0x244   :  { %13955 = vmatprep.subr.bf16.mxu0 %v17584_v9  ;;  %v13351_v45 = vpop.f32.mrb[71].mxu1 }
 0x245   :  { %v13352_v46 = vadd.f32 %v13351_v45, %v13350_v39  ;;  %v16526_v39 = vld [vmem:[%s22832_s2 + $0x3c0] ss:$8 sps:$4 sm:$0xff]   ;;  %v16532_v45 = vld [vmem:[%s22832_s2 + $0xa4] ss:$8 sps:$4 sm:$0xff]  }
 0x246   :  { %15074 = vmatpush3.bf16.msra.mxu1 %v16499_v22  ;;  %4013 = vmatmul.mubr.bf16.gmra.mrb[152].mxu0 %v16502_v35  ;;  %v16513_v35 = vld [vmem:[%s22832_s2 + $0x384] ss:$8 sps:$4 sm:$0xff]  }
 0x247   :  { %13956 = vmatpush3.bf16.msra.mxu0 %v17588_v28  ;;  %v1113_v49 = vpack.c.bf16 %v13352_v46, %v13349_v38  ;;  %15075 = vmatprep.subr.bf16.mxu1 %v16503_v44  ;;  %v16539_v38 = vld [vmem:[%s22833_s3 + $0x48] sm:$0xff]   ;;  %v16535_v46 = vld [vmem:[%s22832_s2 + $0xb4] ss:$8 sps:$4 sm:$0xff]  }
 0x248   :  { %13957 = vmatprep.subr.bf16.mxu0 %v17582_v4  ;;  %4020 = vmatprep.mubr.bf16.mxu0 %v16505_v23  ;;  %v16534_v23 = vld [vmem:[%s22832_s2 + $0xa0] ss:$8 sps:$4 sm:$0xff]  }
 0x249   :  { %v13353_v54 = vpop.f32.mrb[72].mxu1  ;;  %15067 = vmatprep.mubr.msk.bf16.mxu1 %vm1148_vm0, %v1113_v49  ;;  %v16537_v49 = vld [vmem:[%s22832_s2 + $0xb0] ss:$8 sps:$4 sm:$0xff]  }
 0x24a   :  { %15076 = vmatpush3.bf16.msra.mxu1 %v16503_v44  ;;  %v13354_v59 = vpop.f32.mrb[73].mxu1  ;;  %v16531_v44 = vld [vmem:[%s22832_s2 + $0x90] ss:$8 sps:$4 sm:$0xff]  }
 0x24b   :  { %v13355_v3 = vadd.f32 %v13354_v59, %v13353_v54  ;;  %v13356_v8 = vpop.f32.mrb[74].mxu1  ;;  %13958 = vmatpush3.bf16.msra.mxu0 %v17586_v25  ;;  %15077 = vmatprep.subr.bf16.mxu1 %v16504_v50 }
 0x24c   :  { %v13357_v10 = vpop.f32.mrb[75].mxu1  ;;  %13959 = vmatprep.subr.bf16.mxu0 %v17593_v37 }
 0x24d   :  { %v13358_v22 = vadd.f32 %v13357_v10, %v13356_v8 }
 0x24e   :  { %15078 = vmatpush3.bf16.msra.mxu1 %v16504_v50  ;;  %4021 = vmatmul.mubr.bf16.gmra.mrb[156].mxu0 %v16507_v1  ;;  %v13439_v50 = vpop.f32.mrb[20].mxu0 }
 0x24f   :  { %v1114_v27 = vpack.c.bf16 %v13358_v22, %v13355_v3  ;;  %13375 = vmatprep.subr.bf16.mxu1 %v17610_v31  ;;  %13960 = vmatpush3.bf16.msra.mxu0 %v17597_v56  ;;  %v13440_v54 = vpop.f32.mrb[21].mxu0 }
 0x250   :  { %13961 = vmatprep.subr.bf16.mxu0 %v17591_v32  ;;  %4028 = vmatprep.mubr.bf16.mxu0 %v16508_v14  ;;  %v13442_v59 = vpop.f32.mrb[22].mxu0  ;;  %v18279_v3 = vadd.f32 %v13440_v54, %v13439_v50  ;;  %v16541_v54 = vld [vmem:[%s22833_s3 + $0x58] sm:$0xff]  }
 0x251   :  { %15068 = vmatmul.mubr.msk.bf16.gmra.mrb[80].mxu1 %vm1148_vm0, %v1114_v27  ;;  %v13443_v1 = vpop.f32.mrb[23].mxu0 }
 0x252   :  { %15079 = vmatprep.mubr.msk.bf16.mxu1 %vm1148_vm0, %v985_v21  ;;  %v16524_v21 = vld [vmem:[%s22832_s2 + $0x84] ss:$8 sps:$4 sm:$0xff]   ;;  %v18281_v8 = vadd.f32 %v13443_v1, %v13442_v59  ;;  %v13445_v14 = vpop.f32.mrb[24].mxu0 }
 0x253   :  { %13962 = vmatpush3.bf16.msra.mxu0 %v17595_v53  ;;  %v13446_v22 = vpop.f32.mrb[25].mxu0 }
 0x254   :  { %13963 = vmatprep.subr.bf16.mxu0 %v17602_v2  ;;  %v13448_v27 = vpop.f32.mrb[26].mxu0 }
 0x256   :  { %4029 = vmatmul.mubr.bf16.gmra.mrb[160].mxu0 %v16510_v30  ;;  %v13449_v30 = vpop.f32.mrb[27].mxu0 }
 0x257   :  { %13964 = vmatpush3.bf16.msra.mxu0 %v17606_v15  ;;  %4240 = vmatprep.mubr.bf16.mxu0 %v16513_v35  ;;  %v18285_v35 = vadd.f32 %v13446_v22, %v13445_v14 }
 0x258   :  { %13965 = vmatprep.subr.bf16.mxu0 %v17600_v60 }
 0x259   :  { %15080 = vmatmul.mubr.msk.bf16.vlgmr.msra.gmra.mrb[76].mxu1 %vm1148_vm0, %v986_v42  ;;  %v16519_v42 = vld [vmem:[%s22832_s2 + $0x3a0] ss:$8 sps:$4 sm:$0xff]  }
 0x25a   :  { %13376 = vmatpush3.bf16.msra.mxu1 %v17579_v0  ;;  %15083 = vmatprep.mubr.msk.bf16.mxu1 %vm1148_vm0, %v987_v58  ;;  %v16528_v58 = vld [vmem:[%s22832_s2 + $0x3c4] ss:$8 sps:$4 sm:$0xff]  }
 0x25b   :  { %13377 = vmatprep.subr.bf16.mxu1 %v17608_v29  ;;  %13966 = vmatpush3.bf16.msra.mxu0 %v17604_v13 }
 0x25c   :  { %13999 = vmatprep.subr.bf16.mxu0 %v17610_v31 }
 0x25e   :  { %13378 = vmatpush3.bf16.msra.mxu1 %v17577_v61  ;;  %4241 = vmatmul.mubr.bf16.vlgmr.msra.gmra.mrb[164].mxu0 %v16511_v16  ;;  %v18287_v16 = vadd.f32 %v13449_v30, %v13448_v27 }
 0x25f   :  { %13379 = vmatprep.subr.bf16.mxu1 %v17584_v9  ;;  %14000 = vmatpush3.bf16.msra.mxu0 %v17579_v0 }
 0x260   :  { %14001 = vmatprep.subr.bf16.mxu0 %v17608_v29  ;;  %4248 = vmatprep.mubr.bf16.mxu0 %v16514_v20  ;;  %v13451_v20 = vpop.f32.mrb[28].mxu0 }
 0x261   :  { %15084 = vmatmul.mubr.msk.bf16.gmra.mrb[80].mxu1 %vm1148_vm0, %v988_v19  ;;  %v16529_v19 = vld [vmem:[%s22832_s2 + $0x94] ss:$8 sps:$4 sm:$0xff]  }
 0x262   :  { %13380 = vmatpush3.bf16.msra.mxu1 %v17588_v28  ;;  %1408 = vmatprep.mubr.bf16.mxu1 %v16524_v21  ;;  %v13452_v21 = vpop.f32.mrb[29].mxu0 }
 0x263   :  { %13381 = vmatprep.subr.bf16.mxu1 %v17582_v4  ;;  %14002 = vmatpush3.bf16.msra.mxu0 %v17577_v61 }
 0x264   :  { %14003 = vmatprep.subr.bf16.mxu0 %v17584_v9 }
 0x266   :  { %13382 = vmatpush3.bf16.msra.mxu1 %v17586_v25  ;;  %4249 = vmatmul.mubr.bf16.gmra.mrb[168].mxu0 %v16516_v36  ;;  %v13454_v36 = vpop.f32.mrb[30].mxu0 }
 0x267   :  { %13383 = vmatprep.subr.bf16.mxu1 %v17593_v37  ;;  %14004 = vmatpush3.bf16.msra.mxu0 %v17588_v28 }
 0x268   :  { %14005 = vmatprep.subr.bf16.mxu0 %v17582_v4  ;;  %4256 = vmatprep.mubr.bf16.mxu0 %v16517_v41  ;;  %v13455_v41 = vpop.f32.mrb[31].mxu0 }
 0x26a   :  { %13384 = vmatpush3.bf16.msra.mxu1 %v17597_v56 }
 0x26b   :  { %13385 = vmatprep.subr.bf16.mxu1 %v17591_v32  ;;  %14006 = vmatpush3.bf16.msra.mxu0 %v17586_v25 }
 0x26c   :  { %14007 = vmatprep.subr.bf16.mxu0 %v17593_v37 }
 0x26e   :  { %13386 = vmatpush3.bf16.msra.mxu1 %v17595_v53  ;;  %4257 = vmatmul.mubr.bf16.gmra.mrb[172].mxu0 %v16519_v42  ;;  %v18291_v42 = vadd.f32 %v13452_v21, %v13451_v20 }
 0x26f   :  { %13387 = vmatprep.subr.bf16.mxu1 %v17602_v2  ;;  %14008 = vmatpush3.bf16.msra.mxu0 %v17597_v56 }
 0x270   :  { %14009 = vmatprep.subr.bf16.mxu0 %v17591_v32  ;;  %4264 = vmatprep.mubr.bf16.mxu0 %v16520_v47  ;;  %v18293_v47 = vadd.f32 %v13455_v41, %v13454_v36 }
 0x272   :  { %13388 = vmatpush3.bf16.msra.mxu1 %v17606_v15 }
 0x273   :  { %13389 = vmatprep.subr.bf16.mxu1 %v17600_v60  ;;  %14010 = vmatpush3.bf16.msra.mxu0 %v17595_v53 }
 0x274   :  { %14011 = vmatprep.subr.bf16.mxu0 %v17602_v2 }
 0x276   :  { %13390 = vmatpush3.bf16.msra.mxu1 %v17604_v13  ;;  %4265 = vmatmul.mubr.bf16.gmra.mrb[176].mxu0 %v16525_v57 }
 0x277   :  { %14012 = vmatpush3.bf16.msra.mxu0 %v17606_v15  ;;  %4476 = vmatprep.mubr.bf16.mxu0 %v16528_v58  ;;  %v13457_v58 = vpop.f32.mrb[32].mxu0 }
 0x278   :  { %14013 = vmatprep.subr.bf16.mxu0 %v17600_v60  ;;  %15087 = vmatprep.subr.bf16.mxu1 %v16538_v6 }
 0x279   :  { %1409 = vmatmul.mubr.bf16.vlgmr.msra.gmra.mrb[84].mxu1 %v16522_v17 }
 0x27a   :  { %1416 = vmatprep.mubr.bf16.mxu1 %v16529_v19  ;;  %15088 = vmatpush3.bf16.msra.mxu1 %v16538_v6  ;;  %v13458_v6 = vpop.f32.mrb[33].mxu0 }
 0x27b   :  { %14014 = vmatpush3.bf16.msra.mxu0 %v17604_v13  ;;  %15089 = vmatprep.subr.bf16.mxu1 %v16539_v38  ;;  %v13460_v17 = vpop.f32.mrb[34].mxu0 }
 0x27c   :  { %14047 = vmatprep.subr.bf16.mxu0 %v17800_v43  ;;  %v13461_v19 = vpop.f32.mrb[35].mxu0 }
 0x27e   :  { %4477 = vmatmul.mubr.bf16.vlgmr.msra.gmra.mrb[180].mxu0 %v16526_v39  ;;  %15090 = vmatpush3.bf16.msra.mxu1 %v16539_v38  ;;  %v18297_v38 = vadd.f32 %v13458_v6, %v13457_v58  ;;  %v18299_v39 = vadd.f32 %v13461_v19, %v13460_v17  ;;  %v18324_v58 = vld [vmem:[%s22833_s3 + $0x60] sm:$0xff]  }
 0x27f   :  { %14048 = vmatpush3.bf16.msra.mxu0 %v17720_v7 }
 0x280   :  { %14049 = vmatprep.subr.bf16.mxu0 %v17797_v40 }
 0x281   :  { %1417 = vmatmul.mubr.bf16.gmra.mrb[88].mxu1 %v16531_v44  ;;  %v16540_v44 = vld [vmem:[%s22833_s3 + $0x50] sm:$0xff]  }
 0x282   :  { %1424 = vmatprep.mubr.bf16.mxu1 %v16532_v45  ;;  %15091 = vmatprep.subr.bf16.mxu1 %v16540_v44 }
 0x283   :  { %14050 = vmatpush3.bf16.msra.mxu0 %v17710_v63  ;;  %15092 = vmatpush3.bf16.msra.mxu1 %v16540_v44 }
 0x284   :  { %14051 = vmatprep.subr.bf16.mxu0 %v17814_v5  ;;  %15093 = vmatprep.subr.bf16.mxu1 %v16541_v54 }
 0x287   :  { %14052 = vmatpush3.bf16.msra.mxu0 %v17743_v33  ;;  %15094 = vmatpush3.bf16.msra.mxu1 %v16541_v54 }
 0x288   :  { %14053 = vmatprep.subr.bf16.mxu0 %v17811_v62  ;;  %15103 = vmatprep.subr.bf16.mxu1 %v18324_v58 }
 0x289   :  { %1425 = vmatmul.mubr.bf16.gmra.mrb[92].mxu1 %v16534_v23  ;;  %v13487_v23 = vpop.f32.mrb[36].mxu0 }
 0x28a   :  { %1432 = vmatprep.mubr.bf16.mxu1 %v16535_v46  ;;  %v13488_v46 = vpop.f32.mrb[37].mxu0 }
 0x28b   :  { %14054 = vmatpush3.bf16.msra.mxu0 %v17737_v24  ;;  %v18309_v59 = vadd.f32 %v13488_v46, %v13487_v23 }
 0x28c   :  { %14055 = vmatprep.subr.bf16.mxu0 %v17828_v34 }
 0x28f   :  { %14056 = vmatpush3.bf16.msra.mxu0 %v17763_v52 }
 0x290   :  { %14057 = vmatprep.subr.bf16.mxu0 %v17825_v26 }
 0x291   :  { %1433 = vmatmul.mubr.bf16.gmra.mrb[96].mxu1 %v16537_v49  ;;  %v13490_v49 = vpop.f32.mrb[38].mxu0 }
 0x292   :  { %v13491_v50 = vpop.f32.mrb[39].mxu0 }
 0x293   :  { %14058 = vmatpush3.bf16.msra.mxu0 %v17757_v48  ;;  %v18311_v1 = vadd.f32 %v13491_v50, %v13490_v49  ;;  %v13493_v22 = vpop.f32.mrb[40].mxu0 }
 0x294   :  { %14059 = vmatprep.subr.bf16.mxu0 %v17842_v55  ;;  %v13494_v27 = vpop.f32.mrb[41].mxu0 }
 0x295   :  { %v13496_v30 = vpop.f32.mrb[42].mxu0  ;;  %v18315_v21 = vadd.f32 %v13494_v27, %v13493_v22 }
 0x296   :  { %v13497_v20 = vpop.f32.mrb[43].mxu0 }
 0x297   :  { %14060 = vmatpush3.bf16.msra.mxu0 %v17783_v18  ;;  %v18317_v36 = vadd.f32 %v13497_v20, %v13496_v30  ;;  %v13499_v6 = vpop.f32.mrb[44].mxu0 }
 0x298   :  { %14061 = vmatprep.subr.bf16.mxu0 %v17839_v51  ;;  %v13500_v17 = vpop.f32.mrb[45].mxu0 }
 0x299   :  { %v13502_v19 = vpop.f32.mrb[46].mxu0  ;;  %v18327_v23 = vadd.f32 %v13500_v17, %v13499_v6 }
 0x29a   :  { %v13503_v44 = vpop.f32.mrb[47].mxu0 }
 0x29b   :  { %14062 = vmatpush3.bf16.msra.mxu0 %v17777_v12  ;;  %v18329_v46 = vadd.f32 %v13503_v44, %v13502_v19  ;;  %v13505_v50 = vpop.f32.mrb[48].mxu0 }
 0x29c   :  { %15311 = vmatprep.subr.bf16.mxu0 %v17887_v11  ;;  %v13506_v54 = vpop.f32.mrb[49].mxu0 }
 0x29d   :  { %v13508_v22 = vpop.f32.mrb[50].mxu0  ;;  %v18333_v30 = vadd.f32 %v13506_v54, %v13505_v50 }
 0x29e   :  { %v13509_v27 = vpop.f32.mrb[51].mxu0 }
 0x29f   :  { %v18335_v20 = vadd.f32 %v13509_v27, %v13508_v22  ;;  %v13535_v14 = vpop.f32.mrb[52].mxu0 }
 0x2a0   :  { %v13536_v45 = vpop.f32.mrb[53].mxu0 }
 0x2a1   :  { %v13538_v6 = vpop.f32.mrb[54].mxu0  ;;  %v18339_v19 = vadd.f32 %v13536_v45, %v13535_v14 }
 0x2a2   :  { %v13539_v17 = vpop.f32.mrb[55].mxu0 }
 0x2a3   :  { %v18341_v44 = vadd.f32 %v13539_v17, %v13538_v6  ;;  %v13541_v57 = vpop.f32.mrb[56].mxu0 }
 0x2a4   :  { %v13542_v11 = vpop.f32.mrb[57].mxu0 }
 0x2a5   :  { %v13544_v50 = vpop.f32.mrb[58].mxu0  ;;  %v18345_v22 = vadd.f32 %v13542_v11, %v13541_v57 }
 0x2a6   :  { %v13545_v54 = vpop.f32.mrb[59].mxu0 }
 0x2a7   :  { %v18347_v27 = vadd.f32 %v13545_v54, %v13544_v50  ;;  %v13547_v10 = vpop.f32.mrb[60].mxu0 }
 0x2a8   :  { %v13548_v12 = vpop.f32.mrb[61].mxu0 }
 0x2a9   :  { %v13550_v45 = vpop.f32.mrb[62].mxu0  ;;  %v18351_v6 = vadd.f32 %v13548_v12, %v13547_v10 }
 0x2aa   :  { %v13551_v14 = vpop.f32.mrb[63].mxu0 }
 0x2ab   :  { %v18353_v17 = vadd.f32 %v13551_v14, %v13550_v45  ;;  %v13553_v51 = vpop.f32.mrb[64].mxu0 }
 0x2ac   :  { %v13554_v18 = vpop.f32.mrb[65].mxu0 }
 0x2ad   :  { %v13556_v11 = vpop.f32.mrb[66].mxu0  ;;  %v18357_v50 = vadd.f32 %v13554_v18, %v13553_v51 }
 0x2ae   :  { %v13557_v57 = vpop.f32.mrb[67].mxu0 }
 0x2af   :  { %v18359_v54 = vadd.f32 %v13557_v57, %v13556_v11  ;;  %v13583_v55 = vpop.f32.mrb[68].mxu0 }
 0x2b0   :  { %v13584_v48 = vpop.f32.mrb[69].mxu0 }
 0x2b1   :  { %v13586_v12 = vpop.f32.mrb[70].mxu0  ;;  %v18363_v45 = vadd.f32 %v13584_v48, %v13583_v55 }
 0x2b2   :  { %v13587_v10 = vpop.f32.mrb[71].mxu0 }
 0x2b3   :  { %v18365_v14 = vadd.f32 %v13587_v10, %v13586_v12  ;;  %v13589_v26 = vpop.f32.mrb[72].mxu0 }
 0x2b4   :  { %v13590_v52 = vpop.f32.mrb[73].mxu0 }
 0x2b5   :  { %v13592_v18 = vpop.f32.mrb[74].mxu0  ;;  %v18369_v51 = vadd.f32 %v13590_v52, %v13589_v26 }
 0x2b6   :  { %v13593_v11 = vpop.f32.mrb[75].mxu0 }
 0x2b7   :  { %v18371_v57 = vadd.f32 %v13593_v11, %v13592_v18  ;;  %v13595_v34 = vpop.f32.mrb[76].mxu0 }
 0x2b8   :  { %v13596_v24 = vpop.f32.mrb[77].mxu0 }
 0x2b9   :  { %v13598_v48 = vpop.f32.mrb[78].mxu0  ;;  %v18375_v12 = vadd.f32 %v13596_v24, %v13595_v34 }
 0x2ba   :  { %v13599_v55 = vpop.f32.mrb[79].mxu0 }
 0x2bb   :  { %v18377_v10 = vadd.f32 %v13599_v55, %v13598_v48  ;;  %v13601_v62 = vpop.f32.mrb[80].mxu0 }
 0x2bc   :  { %v13602_v52 = vpop.f32.mrb[81].mxu0 }
 0x2bd   :  { %v18381_v26 = vadd.f32 %v13602_v52, %v13601_v62  ;;  %v13604_v18 = vpop.f32.mrb[82].mxu0 }
 0x2be   :  { %v13605_v11 = vpop.f32.mrb[83].mxu0 }
 0x2bf   :  { %v18383_v33 = vadd.f32 %v13605_v11, %v13604_v18  ;;  %v16543_v11 = vld [vmem:[%s22833_s3 + $0x68] sm:$0xff]  }
 0x34c   :  { %v13391_v5 = vpop.f32.mrb[84].mxu1 }
 0x34d   :  { %v13392_v63 = vpop.f32.mrb[85].mxu1 }
 0x34e   :  { %v13394_v24 = vpop.f32.mrb[86].mxu1  ;;  %v13393_v34 = vadd.f32 %v13392_v63, %v13391_v5 }
 0x34f   :  { %v13395_v48 = vpop.f32.mrb[87].mxu1 }
 0x350   :  { %v13396_v55 = vadd.f32 %v13395_v48, %v13394_v24 }
 0x352   :  { %v1441_v40 = vpack.c.bf16 %v13396_v55, %v13393_v34  ;;  %v16546_v55 = vld [vmem:[%s22833_s3 + $0x80] sm:$0xff]  }
 0x354   :  { %v13397_v7 = vpop.f32.mrb[88].mxu1  ;;  %15095 = vmatprep.mubr.msk.bf16.mxu1 %vm1148_vm0, %v1441_v40 }
 0x355   :  { %v13398_v49 = vpop.f32.mrb[89].mxu1 }
 0x356   :  { %v13399_v62 = vadd.f32 %v13398_v49, %v13397_v7  ;;  %v13400_v52 = vpop.f32.mrb[90].mxu1  ;;  %v16544_v7 = vld [vmem:[%s22833_s3 + $0x70] sm:$0xff]   ;;  %v16545_v49 = vld [vmem:[%s22833_s3 + $0x78] sm:$0xff]  }
 0x357   :  { %v13401_v43 = vpop.f32.mrb[91].mxu1 }
 0x358   :  { %v13402_v13 = vadd.f32 %v13401_v43, %v13400_v52 }
 0x35a   :  { %v1442_v18 = vpack.c.bf16 %v13402_v13, %v13399_v62 }
 0x35c   :  { %v13403_v41 = vpop.f32.mrb[92].mxu1  ;;  %15096 = vmatmul.mubr.msk.bf16.vlgmr.msra.gmra.mrb[76].mxu1 %vm1148_vm0, %v1442_v18 }
 0x35d   :  { %v13404_v63 = vpop.f32.mrb[93].mxu1  ;;  %15104 = vmatpush3.bf16.msra.mxu1 %v18324_v58 }
 0x35e   :  { %v13405_v5 = vadd.f32 %v13404_v63, %v13403_v41  ;;  %v13406_v24 = vpop.f32.mrb[94].mxu1  ;;  %15105 = vmatprep.subr.bf16.mxu1 %v16543_v11  ;;  %v16547_v63 = vld [vmem:[%s22833_s3 + $0x88] sm:$0xff]  }
 0x35f   :  { %v13407_v40 = vpop.f32.mrb[95].mxu1 }
 0x360   :  { %v13408_v43 = vadd.f32 %v13407_v40, %v13406_v24  ;;  %v22946_v24 = vpack.c.bf16 %v18293_v47, %v18291_v42  ;;  %v16550_v42 = vld [vmem:[%s22833_s3 + $0xa0] sm:$0xff]   ;;  %v16551_v47 = vld [vmem:[%s22833_s3 + $0xa8] sm:$0xff]   ;;  %v16569_v40 = vld [vmem:[%s22832_s2 + $0x1f0] ss:$8 sps:$4 sm:$0xff]  }
 0x361   :  { %15106 = vmatpush3.bf16.msra.mxu1 %v16543_v11  ;;  %v22944_v11 = vpack.c.bf16 %v18281_v8, %v18279_v3  ;;  %v16548_v3 = vld [vmem:[%s22833_s3 + $0x90] sm:$0xff]   ;;  %v16549_v8 = vld [vmem:[%s22833_s3 + $0x98] sm:$0xff]  }
 0x362   :  { %v1443_v13 = vpack.c.bf16 %v13408_v43, %v13405_v5  ;;  %15107 = vmatprep.subr.bf16.mxu1 %v16544_v7  ;;  %v22945_v5 = vpack.c.bf16 %v18287_v16, %v18285_v35  ;;  %v22947_v35 = vpack.c.bf16 %v18299_v39, %v18297_v38  ;;  %v22948_v16 = vpack.c.bf16 %v18311_v1, %v18309_v59  ;;  %v16552_v59 = vld [vmem:[%s22833_s3 + $0xb0] sm:$0xff]   ;;  %v16553_v1 = vld [vmem:[%s22833_s3 + $0xb8] sm:$0xff]   ;;  %v13679_v43 = vpop.f32.mrb[84].mxu0 }
 0x363   :  { %v22949_v38 = vpack.c.bf16 %v18317_v36, %v18315_v21  ;;  %v22950_v39 = vpack.c.bf16 %v18329_v46, %v18327_v23  ;;  %v22951_v21 = vpack.c.bf16 %v18335_v20, %v18333_v30  ;;  %v22952_v36 = vpack.c.bf16 %v18341_v44, %v18339_v19  ;;  %v16554_v23 = vld [vmem:[%s22833_s3 + $0xc0] sm:$0xff]   ;;  %v16555_v46 = vld [vmem:[%s22833_s3 + $0xc8] sm:$0xff]   ;;  %v16556_v19 = vld [vmem:[%s22833_s3 + $0xd0] sm:$0xff]  }
 0x364   :  { %v13409_v34 = vpop.f32.mrb[96].mxu1  ;;  %15099 = vmatprep.mubr.msk.bf16.mxu1 %vm1148_vm0, %v1443_v13  ;;  %v22953_v30 = vpack.c.bf16 %v18347_v27, %v18345_v22  ;;  %v22954_v20 = vpack.c.bf16 %v18353_v17, %v18351_v6  ;;  %v16557_v44 = vld [vmem:[%s22833_s3 + $0xd8] sm:$0xff]   ;;  %v22955_v22 = vpack.c.bf16 %v18359_v54, %v18357_v50  ;;  %v22956_v27 = vpack.c.bf16 %v18365_v14, %v18363_v45  ;;  %v16560_v50 = vld [vmem:[%s22832_s2 + $0x1c4] ss:$8 sps:$4 sm:$0xff]   ;;  %v16558_v45 = vld [vmem:[%s22832_s2 + $0x1c0] ss:$8 sps:$4 sm:$0xff]  }
 0x365   :  { %v13410_v58 = vpop.f32.mrb[97].mxu1  ;;  %15108 = vmatpush3.bf16.msra.mxu1 %v16544_v7  ;;  %v22957_v6 = vpack.c.bf16 %v18371_v57, %v18369_v51  ;;  %v22958_v17 = vpack.c.bf16 %v18377_v10, %v18375_v12  ;;  %v22959_v54 = vpack.c.bf16 %v18383_v33, %v18381_v26  ;;  %v16570_v33 = vld [vmem:[%s22833_s3 + $0xe0] sm:$0xff]   ;;  %v16561_v51 = vld [vmem:[%s22832_s2 + $0x1d4] ss:$8 sps:$4 sm:$0xff]   ;;  %v16571_v57 = vld [vmem:[%s22833_s3 + $0xe8] sm:$0xff]   ;;  %v13680_v13 = vpop.f32.mrb[85].mxu0 }
 0x366   :  { %v13411_v41 = vadd.f32 %v13410_v58, %v13409_v34  ;;  %v13412_v48 = vpop.f32.mrb[98].mxu1  ;;  %15109 = vmatprep.subr.bf16.mxu1 %v16545_v49  ;;  %v22960_v14 = vld [vmem:[#allocation2_spill] sm:$0xff]  ;;  %v16563_v12 = vld [vmem:[%s22832_s2 + $0x1d0] ss:$8 sps:$4 sm:$0xff]   ;;  %v16567_v7 = vld [vmem:[%s22832_s2 + $0x1f4] ss:$8 sps:$4 sm:$0xff]   ;;  %v18547_v58 = vadd.f32 %v13680_v13, %v13679_v43 }
 0x367   :  { %v13413_v62 = vpop.f32.mrb[99].mxu1  ;;  %v16564_v10 = vld [vmem:[%s22832_s2 + $0x1e4] ss:$8 sps:$4 sm:$0xff]   ;;  %v16566_v26 = vld [vmem:[%s22832_s2 + $0x1e0] ss:$8 sps:$4 sm:$0xff]  }
 0x368   :  { %v13414_v52 = vadd.f32 %v13413_v62, %v13412_v48 }
 0x369   :  { %15110 = vmatpush3.bf16.msra.mxu1 %v16545_v49  ;;  %v13682_v49 = vpop.f32.mrb[86].mxu0 }
 0x36a   :  { %v1444_v18 = vpack.c.bf16 %v13414_v52, %v13411_v41  ;;  %15119 = vmatprep.subr.bf16.mxu1 %v16546_v55  ;;  %v13683_v34 = vpop.f32.mrb[87].mxu0 }
 0x36b   :  { %v18549_v41 = vadd.f32 %v13683_v34, %v13682_v49 }
 0x36c   :  { %15100 = vmatmul.mubr.msk.bf16.gmra.mrb[80].mxu1 %vm1148_vm0, %v1444_v18 }
 0x36d   :  { %15111 = vmatprep.mubr.msk.bf16.mxu1 %vm1148_vm0, %v22944_v11 }
 0x374   :  { %15112 = vmatmul.mubr.msk.bf16.vlgmr.msra.gmra.mrb[76].mxu1 %vm1148_vm0, %v22945_v5 }
 0x375   :  { %15120 = vmatpush3.bf16.msra.mxu1 %v16546_v55  ;;  %15115 = vmatprep.mubr.msk.bf16.mxu1 %vm1148_vm0, %v22946_v24  ;;  %v13685_v55 = vpop.f32.mrb[88].mxu0 }
 0x376   :  { %15121 = vmatprep.subr.bf16.mxu1 %v16547_v63  ;;  %v13686_v62 = vpop.f32.mrb[89].mxu0 }
 0x377   :  { %v13688_v52 = vpop.f32.mrb[90].mxu0  ;;  %v18553_v11 = vadd.f32 %v13686_v62, %v13685_v55 }
 0x378   :  { %v13689_v18 = vpop.f32.mrb[91].mxu0 }
 0x379   :  { %15122 = vmatpush3.bf16.msra.mxu1 %v16547_v63  ;;  %v18555_v63 = vadd.f32 %v13689_v18, %v13688_v52  ;;  %v13691_v24 = vpop.f32.mrb[92].mxu0 }
 0x37a   :  { %15123 = vmatprep.subr.bf16.mxu1 %v16548_v3 }
 0x37c   :  { %15116 = vmatmul.mubr.msk.bf16.gmra.mrb[80].mxu1 %vm1148_vm0, %v22947_v35 }
 0x37d   :  { %15124 = vmatpush3.bf16.msra.mxu1 %v16548_v3  ;;  %15127 = vmatprep.mubr.msk.bf16.mxu1 %vm1148_vm0, %v22948_v16  ;;  %v13692_v3 = vpop.f32.mrb[93].mxu0 }
 0x37e   :  { %15125 = vmatprep.subr.bf16.mxu1 %v16549_v8  ;;  %v18559_v16 = vadd.f32 %v13692_v3, %v13691_v24 }
 0x381   :  { %15126 = vmatpush3.bf16.msra.mxu1 %v16549_v8  ;;  %v13694_v8 = vpop.f32.mrb[94].mxu0 }
 0x382   :  { %15135 = vmatprep.subr.bf16.mxu1 %v16550_v42  ;;  %v13695_v35 = vpop.f32.mrb[95].mxu0 }
 0x384   :  { %15128 = vmatmul.mubr.msk.bf16.vlgmr.msra.gmra.mrb[76].mxu1 %vm1148_vm0, %v22949_v38  ;;  %v13697_v38 = vpop.f32.mrb[96].mxu0 }
 0x385   :  { %15136 = vmatpush3.bf16.msra.mxu1 %v16550_v42  ;;  %15131 = vmatprep.mubr.msk.bf16.mxu1 %vm1148_vm0, %v22950_v39  ;;  %v18561_v42 = vadd.f32 %v13695_v35, %v13694_v8  ;;  %v13698_v39 = vpop.f32.mrb[97].mxu0 }
 0x386   :  { %15137 = vmatprep.subr.bf16.mxu1 %v16551_v47 }
 0x389   :  { %15138 = vmatpush3.bf16.msra.mxu1 %v16551_v47 }
 0x38a   :  { %15139 = vmatprep.subr.bf16.mxu1 %v16552_v59 }
 0x38c   :  { %15132 = vmatmul.mubr.msk.bf16.gmra.mrb[80].mxu1 %vm1148_vm0, %v22951_v21  ;;  %v18565_v21 = vadd.f32 %v13698_v39, %v13697_v38 }
 0x38d   :  { %15140 = vmatpush3.bf16.msra.mxu1 %v16552_v59  ;;  %15143 = vmatprep.mubr.msk.bf16.mxu1 %vm1148_vm0, %v22952_v36  ;;  %v13700_v59 = vpop.f32.mrb[98].mxu0 }
 0x38e   :  { %15141 = vmatprep.subr.bf16.mxu1 %v16553_v1 }
 0x391   :  { %15142 = vmatpush3.bf16.msra.mxu1 %v16553_v1  ;;  %v13701_v1 = vpop.f32.mrb[99].mxu0 }
 0x392   :  { %15151 = vmatprep.subr.bf16.mxu1 %v16554_v23  ;;  %v18567_v36 = vadd.f32 %v13701_v1, %v13700_v59 }
 0x394   :  { %15144 = vmatmul.mubr.msk.bf16.vlgmr.msra.gmra.mrb[76].mxu1 %vm1148_vm0, %v22953_v30  ;;  %v13727_v30 = vpop.f32.mrb[100].mxu0 }
 0x395   :  { %15152 = vmatpush3.bf16.msra.mxu1 %v16554_v23  ;;  %15147 = vmatprep.mubr.msk.bf16.mxu1 %vm1148_vm0, %v22954_v20  ;;  %v13728_v20 = vpop.f32.mrb[101].mxu0 }
 0x396   :  { %15153 = vmatprep.subr.bf16.mxu1 %v16555_v46 }
 0x399   :  { %15154 = vmatpush3.bf16.msra.mxu1 %v16555_v46  ;;  %v16572_v46 = vld [vmem:[%s22833_s3 + $0xf0] sm:$0xff]  }
 0x39a   :  { %15155 = vmatprep.subr.bf16.mxu1 %v16556_v19 }
 0x39c   :  { %15148 = vmatmul.mubr.msk.bf16.gmra.mrb[80].mxu1 %vm1148_vm0, %v22955_v22  ;;  %v16573_v22 = vld [vmem:[%s22833_s3 + $0xf8] sm:$0xff]  }
 0x39d   :  { %15156 = vmatpush3.bf16.msra.mxu1 %v16556_v19  ;;  %15159 = vmatprep.mubr.msk.bf16.mxu1 %vm1148_vm0, %v22956_v27  ;;  %v13730_v19 = vpop.f32.mrb[102].mxu0  ;;  %v18577_v27 = vadd.f32 %v13728_v20, %v13727_v30 }
 0x39e   :  { %15157 = vmatprep.subr.bf16.mxu1 %v16557_v44 }
 0x3a1   :  { %15158 = vmatpush3.bf16.msra.mxu1 %v16557_v44  ;;  %v13731_v44 = vpop.f32.mrb[103].mxu0 }
 0x3a2   :  { %13615 = vmatprep.subr.bf16.mxu1 %v17610_v31 }
 0x3a4   :  { %15160 = vmatmul.mubr.msk.bf16.vlgmr.msra.gmra.mrb[76].mxu1 %vm1148_vm0, %v22957_v6  ;;  %v18579_v6 = vadd.f32 %v13731_v44, %v13730_v19 }
 0x3a5   :  { %13616 = vmatpush3.bf16.msra.mxu1 %v17579_v0  ;;  %15163 = vmatprep.mubr.msk.bf16.mxu1 %vm1148_vm0, %v22958_v17 }
 0x3a6   :  { %13617 = vmatprep.subr.bf16.mxu1 %v17608_v29 }
 0x3a9   :  { %13618 = vmatpush3.bf16.msra.mxu1 %v17577_v61 }
 0x3aa   :  { %13619 = vmatprep.subr.bf16.mxu1 %v17584_v9 }
 0x3ac   :  { %15164 = vmatmul.mubr.msk.bf16.gmra.mrb[80].mxu1 %vm1148_vm0, %v22959_v54 }
 0x3ad   :  { %13620 = vmatpush3.bf16.msra.mxu1 %v17588_v28  ;;  %2588 = vmatprep.mubr.bf16.mxu1 %v16560_v50  ;;  %v13733_v50 = vpop.f32.mrb[104].mxu0 }
 0x3ae   :  { %13621 = vmatprep.subr.bf16.mxu1 %v17582_v4  ;;  %v13734_v54 = vpop.f32.mrb[105].mxu0 }
 0x3b1   :  { %13622 = vmatpush3.bf16.msra.mxu1 %v17586_v25 }
 0x3b2   :  { %13623 = vmatprep.subr.bf16.mxu1 %v17593_v37 }
 0x3b5   :  { %13624 = vmatpush3.bf16.msra.mxu1 %v17597_v56 }
 0x3b6   :  { %13625 = vmatprep.subr.bf16.mxu1 %v17591_v32 }
 0x3b9   :  { %13626 = vmatpush3.bf16.msra.mxu1 %v17595_v53 }
 0x3ba   :  { %13627 = vmatprep.subr.bf16.mxu1 %v17602_v2 }
 0x3bd   :  { %13628 = vmatpush3.bf16.msra.mxu1 %v17606_v15 }
 0x3be   :  { %13629 = vmatprep.subr.bf16.mxu1 %v17600_v60 }
 0x3c1   :  { %13630 = vmatpush3.bf16.msra.mxu1 %v22960_v14 }
 0x3c2   :  { %15167 = vmatprep.subr.bf16.mxu1 %v16570_v33 }
 0x3c4   :  { %2589 = vmatmul.mubr.bf16.vlgmr.msra.gmra.mrb[100].mxu1 %v16558_v45 }
 0x3c5   :  { %2596 = vmatprep.mubr.bf16.mxu1 %v16561_v51  ;;  %15168 = vmatpush3.bf16.msra.mxu1 %v16570_v33  ;;  %v13736_v33 = vpop.f32.mrb[106].mxu0  ;;  %v18583_v51 = vadd.f32 %v13734_v54, %v13733_v50 }
 0x3c6   :  { %15169 = vmatprep.subr.bf16.mxu1 %v16571_v57  ;;  %v13737_v45 = vpop.f32.mrb[107].mxu0 }
 0x3c9   :  { %15170 = vmatpush3.bf16.msra.mxu1 %v16571_v57  ;;  %v18585_v57 = vadd.f32 %v13737_v45, %v13736_v33 }
 0x3ca   :  { %15171 = vmatprep.subr.bf16.mxu1 %v16572_v46 }
 0x3cc   :  { %2597 = vmatmul.mubr.bf16.gmra.mrb[104].mxu1 %v16563_v12 }
 0x3cd   :  { %2604 = vmatprep.mubr.bf16.mxu1 %v16564_v10  ;;  %15172 = vmatpush3.bf16.msra.mxu1 %v16572_v46  ;;  %v18592_v10 = vld [vmem:[%s22833_s3 + $0x100] sm:$0xff]  }
 0x3ce   :  { %15173 = vmatprep.subr.bf16.mxu1 %v16573_v22 }
 0x3d1   :  { %15174 = vmatpush3.bf16.msra.mxu1 %v16573_v22 }
 0x3d2   :  { %15183 = vmatprep.subr.bf16.mxu1 %v18592_v10 }
 0x3d4   :  { %2605 = vmatmul.mubr.bf16.gmra.mrb[108].mxu1 %v16566_v26  ;;  %v13739_v26 = vpop.f32.mrb[108].mxu0 }
 0x3d5   :  { %2612 = vmatprep.mubr.bf16.mxu1 %v16567_v7  ;;  %v13740_v7 = vpop.f32.mrb[109].mxu0 }
 0x3d6   :  { %v18595_v13 = vadd.f32 %v13740_v7, %v13739_v26 }
 0x3dc   :  { %2613 = vmatmul.mubr.bf16.gmra.mrb[112].mxu1 %v16569_v40  ;;  %v13742_v40 = vpop.f32.mrb[110].mxu0 }
 0x3dd   :  { %v13743_v43 = vpop.f32.mrb[111].mxu0 }
 0x3de   :  { %v18597_v49 = vadd.f32 %v13743_v43, %v13742_v40  ;;  %v13745_v55 = vpop.f32.mrb[112].mxu0 }
 0x3df   :  { %v13746_v62 = vpop.f32.mrb[113].mxu0 }
 0x3e0   :  { %v13748_v52 = vpop.f32.mrb[114].mxu0  ;;  %v18601_v24 = vadd.f32 %v13746_v62, %v13745_v55 }
 0x3e1   :  { %v13749_v18 = vpop.f32.mrb[115].mxu0 }
 0x3e2   :  { %v18603_v3 = vadd.f32 %v13749_v18, %v13748_v52  ;;  %v13775_v35 = vpop.f32.mrb[116].mxu0 }
 0x3e3   :  { %v13776_v38 = vpop.f32.mrb[117].mxu0 }
 0x3e4   :  { %v13778_v39 = vpop.f32.mrb[118].mxu0  ;;  %v18607_v1 = vadd.f32 %v13776_v38, %v13775_v35 }
 0x3e5   :  { %v13779_v59 = vpop.f32.mrb[119].mxu0 }
 0x3e6   :  { %v18609_v46 = vadd.f32 %v13779_v59, %v13778_v39  ;;  %v13781_v20 = vpop.f32.mrb[120].mxu0 }
 0x3e7   :  { %v13782_v19 = vpop.f32.mrb[121].mxu0 }
 0x3e8   :  { %v13784_v44 = vpop.f32.mrb[122].mxu0  ;;  %v18613_v50 = vadd.f32 %v13782_v19, %v13781_v20 }
 0x3e9   :  { %v13785_v22 = vpop.f32.mrb[123].mxu0 }
 0x3ea   :  { %v18615_v54 = vadd.f32 %v13785_v22, %v13784_v44  ;;  %v13787_v45 = vpop.f32.mrb[124].mxu0 }
 0x3eb   :  { %v13788_v26 = vpop.f32.mrb[125].mxu0 }
 0x3ec   :  { %v13790_v7 = vpop.f32.mrb[126].mxu0  ;;  %v18619_v43 = vadd.f32 %v13788_v26, %v13787_v45 }
 0x3ed   :  { %v13791_v40 = vpop.f32.mrb[127].mxu0 }
 0x3ee   :  { %v18621_v55 = vadd.f32 %v13791_v40, %v13790_v7  ;;  %v13793_v52 = vpop.f32.mrb[128].mxu0 }
 0x3ef   :  { %v13794_v18 = vpop.f32.mrb[129].mxu0 }
 0x3f0   :  { %v13796_v35 = vpop.f32.mrb[130].mxu0  ;;  %v18625_v39 = vadd.f32 %v13794_v18, %v13793_v52 }
 0x3f1   :  { %v13797_v38 = vpop.f32.mrb[131].mxu0 }
 0x3f2   :  { %v18627_v59 = vadd.f32 %v13797_v38, %v13796_v35  ;;  %v13823_v19 = vpop.f32.mrb[132].mxu0 }
 0x3f3   :  { %v13824_v44 = vpop.f32.mrb[133].mxu0 }
 0x3f4   :  { %v13826_v22 = vpop.f32.mrb[134].mxu0  ;;  %v18631_v26 = vadd.f32 %v13824_v44, %v13823_v19 }
 0x3f5   :  { %v13827_v45 = vpop.f32.mrb[135].mxu0 }
 0x3f6   :  { %v18633_v7 = vadd.f32 %v13827_v45, %v13826_v22  ;;  %v13829_v62 = vpop.f32.mrb[136].mxu0 }
 0x3f7   :  { %v13830_v33 = vpop.f32.mrb[137].mxu0 }
 0x3f8   :  { %v13832_v52 = vpop.f32.mrb[138].mxu0  ;;  %v18637_v18 = vadd.f32 %v13830_v33, %v13829_v62 }
 0x3f9   :  { %v13833_v35 = vpop.f32.mrb[139].mxu0 }
 0x3fa   :  { %v18639_v38 = vadd.f32 %v13833_v35, %v13832_v52  ;;  %v13835_v30 = vpop.f32.mrb[140].mxu0 }
 0x3fb   :  { %v13836_v8 = vpop.f32.mrb[141].mxu0 }
 0x3fc   :  { %v13838_v19 = vpop.f32.mrb[142].mxu0  ;;  %v18643_v22 = vadd.f32 %v13836_v8, %v13835_v30 }
 0x3fd   :  { %v13839_v44 = vpop.f32.mrb[143].mxu0 }
 0x3fe   :  { %v18645_v45 = vadd.f32 %v13839_v44, %v13838_v19  ;;  %v13841_v34 = vpop.f32.mrb[144].mxu0 }
 0x3ff   :  { %v13842_v33 = vpop.f32.mrb[145].mxu0 }
 0x400   :  { %v18649_v62 = vadd.f32 %v13842_v33, %v13841_v34  ;;  %v13844_v52 = vpop.f32.mrb[146].mxu0 }
 0x401   :  { %v13845_v35 = vpop.f32.mrb[147].mxu0 }
 0x402   :  { %v18651_v12 = vadd.f32 %v13845_v35, %v13844_v52  ;;  %v16575_v35 = vld [vmem:[%s22833_s3 + $0x108] sm:$0xff]  }
 0x497   :  { %v13631_v17 = vpop.f32.mrb[100].mxu1 }
 0x498   :  { %v13632_v23 = vpop.f32.mrb[101].mxu1 }
 0x499   :  { %v13633_v8 = vadd.f32 %v13632_v23, %v13631_v17  ;;  %v13634_v30 = vpop.f32.mrb[102].mxu1  ;;  %v16602_v23 = vld [vmem:[%s22832_s2 + $0x3d4] ss:$8 sps:$4 sm:$0xff]  }
 0x49a   :  { %v13635_v19 = vpop.f32.mrb[103].mxu1  ;;  %4484 = vmatprep.mubr.bf16.mxu0 %v16602_v23  ;;  %v16578_v23 = vld [vmem:[%s22833_s3 + $0x120] sm:$0xff]  }
 0x49b   :  { %v13636_v44 = vadd.f32 %v13635_v19, %v13634_v30 }
 0x49d   :  { %v2621_v47 = vpack.c.bf16 %v13636_v44, %v13633_v8 }
 0x49f   :  { %v13637_v5 = vpop.f32.mrb[104].mxu1  ;;  %15175 = vmatprep.mubr.msk.bf16.mxu1 %vm1148_vm0, %v2621_v47  ;;  %v16604_v47 = vld [vmem:[%s22832_s2 + $0x3d0] ss:$8 sps:$4 sm:$0xff]  }
 0x4a0   :  { %v13638_v40 = vpop.f32.mrb[105].mxu1  ;;  %4485 = vmatmul.mubr.bf16.gmra.mrb[184].mxu0 %v16604_v47 }
 0x4a1   :  { %v13639_v34 = vadd.f32 %v13638_v40, %v13637_v5  ;;  %v13640_v33 = vpop.f32.mrb[106].mxu1  ;;  %v16576_v40 = vld [vmem:[%s22833_s3 + $0x110] sm:$0xff]  }
 0x4a2   :  { %v13641_v48 = vpop.f32.mrb[107].mxu1 }
 0x4a3   :  { %v13642_v14 = vadd.f32 %v13641_v48, %v13640_v33 }
 0x4a5   :  { %v2622_v52 = vpack.c.bf16 %v13642_v14, %v13639_v34  ;;  %v16605_v14 = vld [vmem:[%s22832_s2 + $0x3e4] ss:$8 sps:$4 sm:$0xff]   ;;  %v16608_v34 = vld [vmem:[%s22832_s2 + $0x3f4] ss:$8 sps:$4 sm:$0xff]  }
 0x4a6   :  { %4492 = vmatprep.mubr.bf16.mxu0 %v16605_v14 }
 0x4a7   :  { %v13643_v20 = vpop.f32.mrb[108].mxu1  ;;  %15176 = vmatmul.mubr.msk.bf16.vlgmr.msra.gmra.mrb[76].mxu1 %vm1148_vm0, %v2622_v52 }
 0x4a8   :  { %v13644_v5 = vpop.f32.mrb[109].mxu1  ;;  %15184 = vmatpush3.bf16.msra.mxu1 %v18592_v10  ;;  %v16577_v10 = vld [vmem:[%s22833_s3 + $0x118] sm:$0xff]  }
 0x4a9   :  { %v13645_v48 = vadd.f32 %v13644_v5, %v13643_v20  ;;  %v13646_v17 = vpop.f32.mrb[110].mxu1  ;;  %15185 = vmatprep.subr.bf16.mxu1 %v16575_v35  ;;  %v16607_v20 = vld [vmem:[%s22832_s2 + $0x3e0] ss:$8 sps:$4 sm:$0xff]  }
 0x4aa   :  { %v13647_v8 = vpop.f32.mrb[111].mxu1  ;;  %4493 = vmatmul.mubr.bf16.gmra.mrb[188].mxu0 %v16607_v20  ;;  %v22965_v20 = vpack.c.bf16 %v18579_v6, %v18577_v27  ;;  %v17049_v27 = vld [vmem:[%s22833_s3 + $0x38] sm:$0xff]   ;;  %v16583_v6 = vld [vmem:[%s22833_s3 + $0x148] sm:$0xff]  }
 0x4ab   :  { %v13648_v30 = vadd.f32 %v13647_v8, %v13646_v17  ;;  %4500 = vmatprep.mubr.bf16.mxu0 %v16608_v34  ;;  %v22961_v17 = vpack.c.bf16 %v18549_v41, %v18547_v58  ;;  %v16579_v8 = vld [vmem:[%s22833_s3 + $0x128] sm:$0xff]   ;;  %v22963_v58 = vpack.c.bf16 %v18561_v42, %v18559_v16  ;;  %v16580_v41 = vld [vmem:[%s22833_s3 + $0x130] sm:$0xff]   ;;  %v16581_v42 = vld [vmem:[%s22833_s3 + $0x138] sm:$0xff]  }
 0x4ac   :  { %15186 = vmatpush3.bf16.msra.mxu1 %v16575_v35  ;;  %v17045_v16 = vld [vmem:[%s22833_s3 + $0x28] sm:$0xff]   ;;  %v17046_v34 = vld [vmem:[%s22833_s3 + $0x30] sm:$0xff]  }
 0x4ad   :  { %v2623_v19 = vpack.c.bf16 %v13648_v30, %v13645_v48  ;;  %15187 = vmatprep.subr.bf16.mxu1 %v16576_v40  ;;  %v16610_v48 = vld [vmem:[%s22832_s2 + $0x3f0] ss:$8 sps:$4 sm:$0xff]   ;;  %v22962_v30 = vpack.c.bf16 %v18555_v63, %v18553_v11  ;;  %v17043_v11 = vld [vmem:[%s22832_s2 + $0x14] ss:$8 sps:$4 sm:$0xff]   ;;  %v17044_v63 = vld [vmem:[%s22833_s3 + $0x20] sm:$0xff]  }
 0x4af   :  { %v13649_v44 = vpop.f32.mrb[112].mxu1  ;;  %15179 = vmatprep.mubr.msk.bf16.mxu1 %vm1148_vm0, %v2623_v19  ;;  %v17042_v19 = vld [vmem:[%s22832_s2] ss:$8 sps:$4 sm:$0xff]  }
 0x4b0   :  { %v13650_v33 = vpop.f32.mrb[113].mxu1  ;;  %15188 = vmatpush3.bf16.msra.mxu1 %v16576_v40  ;;  %v17041_v40 = vld [vmem:[%s22832_s2 + $0x4] ss:$8 sps:$4 sm:$0xff]  }
 0x4b1   :  { %v13651_v52 = vadd.f32 %v13650_v33, %v13649_v44  ;;  %v13652_v35 = vpop.f32.mrb[114].mxu1  ;;  %15189 = vmatprep.subr.bf16.mxu1 %v16577_v10  ;;  %v16582_v44 = vld [vmem:[%s22833_s3 + $0x140] sm:$0xff]   ;;  %v22966_v33 = vpack.c.bf16 %v18585_v57, %v18583_v51  ;;  %v17052_v57 = vld [vmem:[%s22832_s2 + $0x34] ss:$8 sps:$4 sm:$0xff]  }
 0x4b2   :  { %v13653_v47 = vpop.f32.mrb[115].mxu1  ;;  %4501 = vmatmul.mubr.bf16.gmra.mrb[192].mxu0 %v16610_v48  ;;  %v17051_v51 = vld [vmem:[%s22832_s2 + $0x20] ss:$8 sps:$4 sm:$0xff]   ;;  %v16589_v48 = vld [vmem:[%s22833_s3 + $0x178] sm:$0xff]  }
 0x4b3   :  { %v13654_v5 = vadd.f32 %v13653_v47, %v13652_v35  ;;  %4663 = vmatprep.mubr.bf16.mxu0 %v17041_v40  ;;  %v16584_v35 = vld [vmem:[%s22833_s3 + $0x150] sm:$0xff]   ;;  %v22969_v47 = vpack.c.bf16 %v18609_v46, %v18607_v1  ;;  %v22971_v1 = vpack.c.bf16 %v18621_v55, %v18619_v43  ;;  %v22974_v43 = vpack.c.bf16 %v18639_v38, %v18637_v18 }
 0x4b4   :  { %15190 = vmatpush3.bf16.msra.mxu1 %v16577_v10  ;;  %v22964_v10 = vpack.c.bf16 %v18567_v36, %v18565_v21  ;;  %v17047_v21 = vld [vmem:[%s22832_s2 + $0x10] ss:$8 sps:$4 sm:$0xff]   ;;  %v17048_v36 = vld [vmem:[%s22832_s2 + $0x24] ss:$8 sps:$4 sm:$0xff]   ;;  %v22975_v55 = vpack.c.bf16 %v18645_v45, %v18643_v22 }
 0x4b5   :  { %v2624_v14 = vpack.c.bf16 %v13654_v5, %v13651_v52  ;;  %15199 = vmatprep.subr.bf16.mxu1 %v16578_v23  ;;  %v22967_v52 = vpack.c.bf16 %v18597_v49, %v18595_v13  ;;  %v16585_v13 = vld [vmem:[%s22833_s3 + $0x158] sm:$0xff]   ;;  %v22968_v49 = vpack.c.bf16 %v18603_v3, %v18601_v24  ;;  %v16586_v5 = vld [vmem:[%s22833_s3 + $0x160] sm:$0xff]   ;;  %v16587_v24 = vld [vmem:[%s22833_s3 + $0x168] sm:$0xff]   ;;  %v22970_v3 = vpack.c.bf16 %v18615_v54, %v18613_v50 }
 0x4b6   :  { %v16588_v46 = vld [vmem:[%s22833_s3 + $0x170] sm:$0xff]   ;;  %v22972_v50 = vpack.c.bf16 %v18627_v59, %v18625_v39  ;;  %v22973_v54 = vpack.c.bf16 %v18633_v7, %v18631_v26  ;;  %v22976_v39 = vpack.c.bf16 %v18651_v12, %v18649_v62 }
 0x4b7   :  { %15180 = vmatmul.mubr.msk.bf16.gmra.mrb[80].mxu1 %vm1148_vm0, %v2624_v14  ;;  %v17053_v14 = vld [vmem:[%s22832_s2 + $0x30] ss:$8 sps:$4 sm:$0xff]  }
 0x4b8   :  { %15191 = vmatprep.mubr.msk.bf16.mxu1 %vm1148_vm0, %v22961_v17 }
 0x4ba   :  { %4664 = vmatmul.mubr.bf16.vlgmr.msra.gmra.mrb[196].mxu0 %v17042_v19 }
 0x4bb   :  { %4671 = vmatprep.mubr.bf16.mxu0 %v17043_v11  ;;  %15312 = vmatpush3.bf16.msra.mxu0 %v17044_v63  ;;  %v16614_v63 = vld [vmem:[%s22833_s3 + $0x198] sm:$0xff]  }
 0x4bc   :  { %15313 = vmatprep.subr.bf16.mxu0 %v17045_v16 }
 0x4bf   :  { %15192 = vmatmul.mubr.msk.bf16.vlgmr.msra.gmra.mrb[76].mxu1 %vm1148_vm0, %v22962_v30  ;;  %15314 = vmatpush3.bf16.msra.mxu0 %v17045_v16 }
 0x4c0   :  { %15200 = vmatpush3.bf16.msra.mxu1 %v16578_v23  ;;  %15195 = vmatprep.mubr.msk.bf16.mxu1 %vm1148_vm0, %v22963_v58  ;;  %v18766_v23 = vld [vmem:[%s22833_s3] sm:$0xff]  }
 0x4c1   :  { %15201 = vmatprep.subr.bf16.mxu1 %v16579_v8  ;;  %15315 = vmatprep.subr.bf16.mxu0 %v17046_v34 }
 0x4c2   :  { %4672 = vmatmul.mubr.bf16.gmra.mrb[200].mxu0 %v17047_v21 }
 0x4c3   :  { %4679 = vmatprep.mubr.bf16.mxu0 %v17048_v36  ;;  %15316 = vmatpush3.bf16.msra.mxu0 %v17046_v34 }
 0x4c4   :  { %15202 = vmatpush3.bf16.msra.mxu1 %v16579_v8  ;;  %15317 = vmatprep.subr.bf16.mxu0 %v17049_v27  ;;  %v16613_v8 = vld [vmem:[%s22833_s3 + $0x190] sm:$0xff]  }
 0x4c5   :  { %15203 = vmatprep.subr.bf16.mxu1 %v16580_v41 }
 0x4c7   :  { %15196 = vmatmul.mubr.msk.bf16.gmra.mrb[80].mxu1 %vm1148_vm0, %v22964_v10  ;;  %15318 = vmatpush3.bf16.msra.mxu0 %v17049_v27  ;;  %v18908_v27 = vld [vmem:[%s22833_s3 + $0x1a0] sm:$0xff]  }
 0x4c8   :  { %15204 = vmatpush3.bf16.msra.mxu1 %v16580_v41  ;;  %15207 = vmatprep.mubr.msk.bf16.mxu1 %vm1148_vm0, %v22965_v20 }
 0x4c9   :  { %15205 = vmatprep.subr.bf16.mxu1 %v16581_v42  ;;  %15327 = vmatprep.subr.bf16.mxu0 %v18766_v23 }
 0x4ca   :  { %4680 = vmatmul.mubr.bf16.gmra.mrb[204].mxu0 %v17051_v51 }
 0x4cb   :  { %4687 = vmatprep.mubr.bf16.mxu0 %v17052_v57 }
 0x4cc   :  { %15206 = vmatpush3.bf16.msra.mxu1 %v16581_v42 }
 0x4cd   :  { %15215 = vmatprep.subr.bf16.mxu1 %v16582_v44 }
 0x4cf   :  { %15208 = vmatmul.mubr.msk.bf16.vlgmr.msra.gmra.mrb[76].mxu1 %vm1148_vm0, %v22966_v33 }
 0x4d0   :  { %15216 = vmatpush3.bf16.msra.mxu1 %v16582_v44  ;;  %15211 = vmatprep.mubr.msk.bf16.mxu1 %vm1148_vm0, %v22967_v52 }
 0x4d1   :  { %15217 = vmatprep.subr.bf16.mxu1 %v16583_v6 }
 0x4d2   :  { %4688 = vmatmul.mubr.bf16.gmra.mrb[208].mxu0 %v17053_v14 }
 0x4d4   :  { %15218 = vmatpush3.bf16.msra.mxu1 %v16583_v6 }
 0x4d5   :  { %15219 = vmatprep.subr.bf16.mxu1 %v16584_v35 }
 0x4d7   :  { %15212 = vmatmul.mubr.msk.bf16.gmra.mrb[80].mxu1 %vm1148_vm0, %v22968_v49 }
 0x4d8   :  { %15220 = vmatpush3.bf16.msra.mxu1 %v16584_v35  ;;  %15223 = vmatprep.mubr.msk.bf16.mxu1 %vm1148_vm0, %v22969_v47 }
 0x4d9   :  { %15221 = vmatprep.subr.bf16.mxu1 %v16585_v13 }
 0x4dc   :  { %15222 = vmatpush3.bf16.msra.mxu1 %v16585_v13 }
 0x4dd   :  { %15231 = vmatprep.subr.bf16.mxu1 %v16586_v5 }
 0x4df   :  { %15224 = vmatmul.mubr.msk.bf16.vlgmr.msra.gmra.mrb[76].mxu1 %vm1148_vm0, %v22970_v3 }
 0x4e0   :  { %15232 = vmatpush3.bf16.msra.mxu1 %v16586_v5  ;;  %15227 = vmatprep.mubr.msk.bf16.mxu1 %vm1148_vm0, %v22971_v1 }
 0x4e1   :  { %15233 = vmatprep.subr.bf16.mxu1 %v16587_v24 }
 0x4e4   :  { %15234 = vmatpush3.bf16.msra.mxu1 %v16587_v24 }
 0x4e5   :  { %15235 = vmatprep.subr.bf16.mxu1 %v16588_v46 }
 0x4e7   :  { %15228 = vmatmul.mubr.msk.bf16.gmra.mrb[80].mxu1 %vm1148_vm0, %v22972_v50 }
 0x4e8   :  { %15236 = vmatpush3.bf16.msra.mxu1 %v16588_v46  ;;  %15239 = vmatprep.mubr.msk.bf16.mxu1 %vm1148_vm0, %v22973_v54 }
 0x4e9   :  { %15237 = vmatprep.subr.bf16.mxu1 %v16589_v48 }
 0x4ec   :  { %15238 = vmatpush3.bf16.msra.mxu1 %v16589_v48 }
 0x4ed   :  { %13855 = vmatprep.subr.bf16.mxu1 %v17610_v31  ;;  %v16592_v31 = vld [vmem:[%s22832_s2 + $0x304] ss:$8 sps:$4 sm:$0xff]  }
 0x4ef   :  { %15240 = vmatmul.mubr.msk.bf16.vlgmr.msra.gmra.mrb[76].mxu1 %vm1148_vm0, %v22974_v43 }
 0x4f0   :  { %13856 = vmatpush3.bf16.msra.mxu1 %v17579_v0  ;;  %15243 = vmatprep.mubr.msk.bf16.mxu1 %vm1148_vm0, %v22975_v55  ;;  %v16590_v0 = vld [vmem:[%s22832_s2 + $0x300] ss:$8 sps:$4 sm:$0xff]  }
 0x4f1   :  { %13857 = vmatprep.subr.bf16.mxu1 %v17608_v29 }
 0x4f4   :  { %13858 = vmatpush3.bf16.msra.mxu1 %v17577_v61  ;;  %v16611_v61 = vld [vmem:[%s22833_s3 + $0x180] sm:$0xff]  }
 0x4f5   :  { %13859 = vmatprep.subr.bf16.mxu1 %v17584_v9  ;;  %v16593_v9 = vld [vmem:[%s22832_s2 + $0x314] ss:$8 sps:$4 sm:$0xff]  }
 0x4f7   :  { %15244 = vmatmul.mubr.msk.bf16.gmra.mrb[80].mxu1 %vm1148_vm0, %v22976_v39 }
 0x4f8   :  { %13860 = vmatpush3.bf16.msra.mxu1 %v17588_v28  ;;  %3768 = vmatprep.mubr.bf16.mxu1 %v16592_v31  ;;  %v16595_v28 = vld [vmem:[%s22832_s2 + $0x310] ss:$8 sps:$4 sm:$0xff]  }
 0x4f9   :  { %13861 = vmatprep.subr.bf16.mxu1 %v17582_v4  ;;  %v22977_v4 = vld [vmem:[#allocation2_spill] sm:$0xff] }
 0x4fc   :  { %13862 = vmatpush3.bf16.msra.mxu1 %v17586_v25  ;;  %v16612_v25 = vld [vmem:[%s22833_s3 + $0x188] sm:$0xff]  }
 0x4fd   :  { %13863 = vmatprep.subr.bf16.mxu1 %v17593_v37  ;;  %v16598_v37 = vld [vmem:[%s22832_s2 + $0x320] ss:$8 sps:$4 sm:$0xff]  }
 0x500   :  { %13864 = vmatpush3.bf16.msra.mxu1 %v17597_v56  ;;  %v16601_v56 = vld [vmem:[%s22832_s2 + $0x330] ss:$8 sps:$4 sm:$0xff]  }
 0x501   :  { %13865 = vmatprep.subr.bf16.mxu1 %v17591_v32  ;;  %v16596_v32 = vld [vmem:[%s22832_s2 + $0x324] ss:$8 sps:$4 sm:$0xff]  }
 0x504   :  { %13866 = vmatpush3.bf16.msra.mxu1 %v17595_v53  ;;  %v16599_v53 = vld [vmem:[%s22832_s2 + $0x334] ss:$8 sps:$4 sm:$0xff]  }
 0x505   :  { %13867 = vmatprep.subr.bf16.mxu1 %v17602_v2 }
 0x508   :  { %13868 = vmatpush3.bf16.msra.mxu1 %v17606_v15 }
 0x509   :  { %13869 = vmatprep.subr.bf16.mxu1 %v17600_v60  ;;  %v13919_v60 = vpop.f32.mrb[148].mxu0 }
 0x50a   :  { %v13920_v2 = vpop.f32.mrb[149].mxu0 }
 0x50b   :  { %v13922_v15 = vpop.f32.mrb[150].mxu0  ;;  %v18875_v12 = vadd.f32 %v13920_v2, %v13919_v60 }
 0x50c   :  { %13870 = vmatpush3.bf16.msra.mxu1 %v22977_v4  ;;  %v13923_v29 = vpop.f32.mrb[151].mxu0 }
 0x50d   :  { %15247 = vmatprep.subr.bf16.mxu1 %v16611_v61  ;;  %v18877_v59 = vadd.f32 %v13923_v29, %v13922_v15  ;;  %v13925_v7 = vpop.f32.mrb[152].mxu0 }
 0x50e   :  { %v13926_v18 = vpop.f32.mrb[153].mxu0 }
 0x50f   :  { %3769 = vmatmul.mubr.bf16.vlgmr.msra.gmra.mrb[116].mxu1 %v16590_v0  ;;  %v4037_v26 = vpack.c.bf16 %v18877_v59, %v18875_v12  ;;  %v13928_v38 = vpop.f32.mrb[154].mxu0  ;;  %v18881_v45 = vadd.f32 %v13926_v18, %v13925_v7  ;;  %v16621_v12 = vld [vmem:[%s22833_s3 + $0x1d0] sm:$0xff]   ;;  %v16622_v59 = vld [vmem:[%s22833_s3 + $0x1d8] sm:$0xff]  }
 0x510   :  { %3776 = vmatprep.mubr.bf16.mxu1 %v16593_v9  ;;  %15248 = vmatpush3.bf16.msra.mxu1 %v16611_v61  ;;  %v13929_v22 = vpop.f32.mrb[155].mxu0 }
 0x511   :  { %15249 = vmatprep.subr.bf16.mxu1 %v16612_v25  ;;  %v18883_v62 = vadd.f32 %v13929_v22, %v13928_v38  ;;  %v13931_v40 = vpop.f32.mrb[156].mxu0 }
 0x512   :  { %v13932_v30 = vpop.f32.mrb[157].mxu0 }
 0x513   :  { %v4038_v17 = vpack.c.bf16 %v18883_v62, %v18881_v45  ;;  %v13934_v58 = vpop.f32.mrb[158].mxu0  ;;  %v18890_v19 = vadd.f32 %v13932_v30, %v13931_v40  ;;  %v16624_v45 = vld [vmem:[%s22833_s3 + $0x1e8] sm:$0xff]   ;;  %v16625_v62 = vld [vmem:[%s22833_s3 + $0x1f0] sm:$0xff]  }
 0x514   :  { %15250 = vmatpush3.bf16.msra.mxu1 %v16612_v25  ;;  %v13935_v41 = vpop.f32.mrb[159].mxu0 }
 0x515   :  { %15251 = vmatprep.subr.bf16.mxu1 %v16613_v8  ;;  %v18892_v11 = vadd.f32 %v13935_v41, %v13934_v58  ;;  %v13937_v42 = vpop.f32.mrb[160].mxu0 }
 0x516   :  { %v13938_v10 = vpop.f32.mrb[161].mxu0 }
 0x517   :  { %3777 = vmatmul.mubr.bf16.gmra.mrb[120].mxu1 %v16595_v28  ;;  %v4039_v16 = vpack.c.bf16 %v18892_v11, %v18890_v19  ;;  %v13940_v20 = vpop.f32.mrb[162].mxu0  ;;  %v18899_v34 = vadd.f32 %v13938_v10, %v13937_v42  ;;  %v22978_v19 = vld [vmem:[#allocation12_spill] sm:$0xff] }
 0x518   :  { %3784 = vmatprep.mubr.bf16.mxu1 %v16596_v32  ;;  %15252 = vmatpush3.bf16.msra.mxu1 %v16613_v8  ;;  %v13941_v44 = vpop.f32.mrb[163].mxu0  ;;  %v22979_v11 = vld [vmem:[#allocation4_spill] sm:$0xff] }
 0x519   :  { %15253 = vmatprep.subr.bf16.mxu1 %v16614_v63  ;;  %v18901_v21 = vadd.f32 %v13941_v44, %v13940_v20  ;;  %v13967_v6 = vpop.f32.mrb[164].mxu0 }
 0x51a   :  { %v13968_v33 = vpop.f32.mrb[165].mxu0 }
 0x51b   :  { %v4040_v36 = vpack.c.bf16 %v18901_v21, %v18899_v34  ;;  %v13970_v52 = vpop.f32.mrb[166].mxu0  ;;  %v18911_v51 = vadd.f32 %v13968_v33, %v13967_v6  ;;  %v22981_v34 = vld [vmem:[#allocation3_spill] sm:$0xff]  ;;  %v22982_v21 = vld [vmem:[#allocation14_spill] sm:$0xff] }
 0x51c   :  { %15254 = vmatpush3.bf16.msra.mxu1 %v16614_v63  ;;  %v13971_v35 = vpop.f32.mrb[167].mxu0 }
 0x51d   :  { %15263 = vmatprep.subr.bf16.mxu1 %v18908_v27  ;;  %v18913_v57 = vadd.f32 %v13971_v35, %v13970_v52  ;;  %v13973_v49 = vpop.f32.mrb[168].mxu0 }
 0x51e   :  { %v13974_v47 = vpop.f32.mrb[169].mxu0 }
 0x51f   :  { %3785 = vmatmul.mubr.bf16.gmra.mrb[124].mxu1 %v16598_v37  ;;  %v4273_v13 = vpack.c.bf16 %v18913_v57, %v18911_v51  ;;  %v13976_v5 = vpop.f32.mrb[170].mxu0  ;;  %v18917_v24 = vadd.f32 %v13974_v47, %v13973_v49  ;;  %v17054_v51 = vld [vmem:[%s22832_s2 + $0x44] ss:$8 sps:$4 sm:$0xff]   ;;  %v22984_v57 = vld [vmem:[#allocation13_spill] sm:$0xff] }
 0x520   :  { %3792 = vmatprep.mubr.bf16.mxu1 %v16599_v53  ;;  %v13977_v14 = vpop.f32.mrb[171].mxu0 }
 0x521   :  { %v18919_v3 = vadd.f32 %v13977_v14, %v13976_v5  ;;  %v13979_v46 = vpop.f32.mrb[172].mxu0 }
 0x522   :  { %v13980_v48 = vpop.f32.mrb[173].mxu0 }
 0x523   :  { %v4274_v1 = vpack.c.bf16 %v18919_v3, %v18917_v24  ;;  %v13982_v50 = vpop.f32.mrb[174].mxu0  ;;  %v18923_v43 = vadd.f32 %v13980_v48, %v13979_v46  ;;  %v22986_v24 = vld [vmem:[#allocation16_spill] sm:$0xff] }
 0x524   :  { %v13983_v54 = vpop.f32.mrb[175].mxu0  ;;  %v22987_v3 = vld [vmem:[#allocation8_spill] sm:$0xff] }
 0x525   :  { %v18925_v55 = vadd.f32 %v13983_v54, %v13982_v50  ;;  %v13985_v39 = vpop.f32.mrb[176].mxu0 }
 0x526   :  { %v13986_v61 = vpop.f32.mrb[177].mxu0 }
 0x527   :  { %3793 = vmatmul.mubr.bf16.gmra.mrb[128].mxu1 %v16601_v56  ;;  %v4275_v31 = vpack.c.bf16 %v18925_v55, %v18923_v43  ;;  %v13988_v0 = vpop.f32.mrb[178].mxu0  ;;  %v18929_v9 = vadd.f32 %v13986_v61, %v13985_v39  ;;  %v22989_v43 = vld [vmem:[#allocation7_spill] sm:$0xff]  ;;  %v22990_v55 = vld [vmem:[#allocation18_spill] sm:$0xff] }
 0x528   :  { %v13989_v4 = vpop.f32.mrb[179].mxu0 }
 0x529   :  { %v18931_v25 = vadd.f32 %v13989_v4, %v13988_v0  ;;  %v14015_v32 = vpop.f32.mrb[180].mxu0 }
 0x52a   :  { %v14016_v37 = vpop.f32.mrb[181].mxu0 }
 0x52b   :  { %v4276_v28 = vpack.c.bf16 %v18931_v25, %v18929_v9  ;;  %v14018_v53 = vpop.f32.mrb[182].mxu0  ;;  %v18935_v60 = vadd.f32 %v14016_v37, %v14015_v32  ;;  %v22992_v9 = vld [vmem:[#allocation17_spill] sm:$0xff] }
 0x52c   :  { %v14019_v56 = vpop.f32.mrb[183].mxu0  ;;  %v22993_v25 = vld [vmem:[#allocation9_spill] sm:$0xff] }
 0x52d   :  { %v18937_v2 = vadd.f32 %v14019_v56, %v14018_v53 }
 0x52f   :  { %v4509_v15 = vpack.c.bf16 %v18937_v2, %v18935_v60  ;;  %v17056_v60 = vld [vmem:[%s22832_s2 + $0x54] ss:$8 sps:$4 sm:$0xff]   ;;  %v17057_v2 = vld [vmem:[%s22832_s2 + $0x50] ss:$8 sps:$4 sm:$0xff]  }
 0x573   :  { %v14021_v29 = vpop.f32.mrb[184].mxu0 }
 0x574   :  { %v14022_v7 = vpop.f32.mrb[185].mxu0 }
 0x575   :  { %v14024_v18 = vpop.f32.mrb[186].mxu0  ;;  %v18941_v38 = vadd.f32 %v14022_v7, %v14021_v29  ;;  %v16616_v29 = vld [vmem:[%s22833_s3 + $0x1a8] sm:$0xff]  }
 0x576   :  { %v14025_v22 = vpop.f32.mrb[187].mxu0 }
 0x577   :  { %v18943_v40 = vadd.f32 %v14025_v22, %v14024_v18 }
 0x579   :  { %v4510_v30 = vpack.c.bf16 %v18943_v40, %v18941_v38  ;;  %v17059_v38 = vld [vmem:[%s22832_s2 + $0x60] ss:$8 sps:$4 sm:$0xff]   ;;  %v17060_v40 = vld [vmem:[%s22832_s2 + $0x74] ss:$8 sps:$4 sm:$0xff]  }
 0x57d   :  { %v14027_v8 = vpop.f32.mrb[188].mxu0 }
 0x57e   :  { %v14028_v58 = vpop.f32.mrb[189].mxu0 }
 0x57f   :  { %v18947_v41 = vadd.f32 %v14028_v58, %v14027_v8  ;;  %v14030_v63 = vpop.f32.mrb[190].mxu0  ;;  %v16617_v58 = vld [vmem:[%s22833_s3 + $0x1b0] sm:$0xff]  }
 0x580   :  { %v14031_v42 = vpop.f32.mrb[191].mxu0 }
 0x581   :  { %v18949_v10 = vadd.f32 %v14031_v42, %v14030_v63 }
 0x583   :  { %v4511_v6 = vpack.c.bf16 %v18949_v10, %v18947_v41  ;;  %v17062_v41 = vld [vmem:[%s22832_s2 + $0x84] ss:$8 sps:$4 sm:$0xff]   ;;  %v17063_v10 = vld [vmem:[%s22832_s2 + $0x80] ss:$8 sps:$4 sm:$0xff]  }
 0x585   :  { %v14033_v20 = vpop.f32.mrb[192].mxu0 }
 0x586   :  { %v14034_v44 = vpop.f32.mrb[193].mxu0 }
 0x587   :  { %v18953_v33 = vadd.f32 %v14034_v44, %v14033_v20  ;;  %v14036_v52 = vpop.f32.mrb[194].mxu0  ;;  %v16618_v44 = vld [vmem:[%s22833_s3 + $0x1b8] sm:$0xff]  }
 0x588   :  { %v14037_v35 = vpop.f32.mrb[195].mxu0 }
 0x589   :  { %v18955_v49 = vadd.f32 %v14037_v35, %v14036_v52 }
 0x58b   :  { %v4512_v47 = vpack.c.bf16 %v18955_v49, %v18953_v33  ;;  %v17065_v33 = vld [vmem:[%s22832_s2 + $0x90] ss:$8 sps:$4 sm:$0xff]   ;;  %v17066_v49 = vld [vmem:[%s22832_s2 + $0xa4] ss:$8 sps:$4 sm:$0xff]  }
 0x5e2   :  { %v13871_v5 = vpop.f32.mrb[116].mxu1 }
 0x5e3   :  { %v13872_v14 = vpop.f32.mrb[117].mxu1 }
 0x5e4   :  { %v13873_v46 = vadd.f32 %v13872_v14, %v13871_v5  ;;  %v13874_v48 = vpop.f32.mrb[118].mxu1  ;;  %v16619_v14 = vld [vmem:[%s22833_s3 + $0x1c0] sm:$0xff]  }
 0x5e5   :  { %v13875_v50 = vpop.f32.mrb[119].mxu1 }
 0x5e6   :  { %v13876_v54 = vadd.f32 %v13875_v50, %v13874_v48 }
 0x5e8   :  { %v3801_v39 = vpack.c.bf16 %v13876_v54, %v13873_v46  ;;  %v16620_v54 = vld [vmem:[%s22833_s3 + $0x1c8] sm:$0xff]  }
 0x5ea   :  { %v13877_v61 = vpop.f32.mrb[120].mxu1  ;;  %15255 = vmatprep.mubr.msk.bf16.mxu1 %vm1148_vm0, %v3801_v39  ;;  %v17068_v39 = vld [vmem:[%s22832_s2 + $0xb4] ss:$8 sps:$4 sm:$0xff]  }
 0x5eb   :  { %v13878_v0 = vpop.f32.mrb[121].mxu1 }
 0x5ec   :  { %v13879_v4 = vadd.f32 %v13878_v0, %v13877_v61  ;;  %v13880_v32 = vpop.f32.mrb[122].mxu1  ;;  %v17069_v61 = vld [vmem:[%s22832_s2 + $0xb0] ss:$8 sps:$4 sm:$0xff]   ;;  %v17070_v0 = vld [vmem:[%s22832_s2 + $0xc4] ss:$8 sps:$4 sm:$0xff]  }
 0x5ed   :  { %v13881_v37 = vpop.f32.mrb[123].mxu1 }
 0x5ee   :  { %v13882_v53 = vadd.f32 %v13881_v37, %v13880_v32  ;;  %v17072_v32 = vld [vmem:[%s22832_s2 + $0xd4] ss:$8 sps:$4 sm:$0xff]   ;;  %v17073_v37 = vld [vmem:[%s22832_s2 + $0xd0] ss:$8 sps:$4 sm:$0xff]  }
 0x5f0   :  { %v3802_v56 = vpack.c.bf16 %v13882_v53, %v13879_v4  ;;  %v17071_v4 = vld [vmem:[%s22832_s2 + $0xc0] ss:$8 sps:$4 sm:$0xff]   ;;  %v17074_v53 = vld [vmem:[%s22832_s2 + $0xe4] ss:$8 sps:$4 sm:$0xff]  }
 0x5f2   :  { %v13883_v7 = vpop.f32.mrb[124].mxu1  ;;  %15256 = vmatmul.mubr.msk.bf16.vlgmr.msra.gmra.mrb[76].mxu1 %vm1148_vm0, %v3802_v56  ;;  %v17075_v56 = vld [vmem:[%s22832_s2 + $0xe0] ss:$8 sps:$4 sm:$0xff]  }
 0x5f3   :  { %v13884_v18 = vpop.f32.mrb[125].mxu1  ;;  %15264 = vmatpush3.bf16.msra.mxu1 %v18908_v27 }
 0x5f4   :  { %v13885_v22 = vadd.f32 %v13884_v18, %v13883_v7  ;;  %v13886_v8 = vpop.f32.mrb[126].mxu1  ;;  %15265 = vmatprep.subr.bf16.mxu1 %v16616_v29  ;;  %v17077_v7 = vld [vmem:[%s22832_s2 + $0xf0] ss:$8 sps:$4 sm:$0xff]   ;;  %v17078_v18 = vld [vmem:[%s22832_s2 + $0x104] ss:$8 sps:$4 sm:$0xff]  }
 0x5f5   :  { %v13887_v63 = vpop.f32.mrb[127].mxu1 }
 0x5f6   :  { %v13888_v42 = vadd.f32 %v13887_v63, %v13886_v8  ;;  %v17080_v8 = vld [vmem:[%s22832_s2 + $0x114] ss:$8 sps:$4 sm:$0xff]   ;;  %v17082_v63 = vld [vmem:[%s22832_s2 + $0x124] ss:$8 sps:$4 sm:$0xff]  }
 0x5f7   :  { %15266 = vmatpush3.bf16.msra.mxu1 %v16616_v29  ;;  %v17076_v29 = vld [vmem:[%s22832_s2 + $0xf4] ss:$8 sps:$4 sm:$0xff]  }
 0x5f8   :  { %v3803_v20 = vpack.c.bf16 %v13888_v42, %v13885_v22  ;;  %15267 = vmatprep.subr.bf16.mxu1 %v16617_v58  ;;  %v17079_v22 = vld [vmem:[%s22832_s2 + $0x100] ss:$8 sps:$4 sm:$0xff]   ;;  %v14063_v42 = vpop.f32.mrb[196].mxu0 }
 0x5fa   :  { %v13889_v52 = vpop.f32.mrb[128].mxu1  ;;  %15259 = vmatprep.mubr.msk.bf16.mxu1 %vm1148_vm0, %v3803_v20  ;;  %v17083_v20 = vld [vmem:[%s22832_s2 + $0x120] ss:$8 sps:$4 sm:$0xff]  }
 0x5fb   :  { %v13890_v27 = vpop.f32.mrb[129].mxu1  ;;  %15268 = vmatpush3.bf16.msra.mxu1 %v16617_v58  ;;  %v17081_v58 = vld [vmem:[%s22832_s2 + $0x110] ss:$8 sps:$4 sm:$0xff]  }
 0x5fc   :  { %v13891_v35 = vadd.f32 %v13890_v27, %v13889_v52  ;;  %v13892_v5 = vpop.f32.mrb[130].mxu1  ;;  %15269 = vmatprep.subr.bf16.mxu1 %v16618_v44  ;;  %v17084_v52 = vld [vmem:[%s22832_s2 + $0x134] ss:$8 sps:$4 sm:$0xff]  }
 0x5fd   :  { %v13893_v46 = vpop.f32.mrb[131].mxu1 }
 0x5fe   :  { %v13894_v48 = vadd.f32 %v13893_v46, %v13892_v5 }
 0x5ff   :  { %15270 = vmatpush3.bf16.msra.mxu1 %v16618_v44  ;;  %v14064_v44 = vpop.f32.mrb[197].mxu0 }
 0x600   :  { %v3804_v50 = vpack.c.bf16 %v13894_v48, %v13891_v35  ;;  %15279 = vmatprep.subr.bf16.mxu1 %v16619_v14  ;;  %v14066_v27 = vpop.f32.mrb[198].mxu0  ;;  %v19215_v48 = vadd.f32 %v14064_v44, %v14063_v42 }
 0x601   :  { %v14067_v35 = vpop.f32.mrb[199].mxu0 }
 0x602   :  { %15260 = vmatmul.mubr.msk.bf16.gmra.mrb[80].mxu1 %vm1148_vm0, %v3804_v50  ;;  %v14069_v5 = vpop.f32.mrb[200].mxu0  ;;  %v19217_v50 = vadd.f32 %v14067_v35, %v14066_v27 }
 0x603   :  { %15271 = vmatprep.mubr.msk.bf16.mxu1 %vm1148_vm0, %v4037_v26  ;;  %v16623_v26 = vld [vmem:[%s22833_s3 + $0x1e0] sm:$0xff]  }
 0x60a   :  { %15272 = vmatmul.mubr.msk.bf16.vlgmr.msra.gmra.mrb[76].mxu1 %vm1148_vm0, %v4038_v17  ;;  %v16626_v17 = vld [vmem:[%s22833_s3 + $0x1f8] sm:$0xff]  }
 0x60b   :  { %15280 = vmatpush3.bf16.msra.mxu1 %v16619_v14  ;;  %15275 = vmatprep.mubr.msk.bf16.mxu1 %vm1148_vm0, %v4039_v16  ;;  %v22980_v16 = vld [vmem:[#allocation11_spill] sm:$0xff]  ;;  %v14070_v14 = vpop.f32.mrb[201].mxu0 }
 0x60c   :  { %15281 = vmatprep.subr.bf16.mxu1 %v16620_v54  ;;  %v14072_v46 = vpop.f32.mrb[202].mxu0 }
 0x60f   :  { %15282 = vmatpush3.bf16.msra.mxu1 %v16620_v54  ;;  %v14073_v54 = vpop.f32.mrb[203].mxu0 }
 0x610   :  { %15283 = vmatprep.subr.bf16.mxu1 %v16621_v12 }
 0x612   :  { %15276 = vmatmul.mubr.msk.bf16.gmra.mrb[80].mxu1 %vm1148_vm0, %v4040_v36  ;;  %v22983_v36 = vld [vmem:[#allocation6_spill] sm:$0xff] }
 0x613   :  { %15284 = vmatpush3.bf16.msra.mxu1 %v16621_v12  ;;  %15287 = vmatprep.mubr.msk.bf16.mxu1 %vm1148_vm0, %v4273_v13  ;;  %v22985_v13 = vld [vmem:[#allocation5_spill] sm:$0xff]  ;;  %v19219_v12 = vadd.f32 %v14070_v14, %v14069_v5 }
 0x614   :  { %15285 = vmatprep.subr.bf16.mxu1 %v16622_v59  ;;  %v17101_v5 = vld [vmem:[%s22832_s2 + $0x1f0] ss:$8 sps:$4 sm:$0xff]  }
 0x617   :  { %15286 = vmatpush3.bf16.msra.mxu1 %v16622_v59  ;;  %v19221_v59 = vadd.f32 %v14073_v54, %v14072_v46 }
 0x618   :  { %15295 = vmatprep.subr.bf16.mxu1 %v16623_v26 }
 0x61a   :  { %15288 = vmatmul.mubr.msk.bf16.vlgmr.msra.gmra.mrb[76].mxu1 %vm1148_vm0, %v4274_v1  ;;  %v22988_v1 = vld [vmem:[#allocation15_spill] sm:$0xff] }
 0x61b   :  { %15296 = vmatpush3.bf16.msra.mxu1 %v16623_v26  ;;  %15291 = vmatprep.mubr.msk.bf16.mxu1 %vm1148_vm0, %v4275_v31  ;;  %v22991_v31 = vld [vmem:[#allocation10_spill] sm:$0xff]  ;;  %v14075_v26 = vpop.f32.mrb[204].mxu0 }
 0x61c   :  { %15297 = vmatprep.subr.bf16.mxu1 %v16624_v45 }
 0x61f   :  { %15298 = vmatpush3.bf16.msra.mxu1 %v16624_v45  ;;  %v17085_v45 = vld [vmem:[%s22832_s2 + $0x130] ss:$8 sps:$4 sm:$0xff]  }
 0x620   :  { %15299 = vmatprep.subr.bf16.mxu1 %v16625_v62 }
 0x622   :  { %15292 = vmatmul.mubr.msk.bf16.gmra.mrb[80].mxu1 %vm1148_vm0, %v4276_v28  ;;  %v17055_v28 = vld [vmem:[%s22832_s2 + $0x40] ss:$8 sps:$4 sm:$0xff]  }
 0x623   :  { %15300 = vmatpush3.bf16.msra.mxu1 %v16625_v62  ;;  %15303 = vmatprep.mubr.msk.bf16.mxu1 %vm1148_vm0, %v4509_v15  ;;  %v17058_v15 = vld [vmem:[%s22832_s2 + $0x64] ss:$8 sps:$4 sm:$0xff]   ;;  %v4696_v62 = vpack.c.bf16 %v19217_v50, %v19215_v48 }
 0x624   :  { %15301 = vmatprep.subr.bf16.mxu1 %v16626_v17  ;;  %v17122_v48 = vld [vmem:[%s22832_s2 + $0x2c4] ss:$8 sps:$4 sm:$0xff]  }
 0x627   :  { %15302 = vmatpush3.bf16.msra.mxu1 %v16626_v17  ;;  %v14076_v17 = vpop.f32.mrb[205].mxu0 }
 0x628   :  { %14087 = vmatprep.subr.bf16.mxu1 %v22978_v19 }
 0x62a   :  { %15304 = vmatmul.mubr.msk.bf16.vlgmr.msra.gmra.mrb[76].mxu1 %vm1148_vm0, %v4510_v30  ;;  %v17061_v30 = vld [vmem:[%s22832_s2 + $0x70] ss:$8 sps:$4 sm:$0xff]  }
 0x62b   :  { %14088 = vmatpush3.bf16.msra.mxu1 %v22979_v11  ;;  %15307 = vmatprep.mubr.msk.bf16.mxu1 %vm1148_vm0, %v4511_v6  ;;  %v17064_v6 = vld [vmem:[%s22832_s2 + $0x94] ss:$8 sps:$4 sm:$0xff]  }
 0x62c   :  { %14089 = vmatprep.subr.bf16.mxu1 %v22980_v16 }
 0x62f   :  { %14090 = vmatpush3.bf16.msra.mxu1 %v22981_v34 }
 0x630   :  { %14091 = vmatprep.subr.bf16.mxu1 %v22982_v21 }
 0x632   :  { %15308 = vmatmul.mubr.msk.bf16.gmra.mrb[80].mxu1 %vm1148_vm0, %v4512_v47  ;;  %v17067_v47 = vld [vmem:[%s22832_s2 + $0xa0] ss:$8 sps:$4 sm:$0xff]  }
 0x633   :  { %14092 = vmatpush3.bf16.msra.mxu1 %v22983_v36  ;;  %4732 = vmatprep.mubr.bf16.mxu1 %v17054_v51  ;;  %v17086_v51 = vld [vmem:[%s22832_s2 + $0x184] ss:$8 sps:$4 sm:$0xff]  }
 0x634   :  { %14093 = vmatprep.subr.bf16.mxu1 %v22984_v57 }
 0x637   :  { %14094 = vmatpush3.bf16.msra.mxu1 %v22985_v13 }
 0x638   :  { %14095 = vmatprep.subr.bf16.mxu1 %v22986_v24 }
 0x63b   :  { %14096 = vmatpush3.bf16.msra.mxu1 %v22987_v3 }
 0x63c   :  { %14097 = vmatprep.subr.bf16.mxu1 %v22988_v1 }
 0x63f   :  { %14098 = vmatpush3.bf16.msra.mxu1 %v22989_v43 }
 0x640   :  { %14099 = vmatprep.subr.bf16.mxu1 %v22990_v55 }
 0x643   :  { %14100 = vmatpush3.bf16.msra.mxu1 %v22991_v31 }
 0x644   :  { %14101 = vmatprep.subr.bf16.mxu1 %v22992_v9 }
 0x647   :  { %14102 = vmatpush3.bf16.msra.mxu1 %v22993_v25 }
 0x648   :  { %14143 = vmatprep.subr.bf16.mxu1 %v22978_v19 }
 0x64a   :  { %4733 = vmatmul.mubr.bf16.vlgmr.msra.gmra.mrb[132].mxu1 %v17055_v28  ;;  %v4697_v28 = vpack.c.bf16 %v19221_v59, %v19219_v12 }
 0x64b   :  { %14144 = vmatpush3.bf16.msra.mxu1 %v22979_v11  ;;  %4740 = vmatprep.mubr.bf16.mxu1 %v17056_v60  ;;  %v14078_v60 = vpop.f32.mrb[206].mxu0 }
 0x64c   :  { %14145 = vmatprep.subr.bf16.mxu1 %v22980_v16 }
 0x64f   :  { %14146 = vmatpush3.bf16.msra.mxu1 %v22981_v34 }
 0x650   :  { %14147 = vmatprep.subr.bf16.mxu1 %v22982_v21 }
 0x652   :  { %4741 = vmatmul.mubr.bf16.gmra.mrb[136].mxu1 %v17057_v2  ;;  %v14079_v2 = vpop.f32.mrb[207].mxu0 }
 0x653   :  { %14148 = vmatpush3.bf16.msra.mxu1 %v22983_v36  ;;  %4748 = vmatprep.mubr.bf16.mxu1 %v17058_v15  ;;  %v14081_v15 = vpop.f32.mrb[208].mxu0 }
 0x654   :  { %14149 = vmatprep.subr.bf16.mxu1 %v22984_v57 }
 0x657   :  { %14150 = vmatpush3.bf16.msra.mxu1 %v22985_v13 }
 0x658   :  { %14151 = vmatprep.subr.bf16.mxu1 %v22986_v24 }
 0x65a   :  { %4749 = vmatmul.mubr.bf16.gmra.mrb[140].mxu1 %v17059_v38  ;;  %v14082_v38 = vpop.f32.mrb[209].mxu0 }
 0x65b   :  { %14152 = vmatpush3.bf16.msra.mxu1 %v22987_v3  ;;  %4756 = vmatprep.mubr.bf16.mxu1 %v17060_v40  ;;  %v14084_v40 = vpop.f32.mrb[210].mxu0 }
 0x65c   :  { %14153 = vmatprep.subr.bf16.mxu1 %v22988_v1 }
 0x65f   :  { %14154 = vmatpush3.bf16.msra.mxu1 %v22989_v43 }
 0x660   :  { %14155 = vmatprep.subr.bf16.mxu1 %v22990_v55 }
 0x662   :  { %4757 = vmatmul.mubr.bf16.gmra.mrb[144].mxu1 %v17061_v30  ;;  %v19237_v30 = vadd.f32 %v14076_v17, %v14075_v26  ;;  %v17102_v26 = vld [vmem:[%s22832_s2 + $0x204] ss:$8 sps:$4 sm:$0xff]  }
 0x663   :  { %14156 = vmatpush3.bf16.msra.mxu1 %v22991_v31  ;;  %4955 = vmatprep.mubr.bf16.mxu1 %v17062_v41  ;;  %v19239_v41 = vadd.f32 %v14079_v2, %v14078_v60 }
 0x664   :  { %14157 = vmatprep.subr.bf16.mxu1 %v22992_v9 }
 0x667   :  { %14158 = vmatpush3.bf16.msra.mxu1 %v22993_v25 }
 0x668   :  { %14191 = vmatprep.subr.bf16.mxu1 %v22978_v19 }
 0x66a   :  { %4956 = vmatmul.mubr.bf16.vlgmr.msra.gmra.mrb[148].mxu1 %v17063_v10  ;;  %v14085_v10 = vpop.f32.mrb[211].mxu0 }
 0x66b   :  { %14192 = vmatpush3.bf16.msra.mxu1 %v22979_v11  ;;  %4963 = vmatprep.mubr.bf16.mxu1 %v17064_v6  ;;  %v19241_v6 = vadd.f32 %v14082_v38, %v14081_v15 }
 0x66c   :  { %14193 = vmatprep.subr.bf16.mxu1 %v22980_v16 }
 0x66f   :  { %14194 = vmatpush3.bf16.msra.mxu1 %v22981_v34 }
 0x670   :  { %14195 = vmatprep.subr.bf16.mxu1 %v22982_v21 }
 0x672   :  { %4964 = vmatmul.mubr.bf16.gmra.mrb[152].mxu1 %v17065_v33  ;;  %v19243_v33 = vadd.f32 %v14085_v10, %v14084_v40 }
 0x673   :  { %14196 = vmatpush3.bf16.msra.mxu1 %v22983_v36  ;;  %4971 = vmatprep.mubr.bf16.mxu1 %v17066_v49  ;;  %v17087_v49 = vld [vmem:[%s22832_s2 + $0x180] ss:$8 sps:$4 sm:$0xff]  }
 0x674   :  { %14197 = vmatprep.subr.bf16.mxu1 %v22984_v57 }
 0x677   :  { %14198 = vmatpush3.bf16.msra.mxu1 %v22985_v13 }
 0x678   :  { %14199 = vmatprep.subr.bf16.mxu1 %v22986_v24 }
 0x67a   :  { %4972 = vmatmul.mubr.bf16.gmra.mrb[156].mxu1 %v17067_v47  ;;  %v4698_v47 = vpack.c.bf16 %v19239_v41, %v19237_v30  ;;  %v17125_v30 = vld [vmem:[%s22832_s2 + $0x2d4] ss:$8 sps:$4 sm:$0xff]  }
 0x67b   :  { %14200 = vmatpush3.bf16.msra.mxu1 %v22987_v3  ;;  %4979 = vmatprep.mubr.bf16.mxu1 %v17068_v39  ;;  %v17088_v39 = vld [vmem:[%s22832_s2 + $0x194] ss:$8 sps:$4 sm:$0xff]  }
 0x67c   :  { %14201 = vmatprep.subr.bf16.mxu1 %v22988_v1 }
 0x67f   :  { %14202 = vmatpush3.bf16.msra.mxu1 %v22989_v43 }
 0x680   :  { %14203 = vmatprep.subr.bf16.mxu1 %v22990_v55 }
 0x682   :  { %4980 = vmatmul.mubr.bf16.gmra.mrb[160].mxu1 %v17069_v61  ;;  %v4699_v61 = vpack.c.bf16 %v19243_v33, %v19241_v6  ;;  %v17128_v33 = vld [vmem:[%s22832_s2 + $0x2d0] ss:$8 sps:$4 sm:$0xff]  }
 0x683   :  { %14204 = vmatpush3.bf16.msra.mxu1 %v22991_v31  ;;  %5109 = vmatprep.mubr.bf16.mxu1 %v17070_v0  ;;  %v17089_v0 = vld [vmem:[%s22832_s2 + $0x190] ss:$8 sps:$4 sm:$0xff]  }
 0x684   :  { %14205 = vmatprep.subr.bf16.mxu1 %v22992_v9 }
 0x687   :  { %14206 = vmatpush3.bf16.msra.mxu1 %v22993_v25 }
 0x688   :  { %14239 = vmatprep.subr.bf16.mxu1 %v22978_v19 }
 0x68a   :  { %5110 = vmatmul.mubr.bf16.vlgmr.msra.gmra.mrb[164].mxu1 %v17071_v4  ;;  %v17090_v4 = vld [vmem:[%s22832_s2 + $0x1a4] ss:$8 sps:$4 sm:$0xff]  }
 0x68b   :  { %14240 = vmatpush3.bf16.msra.mxu1 %v22979_v11  ;;  %5117 = vmatprep.mubr.bf16.mxu1 %v17072_v32  ;;  %v17091_v32 = vld [vmem:[%s22832_s2 + $0x1a0] ss:$8 sps:$4 sm:$0xff]  }
 0x68c   :  { %14241 = vmatprep.subr.bf16.mxu1 %v22980_v16 }
 0x68f   :  { %14242 = vmatpush3.bf16.msra.mxu1 %v22981_v34 }
 0x690   :  { %14243 = vmatprep.subr.bf16.mxu1 %v22982_v21 }
 0x692   :  { %5118 = vmatmul.mubr.bf16.gmra.mrb[168].mxu1 %v17073_v37  ;;  %v17092_v37 = vld [vmem:[%s22832_s2 + $0x1b4] ss:$8 sps:$4 sm:$0xff]  }
 0x693   :  { %14244 = vmatpush3.bf16.msra.mxu1 %v22983_v36  ;;  %5125 = vmatprep.mubr.bf16.mxu1 %v17074_v53  ;;  %v17093_v53 = vld [vmem:[%s22832_s2 + $0x1b0] ss:$8 sps:$4 sm:$0xff]  }
 0x694   :  { %14245 = vmatprep.subr.bf16.mxu1 %v22984_v57 }
 0x697   :  { %14246 = vmatpush3.bf16.msra.mxu1 %v22985_v13 }
 0x698   :  { %14247 = vmatprep.subr.bf16.mxu1 %v22986_v24 }
 0x69a   :  { %5126 = vmatmul.mubr.bf16.gmra.mrb[172].mxu1 %v17075_v56  ;;  %v17094_v56 = vld [vmem:[%s22832_s2 + $0x1c4] ss:$8 sps:$4 sm:$0xff]  }
 0x69b   :  { %14248 = vmatpush3.bf16.msra.mxu1 %v22987_v3  ;;  %5133 = vmatprep.mubr.bf16.mxu1 %v17076_v29  ;;  %v17095_v29 = vld [vmem:[%s22832_s2 + $0x1c0] ss:$8 sps:$4 sm:$0xff]  }
 0x69c   :  { %14249 = vmatprep.subr.bf16.mxu1 %v22988_v1 }
 0x69f   :  { %14250 = vmatpush3.bf16.msra.mxu1 %v22989_v43 }
 0x6a0   :  { %14251 = vmatprep.subr.bf16.mxu1 %v22990_v55 }
 0x6a2   :  { %5134 = vmatmul.mubr.bf16.gmra.mrb[176].mxu1 %v17077_v7  ;;  %v17096_v7 = vld [vmem:[%s22832_s2 + $0x1d4] ss:$8 sps:$4 sm:$0xff]  }
 0x6a3   :  { %14252 = vmatpush3.bf16.msra.mxu1 %v22991_v31  ;;  %5263 = vmatprep.mubr.bf16.mxu1 %v17078_v18  ;;  %v17097_v18 = vld [vmem:[%s22832_s2 + $0x1d0] ss:$8 sps:$4 sm:$0xff]  }
 0x6a4   :  { %14253 = vmatprep.subr.bf16.mxu1 %v22992_v9 }
 0x6a7   :  { %14254 = vmatpush3.bf16.msra.mxu1 %v22993_v25 }
 0x6a8   :  { %14335 = vmatprep.subr.bf16.mxu1 %v22978_v19 }
 0x6aa   :  { %5264 = vmatmul.mubr.bf16.vlgmr.msra.gmra.mrb[180].mxu1 %v17079_v22  ;;  %v17098_v22 = vld [vmem:[%s22832_s2 + $0x1e4] ss:$8 sps:$4 sm:$0xff]  }
 0x6ab   :  { %14336 = vmatpush3.bf16.msra.mxu1 %v22979_v11  ;;  %5271 = vmatprep.mubr.bf16.mxu1 %v17080_v8  ;;  %v17099_v8 = vld [vmem:[%s22832_s2 + $0x1e0] ss:$8 sps:$4 sm:$0xff]  }
 0x6ac   :  { %14337 = vmatprep.subr.bf16.mxu1 %v22980_v16 }
 0x6af   :  { %14338 = vmatpush3.bf16.msra.mxu1 %v22981_v34 }
 0x6b0   :  { %14339 = vmatprep.subr.bf16.mxu1 %v22982_v21 }
 0x6b2   :  { %5272 = vmatmul.mubr.bf16.gmra.mrb[184].mxu1 %v17081_v58  ;;  %v17100_v58 = vld [vmem:[%s22832_s2 + $0x1f4] ss:$8 sps:$4 sm:$0xff]  }
 0x6b3   :  { %14340 = vmatpush3.bf16.msra.mxu1 %v22983_v36  ;;  %5279 = vmatprep.mubr.bf16.mxu1 %v17082_v63 }
 0x6b4   :  { %14341 = vmatprep.subr.bf16.mxu1 %v22984_v57 }
 0x6b7   :  { %14342 = vmatpush3.bf16.msra.mxu1 %v22985_v13 }
 0x6b8   :  { %14343 = vmatprep.subr.bf16.mxu1 %v22986_v24 }
 0x6ba   :  { %5280 = vmatmul.mubr.bf16.gmra.mrb[188].mxu1 %v17083_v20 }
 0x6bb   :  { %14344 = vmatpush3.bf16.msra.mxu1 %v22987_v3  ;;  %5287 = vmatprep.mubr.bf16.mxu1 %v17084_v52 }
 0x6bc   :  { %14345 = vmatprep.subr.bf16.mxu1 %v22988_v1 }
 0x6bf   :  { %14346 = vmatpush3.bf16.msra.mxu1 %v22989_v43 }
 0x6c0   :  { %14347 = vmatprep.subr.bf16.mxu1 %v22990_v55 }
 0x6c2   :  { %5288 = vmatmul.mubr.bf16.gmra.mrb[192].mxu1 %v17085_v45 }
 0x6c3   :  { %14348 = vmatpush3.bf16.msra.mxu1 %v22991_v31  ;;  %5571 = vmatprep.mubr.bf16.mxu1 %v17086_v51 }
 0x6c4   :  { %14349 = vmatprep.subr.bf16.mxu1 %v22992_v9 }
 0x6c7   :  { %14350 = vmatpush3.bf16.msra.mxu1 %v22993_v25 }
 0x6c8   :  { %14383 = vmatprep.subr.bf16.mxu1 %v22978_v19 }
 0x6ca   :  { %5572 = vmatmul.mubr.bf16.vlgmr.msra.gmra.mrb[196].mxu1 %v17087_v49 }
 0x6cb   :  { %14384 = vmatpush3.bf16.msra.mxu1 %v22979_v11  ;;  %5579 = vmatprep.mubr.bf16.mxu1 %v17088_v39 }
 0x6cc   :  { %14385 = vmatprep.subr.bf16.mxu1 %v22980_v16 }
 0x6cf   :  { %14386 = vmatpush3.bf16.msra.mxu1 %v22981_v34 }
 0x6d0   :  { %14387 = vmatprep.subr.bf16.mxu1 %v22982_v21 }
 0x6d2   :  { %5580 = vmatmul.mubr.bf16.gmra.mrb[200].mxu1 %v17089_v0 }
 0x6d3   :  { %14388 = vmatpush3.bf16.msra.mxu1 %v22983_v36  ;;  %5587 = vmatprep.mubr.bf16.mxu1 %v17090_v4 }
 0x6d4   :  { %14389 = vmatprep.subr.bf16.mxu1 %v22984_v57 }
 0x6d7   :  { %14390 = vmatpush3.bf16.msra.mxu1 %v22985_v13 }
 0x6d8   :  { %14391 = vmatprep.subr.bf16.mxu1 %v22986_v24 }
 0x6da   :  { %5588 = vmatmul.mubr.bf16.gmra.mrb[204].mxu1 %v17091_v32  ;;  %v17103_v32 = vld [vmem:[%s22832_s2 + $0x200] ss:$8 sps:$4 sm:$0xff]  }
 0x6db   :  { %14392 = vmatpush3.bf16.msra.mxu1 %v22987_v3  ;;  %5595 = vmatprep.mubr.bf16.mxu1 %v17092_v37 }
 0x6dc   :  { %14393 = vmatprep.subr.bf16.mxu1 %v22988_v1 }
 0x6df   :  { %14394 = vmatpush3.bf16.msra.mxu1 %v22989_v43 }
 0x6e0   :  { %14395 = vmatprep.subr.bf16.mxu1 %v22990_v55 }
 0x6e2   :  { %5596 = vmatmul.mubr.bf16.gmra.mrb[208].mxu1 %v17093_v53 }
 0x6e3   :  { %14396 = vmatpush3.bf16.msra.mxu1 %v22991_v31  ;;  %5725 = vmatprep.mubr.bf16.mxu1 %v17094_v56 }
 0x6e4   :  { %14397 = vmatprep.subr.bf16.mxu1 %v22992_v9 }
 0x6e7   :  { %14398 = vmatpush3.bf16.msra.mxu1 %v22993_v25 }
 0x6e8   :  { %14431 = vmatprep.subr.bf16.mxu1 %v22978_v19 }
 0x6ea   :  { %5726 = vmatmul.mubr.bf16.vlgmr.msra.gmra.mrb[212].mxu1 %v17095_v29  ;;  %v17104_v29 = vld [vmem:[%s22832_s2 + $0x214] ss:$8 sps:$4 sm:$0xff]  }
 0x6eb   :  { %14432 = vmatpush3.bf16.msra.mxu1 %v22979_v11  ;;  %5733 = vmatprep.mubr.bf16.mxu1 %v17096_v7 }
 0x6ec   :  { %14433 = vmatprep.subr.bf16.mxu1 %v22980_v16 }
 0x6ef   :  { %14434 = vmatpush3.bf16.msra.mxu1 %v22981_v34 }
 0x6f0   :  { %14435 = vmatprep.subr.bf16.mxu1 %v22982_v21 }
 0x6f2   :  { %5734 = vmatmul.mubr.bf16.gmra.mrb[216].mxu1 %v17097_v18 }
 0x6f3   :  { %14436 = vmatpush3.bf16.msra.mxu1 %v22983_v36  ;;  %5741 = vmatprep.mubr.bf16.mxu1 %v17098_v22 }
 0x6f4   :  { %14437 = vmatprep.subr.bf16.mxu1 %v22984_v57 }
 0x6f7   :  { %14438 = vmatpush3.bf16.msra.mxu1 %v22985_v13 }
 0x6f8   :  { %14439 = vmatprep.subr.bf16.mxu1 %v22986_v24 }
 0x6fa   :  { %5742 = vmatmul.mubr.bf16.gmra.mrb[220].mxu1 %v17099_v8 }
 0x6fb   :  { %14440 = vmatpush3.bf16.msra.mxu1 %v22987_v3  ;;  %5749 = vmatprep.mubr.bf16.mxu1 %v17100_v58  ;;  %v17105_v58 = vld [vmem:[%s22832_s2 + $0x210] ss:$8 sps:$4 sm:$0xff]  }
 0x6fc   :  { %14441 = vmatprep.subr.bf16.mxu1 %v22988_v1 }
 0x6fd   :  { %v19317_v63 = vpop.f32.mrb[76].mxu1 }
 0x6fe   :  { %22994 = vst [vmem:[#allocation2_spill] sm:$0xff] %v19317_v63  ;;  %v19319_v42 = vpop.f32.mrb[77].mxu1  ;;  %v7111_v14 = vmul.f32 %v19317_v63, %v19317_v63 }
 0x6ff   :  { %22995 = vst [vmem:[#allocation12_spill] sm:$0xff] %v19319_v42  ;;  %14442 = vmatpush3.bf16.msra.mxu1 %v22989_v43  ;;  %v19322_v20 = vpop.f32.mrb[78].mxu1  ;;  %v7109_v52 = vmul.f32 %v19319_v42, %v19319_v42 }
 0x700   :  { %22996 = vst [vmem:[#allocation4_spill] sm:$0xff] %v19322_v20  ;;  %14443 = vmatprep.subr.bf16.mxu1 %v22990_v55  ;;  %v19325_v44 = vpop.f32.mrb[79].mxu1  ;;  %v7112_v45 = vmul.f32 %v19322_v20, %v19322_v20 }
 0x701   :  { %22997 = vst [vmem:[#allocation11_spill] sm:$0xff] %v19325_v44  ;;  %v7081_v27 = vadd.f32 %v19325_v44, %v19319_v42  ;;  %v7110_v35 = vmul.f32 %v19325_v44, %v19325_v44 }
 0x702   :  { %5750 = vmatmul.mubr.bf16.gmra.mrb[224].mxu1 %v17101_v5 }
 0x703   :  { %v7082_v46 = vadd.f32 %v19317_v63, %v7081_v27  ;;  %v7117_v54 = vadd.f32 %v7110_v35, %v7109_v52  ;;  %14444 = vmatpush3.bf16.msra.mxu1 %v22991_v31  ;;  %5879 = vmatprep.mubr.bf16.mxu1 %v17102_v26  ;;  %v17106_v52 = vld [vmem:[%s22832_s2 + $0x224] ss:$8 sps:$4 sm:$0xff]   ;;  %v17107_v27 = vld [vmem:[%s22832_s2 + $0x220] ss:$8 sps:$4 sm:$0xff]   ;;  %v17108_v35 = vld [vmem:[%s22832_s2 + $0x234] ss:$8 sps:$4 sm:$0xff]  }
 0x704   :  { %14445 = vmatprep.subr.bf16.mxu1 %v22992_v9 }
 0x705   :  { %v7118_v17 = vadd.f32 %v7117_v54, %v7111_v14  ;;  %v19346_v51 = vpop.f32.mrb[80].mxu1  ;;  %v7083_v60 = vadd.f32 %v19322_v20, %v7082_v46 }
 0x706   :  { %22998 = vst [vmem:[#allocation3_spill] sm:$0xff] %v19346_v51  ;;  %v19349_v2 = vpop.f32.mrb[81].mxu1  ;;  %v7115_v37 = vmul.f32 %v19346_v51, %v19346_v51 }
 0x707   :  { %22999 = vst [vmem:[#allocation14_spill] sm:$0xff] %v19349_v2  ;;  %v7084_v15 = vadd.f32 %v7083_v60, %v19349_v2  ;;  %v7113_v38 = vmul.f32 %v19349_v2, %v19349_v2  ;;  %v7119_v40 = vadd.f32 %v7118_v17, %v7112_v45  ;;  %14446 = vmatpush3.bf16.msra.mxu1 %v22993_v25  ;;  %v19355_v10 = vpop.f32.mrb[82].mxu1  ;;  %v17109_v17 = vld [vmem:[%s22832_s2 + $0x230] ss:$8 sps:$4 sm:$0xff]   ;;  %v17110_v60 = vld [vmem:[%s22832_s2 + $0x244] ss:$8 sps:$4 sm:$0xff]  }
 0x708   :  { %23000 = vst [vmem:[#allocation6_spill] sm:$0xff] %v19355_v10  ;;  %14479 = vmatprep.subr.bf16.mxu1 %v22978_v19  ;;  %v19358_v49 = vpop.f32.mrb[83].mxu1  ;;  %v7116_v7 = vmul.f32 %v19355_v10, %v19355_v10 }
 0x709   :  { %23001 = vst [vmem:[#allocation13_spill] sm:$0xff] %v19358_v49  ;;  %v7120_v39 = vadd.f32 %v7119_v40, %v7113_v38  ;;  %v7085_v0 = vadd.f32 %v7084_v15, %v19358_v49  ;;  %v7114_v4 = vmul.f32 %v19358_v49, %v19358_v49 }
 0x70a   :  { %5880 = vmatmul.mubr.bf16.vlgmr.msra.gmra.mrb[228].mxu1 %v17103_v32 }
 0x70b   :  { %v7086_v53 = vadd.f32 %v19346_v51, %v7085_v0  ;;  %v7121_v56 = vadd.f32 %v7120_v39, %v7114_v4  ;;  %14480 = vmatpush3.bf16.msra.mxu1 %v22979_v11  ;;  %5887 = vmatprep.mubr.bf16.mxu1 %v17104_v29 }
 0x70c   :  { %14481 = vmatprep.subr.bf16.mxu1 %v22980_v16 }
 0x70d   :  { %v19377_v18 = vadd.f32 %v19355_v10, %v7086_v53  ;;  %v7122_v22 = vadd.f32 %v7121_v56, %v7115_v37  ;;  %v17111_v37 = vld [vmem:[%s22832_s2 + $0x240] ss:$8 sps:$4 sm:$0xff]   ;;  %v17112_v53 = vld [vmem:[%s22832_s2 + $0x254] ss:$8 sps:$4 sm:$0xff]  }
 0x70f   :  { %23002 = vst [vmem:[#allocation5_spill] sm:$0xff] %v19377_v18  ;;  %v19379_v8 = vadd.f32 %v7122_v22, %v7116_v7  ;;  %14482 = vmatpush3.bf16.msra.mxu1 %v22981_v34 }
 0x710   :  { %14483 = vmatprep.subr.bf16.mxu1 %v22982_v21 }
 0x711   :  { %23003 = vst [vmem:[#allocation16_spill] sm:$0xff] %v19379_v8 }
 0x712   :  { %5888 = vmatmul.mubr.bf16.gmra.mrb[232].mxu1 %v17105_v58 }
 0x713   :  { %14484 = vmatpush3.bf16.msra.mxu1 %v22983_v36  ;;  %5895 = vmatprep.mubr.bf16.mxu1 %v17106_v52  ;;  %v17113_v52 = vld [vmem:[%s22833_s3 + $0x8] sm:$0xff]  }
 0x714   :  { %14485 = vmatprep.subr.bf16.mxu1 %v22984_v57 }
 0x717   :  { %14486 = vmatpush3.bf16.msra.mxu1 %v22985_v13 }
 0x718   :  { %14487 = vmatprep.subr.bf16.mxu1 %v22986_v24 }
 0x71a   :  { %5896 = vmatmul.mubr.bf16.gmra.mrb[236].mxu1 %v17107_v27 }
 0x71b   :  { %14488 = vmatpush3.bf16.msra.mxu1 %v22987_v3  ;;  %5903 = vmatprep.mubr.bf16.mxu1 %v17108_v35 }
 0x71c   :  { %14489 = vmatprep.subr.bf16.mxu1 %v22988_v1 }
 0x71d   :  { %v14103_v5 = vpop.f32.mrb[132].mxu1 }
 0x71e   :  { %v14104_v14 = vpop.f32.mrb[133].mxu1 }
 0x71f   :  { %14490 = vmatpush3.bf16.msra.mxu1 %v22989_v43  ;;  %v14105_v46 = vadd.f32 %v14104_v14, %v14103_v5  ;;  %v14106_v54 = vpop.f32.mrb[134].mxu1  ;;  %v17114_v5 = vld [vmem:[%s22832_s2 + $0x250] ss:$8 sps:$4 sm:$0xff]  }
 0x720   :  { %14491 = vmatprep.subr.bf16.mxu1 %v22990_v55  ;;  %v14107_v26 = vpop.f32.mrb[135].mxu1 }
 0x721   :  { %v14108_v45 = vadd.f32 %v14107_v26, %v14106_v54 }
 0x722   :  { %5904 = vmatmul.mubr.bf16.gmra.mrb[240].mxu1 %v17109_v17 }
 0x723   :  { %14492 = vmatpush3.bf16.msra.mxu1 %v22991_v31  ;;  %6033 = vmatprep.mubr.bf16.mxu1 %v17110_v60  ;;  %v4765_v15 = vpack.c.bf16 %v14108_v45, %v14105_v46  ;;  %v17116_v46 = vld [vmem:[%s22833_s3 + $0x10] sm:$0xff]   ;;  %v17117_v60 = vld [vmem:[%s22833_s3 + $0x18] sm:$0xff]  }
 0x724   :  { %14493 = vmatprep.subr.bf16.mxu1 %v22992_v9 }
 0x725   :  { %v14109_v38 = vpop.f32.mrb[136].mxu1  ;;  %15319 = vmatprep.mubr.msk.bf16.mxu0 %vm1148_vm0, %v4765_v15 }
 0x726   :  { %v14110_v40 = vpop.f32.mrb[137].mxu1 }
 0x727   :  { %14494 = vmatpush3.bf16.msra.mxu1 %v22993_v25  ;;  %v14111_v39 = vadd.f32 %v14110_v40, %v14109_v38  ;;  %v14112_v0 = vpop.f32.mrb[138].mxu1  ;;  %v17118_v40 = vld [vmem:[%s22832_s2 + $0x260] ss:$8 sps:$4 sm:$0xff]  }
 0x728   :  { %14575 = vmatprep.subr.bf16.mxu1 %v22978_v19  ;;  %v14113_v4 = vpop.f32.mrb[139].mxu1 }
 0x729   :  { %v14114_v32 = vadd.f32 %v14113_v4, %v14112_v0  ;;  %v17119_v0 = vld [vmem:[%s22832_s2 + $0x274] ss:$8 sps:$4 sm:$0xff]   ;;  %v17120_v4 = vld [vmem:[%s22833_s3 + $0x40] sm:$0xff]  }
 0x72a   :  { %6034 = vmatmul.mubr.bf16.vlgmr.msra.gmra.mrb[244].mxu1 %v17111_v37 }
 0x72b   :  { %14576 = vmatpush3.bf16.msra.mxu1 %v22979_v11  ;;  %6041 = vmatprep.mubr.bf16.mxu1 %v17112_v53  ;;  %v4766_v56 = vpack.c.bf16 %v14114_v32, %v14111_v39 }
 0x72c   :  { %14577 = vmatprep.subr.bf16.mxu1 %v22980_v16 }
 0x72d   :  { %v14115_v29 = vpop.f32.mrb[140].mxu1  ;;  %15320 = vmatmul.mubr.msk.bf16.vlgmr.msra.gmra.mrb[212].mxu0 %vm1148_vm0, %v4766_v56 }
 0x72e   :  { %v14116_v7 = vpop.f32.mrb[141].mxu1  ;;  %15328 = vmatpush3.bf16.msra.mxu0 %v18766_v23  ;;  %v17115_v23 = vld [vmem:[%s22832_s2 + $0x264] ss:$8 sps:$4 sm:$0xff]  }
 0x72f   :  { %14578 = vmatpush3.bf16.msra.mxu1 %v22981_v34  ;;  %v14117_v22 = vadd.f32 %v14116_v7, %v14115_v29  ;;  %v14118_v58 = vpop.f32.mrb[142].mxu1  ;;  %15329 = vmatprep.subr.bf16.mxu0 %v17113_v52 }
 0x730   :  { %14579 = vmatprep.subr.bf16.mxu1 %v22982_v21  ;;  %v14119_v27 = vpop.f32.mrb[143].mxu1 }
 0x731   :  { %v14120_v35 = vadd.f32 %v14119_v27, %v14118_v58 }
 0x732   :  { %6042 = vmatmul.mubr.bf16.gmra.mrb[248].mxu1 %v17114_v5  ;;  %15330 = vmatpush3.bf16.msra.mxu0 %v17113_v52  ;;  %v17123_v52 = vld [vmem:[%s22833_s3 + $0x48] sm:$0xff]  }
 0x733   :  { %14580 = vmatpush3.bf16.msra.mxu1 %v22983_v36  ;;  %6049 = vmatprep.mubr.bf16.mxu1 %v17115_v23  ;;  %v4767_v14 = vpack.c.bf16 %v14120_v35, %v14117_v22  ;;  %v17121_v22 = vld [vmem:[%s22832_s2 + $0x270] ss:$8 sps:$4 sm:$0xff]  }
 0x734   :  { %14581 = vmatprep.subr.bf16.mxu1 %v22984_v57  ;;  %15331 = vmatprep.subr.bf16.mxu0 %v17116_v46 }
 0x735   :  { %v14121_v54 = vpop.f32.mrb[144].mxu1  ;;  %15323 = vmatprep.mubr.msk.bf16.mxu0 %vm1148_vm0, %v4767_v14  ;;  %v17127_v14 = vld [vmem:[%s22833_s3 + $0x58] sm:$0xff]  }
 0x736   :  { %v14122_v26 = vpop.f32.mrb[145].mxu1  ;;  %15332 = vmatpush3.bf16.msra.mxu0 %v17116_v46 }
 0x737   :  { %14582 = vmatpush3.bf16.msra.mxu1 %v22985_v13  ;;  %v14123_v45 = vadd.f32 %v14122_v26, %v14121_v54  ;;  %v14124_v17 = vpop.f32.mrb[146].mxu1  ;;  %15333 = vmatprep.subr.bf16.mxu0 %v17117_v60 }
 0x738   :  { %14583 = vmatprep.subr.bf16.mxu1 %v22986_v24  ;;  %v14125_v15 = vpop.f32.mrb[147].mxu1 }
 0x739   :  { %v14126_v38 = vadd.f32 %v14125_v15, %v14124_v17  ;;  %v17130_v17 = vld [vmem:[%s22833_s3 + $0x60] sm:$0xff]  }
 0x73a   :  { %6050 = vmatmul.mubr.bf16.gmra.mrb[252].mxu1 %v17118_v40  ;;  %15334 = vmatpush3.bf16.msra.mxu0 %v17117_v60 }
 0x73b   :  { %14584 = vmatpush3.bf16.msra.mxu1 %v22987_v3  ;;  %v4768_v39 = vpack.c.bf16 %v14126_v38, %v14123_v45  ;;  %6057 = vmatprep.mubr.bf16.mxu1 %v17119_v0 }
 0x73c   :  { %14585 = vmatprep.subr.bf16.mxu1 %v22988_v1  ;;  %15343 = vmatprep.subr.bf16.mxu0 %v17120_v4 }
 0x73d   :  { %15324 = vmatmul.mubr.msk.bf16.gmra.mrb[216].mxu0 %vm1148_vm0, %v4768_v39  ;;  %v14159_v32 = vpop.f32.mrb[148].mxu1  ;;  %v17131_v39 = vld [vmem:[%s22833_s3 + $0x68] sm:$0xff]  }
 0x73e   :  { %15335 = vmatprep.mubr.msk.bf16.mxu0 %vm1148_vm0, %v4696_v62  ;;  %v14160_v37 = vpop.f32.mrb[149].mxu1 }
 0x73f   :  { %14586 = vmatpush3.bf16.msra.mxu1 %v22989_v43  ;;  %v14161_v53 = vadd.f32 %v14160_v37, %v14159_v32  ;;  %v14162_v56 = vpop.f32.mrb[150].mxu1  ;;  %v17132_v32 = vld [vmem:[%s22832_s2 + $0x2e0] ss:$8 sps:$4 sm:$0xff]  }
 0x740   :  { %14587 = vmatprep.subr.bf16.mxu1 %v22990_v55  ;;  %v14163_v29 = vpop.f32.mrb[151].mxu1 }
 0x741   :  { %v14164_v7 = vadd.f32 %v14163_v29, %v14162_v56  ;;  %v17134_v56 = vld [vmem:[%s22833_s3 + $0x70] sm:$0xff]  }
 0x742   :  { %6058 = vmatmul.mubr.bf16.gmra.mrb[0].mxu1 %v17121_v22 }
 0x743   :  { %14588 = vmatpush3.bf16.msra.mxu1 %v22991_v31  ;;  %6341 = vmatprep.mubr.bf16.mxu1 %v17122_v48  ;;  %v4988_v50 = vpack.c.bf16 %v14164_v7, %v14161_v53  ;;  %v17133_v53 = vld [vmem:[%s22832_s2 + $0x2f4] ss:$8 sps:$4 sm:$0xff]  }
 0x744   :  { %14589 = vmatprep.subr.bf16.mxu1 %v22992_v9 }
 0x745   :  { %15336 = vmatmul.mubr.msk.bf16.vlgmr.msra.gmra.mrb[212].mxu0 %vm1148_vm0, %v4697_v28  ;;  %v14165_v62 = vpop.f32.mrb[152].mxu1  ;;  %v17124_v28 = vld [vmem:[%s22832_s2 + $0x2c0] ss:$8 sps:$4 sm:$0xff]  }
 0x746   :  { %15344 = vmatpush3.bf16.msra.mxu0 %v17120_v4  ;;  %15339 = vmatprep.mubr.msk.bf16.mxu0 %vm1148_vm0, %v4698_v47  ;;  %v14166_v58 = vpop.f32.mrb[153].mxu1  ;;  %v17126_v47 = vld [vmem:[%s22833_s3 + $0x50] sm:$0xff]  }
 0x747   :  { %14590 = vmatpush3.bf16.msra.mxu1 %v22993_v25  ;;  %15345 = vmatprep.subr.bf16.mxu0 %v17123_v52  ;;  %v14167_v27 = vadd.f32 %v14166_v58, %v14165_v62  ;;  %v14168_v35 = vpop.f32.mrb[154].mxu1 }
 0x748   :  { %14623 = vmatprep.subr.bf16.mxu1 %v22978_v19  ;;  %v14169_v12 = vpop.f32.mrb[155].mxu1 }
 0x749   :  { %v14170_v59 = vadd.f32 %v14169_v12, %v14168_v35  ;;  %v17137_v35 = vld [vmem:[%s22832_s2 + $0x304] ss:$8 sps:$4 sm:$0xff]  }
 0x74a   :  { %6342 = vmatmul.mubr.bf16.vlgmr.msra.gmra.mrb[4].mxu1 %v17124_v28  ;;  %15346 = vmatpush3.bf16.msra.mxu0 %v17123_v52  ;;  %v17136_v52 = vld [vmem:[%s22832_s2 + $0x2f0] ss:$8 sps:$4 sm:$0xff]   ;;  %v17138_v12 = vld [vmem:[%s22833_s3 + $0x80] sm:$0xff]  }
 0x74b   :  { %14624 = vmatpush3.bf16.msra.mxu1 %v22979_v11  ;;  %6349 = vmatprep.mubr.bf16.mxu1 %v17125_v30  ;;  %v4989_v41 = vpack.c.bf16 %v14170_v59, %v14167_v27 }
 0x74c   :  { %14625 = vmatprep.subr.bf16.mxu1 %v22980_v16  ;;  %15347 = vmatprep.subr.bf16.mxu0 %v17126_v47 }
 0x74d   :  { %15340 = vmatmul.mubr.msk.bf16.gmra.mrb[216].mxu0 %vm1148_vm0, %v4699_v61  ;;  %v14171_v5 = vpop.f32.mrb[156].mxu1  ;;  %v17129_v61 = vld [vmem:[%s22832_s2 + $0x2e4] ss:$8 sps:$4 sm:$0xff]  }
 0x74e   :  { %15348 = vmatpush3.bf16.msra.mxu0 %v17126_v47  ;;  %v14172_v23 = vpop.f32.mrb[157].mxu1  ;;  %15351 = vmatprep.mubr.msk.bf16.mxu0 %vm1148_vm0, %v4988_v50  ;;  %v17135_v50 = vld [vmem:[%s22833_s3 + $0x78] sm:$0xff]  }
 0x74f   :  { %14626 = vmatpush3.bf16.msra.mxu1 %v22981_v34  ;;  %15349 = vmatprep.subr.bf16.mxu0 %v17127_v14  ;;  %v14173_v46 = vadd.f32 %v14172_v23, %v14171_v5  ;;  %v14174_v54 = vpop.f32.mrb[158].mxu1  ;;  %v17139_v23 = vld [vmem:[%s22832_s2 + $0x300] ss:$8 sps:$4 sm:$0xff]  }
 0x750   :  { %14627 = vmatprep.subr.bf16.mxu1 %v22982_v21  ;;  %v14175_v26 = vpop.f32.mrb[159].mxu1 }
 0x751   :  { %v14176_v6 = vadd.f32 %v14175_v26, %v14174_v54 }
 0x752   :  { %6350 = vmatmul.mubr.bf16.gmra.mrb[8].mxu1 %v17128_v33  ;;  %15350 = vmatpush3.bf16.msra.mxu0 %v17127_v14 }
 0x753   :  { %14628 = vmatpush3.bf16.msra.mxu1 %v22983_v36  ;;  %6357 = vmatprep.mubr.bf16.mxu1 %v17129_v61  ;;  %v4990_v45 = vpack.c.bf16 %v14176_v6, %v14173_v46  ;;  %v17140_v46 = vld [vmem:[%s22832_s2 + $0x314] ss:$8 sps:$4 sm:$0xff]   ;;  %v17141_v6 = vld [vmem:[%s22833_s3 + $0x88] sm:$0xff]  }
 0x754   :  { %14629 = vmatprep.subr.bf16.mxu1 %v22984_v57  ;;  %15359 = vmatprep.subr.bf16.mxu0 %v17130_v17 }
 0x755   :  { %v14177_v60 = vpop.f32.mrb[160].mxu1  ;;  %15352 = vmatmul.mubr.msk.bf16.vlgmr.msra.gmra.mrb[212].mxu0 %vm1148_vm0, %v4989_v41 }
 0x756   :  { %15360 = vmatpush3.bf16.msra.mxu0 %v17130_v17  ;;  %v14178_v15 = vpop.f32.mrb[161].mxu1  ;;  %15355 = vmatprep.mubr.msk.bf16.mxu0 %vm1148_vm0, %v4990_v45 }
 0x757   :  { %14630 = vmatpush3.bf16.msra.mxu1 %v22985_v13  ;;  %v14179_v38 = vadd.f32 %v14178_v15, %v14177_v60  ;;  %v14180_v40 = vpop.f32.mrb[162].mxu1  ;;  %15361 = vmatprep.subr.bf16.mxu0 %v17131_v39  ;;  %v17142_v60 = vld [vmem:[%s22832_s2 + $0x310] ss:$8 sps:$4 sm:$0xff]  }
 0x758   :  { %14631 = vmatprep.subr.bf16.mxu1 %v22986_v24  ;;  %v14181_v0 = vpop.f32.mrb[163].mxu1  ;;  %v17143_v15 = vld [vmem:[%s22833_s3 + $0x90] sm:$0xff]  }
 0x759   :  { %v14182_v4 = vadd.f32 %v14181_v0, %v14180_v40  ;;  %v17144_v40 = vld [vmem:[%s22832_s2 + $0x324] ss:$8 sps:$4 sm:$0xff]  }
 0x75a   :  { %6358 = vmatmul.mubr.bf16.gmra.mrb[12].mxu1 %v17132_v32  ;;  %15362 = vmatpush3.bf16.msra.mxu0 %v17131_v39 }
 0x75b   :  { %14632 = vmatpush3.bf16.msra.mxu1 %v22987_v3  ;;  %v4991_v37 = vpack.c.bf16 %v14182_v4, %v14179_v38  ;;  %6365 = vmatprep.mubr.bf16.mxu1 %v17133_v53  ;;  %v17145_v4 = vld [vmem:[%s22833_s3 + $0x98] sm:$0xff]  }
 0x75c   :  { %14633 = vmatprep.subr.bf16.mxu1 %v22988_v1  ;;  %15363 = vmatprep.subr.bf16.mxu0 %v17134_v56 }
 0x75d   :  { %v14207_v29 = vpop.f32.mrb[164].mxu1  ;;  %15356 = vmatmul.mubr.msk.bf16.gmra.mrb[216].mxu0 %vm1148_vm0, %v4991_v37 }
 0x75e   :  { %v14208_v7 = vpop.f32.mrb[165].mxu1  ;;  %15364 = vmatpush3.bf16.msra.mxu0 %v17134_v56 }
 0x75f   :  { %14634 = vmatpush3.bf16.msra.mxu1 %v22989_v43  ;;  %v14209_v22 = vadd.f32 %v14208_v7, %v14207_v29  ;;  %v14210_v48 = vpop.f32.mrb[166].mxu1  ;;  %15365 = vmatprep.subr.bf16.mxu0 %v17135_v50  ;;  %v17146_v29 = vld [vmem:[%s22832_s2 + $0x320] ss:$8 sps:$4 sm:$0xff]  }
 0x760   :  { %14635 = vmatprep.subr.bf16.mxu1 %v22990_v55  ;;  %v14211_v62 = vpop.f32.mrb[167].mxu1 }
 0x761   :  { %v14212_v58 = vadd.f32 %v14211_v62, %v14210_v48 }
 0x762   :  { %6366 = vmatmul.mubr.bf16.gmra.mrb[16].mxu1 %v17136_v52  ;;  %15366 = vmatpush3.bf16.msra.mxu0 %v17135_v50 }
 0x763   :  { %14636 = vmatpush3.bf16.msra.mxu1 %v22991_v31  ;;  %v5142_v27 = vpack.c.bf16 %v14212_v58, %v14209_v22  ;;  %6495 = vmatprep.mubr.bf16.mxu1 %v17137_v35  ;;  %v17147_v22 = vld [vmem:[%s22832_s2 + $0x334] ss:$8 sps:$4 sm:$0xff]   ;;  %v17148_v35 = vld [vmem:[%s22832_s2 + $0x330] ss:$8 sps:$4 sm:$0xff]  }
 0x764   :  { %14637 = vmatprep.subr.bf16.mxu1 %v22992_v9  ;;  %15375 = vmatprep.subr.bf16.mxu0 %v17138_v12 }
 0x765   :  { %v14213_v59 = vpop.f32.mrb[168].mxu1  ;;  %15367 = vmatprep.mubr.msk.bf16.mxu0 %vm1148_vm0, %v5142_v27 }
 0x766   :  { %v14214_v28 = vpop.f32.mrb[169].mxu1 }
 0x767   :  { %v14215_v30 = vadd.f32 %v14214_v28, %v14213_v59  ;;  %v14216_v41 = vpop.f32.mrb[170].mxu1  ;;  %14638 = vmatpush3.bf16.msra.mxu1 %v22993_v25  ;;  %v17149_v59 = vld [vmem:[%s22832_s2 + $0x344] ss:$8 sps:$4 sm:$0xff]  }
 0x768   :  { %v14217_v47 = vpop.f32.mrb[171].mxu1  ;;  %14671 = vmatprep.subr.bf16.mxu1 %v22978_v19 }
 0x769   :  { %v14218_v5 = vadd.f32 %v14217_v47, %v14216_v41 }
 0x76a   :  { %6496 = vmatmul.mubr.bf16.vlgmr.msra.gmra.mrb[20].mxu1 %v17139_v23 }
 0x76b   :  { %v5143_v14 = vpack.c.bf16 %v14218_v5, %v14215_v30  ;;  %14672 = vmatpush3.bf16.msra.mxu1 %v22979_v11  ;;  %6503 = vmatprep.mubr.bf16.mxu1 %v17140_v46 }
 0x76c   :  { %14673 = vmatprep.subr.bf16.mxu1 %v22980_v16 }
 0x76d   :  { %15368 = vmatmul.mubr.msk.bf16.vlgmr.msra.gmra.mrb[212].mxu0 %vm1148_vm0, %v5143_v14  ;;  %v14219_v54 = vpop.f32.mrb[172].mxu1  ;;  %v17150_v14 = vld [vmem:[%s22832_s2 + $0x340] ss:$8 sps:$4 sm:$0xff]  }
 0x76e   :  { %15376 = vmatpush3.bf16.msra.mxu0 %v17138_v12  ;;  %v14220_v26 = vpop.f32.mrb[173].mxu1 }
 0x76f   :  { %14674 = vmatpush3.bf16.msra.mxu1 %v22981_v34  ;;  %15377 = vmatprep.subr.bf16.mxu0 %v17141_v6  ;;  %v14221_v33 = vadd.f32 %v14220_v26, %v14219_v54  ;;  %v14222_v61 = vpop.f32.mrb[174].mxu1  ;;  %v17151_v54 = vld [vmem:[%s22832_s2 + $0x354] ss:$8 sps:$4 sm:$0xff]  }
 0x770   :  { %14675 = vmatprep.subr.bf16.mxu1 %v22982_v21  ;;  %v14223_v45 = vpop.f32.mrb[175].mxu1 }
 0x771   :  { %v14224_v17 = vadd.f32 %v14223_v45, %v14222_v61 }
 0x772   :  { %15378 = vmatpush3.bf16.msra.mxu0 %v17141_v6  ;;  %6504 = vmatmul.mubr.bf16.gmra.mrb[24].mxu1 %v17142_v60  ;;  %v17152_v60 = vld [vmem:[%s22832_s2 + $0x350] ss:$8 sps:$4 sm:$0xff]  }
 0x773   :  { %14676 = vmatpush3.bf16.msra.mxu1 %v22983_v36  ;;  %15379 = vmatprep.subr.bf16.mxu0 %v17143_v15  ;;  %v5144_v38 = vpack.c.bf16 %v14224_v17, %v14221_v33 }
 0x774   :  { %14677 = vmatprep.subr.bf16.mxu1 %v22984_v57  ;;  %6511 = vmatprep.mubr.bf16.mxu1 %v17144_v40 }
 0x775   :  { %v14225_v39 = vpop.f32.mrb[176].mxu1  ;;  %15371 = vmatprep.mubr.msk.bf16.mxu0 %vm1148_vm0, %v5144_v38  ;;  %v17153_v38 = vld [vmem:[%s22832_s2 + $0x364] ss:$8 sps:$4 sm:$0xff]  }
 0x776   :  { %15380 = vmatpush3.bf16.msra.mxu0 %v17143_v15  ;;  %v14226_v0 = vpop.f32.mrb[177].mxu1 }
 0x777   :  { %14678 = vmatpush3.bf16.msra.mxu1 %v22985_v13  ;;  %15381 = vmatprep.subr.bf16.mxu0 %v17145_v4  ;;  %v14227_v32 = vadd.f32 %v14226_v0, %v14225_v39  ;;  %v14228_v37 = vpop.f32.mrb[178].mxu1 }
 0x778   :  { %14679 = vmatprep.subr.bf16.mxu1 %v22986_v24  ;;  %v14229_v53 = vpop.f32.mrb[179].mxu1 }
 0x779   :  { %v14230_v56 = vadd.f32 %v14229_v53, %v14228_v37  ;;  %v17154_v53 = vld [vmem:[%s22832_s2 + $0x360] ss:$8 sps:$4 sm:$0xff]  }
 0x77a   :  { %15382 = vmatpush3.bf16.msra.mxu0 %v17145_v4  ;;  %6512 = vmatmul.mubr.bf16.gmra.mrb[28].mxu1 %v17146_v29  ;;  %v17155_v29 = vld [vmem:[%s22832_s2 + $0x374] ss:$8 sps:$4 sm:$0xff]  }
 0x77b   :  { %14287 = vmatprep.subr.bf16.mxu0 %v22978_v19  ;;  %14680 = vmatpush3.bf16.msra.mxu1 %v22987_v3  ;;  %v5145_v7 = vpack.c.bf16 %v14230_v56, %v14227_v32 }
 0x77c   :  { %14681 = vmatprep.subr.bf16.mxu1 %v22988_v1  ;;  %6519 = vmatprep.mubr.bf16.mxu1 %v17147_v22  ;;  %v17157_v22 = vld [vmem:[%s22832_s2 + $0x370] ss:$8 sps:$4 sm:$0xff]  }
 0x77d   :  { %v14255_v48 = vpop.f32.mrb[180].mxu1  ;;  %15372 = vmatmul.mubr.msk.bf16.gmra.mrb[216].mxu0 %vm1148_vm0, %v5145_v7  ;;  %v17156_v7 = vld [vmem:[%s22832_s2 + $0x144] ss:$8 sps:$4 sm:$0xff]  }
 0x77e   :  { %v14256_v50 = vpop.f32.mrb[181].mxu1 }
 0x77f   :  { %14682 = vmatpush3.bf16.msra.mxu1 %v22989_v43  ;;  %v14257_v62 = vadd.f32 %v14256_v50, %v14255_v48  ;;  %v14258_v58 = vpop.f32.mrb[182].mxu1  ;;  %v17158_v48 = vld [vmem:[%s22832_s2 + $0x384] ss:$8 sps:$4 sm:$0xff]   ;;  %v17159_v50 = vld [vmem:[%s22832_s2 + $0x380] ss:$8 sps:$4 sm:$0xff]  }
 0x780   :  { %14683 = vmatprep.subr.bf16.mxu1 %v22990_v55  ;;  %v14259_v52 = vpop.f32.mrb[183].mxu1 }
 0x781   :  { %v14260_v27 = vadd.f32 %v14259_v52, %v14258_v58  ;;  %v17161_v58 = vld [vmem:[%s22832_s2 + $0x394] ss:$8 sps:$4 sm:$0xff]   ;;  %v17162_v52 = vld [vmem:[%s22832_s2 + $0x140] ss:$8 sps:$4 sm:$0xff]  }
 0x782   :  { %6520 = vmatmul.mubr.bf16.gmra.mrb[32].mxu1 %v17148_v35  ;;  %v17164_v35 = vld [vmem:[%s22833_s3 + $0xa8] sm:$0xff]  }
 0x783   :  { %14684 = vmatpush3.bf16.msra.mxu1 %v22991_v31  ;;  %v5296_v12 = vpack.c.bf16 %v14260_v27, %v14257_v62  ;;  %6649 = vmatprep.mubr.bf16.mxu1 %v17149_v59  ;;  %v17160_v62 = vld [vmem:[%s22833_s3 + $0xa0] sm:$0xff]   ;;  %v17163_v27 = vld [vmem:[%s22832_s2 + $0x154] ss:$8 sps:$4 sm:$0xff]  }
 0x784   :  { %14685 = vmatprep.subr.bf16.mxu1 %v22992_v9  ;;  %v17166_v59 = vld [vmem:[%s22833_s3 + $0xb0] sm:$0xff]  }
 0x785   :  { %v14261_v28 = vpop.f32.mrb[184].mxu1  ;;  %15383 = vmatprep.mubr.msk.bf16.mxu0 %vm1148_vm0, %v5296_v12  ;;  %v17165_v12 = vld [vmem:[%s22832_s2 + $0x390] ss:$8 sps:$4 sm:$0xff]  }
 0x786   :  { %v14262_v30 = vpop.f32.mrb[185].mxu1 }
 0x787   :  { %v14263_v41 = vadd.f32 %v14262_v30, %v14261_v28  ;;  %v14264_v47 = vpop.f32.mrb[186].mxu1  ;;  %14686 = vmatpush3.bf16.msra.mxu1 %v22993_v25  ;;  %v17167_v28 = vld [vmem:[%s22832_s2 + $0x3a4] ss:$8 sps:$4 sm:$0xff]   ;;  %v17168_v30 = vld [vmem:[%s22832_s2 + $0x150] ss:$8 sps:$4 sm:$0xff]  }
 0x788   :  { %v14265_v5 = vpop.f32.mrb[187].mxu1  ;;  %14719 = vmatprep.subr.bf16.mxu1 %v22978_v19 }
 0x789   :  { %v14266_v23 = vadd.f32 %v14265_v5, %v14264_v47  ;;  %v17170_v47 = vld [vmem:[%s22833_s3 + $0xb8] sm:$0xff]   ;;  %v17171_v5 = vld [vmem:[%s22832_s2 + $0x3a0] ss:$8 sps:$4 sm:$0xff]  }
 0x78a   :  { %6650 = vmatmul.mubr.bf16.vlgmr.msra.gmra.mrb[36].mxu1 %v17150_v14  ;;  %v17173_v14 = vld [vmem:[%s22832_s2 + $0x3b4] ss:$8 sps:$4 sm:$0xff]  }
 0x78b   :  { %v5297_v46 = vpack.c.bf16 %v14266_v23, %v14263_v41  ;;  %14720 = vmatpush3.bf16.msra.mxu1 %v22979_v11  ;;  %6657 = vmatprep.mubr.bf16.mxu1 %v17151_v54  ;;  %v17169_v41 = vld [vmem:[%s22832_s2 + $0x164] ss:$8 sps:$4 sm:$0xff]   ;;  %v17175_v54 = vld [vmem:[%s22832_s2 + $0x174] ss:$8 sps:$4 sm:$0xff]  }
 0x78c   :  { %14721 = vmatprep.subr.bf16.mxu1 %v22980_v16  ;;  %v19711_v23 = vld [vmem:[%s22833_s3 + $0xc0] sm:$0xff]  }
 0x78d   :  { %15384 = vmatmul.mubr.msk.bf16.vlgmr.msra.gmra.mrb[212].mxu0 %vm1148_vm0, %v5297_v46  ;;  %v14267_v26 = vpop.f32.mrb[188].mxu1  ;;  %v17174_v46 = vld [vmem:[%s22832_s2 + $0x160] ss:$8 sps:$4 sm:$0xff]  }
 0x78e   :  { %14288 = vmatpush3.bf16.msra.mxu0 %v22979_v11  ;;  %v14268_v6 = vpop.f32.mrb[189].mxu1 }
 0x78f   :  { %14289 = vmatprep.subr.bf16.mxu0 %v22980_v16  ;;  %14722 = vmatpush3.bf16.msra.mxu1 %v22981_v34  ;;  %v14269_v33 = vadd.f32 %v14268_v6, %v14267_v26  ;;  %v14270_v61 = vpop.f32.mrb[190].mxu1  ;;  %v17176_v26 = vld [vmem:[%s22832_s2 + $0x3b0] ss:$8 sps:$4 sm:$0xff]  }
 0x790   :  { %14723 = vmatprep.subr.bf16.mxu1 %v22982_v21  ;;  %v14271_v45 = vpop.f32.mrb[191].mxu1  ;;  %v17177_v6 = vld [vmem:[%s22832_s2 + $0x170] ss:$8 sps:$4 sm:$0xff]  }
 0x791   :  { %v14272_v17 = vadd.f32 %v14271_v45, %v14270_v61 }
 0x792   :  { %14290 = vmatpush3.bf16.msra.mxu0 %v22981_v34  ;;  %6658 = vmatmul.mubr.bf16.gmra.mrb[40].mxu1 %v17152_v60 }
 0x793   :  { %14291 = vmatprep.subr.bf16.mxu0 %v22982_v21  ;;  %14724 = vmatpush3.bf16.msra.mxu1 %v22983_v36  ;;  %v5298_v15 = vpack.c.bf16 %v14272_v17, %v14269_v33 }
 0x794   :  { %14725 = vmatprep.subr.bf16.mxu1 %v22984_v57  ;;  %6665 = vmatprep.mubr.bf16.mxu1 %v17153_v38 }
 0x795   :  { %v14273_v40 = vpop.f32.mrb[192].mxu1  ;;  %15387 = vmatprep.mubr.msk.bf16.mxu0 %vm1148_vm0, %v5298_v15 }
 0x796   :  { %14292 = vmatpush3.bf16.msra.mxu0 %v22983_v36  ;;  %v14274_v39 = vpop.f32.mrb[193].mxu1 }
 0x797   :  { %14293 = vmatprep.subr.bf16.mxu0 %v22984_v57  ;;  %14726 = vmatpush3.bf16.msra.mxu1 %v22985_v13  ;;  %v14275_v0 = vadd.f32 %v14274_v39, %v14273_v40  ;;  %v14276_v4 = vpop.f32.mrb[194].mxu1 }
 0x798   :  { %14727 = vmatprep.subr.bf16.mxu1 %v22986_v24  ;;  %v14277_v32 = vpop.f32.mrb[195].mxu1 }
 0x799   :  { %v14278_v37 = vadd.f32 %v14277_v32, %v14276_v4 }
 0x79a   :  { %14294 = vmatpush3.bf16.msra.mxu0 %v22985_v13  ;;  %6666 = vmatmul.mubr.bf16.gmra.mrb[44].mxu1 %v17154_v53 }
 0x79b   :  { %14295 = vmatprep.subr.bf16.mxu0 %v22986_v24  ;;  %14728 = vmatpush3.bf16.msra.mxu1 %v22987_v3  ;;  %v5299_v56 = vpack.c.bf16 %v14278_v37, %v14275_v0 }
 0x79c   :  { %14729 = vmatprep.subr.bf16.mxu1 %v22988_v1  ;;  %6673 = vmatprep.mubr.bf16.mxu1 %v17155_v29 }
 0x79d   :  { %15388 = vmatmul.mubr.msk.bf16.gmra.mrb[216].mxu0 %vm1148_vm0, %v5299_v56  ;;  %v14351_v33 = vpop.f32.mrb[196].mxu1 }
 0x79e   :  { %14296 = vmatpush3.bf16.msra.mxu0 %v22987_v3  ;;  %5417 = vmatprep.mubr.bf16.mxu0 %v17156_v7  ;;  %v14352_v61 = vpop.f32.mrb[197].mxu1 }
 0x79f   :  { %14297 = vmatprep.subr.bf16.mxu0 %v22988_v1  ;;  %14730 = vmatpush3.bf16.msra.mxu1 %v22989_v43  ;;  %v14354_v45 = vpop.f32.mrb[198].mxu1  ;;  %v19729_v60 = vadd.f32 %v14352_v61, %v14351_v33 }
 0x7a0   :  { %14731 = vmatprep.subr.bf16.mxu1 %v22990_v55  ;;  %v14355_v17 = vpop.f32.mrb[199].mxu1 }
 0x7a1   :  { %v19731_v15 = vadd.f32 %v14355_v17, %v14354_v45 }
 0x7a2   :  { %14298 = vmatpush3.bf16.msra.mxu0 %v22989_v43  ;;  %6674 = vmatmul.mubr.bf16.gmra.mrb[48].mxu1 %v17157_v22 }
 0x7a3   :  { %14299 = vmatprep.subr.bf16.mxu0 %v22990_v55  ;;  %14732 = vmatpush3.bf16.msra.mxu1 %v22991_v31 }
 0x7a4   :  { %14733 = vmatprep.subr.bf16.mxu1 %v22992_v9  ;;  %6803 = vmatprep.mubr.bf16.mxu1 %v17158_v48 }
 0x7a5   :  { %v14357_v40 = vpop.f32.mrb[200].mxu1 }
 0x7a6   :  { %14300 = vmatpush3.bf16.msra.mxu0 %v22991_v31  ;;  %v14358_v39 = vpop.f32.mrb[201].mxu1 }
 0x7a7   :  { %14301 = vmatprep.subr.bf16.mxu0 %v22992_v9  ;;  %14734 = vmatpush3.bf16.msra.mxu1 %v22993_v25  ;;  %v14360_v0 = vpop.f32.mrb[202].mxu1  ;;  %v19735_v32 = vadd.f32 %v14358_v39, %v14357_v40 }
 0x7a8   :  { %v14361_v4 = vpop.f32.mrb[203].mxu1 }
 0x7a9   :  { %v19737_v37 = vadd.f32 %v14361_v4, %v14360_v0 }
 0x7aa   :  { %14302 = vmatpush3.bf16.msra.mxu0 %v22993_v25  ;;  %6804 = vmatmul.mubr.bf16.vlgmr.msra.gmra.mrb[52].mxu1 %v17159_v50 }
 0x7ab   :  { %15391 = vmatprep.subr.bf16.mxu0 %v17160_v62  ;;  %6811 = vmatprep.mubr.bf16.mxu1 %v17161_v58 }
 0x7ad   :  { %5418 = vmatmul.mubr.bf16.vlgmr.msra.gmra.mrb[220].mxu0 %v17162_v52  ;;  %v14363_v56 = vpop.f32.mrb[204].mxu1 }
 0x7ae   :  { %5425 = vmatprep.mubr.bf16.mxu0 %v17163_v27  ;;  %15392 = vmatpush3.bf16.msra.mxu0 %v17160_v62  ;;  %v14364_v29 = vpop.f32.mrb[205].mxu1 }
 0x7af   :  { %15393 = vmatprep.subr.bf16.mxu0 %v17164_v35  ;;  %v14366_v7 = vpop.f32.mrb[206].mxu1  ;;  %v19741_v48 = vadd.f32 %v14364_v29, %v14363_v56 }
 0x7b0   :  { %v14367_v22 = vpop.f32.mrb[207].mxu1 }
 0x7b1   :  { %v19743_v50 = vadd.f32 %v14367_v22, %v14366_v7 }
 0x7b2   :  { %15394 = vmatpush3.bf16.msra.mxu0 %v17164_v35  ;;  %6812 = vmatmul.mubr.bf16.gmra.mrb[56].mxu1 %v17165_v12 }
 0x7b3   :  { %15395 = vmatprep.subr.bf16.mxu0 %v17166_v59  ;;  %6819 = vmatprep.mubr.bf16.mxu1 %v17167_v28 }
 0x7b5   :  { %5426 = vmatmul.mubr.bf16.gmra.mrb[224].mxu0 %v17168_v30  ;;  %v14369_v58 = vpop.f32.mrb[208].mxu1 }
 0x7b6   :  { %5433 = vmatprep.mubr.bf16.mxu0 %v17169_v41  ;;  %15396 = vmatpush3.bf16.msra.mxu0 %v17166_v59  ;;  %v14370_v52 = vpop.f32.mrb[209].mxu1 }
 0x7b7   :  { %15397 = vmatprep.subr.bf16.mxu0 %v17170_v47  ;;  %v14372_v27 = vpop.f32.mrb[210].mxu1  ;;  %v19747_v12 = vadd.f32 %v14370_v52, %v14369_v58 }
 0x7b8   :  { %v14373_v35 = vpop.f32.mrb[211].mxu1 }
 0x7b9   :  { %v19749_v59 = vadd.f32 %v14373_v35, %v14372_v27 }
 0x7ba   :  { %15398 = vmatpush3.bf16.msra.mxu0 %v17170_v47  ;;  %6820 = vmatmul.mubr.bf16.gmra.mrb[60].mxu1 %v17171_v5 }
 0x7bb   :  { %15407 = vmatprep.subr.bf16.mxu0 %v19711_v23  ;;  %6827 = vmatprep.mubr.bf16.mxu1 %v17173_v14 }
 0x7bd   :  { %5434 = vmatmul.mubr.bf16.gmra.mrb[228].mxu0 %v17174_v46  ;;  %v14399_v30 = vpop.f32.mrb[212].mxu1 }
 0x7be   :  { %5441 = vmatprep.mubr.bf16.mxu0 %v17175_v54  ;;  %v14400_v41 = vpop.f32.mrb[213].mxu1 }
 0x7bf   :  { %v14402_v47 = vpop.f32.mrb[214].mxu1  ;;  %v19753_v14 = vadd.f32 %v14400_v41, %v14399_v30 }
 0x7c0   :  { %v14403_v5 = vpop.f32.mrb[215].mxu1 }
 0x7c1   :  { %v19755_v46 = vadd.f32 %v14403_v5, %v14402_v47 }
 0x7c2   :  { %6828 = vmatmul.mubr.bf16.gmra.mrb[64].mxu1 %v17176_v26 }
 0x7c5   :  { %5442 = vmatmul.mubr.bf16.gmra.mrb[232].mxu0 %v17177_v6  ;;  %v14405_v26 = vpop.f32.mrb[216].mxu1 }
 0x7c6   :  { %v14406_v6 = vpop.f32.mrb[217].mxu1 }
 0x7c7   :  { %v14408_v33 = vpop.f32.mrb[218].mxu1  ;;  %v19759_v45 = vadd.f32 %v14406_v6, %v14405_v26 }
 0x7c8   :  { %v14409_v61 = vpop.f32.mrb[219].mxu1 }
 0x7c9   :  { %v19761_v17 = vadd.f32 %v14409_v61, %v14408_v33 }
 0x7cd   :  { %v14411_v39 = vpop.f32.mrb[220].mxu1 }
 0x7ce   :  { %v14412_v0 = vpop.f32.mrb[221].mxu1 }
 0x7cf   :  { %v14414_v4 = vpop.f32.mrb[222].mxu1  ;;  %v19765_v29 = vadd.f32 %v14412_v0, %v14411_v39 }
 0x7d0   :  { %v14415_v56 = vpop.f32.mrb[223].mxu1 }
 0x7d1   :  { %v19767_v7 = vadd.f32 %v14415_v56, %v14414_v4 }
 0x7d5   :  { %v14417_v58 = vpop.f32.mrb[224].mxu1 }
 0x7d6   :  { %v14418_v52 = vpop.f32.mrb[225].mxu1 }
 0x7d7   :  { %v14420_v27 = vpop.f32.mrb[226].mxu1  ;;  %v19771_v30 = vadd.f32 %v14418_v52, %v14417_v58 }
 0x7d8   :  { %v14421_v35 = vpop.f32.mrb[227].mxu1 }
 0x7d9   :  { %v19773_v41 = vadd.f32 %v14421_v35, %v14420_v27 }
 0x7dd   :  { %v14447_v5 = vpop.f32.mrb[228].mxu1 }
 0x7de   :  { %v14448_v26 = vpop.f32.mrb[229].mxu1 }
 0x7df   :  { %v14450_v6 = vpop.f32.mrb[230].mxu1  ;;  %v19777_v61 = vadd.f32 %v14448_v26, %v14447_v5 }
 0x7e0   :  { %v14451_v33 = vpop.f32.mrb[231].mxu1 }
 0x7e1   :  { %v19779_v39 = vadd.f32 %v14451_v33, %v14450_v6 }
 0x7e5   :  { %v14453_v4 = vpop.f32.mrb[232].mxu1 }
 0x7e6   :  { %v14454_v56 = vpop.f32.mrb[233].mxu1 }
 0x7e7   :  { %v14456_v58 = vpop.f32.mrb[234].mxu1  ;;  %v19783_v27 = vadd.f32 %v14454_v56, %v14453_v4 }
 0x7e8   :  { %v14457_v52 = vpop.f32.mrb[235].mxu1 }
 0x7e9   :  { %v19785_v35 = vadd.f32 %v14457_v52, %v14456_v58 }
 0x7ed   :  { %v14459_v22 = vpop.f32.mrb[236].mxu1 }
 0x7ee   :  { %v14460_v40 = vpop.f32.mrb[237].mxu1 }
 0x7ef   :  { %v14462_v5 = vpop.f32.mrb[238].mxu1  ;;  %v19789_v6 = vadd.f32 %v14460_v40, %v14459_v22 }
 0x7f0   :  { %v14463_v26 = vpop.f32.mrb[239].mxu1 }
 0x7f1   :  { %v19791_v33 = vadd.f32 %v14463_v26, %v14462_v5 }
 0x7f5   :  { %v14465_v54 = vpop.f32.mrb[240].mxu1 }
 0x7f6   :  { %v14466_v28 = vpop.f32.mrb[241].mxu1 }
 0x7f7   :  { %v14468_v4 = vpop.f32.mrb[242].mxu1  ;;  %v19795_v58 = vadd.f32 %v14466_v28, %v14465_v54 }
 0x7f8   :  { %v14469_v56 = vpop.f32.mrb[243].mxu1 }
 0x7f9   :  { %v19797_v52 = vadd.f32 %v14469_v56, %v14468_v4 }
 0x7fd   :  { %v14495_v62 = vpop.f32.mrb[244].mxu1 }
 0x7fe   :  { %v14496_v53 = vpop.f32.mrb[245].mxu1 }
 0x7ff   :  { %v14498_v40 = vpop.f32.mrb[246].mxu1  ;;  %v19801_v5 = vadd.f32 %v14496_v53, %v14495_v62 }
 0x800   :  { %v14499_v22 = vpop.f32.mrb[247].mxu1 }
 0x801   :  { %v19803_v26 = vadd.f32 %v14499_v22, %v14498_v40 }
 0x805   :  { %v14501_v38 = vpop.f32.mrb[248].mxu1 }
 0x806   :  { %v14502_v10 = vpop.f32.mrb[249].mxu1 }
 0x807   :  { %v14504_v28 = vpop.f32.mrb[250].mxu1  ;;  %v19807_v54 = vadd.f32 %v14502_v10, %v14501_v38 }
 0x808   :  { %v14505_v4 = vpop.f32.mrb[251].mxu1 }
 0x809   :  { %v19809_v56 = vadd.f32 %v14505_v4, %v14504_v28 }
 0x80d   :  { %v14507_v51 = vpop.f32.mrb[252].mxu1 }
 0x80e   :  { %v14508_v49 = vpop.f32.mrb[253].mxu1 }
 0x80f   :  { %v14510_v53 = vpop.f32.mrb[254].mxu1  ;;  %v19813_v40 = vadd.f32 %v14508_v49, %v14507_v51 }
 0x810   :  { %v14511_v62 = vpop.f32.mrb[255].mxu1 }
 0x811   :  { %v19815_v22 = vadd.f32 %v14511_v62, %v14510_v53 }
 0x815   :  { %v14513_v2 = vpop.f32.mrb[0].mxu1 }
 0x816   :  { %v14514_v10 = vpop.f32.mrb[1].mxu1 }
 0x817   :  { %v19819_v38 = vadd.f32 %v14514_v10, %v14513_v2  ;;  %v14516_v28 = vpop.f32.mrb[2].mxu1 }
 0x818   :  { %v14517_v4 = vpop.f32.mrb[3].mxu1 }
 0x819   :  { %v19821_v20 = vadd.f32 %v14517_v4, %v14516_v28 }
 0x880   :  { %v14303_v63 = vpop.f32.mrb[220].mxu0 }
 0x881   :  { %v14304_v44 = vpop.f32.mrb[221].mxu0 }
 0x882   :  { %v14305_v51 = vadd.f32 %v14304_v44, %v14303_v63  ;;  %v14306_v49 = vpop.f32.mrb[222].mxu0 }
 0x883   :  { %v14307_v53 = vpop.f32.mrb[223].mxu0 }
 0x884   :  { %v14308_v62 = vadd.f32 %v14307_v53, %v14306_v49  ;;  %v17180_v53 = vld [vmem:[%s22833_s3 + $0xd8] sm:$0xff]  }
 0x886   :  { %v5450_v42 = vpack.c.bf16 %v14308_v62, %v14305_v51  ;;  %v17178_v51 = vld [vmem:[%s22833_s3 + $0xc8] sm:$0xff]  }
 0x888   :  { %v14309_v8 = vpop.f32.mrb[224].mxu0  ;;  %15399 = vmatprep.mubr.msk.bf16.mxu0 %vm1148_vm0, %v5450_v42 }
 0x889   :  { %v14310_v0 = vpop.f32.mrb[225].mxu0 }
 0x88a   :  { %v14311_v2 = vadd.f32 %v14310_v0, %v14309_v8  ;;  %v14312_v10 = vpop.f32.mrb[226].mxu0 }
 0x88b   :  { %v14313_v18 = vpop.f32.mrb[227].mxu0 }
 0x88c   :  { %v14314_v25 = vadd.f32 %v14313_v18, %v14312_v10 }
 0x88e   :  { %v5451_v28 = vpack.c.bf16 %v14314_v25, %v14311_v2  ;;  %v17179_v25 = vld [vmem:[%s22833_s3 + $0xd0] sm:$0xff]  }
 0x890   :  { %v14315_v4 = vpop.f32.mrb[228].mxu0  ;;  %15400 = vmatmul.mubr.msk.bf16.vlgmr.msra.gmra.mrb[212].mxu0 %vm1148_vm0, %v5451_v28  ;;  %v17181_v28 = vld [vmem:[%s22833_s3 + $0xe0] sm:$0xff]  }
 0x891   :  { %v14316_v47 = vpop.f32.mrb[229].mxu0  ;;  %15408 = vmatpush3.bf16.msra.mxu0 %v19711_v23 }
 0x892   :  { %v14317_v63 = vadd.f32 %v14316_v47, %v14315_v4  ;;  %v14318_v44 = vpop.f32.mrb[230].mxu0  ;;  %15409 = vmatprep.subr.bf16.mxu0 %v17178_v51  ;;  %v23004_v4 = vpack.c.bf16 %v19731_v15, %v19729_v60  ;;  %v17183_v60 = vld [vmem:[%s22833_s3 + $0xf0] sm:$0xff]   ;;  %v23007_v15 = vpack.c.bf16 %v19749_v59, %v19747_v12  ;;  %v23010_v12 = vpack.c.bf16 %v19767_v7, %v19765_v29  ;;  %v17186_v59 = vld [vmem:[%s22833_s3 + $0x108] sm:$0xff]   ;;  %v17189_v29 = vld [vmem:[%s22833_s3 + $0x120] sm:$0xff]  }
 0x893   :  { %v14319_v42 = vpop.f32.mrb[231].mxu0  ;;  %v23013_v7 = vpack.c.bf16 %v19785_v35, %v19783_v27  ;;  %v23016_v27 = vpack.c.bf16 %v19803_v26, %v19801_v5  ;;  %v17192_v35 = vld [vmem:[%s22833_s3 + $0x138] sm:$0xff]   ;;  %v17194_v5 = vld [vmem:[%s22833_s3 + $0x140] sm:$0xff]  }
 0x894   :  { %v14320_v49 = vadd.f32 %v14319_v42, %v14318_v44  ;;  %v23006_v44 = vpack.c.bf16 %v19743_v50, %v19741_v48  ;;  %v17185_v48 = vld [vmem:[%s22833_s3 + $0x100] sm:$0xff]   ;;  %v23009_v50 = vpack.c.bf16 %v19761_v17, %v19759_v45  ;;  %v23012_v45 = vpack.c.bf16 %v19779_v39, %v19777_v61  ;;  %v17188_v17 = vld [vmem:[%s22833_s3 + $0x118] sm:$0xff]   ;;  %v17191_v61 = vld [vmem:[%s22833_s3 + $0x130] sm:$0xff]  }
 0x895   :  { %15410 = vmatpush3.bf16.msra.mxu0 %v17178_v51  ;;  %v17182_v51 = vld [vmem:[%s22833_s3 + $0xe8] sm:$0xff]   ;;  %v23015_v39 = vpack.c.bf16 %v19797_v52, %v19795_v58  ;;  %v23019_v58 = vpack.c.bf16 %v19821_v20, %v19819_v38  ;;  %v23020_v20 = vld [vmem:[#allocation9_spill] sm:$0xff] }
 0x896   :  { %v5452_v8 = vpack.c.bf16 %v14320_v49, %v14317_v63  ;;  %15411 = vmatprep.subr.bf16.mxu0 %v17179_v25  ;;  %v23005_v63 = vpack.c.bf16 %v19737_v37, %v19735_v32  ;;  %v23008_v32 = vpack.c.bf16 %v19755_v46, %v19753_v14  ;;  %v17184_v37 = vld [vmem:[%s22833_s3 + $0xf8] sm:$0xff]   ;;  %v17187_v14 = vld [vmem:[%s22833_s3 + $0x110] sm:$0xff]   ;;  %v23011_v46 = vpack.c.bf16 %v19773_v41, %v19771_v30  ;;  %v17190_v41 = vld [vmem:[%s22833_s3 + $0x128] sm:$0xff]  }
 0x897   :  { %v23014_v30 = vpack.c.bf16 %v19791_v33, %v19789_v6  ;;  %v23017_v6 = vpack.c.bf16 %v19809_v56, %v19807_v54  ;;  %v23018_v33 = vpack.c.bf16 %v19815_v22, %v19813_v40  ;;  %v17193_v52 = vld [vmem:[%s22832_s2 + $0x284] ss:$8 sps:$4 sm:$0xff]   ;;  %v17195_v26 = vld [vmem:[%s22832_s2 + $0x280] ss:$8 sps:$4 sm:$0xff]   ;;  %v17196_v54 = vld [vmem:[%s22832_s2 + $0x294] ss:$8 sps:$4 sm:$0xff]  }
 0x898   :  { %v14321_v18 = vpop.f32.mrb[232].mxu0  ;;  %15403 = vmatprep.mubr.msk.bf16.mxu0 %vm1148_vm0, %v5452_v8  ;;  %v17197_v56 = vld [vmem:[%s22833_s3 + $0x148] sm:$0xff]   ;;  %v17198_v40 = vld [vmem:[%s22833_s3 + $0x150] sm:$0xff]   ;;  %v17201_v42 = vld [vmem:[%s22833_s3 + $0x158] sm:$0xff]  }
 0x899   :  { %v14322_v23 = vpop.f32.mrb[233].mxu0  ;;  %15412 = vmatpush3.bf16.msra.mxu0 %v17179_v25  ;;  %v17199_v22 = vld [vmem:[%s22832_s2 + $0x290] ss:$8 sps:$4 sm:$0xff]   ;;  %v17200_v38 = vld [vmem:[%s22832_s2 + $0x2a4] ss:$8 sps:$4 sm:$0xff]  }
 0x89a   :  { %v14323_v47 = vadd.f32 %v14322_v23, %v14321_v18  ;;  %v14324_v0 = vpop.f32.mrb[234].mxu0  ;;  %15413 = vmatprep.subr.bf16.mxu0 %v17180_v53  ;;  %v19985_v49 = vld [vmem:[%s22833_s3 + $0x160] sm:$0xff]   ;;  %v17204_v25 = vld [vmem:[%s22832_s2 + $0x2b4] ss:$8 sps:$4 sm:$0xff]   ;;  %v17205_v18 = vld [vmem:[%s22832_s2 + $0x2b0] ss:$8 sps:$4 sm:$0xff]  }
 0x89b   :  { %v14325_v62 = vpop.f32.mrb[235].mxu0  ;;  %v17203_v8 = vld [vmem:[%s22832_s2 + $0x2a0] ss:$8 sps:$4 sm:$0xff]   ;;  %v14591_v23 = vpop.f32.mrb[4].mxu1 }
 0x89c   :  { %v14326_v2 = vadd.f32 %v14325_v62, %v14324_v0 }
 0x89d   :  { %15414 = vmatpush3.bf16.msra.mxu0 %v17180_v53 }
 0x89e   :  { %v5453_v10 = vpack.c.bf16 %v14326_v2, %v14323_v47  ;;  %15423 = vmatprep.subr.bf16.mxu0 %v17181_v28  ;;  %v14592_v47 = vpop.f32.mrb[5].mxu1 }
 0x89f   :  { %v14594_v0 = vpop.f32.mrb[6].mxu1  ;;  %v19997_v62 = vadd.f32 %v14592_v47, %v14591_v23 }
 0x8a0   :  { %15404 = vmatmul.mubr.msk.bf16.gmra.mrb[216].mxu0 %vm1148_vm0, %v5453_v10  ;;  %v14595_v53 = vpop.f32.mrb[7].mxu1 }
 0x8a1   :  { %15415 = vmatprep.mubr.msk.bf16.mxu0 %vm1148_vm0, %v23004_v4  ;;  %v19999_v2 = vadd.f32 %v14595_v53, %v14594_v0 }
 0x8a8   :  { %15416 = vmatmul.mubr.msk.bf16.vlgmr.msra.gmra.mrb[212].mxu0 %vm1148_vm0, %v23005_v63 }
 0x8a9   :  { %15424 = vmatpush3.bf16.msra.mxu0 %v17181_v28  ;;  %15419 = vmatprep.mubr.msk.bf16.mxu0 %vm1148_vm0, %v23006_v44  ;;  %v14597_v28 = vpop.f32.mrb[8].mxu1 }
 0x8aa   :  { %15425 = vmatprep.subr.bf16.mxu0 %v17182_v51  ;;  %v14598_v4 = vpop.f32.mrb[9].mxu1 }
 0x8ab   :  { %v14600_v63 = vpop.f32.mrb[10].mxu1 }
 0x8ac   :  { %v14601_v44 = vpop.f32.mrb[11].mxu1 }
 0x8ad   :  { %15426 = vmatpush3.bf16.msra.mxu0 %v17182_v51  ;;  %v20003_v51 = vadd.f32 %v14598_v4, %v14597_v28 }
 0x8ae   :  { %15427 = vmatprep.subr.bf16.mxu0 %v17183_v60 }
 0x8b0   :  { %15420 = vmatmul.mubr.msk.bf16.gmra.mrb[216].mxu0 %vm1148_vm0, %v23007_v15 }
 0x8b1   :  { %15428 = vmatpush3.bf16.msra.mxu0 %v17183_v60  ;;  %15431 = vmatprep.mubr.msk.bf16.mxu0 %vm1148_vm0, %v23008_v32  ;;  %v20005_v60 = vadd.f32 %v14601_v44, %v14600_v63  ;;  %v14603_v32 = vpop.f32.mrb[12].mxu1 }
 0x8b2   :  { %15429 = vmatprep.subr.bf16.mxu0 %v17184_v37 }
 0x8b5   :  { %15430 = vmatpush3.bf16.msra.mxu0 %v17184_v37  ;;  %v14604_v37 = vpop.f32.mrb[13].mxu1 }
 0x8b6   :  { %15439 = vmatprep.subr.bf16.mxu0 %v17185_v48 }
 0x8b8   :  { %15432 = vmatmul.mubr.msk.bf16.vlgmr.msra.gmra.mrb[212].mxu0 %vm1148_vm0, %v23009_v50 }
 0x8b9   :  { %15440 = vmatpush3.bf16.msra.mxu0 %v17185_v48  ;;  %15435 = vmatprep.mubr.msk.bf16.mxu0 %vm1148_vm0, %v23010_v12  ;;  %v14606_v48 = vpop.f32.mrb[14].mxu1  ;;  %v20009_v12 = vadd.f32 %v14604_v37, %v14603_v32 }
 0x8ba   :  { %15441 = vmatprep.subr.bf16.mxu0 %v17186_v59  ;;  %v14607_v50 = vpop.f32.mrb[15].mxu1 }
 0x8bd   :  { %15442 = vmatpush3.bf16.msra.mxu0 %v17186_v59  ;;  %v20011_v59 = vadd.f32 %v14607_v50, %v14606_v48 }
 0x8be   :  { %15443 = vmatprep.subr.bf16.mxu0 %v17187_v14 }
 0x8c0   :  { %15436 = vmatmul.mubr.msk.bf16.gmra.mrb[216].mxu0 %vm1148_vm0, %v23011_v46  ;;  %v14609_v46 = vpop.f32.mrb[16].mxu1 }
 0x8c1   :  { %15444 = vmatpush3.bf16.msra.mxu0 %v17187_v14  ;;  %15447 = vmatprep.mubr.msk.bf16.mxu0 %vm1148_vm0, %v23012_v45  ;;  %v14610_v45 = vpop.f32.mrb[17].mxu1 }
 0x8c2   :  { %15445 = vmatprep.subr.bf16.mxu0 %v17188_v17 }
 0x8c5   :  { %15446 = vmatpush3.bf16.msra.mxu0 %v17188_v17  ;;  %v14612_v17 = vpop.f32.mrb[18].mxu1 }
 0x8c6   :  { %15455 = vmatprep.subr.bf16.mxu0 %v17189_v29 }
 0x8c8   :  { %15448 = vmatmul.mubr.msk.bf16.vlgmr.msra.gmra.mrb[212].mxu0 %vm1148_vm0, %v23013_v7  ;;  %v20015_v7 = vadd.f32 %v14610_v45, %v14609_v46 }
 0x8c9   :  { %15456 = vmatpush3.bf16.msra.mxu0 %v17189_v29  ;;  %15451 = vmatprep.mubr.msk.bf16.mxu0 %vm1148_vm0, %v23014_v30  ;;  %v14613_v29 = vpop.f32.mrb[19].mxu1 }
 0x8ca   :  { %15457 = vmatprep.subr.bf16.mxu0 %v17190_v41  ;;  %v20017_v30 = vadd.f32 %v14613_v29, %v14612_v17 }
 0x8cd   :  { %15458 = vmatpush3.bf16.msra.mxu0 %v17190_v41 }
 0x8ce   :  { %15459 = vmatprep.subr.bf16.mxu0 %v17191_v61 }
 0x8d0   :  { %15452 = vmatmul.mubr.msk.bf16.gmra.mrb[216].mxu0 %vm1148_vm0, %v23015_v39 }
 0x8d1   :  { %15460 = vmatpush3.bf16.msra.mxu0 %v17191_v61  ;;  %15463 = vmatprep.mubr.msk.bf16.mxu0 %vm1148_vm0, %v23016_v27  ;;  %v14639_v61 = vpop.f32.mrb[20].mxu1 }
 0x8d2   :  { %15461 = vmatprep.subr.bf16.mxu0 %v17192_v35  ;;  %v14640_v39 = vpop.f32.mrb[21].mxu1 }
 0x8d3   :  { %v14642_v27 = vpop.f32.mrb[22].mxu1 }
 0x8d5   :  { %15462 = vmatpush3.bf16.msra.mxu0 %v17192_v35  ;;  %v14643_v35 = vpop.f32.mrb[23].mxu1 }
 0x8d6   :  { %14527 = vmatprep.subr.bf16.mxu0 %v22978_v19 }
 0x8d8   :  { %15464 = vmatmul.mubr.msk.bf16.vlgmr.msra.gmra.mrb[212].mxu0 %vm1148_vm0, %v23017_v6  ;;  %v20021_v6 = vadd.f32 %v14640_v39, %v14639_v61 }
 0x8d9   :  { %14528 = vmatpush3.bf16.msra.mxu0 %v22979_v11  ;;  %15467 = vmatprep.mubr.msk.bf16.mxu0 %vm1148_vm0, %v23018_v33  ;;  %v20023_v33 = vadd.f32 %v14643_v35, %v14642_v27 }
 0x8da   :  { %14529 = vmatprep.subr.bf16.mxu0 %v22980_v16 }
 0x8dd   :  { %14530 = vmatpush3.bf16.msra.mxu0 %v22981_v34 }
 0x8de   :  { %14531 = vmatprep.subr.bf16.mxu0 %v22982_v21 }
 0x8e0   :  { %15468 = vmatmul.mubr.msk.bf16.gmra.mrb[216].mxu0 %vm1148_vm0, %v23019_v58 }
 0x8e1   :  { %14532 = vmatpush3.bf16.msra.mxu0 %v22983_v36  ;;  %6187 = vmatprep.mubr.bf16.mxu0 %v17193_v52  ;;  %v14645_v52 = vpop.f32.mrb[24].mxu1 }
 0x8e2   :  { %14533 = vmatprep.subr.bf16.mxu0 %v22984_v57 }
 0x8e5   :  { %14534 = vmatpush3.bf16.msra.mxu0 %v22985_v13 }
 0x8e6   :  { %14535 = vmatprep.subr.bf16.mxu0 %v22986_v24 }
 0x8e9   :  { %14536 = vmatpush3.bf16.msra.mxu0 %v22987_v3 }
 0x8ea   :  { %14537 = vmatprep.subr.bf16.mxu0 %v22988_v1 }
 0x8ed   :  { %14538 = vmatpush3.bf16.msra.mxu0 %v22989_v43 }
 0x8ee   :  { %14539 = vmatprep.subr.bf16.mxu0 %v22990_v55 }
 0x8f1   :  { %14540 = vmatpush3.bf16.msra.mxu0 %v22991_v31 }
 0x8f2   :  { %14541 = vmatprep.subr.bf16.mxu0 %v22992_v9 }
 0x8f5   :  { %14542 = vmatpush3.bf16.msra.mxu0 %v23020_v20 }
 0x8f6   :  { %15471 = vmatprep.subr.bf16.mxu0 %v17194_v5 }
 0x8f8   :  { %6188 = vmatmul.mubr.bf16.vlgmr.msra.gmra.mrb[236].mxu0 %v17195_v26 }
 0x8f9   :  { %6195 = vmatprep.mubr.bf16.mxu0 %v17196_v54  ;;  %15472 = vmatpush3.bf16.msra.mxu0 %v17194_v5  ;;  %v14646_v5 = vpop.f32.mrb[25].mxu1 }
 0x8fa   :  { %15473 = vmatprep.subr.bf16.mxu0 %v17197_v56  ;;  %v14648_v26 = vpop.f32.mrb[26].mxu1 }
 0x8fb   :  { %v14649_v54 = vpop.f32.mrb[27].mxu1 }
 0x8fd   :  { %15474 = vmatpush3.bf16.msra.mxu0 %v17197_v56  ;;  %v20027_v56 = vadd.f32 %v14646_v5, %v14645_v52 }
 0x8fe   :  { %15475 = vmatprep.subr.bf16.mxu0 %v17198_v40 }
 0x900   :  { %6196 = vmatmul.mubr.bf16.gmra.mrb[240].mxu0 %v17199_v22 }
 0x901   :  { %6203 = vmatprep.mubr.bf16.mxu0 %v17200_v38  ;;  %15476 = vmatpush3.bf16.msra.mxu0 %v17198_v40  ;;  %v20029_v40 = vadd.f32 %v14649_v54, %v14648_v26  ;;  %v14651_v38 = vpop.f32.mrb[28].mxu1 }
 0x902   :  { %15477 = vmatprep.subr.bf16.mxu0 %v17201_v42 }
 0x905   :  { %15478 = vmatpush3.bf16.msra.mxu0 %v17201_v42  ;;  %v14652_v42 = vpop.f32.mrb[29].mxu1 }
 0x906   :  { %15487 = vmatprep.subr.bf16.mxu0 %v19985_v49 }
 0x908   :  { %6204 = vmatmul.mubr.bf16.gmra.mrb[244].mxu0 %v17203_v8  ;;  %v14654_v8 = vpop.f32.mrb[30].mxu1 }
 0x909   :  { %6211 = vmatprep.mubr.bf16.mxu0 %v17204_v25  ;;  %v14655_v25 = vpop.f32.mrb[31].mxu1 }
 0x90a   :  { %v20035_v23 = vadd.f32 %v14655_v25, %v14654_v8  ;;  %v14657_v0 = vpop.f32.mrb[32].mxu1 }
 0x90b   :  { %v14658_v53 = vpop.f32.mrb[33].mxu1 }
 0x90c   :  { %v14660_v28 = vpop.f32.mrb[34].mxu1  ;;  %v20039_v63 = vadd.f32 %v14658_v53, %v14657_v0 }
 0x90d   :  { %v14661_v4 = vpop.f32.mrb[35].mxu1 }
 0x90e   :  { %v20041_v44 = vadd.f32 %v14661_v4, %v14660_v28  ;;  %v14687_v37 = vpop.f32.mrb[36].mxu1 }
 0x90f   :  { %v14688_v48 = vpop.f32.mrb[37].mxu1 }
 0x910   :  { %6212 = vmatmul.mubr.bf16.gmra.mrb[248].mxu0 %v17205_v18  ;;  %v20033_v18 = vadd.f32 %v14652_v42, %v14651_v38  ;;  %v14690_v50 = vpop.f32.mrb[38].mxu1  ;;  %v20045_v45 = vadd.f32 %v14688_v48, %v14687_v37 }
 0x911   :  { %v14691_v46 = vpop.f32.mrb[39].mxu1 }
 0x912   :  { %v20047_v17 = vadd.f32 %v14691_v46, %v14690_v50  ;;  %v14693_v61 = vpop.f32.mrb[40].mxu1 }
 0x913   :  { %v14694_v39 = vpop.f32.mrb[41].mxu1 }
 0x914   :  { %v14696_v27 = vpop.f32.mrb[42].mxu1  ;;  %v20051_v52 = vadd.f32 %v14694_v39, %v14693_v61 }
 0x915   :  { %v14697_v35 = vpop.f32.mrb[43].mxu1 }
 0x916   :  { %v20053_v5 = vadd.f32 %v14697_v35, %v14696_v27  ;;  %v14699_v54 = vpop.f32.mrb[44].mxu1 }
 0x917   :  { %v14700_v38 = vpop.f32.mrb[45].mxu1 }
 0x918   :  { %v14702_v42 = vpop.f32.mrb[46].mxu1  ;;  %v20057_v25 = vadd.f32 %v14700_v38, %v14699_v54 }
 0x919   :  { %v14703_v8 = vpop.f32.mrb[47].mxu1 }
 0x91a   :  { %v20059_v0 = vadd.f32 %v14703_v8, %v14702_v42  ;;  %v14705_v28 = vpop.f32.mrb[48].mxu1 }
 0x91b   :  { %v14706_v4 = vpop.f32.mrb[49].mxu1 }
 0x91c   :  { %v14708_v37 = vpop.f32.mrb[50].mxu1  ;;  %v20063_v50 = vadd.f32 %v14706_v4, %v14705_v28 }
 0x91d   :  { %v14709_v48 = vpop.f32.mrb[51].mxu1 }
 0x91e   :  { %v20065_v46 = vadd.f32 %v14709_v48, %v14708_v37  ;;  %v14735_v39 = vpop.f32.mrb[52].mxu1 }
 0x91f   :  { %v14736_v27 = vpop.f32.mrb[53].mxu1 }
 0x920   :  { %v14738_v35 = vpop.f32.mrb[54].mxu1  ;;  %v20069_v38 = vadd.f32 %v14736_v27, %v14735_v39 }
 0x921   :  { %v14739_v54 = vpop.f32.mrb[55].mxu1 }
 0x922   :  { %v20071_v42 = vadd.f32 %v14739_v54, %v14738_v35  ;;  %v14741_v53 = vpop.f32.mrb[56].mxu1 }
 0x923   :  { %v14742_v26 = vpop.f32.mrb[57].mxu1 }
 0x924   :  { %v14744_v28 = vpop.f32.mrb[58].mxu1  ;;  %v20075_v4 = vadd.f32 %v14742_v26, %v14741_v53 }
 0x925   :  { %v14745_v37 = vpop.f32.mrb[59].mxu1 }
 0x926   :  { %v20077_v48 = vadd.f32 %v14745_v37, %v14744_v28  ;;  %v14747_v29 = vpop.f32.mrb[60].mxu1 }
 0x927   :  { %v14748_v32 = vpop.f32.mrb[61].mxu1 }
 0x928   :  { %v14750_v39 = vpop.f32.mrb[62].mxu1  ;;  %v20081_v35 = vadd.f32 %v14748_v32, %v14747_v29 }
 0x929   :  { %v14751_v27 = vpop.f32.mrb[63].mxu1 }
 0x92a   :  { %v20083_v54 = vadd.f32 %v14751_v27, %v14750_v39  ;;  %v14753_v47 = vpop.f32.mrb[64].mxu1 }
 0x92b   :  { %v14754_v26 = vpop.f32.mrb[65].mxu1 }
 0x92c   :  { %v20087_v53 = vadd.f32 %v14754_v26, %v14753_v47  ;;  %v14756_v28 = vpop.f32.mrb[66].mxu1 }
 0x92d   :  { %v14757_v37 = vpop.f32.mrb[67].mxu1 }
 0x92e   :  { %v20089_v22 = vadd.f32 %v14757_v37, %v14756_v28 }
 0x9cb   :  { %v14543_v58 = vpop.f32.mrb[236].mxu0 }
 0x9cc   :  { %v14544_v41 = vpop.f32.mrb[237].mxu0 }
 0x9cd   :  { %v14545_v32 = vadd.f32 %v14544_v41, %v14543_v58  ;;  %v14546_v29 = vpop.f32.mrb[238].mxu0 }
 0x9ce   :  { %v14547_v39 = vpop.f32.mrb[239].mxu0 }
 0x9cf   :  { %v14548_v27 = vadd.f32 %v14547_v39, %v14546_v29  ;;  %v17208_v39 = vld [vmem:[%s22833_s3 + $0x178] sm:$0xff]  }
 0x9d1   :  { %v6220_v14 = vpack.c.bf16 %v14548_v27, %v14545_v32  ;;  %v17206_v32 = vld [vmem:[%s22833_s3 + $0x168] sm:$0xff]  }
 0x9d3   :  { %v14549_v15 = vpop.f32.mrb[240].mxu0  ;;  %15479 = vmatprep.mubr.msk.bf16.mxu0 %vm1148_vm0, %v6220_v14 }
 0x9d4   :  { %v14550_v8 = vpop.f32.mrb[241].mxu0 }
 0x9d5   :  { %v14551_v47 = vadd.f32 %v14550_v8, %v14549_v15  ;;  %v14552_v26 = vpop.f32.mrb[242].mxu0 }
 0x9d6   :  { %v14553_v10 = vpop.f32.mrb[243].mxu0 }
 0x9d7   :  { %v14554_v20 = vadd.f32 %v14553_v10, %v14552_v26 }
 0x9d9   :  { %v6221_v28 = vpack.c.bf16 %v14554_v20, %v14551_v47  ;;  %v17207_v20 = vld [vmem:[%s22833_s3 + $0x170] sm:$0xff]  }
 0x9db   :  { %v14555_v37 = vpop.f32.mrb[244].mxu0  ;;  %15480 = vmatmul.mubr.msk.bf16.vlgmr.msra.gmra.mrb[212].mxu0 %vm1148_vm0, %v6221_v28  ;;  %v17209_v28 = vld [vmem:[%s22833_s3 + $0x180] sm:$0xff]  }
 0x9dc   :  { %v14556_v61 = vpop.f32.mrb[245].mxu0  ;;  %15488 = vmatpush3.bf16.msra.mxu0 %v19985_v49 }
 0x9dd   :  { %v14557_v41 = vadd.f32 %v14556_v61, %v14555_v37  ;;  %v14558_v58 = vpop.f32.mrb[246].mxu0  ;;  %15489 = vmatprep.subr.bf16.mxu0 %v17206_v32  ;;  %v23021_v37 = vpack.c.bf16 %v19999_v2, %v19997_v62  ;;  %v17211_v62 = vld [vmem:[%s22833_s3 + $0x190] sm:$0xff]   ;;  %v23024_v2 = vpack.c.bf16 %v20017_v30, %v20015_v7  ;;  %v23027_v7 = vpack.c.bf16 %v20035_v23, %v20033_v18  ;;  %v17214_v30 = vld [vmem:[%s22833_s3 + $0x1a8] sm:$0xff]   ;;  %v17217_v18 = vld [vmem:[%s22833_s3 + $0x1c0] sm:$0xff]  }
 0x9de   :  { %v14559_v14 = vpop.f32.mrb[247].mxu0  ;;  %v23030_v23 = vpack.c.bf16 %v20053_v5, %v20051_v52  ;;  %v23033_v52 = vpack.c.bf16 %v20071_v42, %v20069_v38  ;;  %v17220_v5 = vld [vmem:[%s22833_s3 + $0x1d8] sm:$0xff]  }
 0x9df   :  { %v14560_v29 = vadd.f32 %v14559_v14, %v14558_v58  ;;  %v23023_v58 = vpack.c.bf16 %v20011_v59, %v20009_v12  ;;  %v17213_v12 = vld [vmem:[%s22833_s3 + $0x1a0] sm:$0xff]   ;;  %v23026_v59 = vpack.c.bf16 %v20029_v40, %v20027_v56  ;;  %v23029_v56 = vpack.c.bf16 %v20047_v17, %v20045_v45  ;;  %v17216_v40 = vld [vmem:[%s22833_s3 + $0x1b8] sm:$0xff]   ;;  %v17219_v45 = vld [vmem:[%s22833_s3 + $0x1d0] sm:$0xff]  }
 0x9e0   :  { %15490 = vmatpush3.bf16.msra.mxu0 %v17206_v32  ;;  %v17210_v32 = vld [vmem:[%s22833_s3 + $0x188] sm:$0xff]   ;;  %v23032_v17 = vpack.c.bf16 %v20065_v46, %v20063_v50 }
 0x9e1   :  { %v6222_v15 = vpack.c.bf16 %v14560_v29, %v14557_v41  ;;  %15491 = vmatprep.subr.bf16.mxu0 %v17207_v20  ;;  %v23022_v41 = vpack.c.bf16 %v20005_v60, %v20003_v51  ;;  %v23025_v51 = vpack.c.bf16 %v20023_v33, %v20021_v6  ;;  %v17212_v60 = vld [vmem:[%s22833_s3 + $0x198] sm:$0xff]   ;;  %v17215_v6 = vld [vmem:[%s22833_s3 + $0x1b0] sm:$0xff]   ;;  %v23028_v33 = vpack.c.bf16 %v20041_v44, %v20039_v63  ;;  %v17218_v44 = vld [vmem:[%s22833_s3 + $0x1c8] sm:$0xff]  }
 0x9e2   :  { %v23031_v63 = vpack.c.bf16 %v20059_v0, %v20057_v25  ;;  %v23034_v25 = vpack.c.bf16 %v20077_v48, %v20075_v4  ;;  %v23035_v0 = vpack.c.bf16 %v20083_v54, %v20081_v35 }
 0x9e3   :  { %v14561_v10 = vpop.f32.mrb[248].mxu0  ;;  %15483 = vmatprep.mubr.msk.bf16.mxu0 %vm1148_vm0, %v6222_v15 }
 0x9e4   :  { %v14562_v49 = vpop.f32.mrb[249].mxu0  ;;  %15492 = vmatpush3.bf16.msra.mxu0 %v17207_v20 }
 0x9e5   :  { %v14563_v61 = vadd.f32 %v14562_v49, %v14561_v10  ;;  %v14564_v8 = vpop.f32.mrb[250].mxu0  ;;  %15493 = vmatprep.subr.bf16.mxu0 %v17208_v39 }
 0x9e6   :  { %v14565_v27 = vpop.f32.mrb[251].mxu0 }
 0x9e7   :  { %v14566_v47 = vadd.f32 %v14565_v27, %v14564_v8 }
 0x9e8   :  { %15494 = vmatpush3.bf16.msra.mxu0 %v17208_v39 }
 0x9e9   :  { %v6223_v26 = vpack.c.bf16 %v14566_v47, %v14563_v61  ;;  %15503 = vmatprep.subr.bf16.mxu0 %v17209_v28 }
 0x9eb   :  { %15484 = vmatmul.mubr.msk.bf16.gmra.mrb[216].mxu0 %vm1148_vm0, %v6223_v26 }
 0x9ec   :  { %15495 = vmatprep.mubr.msk.bf16.mxu0 %vm1148_vm0, %v23021_v37 }
 0x9f3   :  { %15496 = vmatmul.mubr.msk.bf16.vlgmr.msra.gmra.mrb[212].mxu0 %vm1148_vm0, %v23022_v41 }
 0x9f4   :  { %15504 = vmatpush3.bf16.msra.mxu0 %v17209_v28  ;;  %15499 = vmatprep.mubr.msk.bf16.mxu0 %vm1148_vm0, %v23023_v58 }
 0x9f5   :  { %15505 = vmatprep.subr.bf16.mxu0 %v17210_v32 }
 0x9f8   :  { %15506 = vmatpush3.bf16.msra.mxu0 %v17210_v32 }
 0x9f9   :  { %15507 = vmatprep.subr.bf16.mxu0 %v17211_v62 }
 0x9fb   :  { %15500 = vmatmul.mubr.msk.bf16.gmra.mrb[216].mxu0 %vm1148_vm0, %v23024_v2 }
 0x9fc   :  { %15508 = vmatpush3.bf16.msra.mxu0 %v17211_v62  ;;  %15511 = vmatprep.mubr.msk.bf16.mxu0 %vm1148_vm0, %v23025_v51  ;;  %v22887_v62 = vmov 0.0  }
 0x9fd   :  { %15509 = vmatprep.subr.bf16.mxu0 %v17212_v60  ;;  %15567 = vmatprep.subr.bf16.mxu1 %v22887_v62 }
 0x9fe   :  { %15575 = vmatprep.mubr.msk.bf16.mxu1 %vm17388_vm1, %v22887_v62 }
 0xa00   :  { %15510 = vmatpush3.bf16.msra.mxu0 %v17212_v60 }
 0xa01   :  { %15519 = vmatprep.subr.bf16.mxu0 %v17213_v12 }
 0xa03   :  { %15512 = vmatmul.mubr.msk.bf16.vlgmr.msra.gmra.mrb[212].mxu0 %vm1148_vm0, %v23026_v59 }
 0xa04   :  { %15520 = vmatpush3.bf16.msra.mxu0 %v17213_v12  ;;  %15515 = vmatprep.mubr.msk.bf16.mxu0 %vm1148_vm0, %v23027_v7 }
 0xa05   :  { %15521 = vmatprep.subr.bf16.mxu0 %v17214_v30 }
 0xa08   :  { %15522 = vmatpush3.bf16.msra.mxu0 %v17214_v30 }
 0xa09   :  { %15523 = vmatprep.subr.bf16.mxu0 %v17215_v6 }
 0xa0b   :  { %15516 = vmatmul.mubr.msk.bf16.gmra.mrb[216].mxu0 %vm1148_vm0, %v23028_v33 }
 0xa0c   :  { %15524 = vmatpush3.bf16.msra.mxu0 %v17215_v6  ;;  %15527 = vmatprep.mubr.msk.bf16.mxu0 %vm1148_vm0, %v23029_v56 }
 0xa0d   :  { %15525 = vmatprep.subr.bf16.mxu0 %v17216_v40 }
 0xa10   :  { %15526 = vmatpush3.bf16.msra.mxu0 %v17216_v40 }
 0xa11   :  { %15535 = vmatprep.subr.bf16.mxu0 %v17217_v18 }
 0xa13   :  { %15528 = vmatmul.mubr.msk.bf16.vlgmr.msra.gmra.mrb[212].mxu0 %vm1148_vm0, %v23030_v23 }
 0xa14   :  { %15536 = vmatpush3.bf16.msra.mxu0 %v17217_v18  ;;  %15531 = vmatprep.mubr.msk.bf16.mxu0 %vm1148_vm0, %v23031_v63 }
 0xa15   :  { %15537 = vmatprep.subr.bf16.mxu0 %v17218_v44 }
 0xa18   :  { %15538 = vmatpush3.bf16.msra.mxu0 %v17218_v44  ;;  %v23038_v44 = vld [vmem:[#allocation5_spill] sm:$0xff] }
 0xa19   :  { %15539 = vmatprep.subr.bf16.mxu0 %v17219_v45 }
 0xa1b   :  { %15532 = vmatmul.mubr.msk.bf16.gmra.mrb[216].mxu0 %vm1148_vm0, %v23032_v17 }
 0xa1c   :  { %15540 = vmatpush3.bf16.msra.mxu0 %v17219_v45  ;;  %15543 = vmatprep.mubr.msk.bf16.mxu0 %vm1148_vm0, %v23033_v52  ;;  %v7088_v45 = vrot.slane %v23038_v44, 4 }
 0xa1d   :  { %15541 = vmatprep.subr.bf16.mxu0 %v17220_v5 }
 0xa20   :  { %15542 = vmatpush3.bf16.msra.mxu0 %v17220_v5  ;;  %v23039_v5 = vld [vmem:[#allocation16_spill] sm:$0xff] }
 0xa21   :  { %14767 = vmatprep.subr.bf16.mxu0 %v22978_v19  ;;  %v23036_v19 = vpack.c.bf16 %v20089_v22, %v20087_v53 }
 0xa23   :  { %15544 = vmatmul.mubr.msk.bf16.vlgmr.msra.gmra.mrb[212].mxu0 %vm1148_vm0, %v23034_v25  ;;  %v7124_v25 = vrot.slane %v23039_v5, 4 }
 0xa24   :  { %14768 = vmatpush3.bf16.msra.mxu0 %v22979_v11  ;;  %15547 = vmatprep.mubr.msk.bf16.mxu0 %vm1148_vm0, %v23035_v0  ;;  %v17221_v11 = vld [vmem:[%s22832_s2 + $0x3c4] ss:$8 sps:$4 sm:$0xff]  }
 0xa25   :  { %14769 = vmatprep.subr.bf16.mxu0 %v22980_v16  ;;  %v23037_v16 = vld [vmem:[#allocation9_spill] sm:$0xff] }
 0xa28   :  { %14770 = vmatpush3.bf16.msra.mxu0 %v22981_v34  ;;  %v17222_v34 = vld [vmem:[%s22833_s3 + $0x1e0] sm:$0xff]  }
 0xa29   :  { %14771 = vmatprep.subr.bf16.mxu0 %v22982_v21  ;;  %v17223_v21 = vld [vmem:[%s22832_s2 + $0x3c0] ss:$8 sps:$4 sm:$0xff]  }
 0xa2b   :  { %15548 = vmatmul.mubr.msk.bf16.gmra.mrb[216].mxu0 %vm1148_vm0, %v23036_v19 }
 0xa2c   :  { %14772 = vmatpush3.bf16.msra.mxu0 %v22983_v36  ;;  %6957 = vmatprep.mubr.bf16.mxu0 %v17221_v11  ;;  %v17224_v36 = vld [vmem:[%s22832_s2 + $0x3d4] ss:$8 sps:$4 sm:$0xff]  }
 0xa2d   :  { %14773 = vmatprep.subr.bf16.mxu0 %v22984_v57  ;;  %v17225_v57 = vld [vmem:[%s22833_s3 + $0x1e8] sm:$0xff]  }
 0xa30   :  { %14774 = vmatpush3.bf16.msra.mxu0 %v22985_v13  ;;  %v17226_v13 = vld [vmem:[%s22833_s3 + $0x1f0] sm:$0xff]  }
 0xa31   :  { %14775 = vmatprep.subr.bf16.mxu0 %v22986_v24  ;;  %v17227_v24 = vld [vmem:[%s22832_s2 + $0x3d0] ss:$8 sps:$4 sm:$0xff]  }
 0xa34   :  { %14776 = vmatpush3.bf16.msra.mxu0 %v22987_v3  ;;  %v17228_v3 = vld [vmem:[%s22832_s2 + $0x3e4] ss:$8 sps:$4 sm:$0xff]  }
 0xa35   :  { %14777 = vmatprep.subr.bf16.mxu0 %v22988_v1  ;;  %v17229_v1 = vld [vmem:[%s22833_s3 + $0x1f8] sm:$0xff]  }
 0xa38   :  { %14778 = vmatpush3.bf16.msra.mxu0 %v22989_v43  ;;  %v17230_v43 = vld [vmem:[%s22832_s2 + $0x3e0] ss:$8 sps:$4 sm:$0xff]  }
 0xa39   :  { %14779 = vmatprep.subr.bf16.mxu0 %v22990_v55  ;;  %v17231_v55 = vld [vmem:[%s22832_s2 + $0x3f4] ss:$8 sps:$4 sm:$0xff]  }
 0xa3c   :  { %14780 = vmatpush3.bf16.msra.mxu0 %v22991_v31  ;;  %v17232_v31 = vld [vmem:[%s22832_s2 + $0x3f0] ss:$8 sps:$4 sm:$0xff]  }
 0xa3d   :  { %14781 = vmatprep.subr.bf16.mxu0 %v22992_v9 }
 0xa40   :  { %14782 = vmatpush3.bf16.msra.mxu0 %v23037_v16 }
 0xa41   :  { %15551 = vmatprep.subr.bf16.mxu0 %v17222_v34 }
 0xa43   :  { %6958 = vmatmul.mubr.bf16.vlgmr.msra.gmra.mrb[252].mxu0 %v17223_v21 }
 0xa44   :  { %6965 = vmatprep.mubr.bf16.mxu0 %v17224_v36  ;;  %15552 = vmatpush3.bf16.msra.mxu0 %v17222_v34  ;;  %v7089_v34 = vadd.f32 %v7088_v45, %v23038_v44 }
 0xa45   :  { %15553 = vmatprep.subr.bf16.mxu0 %v17225_v57 }
 0xa48   :  { %15554 = vmatpush3.bf16.msra.mxu0 %v17225_v57 }
 0xa49   :  { %15555 = vmatprep.subr.bf16.mxu0 %v17226_v13 }
 0xa4b   :  { %6966 = vmatmul.mubr.bf16.gmra.mrb[0].mxu0 %v17227_v24 }
 0xa4c   :  { %6973 = vmatprep.mubr.bf16.mxu0 %v17228_v3  ;;  %15556 = vmatpush3.bf16.msra.mxu0 %v17226_v13  ;;  %v7125_v13 = vadd.f32 %v7124_v25, %v23039_v5  ;;  %v23042_v25 = vld [vmem:[#allocation12_spill] sm:$0xff] }
 0xa4d   :  { %15557 = vmatprep.subr.bf16.mxu0 %v17229_v1 }
 0xa50   :  { %15558 = vmatpush3.bf16.msra.mxu0 %v17229_v1 }
 0xa51   :  { %15591 = vmatprep.subr.bf16.mxu0 %v22887_v62 }
 0xa53   :  { %6974 = vmatmul.mubr.bf16.gmra.mrb[4].mxu0 %v17230_v43  ;;  %v7090_v43 = vrot.slane %v7089_v34, 2 }
 0xa54   :  { %6981 = vmatprep.mubr.bf16.mxu0 %v17231_v55 }
 0xa5b   :  { %6982 = vmatmul.mubr.bf16.gmra.mrb[8].mxu0 %v17232_v31 }
 0xb16   :  { %v14783_v9 = vpop.f32.mrb[252].mxu0 }
 0xb17   :  { %v14784_v22 = vpop.f32.mrb[253].mxu0 }
 0xb18   :  { %v14785_v50 = vadd.f32 %v14784_v22, %v14783_v9  ;;  %v14786_v46 = vpop.f32.mrb[254].mxu0  ;;  %v7126_v22 = vrot.slane %v7125_v13, 2 }
 0xb19   :  { %v14787_v38 = vpop.f32.mrb[255].mxu0 }
 0xb1a   :  { %v14788_v42 = vadd.f32 %v14787_v38, %v14786_v46  ;;  %v7091_v38 = vadd.f32 %v7090_v43, %v7089_v34  ;;  %v23048_v43 = vld [vmem:[#allocation3_spill] sm:$0xff] }
 0xb1c   :  { %v6990_v4 = vpack.c.bf16 %v14788_v42, %v14785_v50 }
 0xb1e   :  { %v14789_v48 = vpop.f32.mrb[0].mxu0  ;;  %15559 = vmatprep.mubr.msk.bf16.mxu0 %vm1148_vm0, %v6990_v4 }
 0xb1f   :  { %v14790_v35 = vpop.f32.mrb[1].mxu0 }
 0xb20   :  { %v14791_v54 = vadd.f32 %v14790_v35, %v14789_v48  ;;  %v14792_v53 = vpop.f32.mrb[2].mxu0  ;;  %v7127_v48 = vadd.f32 %v7126_v22, %v7125_v13 }
 0xb21   :  { %v14793_v14 = vpop.f32.mrb[3].mxu0 }
 0xb22   :  { %v14794_v29 = vadd.f32 %v14793_v14, %v14792_v53  ;;  %v7092_v53 = vrot.slane %v7091_v38, 1 }
 0xb24   :  { %v6991_v15 = vpack.c.bf16 %v14794_v29, %v14791_v54 }
 0xb26   :  { %15560 = vmatmul.mubr.msk.bf16.vlgmr.msra.gmra.mrb[212].mxu0 %vm1148_vm0, %v6991_v15  ;;  %v14795_v20 = vpop.f32.mrb[4].mxu0  ;;  %v7128_v15 = vrot.slane %v7127_v48, 1 }
 0xb27   :  { %v14796_v10 = vpop.f32.mrb[5].mxu0 }
 0xb28   :  { %v14797_v49 = vadd.f32 %v14796_v10, %v14795_v20  ;;  %v14798_v61 = vpop.f32.mrb[6].mxu0 }
 0xb29   :  { %v14799_v8 = vpop.f32.mrb[7].mxu0 }
 0xb2a   :  { %v14800_v39 = vadd.f32 %v14799_v8, %v14798_v61 }
 0xb2c   :  { %v6992_v27 = vpack.c.bf16 %v14800_v39, %v14797_v49  ;;  %v7093_v49 = vadd.f32 %v7092_v53, %v7091_v38  ;;  %v7129_v39 = vadd.f32 %v7128_v15, %v7127_v48 }
 0xb2e   :  { %v14801_v47 = vpop.f32.mrb[8].mxu0  ;;  %15563 = vmatprep.mubr.msk.bf16.mxu0 %vm1148_vm0, %v6992_v27 }
 0xb2f   :  { %v14802_v26 = vpop.f32.mrb[9].mxu0 }
 0xb30   :  { %v14803_v28 = vadd.f32 %v14802_v26, %v14801_v47  ;;  %v14804_v37 = vpop.f32.mrb[10].mxu0 }
 0xb31   :  { %v14805_v41 = vpop.f32.mrb[11].mxu0 }
 0xb32   :  { %v14806_v58 = vadd.f32 %v14805_v41, %v14804_v37 }
 0xb34   :  { %v6993_v32 = vpack.c.bf16 %v14806_v58, %v14803_v28 }
 0xb36   :  { %15564 = vmatmul.mubr.msk.bf16.gmra.mrb[216].mxu0 %vm1148_vm0, %v6993_v32 }
 0xb37   :  { %15599 = vmatprep.mubr.msk.bf16.mxu0 %vm17388_vm1, %v22887_v62 }
 0xbf9   :  { %v20269_v2 = vpop.f32.mrb[212].mxu0 }
 0xbfa   :  { %v20271_v51 = vpop.f32.mrb[213].mxu0  ;;  %v7133_v6 = vmul.f32 %v20269_v2, %v20269_v2 }
 0xbfb   :  { %v20273_v60 = vpop.f32.mrb[214].mxu0  ;;  %v7131_v59 = vmul.f32 %v20271_v51, %v20271_v51 }
 0xbfc   :  { %v20275_v12 = vpop.f32.mrb[215].mxu0  ;;  %v7134_v40 = vmul.f32 %v20273_v60, %v20273_v60 }
 0xbfd   :  { %v7095_v7 = vadd.f32 %v20275_v12, %v20271_v51  ;;  %v7132_v30 = vmul.f32 %v20275_v12, %v20275_v12 }
 0xbff   :  { %v7096_v33 = vadd.f32 %v20269_v2, %v7095_v7  ;;  %v7139_v56 = vadd.f32 %v7132_v30, %v7131_v59  ;;  %v7164_v7 = vlaneseq }
 0xc01   :  { %v7140_v18 = vadd.f32 %v7139_v56, %v7133_v6  ;;  %v7097_v23 = vadd.f32 %v20273_v60, %v7096_v33  ;;  %v20303_v30 = vshrl.u32 %v7164_v7, 7  ;;  %v7079_v6 = vld [vmem:[%s22835_s4] sm:$0x1] }
 0xc03   :  { %v7141_v63 = vadd.f32 %v7140_v18, %v7134_v40  ;;  %23040 = vst [vmem:[#allocation8_spill] sm:$0xff] %v20303_v30  ;;  %v20309_v33 = vsub.s32 0, %v20303_v30  ;;  %v7080_v18 = vld [vmem:[%s22836_s5] sm:$0x1] }
 0xc05   :  { %23041 = vst [vmem:[#allocation15_spill] sm:$0xff] %v20309_v33 }
 0xc09   :  { %v20290_v17 = vpop.f32.mrb[216].mxu0 }
 0xc0a   :  { %v7056_v52 = vpop.f32.mrb[217].mxu0  ;;  %v7137_v24 = vmul.f32 %v20290_v17, %v20290_v17 }
 0xc0b   :  { %v7098_v0 = vadd.f32 %v7097_v23, %v7056_v52  ;;  %v7135_v19 = vmul.f32 %v7056_v52, %v7056_v52  ;;  %v20293_v11 = vpop.f32.mrb[218].mxu0 }
 0xc0c   :  { %v7059_v16 = vpop.f32.mrb[219].mxu0  ;;  %v7138_v55 = vmul.f32 %v20293_v11, %v20293_v11 }
 0xc0d   :  { %v7142_v21 = vadd.f32 %v7141_v63, %v7135_v19  ;;  %v7099_v36 = vadd.f32 %v7098_v0, %v7059_v16  ;;  %v7136_v57 = vmul.f32 %v7059_v16, %v7059_v16  ;;  %v23043_v19 = vld [vmem:[#allocation11_spill] sm:$0xff] }
 0xc0f   :  { %v7100_v3 = vadd.f32 %v20290_v17, %v7099_v36  ;;  %v7143_v1 = vadd.f32 %v7142_v21, %v7136_v57  ;;  %v23044_v21 = vld [vmem:[#allocation2_spill] sm:$0xff]  ;;  %v23045_v57 = vld [vmem:[#allocation4_spill] sm:$0xff] }
 0xc11   :  { %v7101_v31 = vadd.f32 %v20293_v11, %v7100_v3  ;;  %v7144_v9 = vadd.f32 %v7143_v1, %v7137_v24  ;;  %v23046_v24 = vld [vmem:[#allocation14_spill] sm:$0xff] }
 0xc13   :  { %v7102_v50 = vrot.slane %v7101_v31, 4  ;;  %v7145_v46 = vadd.f32 %v7144_v9, %v7138_v55 }
 0xc15   :  { %v7103_v42 = vadd.f32 %v7102_v50, %v7101_v31  ;;  %v7146_v4 = vrot.slane %v7145_v46, 4  ;;  %v23049_v31 = vld [vmem:[#allocation6_spill] sm:$0xff] }
 0xc17   :  { %v7104_v35 = vrot.slane %v7103_v42, 2  ;;  %v7147_v54 = vadd.f32 %v7146_v4, %v7145_v46 }
 0xc19   :  { %v7105_v14 = vadd.f32 %v7104_v35, %v7103_v42  ;;  %v7148_v29 = vrot.slane %v7147_v54, 2 }
 0xc1b   :  { %v7106_v20 = vrot.slane %v7105_v14, 1  ;;  %v7149_v10 = vadd.f32 %v7148_v29, %v7147_v54 }
 0xc1d   :  { %v7107_v61 = vadd.f32 %v7106_v20, %v7105_v14  ;;  %v7150_v8 = vrot.slane %v7149_v10, 1 }
 0xc1f   :  { %v7108_v27 = vadd.f32 %v7107_v61, %v7093_v49  ;;  %v7151_v47 = vadd.f32 %v7150_v8, %v7149_v10 }
 0xc21   :  { %v7152_v26 = vadd.f32 %v7151_v47, %v7129_v39  ;;  %v7153_v28 = vmul.f32 0.0078125, %v7108_v27 }
 0xc23   :  { %v7154_v37 = vmul.f32 0.0078125, %v7152_v26  ;;  %v7155_v41 = vmul.f32 %v7153_v28, %v7153_v28 }
 0xc25   :  { %v7156_v58 = vsub.f32 %v7154_v37, %v7155_v41 }
 0xc27   :  { %v7157_v32 = vmax.f32 %v7156_v58, 0.0 }
 0xc29   :  { %v7158_v59 = vadd.f32 1e-05, %v7157_v32 }
 0xc2b   :  { %17027 = vrsqrt.f32 %v7158_v59 }
 0xc35   :  { %v17028_v56 = vpop.eup %17027 }
 0xc36   :  { %v7160_v40 = vmul.f32 %v17028_v56, %v7079_v6 }
 0xc38   :  { %v7161_v23 = vmul.f32 %v7160_v40, %v7153_v28  ;;  %v20315_v63 = vrot.slane %v7160_v40, %v20309_v33 }
 0xc3a   :  { %v7162_v44 = vsub.f32 %v7080_v18, %v7161_v23  ;;  %v7219_v45 = vmul.f32 %v20315_v63, %v7056_v52  ;;  %v7220_v5 = vmul.f32 %v20315_v63, %v7059_v16  ;;  %v7169_v0 = vmul.f32 %v20315_v63, %v23042_v25  ;;  %v23047_v52 = vld [vmem:[#allocation13_spill] sm:$0xff] }
 0xc3b   :  { %v7170_v34 = vmul.f32 %v20315_v63, %v23043_v19  ;;  %v7171_v36 = vmul.f32 %v23044_v21, %v20315_v63  ;;  %v7172_v13 = vmul.f32 %v23045_v57, %v20315_v63  ;;  %v7173_v3 = vmul.f32 %v20315_v63, %v23046_v24 }
 0xc3c   :  { %v20330_v1 = vrot.slane %v7162_v44, %v20309_v33  ;;  %v7174_v16 = vmul.f32 %v20315_v63, %v23047_v52  ;;  %v7175_v55 = vmul.f32 %v23048_v43, %v20315_v63  ;;  %v7176_v9 = vmul.f32 %v23049_v31, %v20315_v63 }
 0xc3d   :  { %v7215_v22 = vmul.f32 %v20315_v63, %v20271_v51  ;;  %v7216_v50 = vmul.f32 %v20315_v63, %v20275_v12  ;;  %v7217_v46 = vmul.f32 %v20269_v2, %v20315_v63  ;;  %v7218_v38 = vmul.f32 %v20273_v60, %v20315_v63 }
 0xc3e   :  { %v7227_v42 = vadd.f32 %v7219_v45, %v20330_v1  ;;  %v7228_v4 = vadd.f32 %v7220_v5, %v20330_v1  ;;  %v7183_v48 = vadd.f32 %v20330_v1, %v7169_v0  ;;  %v7184_v35 = vadd.f32 %v20330_v1, %v7170_v34 }
 0xc3f   :  { %v7185_v54 = vadd.f32 %v20330_v1, %v7171_v36  ;;  %v7186_v51 = vadd.f32 %v20330_v1, %v7172_v13  ;;  %v7187_v12 = vadd.f32 %v20330_v1, %v7173_v3  ;;  %v7188_v53 = vadd.f32 %v20330_v1, %v7174_v16 }
 0xc40   :  { %vm7235_vm2 = vcmp.gt.f32.partialorder %v7227_v42, 0.0  ;;  %vm7236_vm3 = vcmp.gt.f32.partialorder %v7228_v4, 0.0  ;;  %v7243_v2 = vmul.f32 0.2, %v7227_v42  ;;  %v7244_v60 = vmul.f32 0.2, %v7228_v4 }
 0xc41   :  { %vm7191_vm4 = vcmp.gt.f32.partialorder %v7183_v48, 0.0  ;;  %vm7192_vm5 = vcmp.gt.f32.partialorder %v7184_v35, 0.0  ;;  %v7199_v14 = vmul.f32 0.2, %v7183_v48  ;;  %v7200_v29 = vmul.f32 0.2, %v7184_v35 }
 0xc42   :  { %v7251_v15 = vsel %vm7235_vm2, %v7227_v42, %v7243_v2  ;;  %v7252_v20 = vsel %vm7236_vm3, %v7228_v4, %v7244_v60  ;;  %vm7193_vm6 = vcmp.gt.f32.partialorder %v7185_v54, 0.0  ;;  %vm7194_vm7 = vcmp.gt.f32.partialorder %v7186_v51, 0.0  ;;  %v16630_v42 = vld [vmem:[%s22834_s6 + $0x18] sm:$0xff]   ;;  %v16631_v4 = vld [vmem:[%s22834_s6 + $0x20] sm:$0xff]  }
 0xc43   :  { %v20354_v10 = vpack.c.bf16 %v7252_v20, %v7251_v15  ;;  %v7207_v49 = vsel %vm7191_vm4, %v7183_v48, %v7199_v14  ;;  %v7208_v61 = vsel %vm7192_vm5, %v7184_v35, %v7200_v29  ;;  %v7201_v8 = vmul.f32 0.2, %v7185_v54  ;;  %v16632_v48 = vld [vmem:[%s22834_s6 + $0x28] sm:$0xff]   ;;  %v16633_v35 = vld [vmem:[%s22834_s6 + $0x30] sm:$0xff]   ;;  %v16634_v2 = vld [vmem:[%s22834_s6 + $0x38] sm:$0xff]  }
 0xc44   :  { %v20356_v39 = vpack.c.bf16 %v7208_v61, %v7207_v49  ;;  %v7202_v27 = vmul.f32 0.2, %v7186_v51  ;;  %vm7195_vm8 = vcmp.gt.f32.partialorder %v7187_v12, 0.0  ;;  %vm7196_vm9 = vcmp.gt.f32.partialorder %v7188_v53, 0.0  ;;  %v20519_v60 = vld [vmem:[%s22837_s7 + $0xa4] ss:$8 sps:$4 sm:$0xff]  }
 0xc45   :  { %v7209_v47 = vsel %vm7193_vm6, %v7185_v54, %v7201_v8  ;;  %v7203_v26 = vmul.f32 0.2, %v7187_v12  ;;  %v7204_v28 = vmul.f32 0.2, %v7188_v53  ;;  %v7189_v37 = vadd.f32 %v20330_v1, %v7175_v55  ;;  %v20490_v54 = vld [vmem:[%s22837_s7 + $0x80] ss:$8 sps:$4 sm:$0xff]  }
 0xc46   :  { %15568 = vmatpush3.bf16.msra.mxu1 %v20356_v39  ;;  %15592 = vmatpush3.bf16.msra.mxu0 %v20356_v39  ;;  %v7210_v41 = vsel %vm7194_vm7, %v7186_v51, %v7202_v27  ;;  %v7190_v58 = vadd.f32 %v20330_v1, %v7176_v9  ;;  %v7223_v32 = vadd.f32 %v7215_v22, %v20330_v1  ;;  %v20495_v51 = vld [vmem:[%s22837_s7 + $0x84] ss:$8 sps:$4 sm:$0xff]   ;;  %v20526_v14 = vld [vmem:[%s22837_s7 + $0xa0] ss:$8 sps:$4 sm:$0xff]   ;;  %v20536_v29 = vld [vmem:[%s22837_s7 + $0xb0] ss:$8 sps:$4 sm:$0xff]  }
 0xc47   :  { %15569 = vmatprep.subr.bf16.mxu1 %v22887_v62  ;;  %15593 = vmatprep.subr.bf16.mxu0 %v22887_v62  ;;  %v20365_v59 = vpack.c.bf16 %v7210_v41, %v7209_v47  ;;  %v7211_v7 = vsel %vm7195_vm8, %v7187_v12, %v7203_v26  ;;  %v7212_v6 = vsel %vm7196_vm9, %v7188_v53, %v7204_v28  ;;  %vm7197_vm10 = vcmp.gt.f32.partialorder %v7189_v37, 0.0  ;;  %v20502_v12 = vld [vmem:[%s22837_s7 + $0x90] ss:$8 sps:$4 sm:$0xff]   ;;  %v20507_v53 = vld [vmem:[%s22837_s7 + $0x94] ss:$8 sps:$4 sm:$0xff]   ;;  %v16635_v27 = vld [vmem:[%s22834_s6 + $0x40] sm:$0xff]  }
 0xc48   :  { %v20367_v56 = vpack.c.bf16 %v7212_v6, %v7211_v7  ;;  %vm7198_vm11 = vcmp.gt.f32.partialorder %v7190_v58, 0.0  ;;  %v7205_v40 = vmul.f32 0.2, %v7189_v37  ;;  %v7206_v18 = vmul.f32 0.2, %v7190_v58  ;;  %v16637_v7 = vld [vmem:[%s22834_s6 + $0x50] sm:$0xff]  }
 0xc49   :  { %v7224_v23 = vadd.f32 %v7216_v50, %v20330_v1  ;;  %vm7231_vm12 = vcmp.gt.f32.partialorder %v7223_v32, 0.0  ;;  %v7239_v44 = vmul.f32 0.2, %v7223_v32  ;;  %v7225_v45 = vadd.f32 %v7217_v46, %v20330_v1  ;;  %v20541_v15 = vld [vmem:[%s22837_s7 + $0xb4] ss:$8 sps:$4 sm:$0xff]  }
 0xc4a   :  { %15570 = vmatpush3.bf16.msra.mxu1 %v20365_v59  ;;  %15594 = vmatpush3.bf16.msra.mxu0 %v20365_v59  ;;  %v7213_v5 = vsel %vm7197_vm10, %v7189_v37, %v7205_v40  ;;  %v7214_v25 = vsel %vm7198_vm11, %v7190_v58, %v7206_v18  ;;  %v7226_v0 = vadd.f32 %v7218_v38, %v20330_v1  ;;  %v20428_v38 = vld [vmem:[%s22834_s6 + $0x8] sm:$0xff]   ;;  %v20564_v61 = vld [vmem:[%s22837_s7 + $0xd0] ss:$8 sps:$4 sm:$0xff]   ;;  %v20569_v8 = vld [vmem:[%s22837_s7 + $0xd4] ss:$8 sps:$4 sm:$0xff]   ;;  %v22889_v58 = vmov 0  }
 0xc4b   :  { %15571 = vmatprep.subr.bf16.mxu1 %v22887_v62  ;;  %15595 = vmatprep.subr.bf16.mxu0 %v22887_v62  ;;  %v20376_v19 = vpack.c.bf16 %v7214_v25, %v7213_v5  ;;  %vm7232_vm13 = vcmp.gt.f32.partialorder %v7224_v23, 0.0  ;;  %v7240_v34 = vmul.f32 0.2, %v7224_v23  ;;  %v7247_v21 = vsel %vm7231_vm12, %v7223_v32, %v7239_v44  ;;  %v20550_v20 = vld [vmem:[%s22837_s7 + $0xc0] ss:$8 sps:$4 sm:$0xff]   ;;  %v16638_v6 = vld [vmem:[%s22834_s6 + $0x58] sm:$0xff]  }
 0xc4c   :  { %vm7233_vm14 = vcmp.gt.f32.partialorder %v7225_v45, 0.0  ;;  %vm7234_vm15 = vcmp.gt.f32.partialorder %v7226_v0, 0.0  ;;  %v7241_v36 = vmul.f32 0.2, %v7225_v45  ;;  %v7242_v57 = vmul.f32 0.2, %v7226_v0 }
 0xc4d   :  { %v7248_v13 = vsel %vm7232_vm13, %v7224_v23, %v7240_v34  ;;  %v7221_v24 = vmul.f32 %v20290_v17, %v20315_v63  ;;  %v7222_v3 = vmul.f32 %v20293_v11, %v20315_v63  ;;  %v20395_v11 = vld [vmem:[%s22834_s6] sm:$0xff]   ;;  %v16628_v63 = vld [vmem:[%s22834_s6 + $0x10] sm:$0xff]   ;;  %v16636_v32 = vld [vmem:[%s22834_s6 + $0x48] sm:$0xff]  }
 0xc4e   :  { %15572 = vmatpush3.bf16.msra.mxu1 %v20367_v56  ;;  %15596 = vmatpush3.bf16.msra.mxu0 %v20367_v56  ;;  %v20384_v52 = vpack.c.bf16 %v7248_v13, %v7247_v21  ;;  %v7249_v16 = vsel %vm7233_vm14, %v7225_v45, %v7241_v36  ;;  %v7250_v43 = vsel %vm7234_vm15, %v7226_v0, %v7242_v57  ;;  %v20555_v49 = vld [vmem:[%s22837_s7 + $0xc4] ss:$8 sps:$4 sm:$0xff]   ;;  %v20581_v47 = vld [vmem:[%s22837_s7 + $0xe0] ss:$8 sps:$4 sm:$0xff]   ;;  %v20600_v28 = vld [vmem:[%s22837_s7 + $0xf0] ss:$8 sps:$4 sm:$0xff]  }
 0xc4f   :  { %15573 = vmatprep.subr.bf16.mxu1 %v22887_v62  ;;  %15597 = vmatprep.subr.bf16.mxu0 %v22887_v62  ;;  %v20388_v55 = vpack.c.bf16 %v7250_v43, %v7249_v16  ;;  %v7229_v31 = vadd.f32 %v7221_v24, %v20330_v1  ;;  %v7230_v17 = vadd.f32 %v7222_v3, %v20330_v1  ;;  %v20586_v26 = vld [vmem:[%s22837_s7 + $0xe4] ss:$8 sps:$4 sm:$0xff]   ;;  %v20605_v37 = vld [vmem:[%s22837_s7 + $0xf4] ss:$8 sps:$4 sm:$0xff]   ;;  %v20744_v16 = vld [vmem:[%s22837_s7] ss:$8 sps:$4 sm:$0xff]  }
 0xc50   :  { %v20614_v41 = vld [vmem:[%s22837_s7 + $0x4] ss:$8 sps:$4 sm:$0xff]   ;;  %v16641_v23 = vld [vmem:[%s22834_s6 + $0x70] sm:$0xff]   ;;  %v16651_v44 = vld [vmem:[%s22834_s6 + $0x78] sm:$0xff]  }
 0xc51   :  { %vm7237_vm2 = vcmp.gt.f32.partialorder %v7229_v31, 0.0  ;;  %vm7238_vm3 = vcmp.gt.f32.partialorder %v7230_v17, 0.0  ;;  %v7245_v9 = vmul.f32 0.2, %v7229_v31  ;;  %v7246_v22 = vmul.f32 0.2, %v7230_v17 }
 0xc52   :  { %15574 = vmatpush3.bf16.msra.mxu1 %v20376_v19  ;;  %15598 = vmatpush3.bf16.msra.mxu0 %v20376_v19  ;;  %v16639_v40 = vld [vmem:[%s22834_s6 + $0x60] sm:$0xff]   ;;  %v16640_v18 = vld [vmem:[%s22834_s6 + $0x68] sm:$0xff]  }
 0xc53   :  { %15579 = vmatprep.subr.bf16.mxu1 %v22887_v62  ;;  %15603 = vmatprep.subr.bf16.mxu0 %v22887_v62  ;;  %v7253_v1 = vsel %vm7237_vm2, %v7229_v31, %v7245_v9  ;;  %v7254_v50 = vsel %vm7238_vm3, %v7230_v17, %v7246_v22  ;;  %v20752_v17 = vld [vmem:[%s22837_s7 + $0x14] ss:$8 sps:$4 sm:$0xff]   ;;  %v20761_v22 = vld [vmem:[%s22837_s7 + $0x10] ss:$8 sps:$4 sm:$0xff]  }
 0xc54   :  { %v20404_v46 = vpack.c.bf16 %v7254_v50, %v7253_v1  ;;  %v20768_v1 = vld [vmem:[%s22837_s7 + $0x24] ss:$8 sps:$4 sm:$0xff]   ;;  %v20776_v50 = vld [vmem:[%s22837_s7 + $0x20] ss:$8 sps:$4 sm:$0xff]  }
 0xc55   :  { %15576 = vmatmul.mubr.msk.bf16.vlgmr.msra.gmra.mrb[68].mxu1 %vm1148_vm0, %v20395_v11  ;;  %15600 = vmatmul.mubr.msk.bf16.vlgmr.msra.gmra.mrb[12].mxu0 %vm1148_vm0, %v16628_v63 }
 0xc56   :  { %15580 = vmatpush3.bf16.msra.mxu1 %v20356_v39  ;;  %15604 = vmatpush3.bf16.msra.mxu0 %v20356_v39 }
 0xc57   :  { %15581 = vmatprep.subr.bf16.mxu1 %v22887_v62  ;;  %15605 = vmatprep.subr.bf16.mxu0 %v22887_v62 }
 0xc58   :  { %15587 = vmatprep.mubr.msk.bf16.mxu1 %vm17388_vm1, %v22887_v62  ;;  %15611 = vmatprep.mubr.msk.bf16.mxu0 %vm17388_vm1, %v22887_v62 }
 0xc5a   :  { %15582 = vmatpush3.bf16.msra.mxu1 %v20365_v59  ;;  %15606 = vmatpush3.bf16.msra.mxu0 %v20365_v59 }
 0xc5b   :  { %15583 = vmatprep.subr.bf16.mxu1 %v22887_v62  ;;  %15607 = vmatprep.subr.bf16.mxu0 %v22887_v62 }
 0xc5e   :  { %15584 = vmatpush3.bf16.msra.mxu1 %v20367_v56  ;;  %15608 = vmatpush3.bf16.msra.mxu0 %v20367_v56 }
 0xc5f   :  { %15585 = vmatprep.subr.bf16.mxu1 %v22887_v62  ;;  %15609 = vmatprep.subr.bf16.mxu0 %v22887_v62 }
 0xc62   :  { %15586 = vmatpush3.bf16.msra.mxu1 %v20376_v19  ;;  %15610 = vmatpush3.bf16.msra.mxu0 %v20376_v19 }
 0xc63   :  { %15615 = vmatprep.subr.bf16.mxu0 %v22887_v62  ;;  %7481 = vmatprep.subr.bf16.mxu1 %v20495_v51 }
 0xc65   :  { %15588 = vmatmul.mubr.msk.bf16.vlgmr.msra.gmra.mrb[72].mxu1 %vm1148_vm0, %v20428_v38  ;;  %15612 = vmatmul.mubr.msk.bf16.vlgmr.msra.gmra.mrb[16].mxu0 %vm1148_vm0, %v16630_v42  ;;  %v20782_v42 = vld [vmem:[%s22837_s7 + $0x34] ss:$8 sps:$4 sm:$0xff]  }
 0xc66   :  { %15616 = vmatpush3.bf16.msra.mxu0 %v20356_v39  ;;  %15623 = vmatprep.mubr.msk.bf16.mxu0 %vm17388_vm1, %v22887_v62 }
 0xc67   :  { %15617 = vmatprep.subr.bf16.mxu0 %v22887_v62  ;;  %7482 = vmatpush1.bf16.msra.mxu1 %v20490_v54 }
 0xc68   :  { %7483 = vmatprep.subr.bf16.mxu1 %v20507_v53  ;;  %7513 = vmatprep.mubr.bf16.mxu1 %v22889_v58 }
 0xc6a   :  { %15618 = vmatpush3.bf16.msra.mxu0 %v20365_v59 }
 0xc6b   :  { %15619 = vmatprep.subr.bf16.mxu0 %v22887_v62  ;;  %7484 = vmatpush1.bf16.msra.mxu1 %v20502_v12 }
 0xc6c   :  { %7485 = vmatprep.subr.bf16.mxu1 %v20519_v60 }
 0xc6e   :  { %15620 = vmatpush3.bf16.msra.mxu0 %v20367_v56 }
 0xc6f   :  { %15621 = vmatprep.subr.bf16.mxu0 %v22887_v62  ;;  %7486 = vmatpush1.bf16.msra.mxu1 %v20526_v14 }
 0xc70   :  { %7487 = vmatprep.subr.bf16.mxu1 %v20541_v15 }
 0xc72   :  { %15622 = vmatpush3.bf16.msra.mxu0 %v20376_v19 }
 0xc73   :  { %15627 = vmatprep.subr.bf16.mxu0 %v22887_v62  ;;  %7488 = vmatpush1.bf16.msra.mxu1 %v20536_v29 }
 0xc74   :  { %7489 = vmatprep.subr.bf16.mxu1 %v20555_v49 }
 0xc75   :  { %15624 = vmatmul.mubr.msk.bf16.vlgmr.msra.gmra.mrb[20].mxu0 %vm1148_vm0, %v16631_v4  ;;  %v20791_v4 = vld [vmem:[%s22837_s7 + $0x30] ss:$8 sps:$4 sm:$0xff]  }
 0xc76   :  { %15628 = vmatpush3.bf16.msra.mxu0 %v20356_v39  ;;  %15635 = vmatprep.mubr.msk.bf16.mxu0 %vm17388_vm1, %v22887_v62 }
 0xc77   :  { %15629 = vmatprep.subr.bf16.mxu0 %v22887_v62  ;;  %7490 = vmatpush1.bf16.msra.mxu1 %v20550_v20 }
 0xc78   :  { %7491 = vmatprep.subr.bf16.mxu1 %v20569_v8 }
 0xc7a   :  { %15630 = vmatpush3.bf16.msra.mxu0 %v20365_v59 }
 0xc7b   :  { %15631 = vmatprep.subr.bf16.mxu0 %v22887_v62  ;;  %7492 = vmatpush1.bf16.msra.mxu1 %v20564_v61 }
 0xc7c   :  { %7493 = vmatprep.subr.bf16.mxu1 %v20586_v26 }
 0xc7e   :  { %15632 = vmatpush3.bf16.msra.mxu0 %v20367_v56 }
 0xc7f   :  { %15633 = vmatprep.subr.bf16.mxu0 %v22887_v62  ;;  %7494 = vmatpush1.bf16.msra.mxu1 %v20581_v47 }
 0xc80   :  { %7495 = vmatprep.subr.bf16.mxu1 %v20605_v37 }
 0xc82   :  { %15634 = vmatpush3.bf16.msra.mxu0 %v20376_v19 }
 0xc83   :  { %15639 = vmatprep.subr.bf16.mxu0 %v22887_v62  ;;  %7496 = vmatpush1.bf16.msra.mxu1 %v20600_v28 }
 0xc84   :  { %7604 = vmatprep.subr.bf16.mxu1 %v20614_v41 }
 0xc85   :  { %15636 = vmatmul.mubr.msk.bf16.vlgmr.msra.gmra.mrb[24].mxu0 %vm1148_vm0, %v16632_v48  ;;  %v20798_v48 = vld [vmem:[%s22837_s7 + $0x44] ss:$8 sps:$4 sm:$0xff]  }
 0xc86   :  { %15640 = vmatpush3.bf16.msra.mxu0 %v20356_v39  ;;  %15647 = vmatprep.mubr.msk.bf16.mxu0 %vm17388_vm1, %v22887_v62 }
 0xc87   :  { %15641 = vmatprep.subr.bf16.mxu0 %v22887_v62 }
 0xc8a   :  { %15642 = vmatpush3.bf16.msra.mxu0 %v20365_v59 }
 0xc8b   :  { %15643 = vmatprep.subr.bf16.mxu0 %v22887_v62 }
 0xc8e   :  { %15644 = vmatpush3.bf16.msra.mxu0 %v20367_v56 }
 0xc8f   :  { %15645 = vmatprep.subr.bf16.mxu0 %v22887_v62 }
 0xc92   :  { %15646 = vmatpush3.bf16.msra.mxu0 %v20376_v19 }
 0xc93   :  { %15651 = vmatprep.subr.bf16.mxu0 %v22887_v62 }
 0xc95   :  { %15648 = vmatmul.mubr.msk.bf16.vlgmr.msra.gmra.mrb[28].mxu0 %vm1148_vm0, %v16633_v35 }
 0xc96   :  { %15652 = vmatpush3.bf16.msra.mxu0 %v20356_v39  ;;  %15659 = vmatprep.mubr.msk.bf16.mxu0 %vm17388_vm1, %v22887_v62 }
 0xc97   :  { %15653 = vmatprep.subr.bf16.mxu0 %v22887_v62 }
 0xc9a   :  { %15654 = vmatpush3.bf16.msra.mxu0 %v20365_v59 }
 0xc9b   :  { %15655 = vmatprep.subr.bf16.mxu0 %v22887_v62 }
 0xc9e   :  { %15656 = vmatpush3.bf16.msra.mxu0 %v20367_v56 }
 0xc9f   :  { %15657 = vmatprep.subr.bf16.mxu0 %v22887_v62 }
 0xca2   :  { %15658 = vmatpush3.bf16.msra.mxu0 %v20376_v19 }
 0xca3   :  { %15663 = vmatprep.subr.bf16.mxu0 %v22887_v62 }
 0xca5   :  { %15660 = vmatmul.mubr.msk.bf16.vlgmr.msra.gmra.mrb[32].mxu0 %vm1148_vm0, %v16634_v2 }
 0xca6   :  { %15664 = vmatpush3.bf16.msra.mxu0 %v20356_v39  ;;  %15671 = vmatprep.mubr.msk.bf16.mxu0 %vm17388_vm1, %v22887_v62 }
 0xca7   :  { %15665 = vmatprep.subr.bf16.mxu0 %v22887_v62 }
 0xcaa   :  { %15666 = vmatpush3.bf16.msra.mxu0 %v20365_v59 }
 0xcab   :  { %15667 = vmatprep.subr.bf16.mxu0 %v22887_v62 }
 0xcae   :  { %15668 = vmatpush3.bf16.msra.mxu0 %v20367_v56 }
 0xcaf   :  { %15669 = vmatprep.subr.bf16.mxu0 %v22887_v62 }
 0xcb2   :  { %15670 = vmatpush3.bf16.msra.mxu0 %v20376_v19 }
 0xcb3   :  { %15675 = vmatprep.subr.bf16.mxu0 %v22887_v62 }
 0xcb5   :  { %15672 = vmatmul.mubr.msk.bf16.vlgmr.msra.gmra.mrb[36].mxu0 %vm1148_vm0, %v16635_v27 }
 0xcb6   :  { %15676 = vmatpush3.bf16.msra.mxu0 %v20356_v39  ;;  %15683 = vmatprep.mubr.msk.bf16.mxu0 %vm17388_vm1, %v22887_v62 }
 0xcb7   :  { %15677 = vmatprep.subr.bf16.mxu0 %v22887_v62 }
 0xcba   :  { %15678 = vmatpush3.bf16.msra.mxu0 %v20365_v59 }
 0xcbb   :  { %15679 = vmatprep.subr.bf16.mxu0 %v22887_v62 }
 0xcbe   :  { %15680 = vmatpush3.bf16.msra.mxu0 %v20367_v56 }
 0xcbf   :  { %15681 = vmatprep.subr.bf16.mxu0 %v22887_v62 }
 0xcc2   :  { %15682 = vmatpush3.bf16.msra.mxu0 %v20376_v19 }
 0xcc3   :  { %15687 = vmatprep.subr.bf16.mxu0 %v22887_v62 }
 0xcc5   :  { %15684 = vmatmul.mubr.msk.bf16.vlgmr.msra.gmra.mrb[40].mxu0 %vm1148_vm0, %v16636_v32  ;;  %v20826_v32 = vld [vmem:[%s22837_s7 + $0x50] ss:$8 sps:$4 sm:$0xff]  }
 0xcc6   :  { %15688 = vmatpush3.bf16.msra.mxu0 %v20356_v39  ;;  %15695 = vmatprep.mubr.msk.bf16.mxu0 %vm17388_vm1, %v22887_v62 }
 0xcc7   :  { %15689 = vmatprep.subr.bf16.mxu0 %v22887_v62 }
 0xcca   :  { %15690 = vmatpush3.bf16.msra.mxu0 %v20365_v59 }
 0xccb   :  { %15691 = vmatprep.subr.bf16.mxu0 %v22887_v62 }
 0xcce   :  { %15692 = vmatpush3.bf16.msra.mxu0 %v20367_v56 }
 0xccf   :  { %15693 = vmatprep.subr.bf16.mxu0 %v22887_v62 }
 0xcd2   :  { %15694 = vmatpush3.bf16.msra.mxu0 %v20376_v19 }
 0xcd3   :  { %15699 = vmatprep.subr.bf16.mxu0 %v22887_v62 }
 0xcd5   :  { %15696 = vmatmul.mubr.msk.bf16.vlgmr.msra.gmra.mrb[44].mxu0 %vm1148_vm0, %v16637_v7 }
 0xcd6   :  { %15700 = vmatpush3.bf16.msra.mxu0 %v20356_v39  ;;  %15707 = vmatprep.mubr.msk.bf16.mxu0 %vm17388_vm1, %v22887_v62 }
 0xcd7   :  { %15701 = vmatprep.subr.bf16.mxu0 %v22887_v62 }
 0xcda   :  { %15702 = vmatpush3.bf16.msra.mxu0 %v20365_v59 }
 0xcdb   :  { %15703 = vmatprep.subr.bf16.mxu0 %v22887_v62 }
 0xcde   :  { %15704 = vmatpush3.bf16.msra.mxu0 %v20367_v56 }
 0xcdf   :  { %15705 = vmatprep.subr.bf16.mxu0 %v22887_v62 }
 0xce2   :  { %15706 = vmatpush3.bf16.msra.mxu0 %v20376_v19 }
 0xce3   :  { %15711 = vmatprep.subr.bf16.mxu0 %v22887_v62 }
 0xce5   :  { %15708 = vmatmul.mubr.msk.bf16.vlgmr.msra.gmra.mrb[48].mxu0 %vm1148_vm0, %v16638_v6  ;;  %v20870_v6 = vld [vmem:[%s22837_s7 + $0x100] ss:$8 sps:$4 sm:$0xff]  }
 0xce6   :  { %15712 = vmatpush3.bf16.msra.mxu0 %v20356_v39  ;;  %15719 = vmatprep.mubr.msk.bf16.mxu0 %vm17388_vm1, %v22887_v62 }
 0xce7   :  { %15713 = vmatprep.subr.bf16.mxu0 %v22887_v62 }
 0xcea   :  { %15714 = vmatpush3.bf16.msra.mxu0 %v20365_v59 }
 0xceb   :  { %15715 = vmatprep.subr.bf16.mxu0 %v22887_v62 }
 0xcee   :  { %15716 = vmatpush3.bf16.msra.mxu0 %v20367_v56 }
 0xcef   :  { %15717 = vmatprep.subr.bf16.mxu0 %v22887_v62 }
 0xcf2   :  { %15718 = vmatpush3.bf16.msra.mxu0 %v20376_v19 }
 0xcf3   :  { %15723 = vmatprep.subr.bf16.mxu0 %v22887_v62 }
 0xcf5   :  { %15720 = vmatmul.mubr.msk.bf16.vlgmr.msra.gmra.mrb[52].mxu0 %vm1148_vm0, %v16639_v40 }
 0xcf6   :  { %15724 = vmatpush3.bf16.msra.mxu0 %v20356_v39  ;;  %15731 = vmatprep.mubr.msk.bf16.mxu0 %vm17388_vm1, %v22887_v62 }
 0xcf7   :  { %15725 = vmatprep.subr.bf16.mxu0 %v22887_v62 }
 0xcfa   :  { %15726 = vmatpush3.bf16.msra.mxu0 %v20365_v59 }
 0xcfb   :  { %15727 = vmatprep.subr.bf16.mxu0 %v22887_v62 }
 0xcfe   :  { %15728 = vmatpush3.bf16.msra.mxu0 %v20367_v56 }
 0xcff   :  { %15729 = vmatprep.subr.bf16.mxu0 %v22887_v62 }
 0xd02   :  { %15730 = vmatpush3.bf16.msra.mxu0 %v20376_v19 }
 0xd03   :  { %15735 = vmatprep.subr.bf16.mxu0 %v22887_v62 }
 0xd05   :  { %15732 = vmatmul.mubr.msk.bf16.vlgmr.msra.gmra.mrb[56].mxu0 %vm1148_vm0, %v16640_v18 }
 0xd06   :  { %15736 = vmatpush3.bf16.msra.mxu0 %v20356_v39  ;;  %15743 = vmatprep.mubr.msk.bf16.mxu0 %vm17388_vm1, %v22887_v62 }
 0xd07   :  { %15737 = vmatprep.subr.bf16.mxu0 %v22887_v62 }
 0xd0a   :  { %15738 = vmatpush3.bf16.msra.mxu0 %v20365_v59 }
 0xd0b   :  { %15739 = vmatprep.subr.bf16.mxu0 %v22887_v62 }
 0xd0e   :  { %15740 = vmatpush3.bf16.msra.mxu0 %v20367_v56 }
 0xd0f   :  { %15741 = vmatprep.subr.bf16.mxu0 %v22887_v62 }
 0xd12   :  { %15742 = vmatpush3.bf16.msra.mxu0 %v20376_v19 }
 0xd13   :  { %15747 = vmatprep.subr.bf16.mxu0 %v22887_v62 }
 0xd15   :  { %15744 = vmatmul.mubr.msk.bf16.vlgmr.msra.gmra.mrb[60].mxu0 %vm1148_vm0, %v16641_v23  ;;  %v20898_v23 = vld [vmem:[%s22837_s7 + $0x124] ss:$8 sps:$4 sm:$0xff]  }
 0xd16   :  { %15748 = vmatpush3.bf16.msra.mxu0 %v20356_v39  ;;  %15755 = vmatprep.mubr.msk.bf16.mxu0 %vm17388_vm1, %v22887_v62 }
 0xd17   :  { %15749 = vmatprep.subr.bf16.mxu0 %v22887_v62 }
 0xd1a   :  { %15750 = vmatpush3.bf16.msra.mxu0 %v20365_v59 }
 0xd1b   :  { %15751 = vmatprep.subr.bf16.mxu0 %v22887_v62 }
 0xd1e   :  { %15752 = vmatpush3.bf16.msra.mxu0 %v20367_v56 }
 0xd1f   :  { %15753 = vmatprep.subr.bf16.mxu0 %v22887_v62 }
 0xd22   :  { %15754 = vmatpush3.bf16.msra.mxu0 %v20376_v19 }
 0xd23   :  { %15759 = vmatprep.subr.bf16.mxu0 %v22887_v62 }
 0xd25   :  { %15756 = vmatmul.mubr.msk.bf16.vlgmr.msra.gmra.mrb[64].mxu0 %vm1148_vm0, %v16651_v44  ;;  %v20912_v44 = vld [vmem:[%s22837_s7 + $0x134] ss:$8 sps:$4 sm:$0xff]  }
 0xd26   :  { %15760 = vmatpush3.bf16.msra.mxu0 %v20384_v52  ;;  %15767 = vmatprep.mubr.msk.bf16.mxu0 %vm17388_vm1, %v22887_v62 }
 0xd27   :  { %15761 = vmatprep.subr.bf16.mxu0 %v22887_v62 }
 0xd28   :  { %v20714_v39 = vpop.f32.mrb[68].mxu1  ;;  %v20716_v59 = vpop.f32.mrb[12].mxu0 }
 0xd29   :  { %v15577_v56 = vpop.f32.mrb[69].mxu1  ;;  %v15601_v45 = vpop.f32.mrb[13].mxu0 }
 0xd2a   :  { %15762 = vmatpush3.bf16.msra.mxu0 %v20388_v55  ;;  %v20719_v5 = vpop.f32.mrb[70].mxu1  ;;  %v20721_v25 = vpop.f32.mrb[14].mxu0  ;;  %v20942_v45 = vld [vmem:[%s22837_s7 + $0x154] ss:$8 sps:$4 sm:$0xff]  }
 0xd2b   :  { %15763 = vmatprep.subr.bf16.mxu0 %v22887_v62  ;;  %v7314_v0 = vpack.c.bf16 %v20719_v5, %v20714_v39  ;;  %v15578_v19 = vpop.f32.mrb[71].mxu1  ;;  %v7699_v34 = vpack.c.bf16 %v20721_v25, %v20716_v59  ;;  %v15602_v21 = vpop.f32.mrb[15].mxu0  ;;  %v16726_v59 = vld [vmem:[%s22837_s7 + $0x1b4] ss:$8 sps:$4 sm:$0xff]   ;;  %v16724_v25 = vld [vmem:[%s22837_s7 + $0x1b0] ss:$8 sps:$4 sm:$0xff]  }
 0xd2c   :  { %v20950_v19 = vld [vmem:[%s22837_s7 + $0x150] ss:$8 sps:$4 sm:$0xff]   ;;  %v20956_v21 = vld [vmem:[%s22837_s7 + $0x164] ss:$8 sps:$4 sm:$0xff]  }
 0xd2e   :  { %15764 = vmatpush3.bf16.msra.mxu0 %v20354_v10 }
 0xd2f   :  { %15765 = vmatprep.subr.bf16.mxu0 %v22887_v62 }
 0xd32   :  { %15766 = vmatpush3.bf16.msra.mxu0 %v20404_v46 }
 0xd33   :  { %15771 = vmatprep.subr.bf16.mxu0 %v22887_v62 }
 0xd35   :  { %15768 = vmatmul.mubr.msk.bf16.vlgmr.msra.gmra.mrb[68].mxu0 %vm1148_vm0, %v20395_v11 }
 0xd36   :  { %15772 = vmatpush3.bf16.msra.mxu0 %v20384_v52  ;;  %15779 = vmatprep.mubr.msk.bf16.mxu0 %vm17388_vm1, %v22887_v62 }
 0xd37   :  { %15773 = vmatprep.subr.bf16.mxu0 %v22887_v62 }
 0xd38   :  { %v7376_v36 = vpop.f32.mrb[72].mxu1  ;;  %v20738_v57 = vpop.f32.mrb[16].mxu0 }
 0xd39   :  { %v15589_v13 = vpop.f32.mrb[73].mxu1  ;;  %v15613_v24 = vpop.f32.mrb[17].mxu0 }
 0xd3a   :  { %v7379_v3 = vpop.f32.mrb[74].mxu1  ;;  %15774 = vmatpush3.bf16.msra.mxu0 %v20388_v55  ;;  %v20746_v43 = vpop.f32.mrb[18].mxu0  ;;  %v20968_v13 = vld [vmem:[%s22837_s7 + $0x174] ss:$8 sps:$4 sm:$0xff]   ;;  %v20974_v24 = vld [vmem:[%s22837_s7 + $0x170] ss:$8 sps:$4 sm:$0xff]  }
 0xd3b   :  { %v7383_v31 = vpack.c.bf16 %v7379_v3, %v7376_v36  ;;  %15775 = vmatprep.subr.bf16.mxu0 %v22887_v62  ;;  %v7896_v11 = vpack.c.bf16 %v20746_v43, %v20738_v57  ;;  %v15614_v63 = vpop.f32.mrb[19].mxu0  ;;  %v15590_v9 = vpop.f32.mrb[75].mxu1  ;;  %v20962_v36 = vld [vmem:[%s22837_s7 + $0x160] ss:$8 sps:$4 sm:$0xff]   ;;  %v16717_v3 = vld [vmem:[%s22837_s7 + $0x184] ss:$8 sps:$4 sm:$0xff]  }
 0xd3c   :  { %v16715_v9 = vld [vmem:[%s22837_s7 + $0x180] ss:$8 sps:$4 sm:$0xff]   ;;  %v16750_v57 = vld [vmem:[%s22837_s7 + $0x234] ss:$8 sps:$4 sm:$0xff]   ;;  %v16748_v43 = vld [vmem:[%s22837_s7 + $0x230] ss:$8 sps:$4 sm:$0xff]  }
 0xd3d   :  { %7514 = vmatmul.mubr.bf16.vlgmr.msra.gmra.mrb[84].mxu1 %v7383_v31 }
 0xd3e   :  { %7605 = vmatpush1.bf16.msra.mxu1 %v20744_v16  ;;  %15776 = vmatpush3.bf16.msra.mxu0 %v20354_v10 }
 0xd3f   :  { %7606 = vmatprep.subr.bf16.mxu1 %v20752_v17  ;;  %15777 = vmatprep.subr.bf16.mxu0 %v22887_v62 }
 0xd40   :  { %7636 = vmatprep.mubr.bf16.mxu1 %v22889_v58 }
 0xd42   :  { %7607 = vmatpush1.bf16.msra.mxu1 %v20761_v22  ;;  %15778 = vmatpush3.bf16.msra.mxu0 %v20404_v46 }
 0xd43   :  { %7608 = vmatprep.subr.bf16.mxu1 %v20768_v1  ;;  %10489 = vmatprep.subr.bf16.mxu0 %v20495_v51 }
 0xd45   :  { %15780 = vmatmul.mubr.msk.bf16.vlgmr.msra.gmra.mrb[72].mxu0 %vm1148_vm0, %v20428_v38 }
 0xd46   :  { %7609 = vmatpush1.bf16.msra.mxu1 %v20776_v50  ;;  %10490 = vmatpush1.bf16.msra.mxu0 %v20490_v54  ;;  %v20808_v54 = vld [vmem:[%s22837_s7 + $0x40] ss:$8 sps:$4 sm:$0xff]  }
 0xd47   :  { %7610 = vmatprep.subr.bf16.mxu1 %v20782_v42  ;;  %10491 = vmatprep.subr.bf16.mxu0 %v20507_v53  ;;  %v20817_v53 = vld [vmem:[%s22837_s7 + $0x54] ss:$8 sps:$4 sm:$0xff]  }
 0xd48   :  { %v20801_v35 = vpop.f32.mrb[20].mxu0  ;;  %10521 = vmatprep.mubr.bf16.mxu0 %v22889_v58 }
 0xd49   :  { %v15625_v38 = vpop.f32.mrb[21].mxu0 }
 0xd4a   :  { %7611 = vmatpush1.bf16.msra.mxu1 %v20791_v4  ;;  %v20810_v51 = vpop.f32.mrb[22].mxu0  ;;  %10492 = vmatpush1.bf16.msra.mxu0 %v20502_v12  ;;  %v20833_v12 = vld [vmem:[%s22837_s7 + $0x64] ss:$8 sps:$4 sm:$0xff]  }
 0xd4b   :  { %7612 = vmatprep.subr.bf16.mxu1 %v20798_v48  ;;  %v8093_v2 = vpack.c.bf16 %v20810_v51, %v20801_v35  ;;  %v15626_v27 = vpop.f32.mrb[23].mxu0  ;;  %10493 = vmatprep.subr.bf16.mxu0 %v20519_v60  ;;  %v20840_v60 = vld [vmem:[%s22837_s7 + $0x60] ss:$8 sps:$4 sm:$0xff]   ;;  %v16774_v35 = vld [vmem:[%s22837_s7 + $0x2b4] ss:$8 sps:$4 sm:$0xff]  }
 0xd4c   :  { %v16720_v27 = vld [vmem:[%s22837_s7 + $0x194] ss:$8 sps:$4 sm:$0xff]   ;;  %v16772_v51 = vld [vmem:[%s22837_s7 + $0x2b0] ss:$8 sps:$4 sm:$0xff]  }
 0xd4e   :  { %7613 = vmatpush1.bf16.msra.mxu1 %v20808_v54  ;;  %10494 = vmatpush1.bf16.msra.mxu0 %v20526_v14  ;;  %v20847_v14 = vld [vmem:[%s22837_s7 + $0x74] ss:$8 sps:$4 sm:$0xff]  }
 0xd4f   :  { %7614 = vmatprep.subr.bf16.mxu1 %v20817_v53  ;;  %10495 = vmatprep.subr.bf16.mxu0 %v20541_v15  ;;  %v20854_v15 = vld [vmem:[%s22837_s7 + $0x70] ss:$8 sps:$4 sm:$0xff]  }
 0xd52   :  { %7615 = vmatpush1.bf16.msra.mxu1 %v20826_v32  ;;  %10496 = vmatpush1.bf16.msra.mxu0 %v20536_v29  ;;  %v20861_v29 = vld [vmem:[%s22837_s7 + $0x104] ss:$8 sps:$4 sm:$0xff]  }
 0xd53   :  { %7616 = vmatprep.subr.bf16.mxu1 %v20833_v12  ;;  %10497 = vmatprep.subr.bf16.mxu0 %v20555_v49 }
 0xd56   :  { %7617 = vmatpush1.bf16.msra.mxu1 %v20840_v60  ;;  %10498 = vmatpush1.bf16.msra.mxu0 %v20550_v20 }
 0xd57   :  { %7618 = vmatprep.subr.bf16.mxu1 %v20847_v14  ;;  %10499 = vmatprep.subr.bf16.mxu0 %v20569_v8  ;;  %v20879_v8 = vld [vmem:[%s22837_s7 + $0x114] ss:$8 sps:$4 sm:$0xff]  }
 0xd58   :  { %v20864_v7 = vpop.f32.mrb[24].mxu0 }
 0xd59   :  { %v15637_v49 = vpop.f32.mrb[25].mxu0 }
 0xd5a   :  { %7619 = vmatpush1.bf16.msra.mxu1 %v20854_v15  ;;  %v20872_v20 = vpop.f32.mrb[26].mxu0  ;;  %10500 = vmatpush1.bf16.msra.mxu0 %v20564_v61  ;;  %v20891_v61 = vld [vmem:[%s22837_s7 + $0x110] ss:$8 sps:$4 sm:$0xff]  }
 0xd5b   :  { %7797 = vmatprep.subr.bf16.mxu1 %v20861_v29  ;;  %v8290_v40 = vpack.c.bf16 %v20872_v20, %v20864_v7  ;;  %v15638_v18 = vpop.f32.mrb[27].mxu0  ;;  %10501 = vmatprep.subr.bf16.mxu0 %v20586_v26  ;;  %v20906_v26 = vld [vmem:[%s22837_s7 + $0x120] ss:$8 sps:$4 sm:$0xff]   ;;  %v16798_v7 = vld [vmem:[%s22837_s7 + $0x334] ss:$8 sps:$4 sm:$0xff]  }
 0xd5c   :  { %v16796_v20 = vld [vmem:[%s22837_s7 + $0x330] ss:$8 sps:$4 sm:$0xff]  }
 0xd5d   :  { %7637 = vmatmul.mubr.bf16.vlgmr.msra.gmra.mrb[84].mxu1 %v7314_v0 }
 0xd5e   :  { %7798 = vmatpush1.bf16.msra.mxu1 %v20870_v6  ;;  %7829 = vmatprep.mubr.bf16.mxu1 %v22889_v58 }
 0xd5f   :  { %7799 = vmatprep.subr.bf16.mxu1 %v20879_v8  ;;  %10502 = vmatpush1.bf16.msra.mxu0 %v20581_v47  ;;  %v20920_v47 = vld [vmem:[%s22837_s7 + $0x130] ss:$8 sps:$4 sm:$0xff]  }
 0xd60   :  { %10503 = vmatprep.subr.bf16.mxu0 %v20605_v37  ;;  %v20926_v37 = vld [vmem:[%s22837_s7 + $0x144] ss:$8 sps:$4 sm:$0xff]  }
 0xd62   :  { %7800 = vmatpush1.bf16.msra.mxu1 %v20891_v61 }
 0xd63   :  { %7801 = vmatprep.subr.bf16.mxu1 %v20898_v23  ;;  %10504 = vmatpush1.bf16.msra.mxu0 %v20600_v28  ;;  %v20934_v28 = vld [vmem:[%s22837_s7 + $0x140] ss:$8 sps:$4 sm:$0xff]  }
 0xd64   :  { %10532 = vmatprep.subr.bf16.mxu0 %v20614_v41 }
 0xd66   :  { %7802 = vmatpush1.bf16.msra.mxu1 %v20906_v26 }
 0xd67   :  { %7803 = vmatprep.subr.bf16.mxu1 %v20912_v44 }
 0xd68   :  { %v20928_v39 = vpop.f32.mrb[28].mxu0 }
 0xd69   :  { %v15649_v56 = vpop.f32.mrb[29].mxu0 }
 0xd6a   :  { %7804 = vmatpush1.bf16.msra.mxu1 %v20920_v47  ;;  %v20936_v41 = vpop.f32.mrb[30].mxu0  ;;  %v16718_v56 = vld [vmem:[%s22837_s7 + $0x190] ss:$8 sps:$4 sm:$0xff]  }
 0xd6b   :  { %7805 = vmatprep.subr.bf16.mxu1 %v20926_v37  ;;  %v15650_v0 = vpop.f32.mrb[31].mxu0  ;;  %v23052_v33 = vpack.c.bf16 %v20936_v41, %v20928_v39  ;;  %v16820_v39 = vld [vmem:[%s22837_s7 + $0x3b0] ss:$8 sps:$4 sm:$0xff]   ;;  %v16825_v41 = vld [vmem:[%s22837_s7 + $0x3c4] ss:$8 sps:$4 sm:$0xff]  }
 0xd6c   :  { %v16723_v0 = vld [vmem:[%s22837_s7 + $0x1a4] ss:$8 sps:$4 sm:$0xff]  }
 0xd6e   :  { %7806 = vmatpush1.bf16.msra.mxu1 %v20934_v28 }
 0xd6f   :  { %7807 = vmatprep.subr.bf16.mxu1 %v20942_v45 }
 0xd72   :  { %7808 = vmatpush1.bf16.msra.mxu1 %v20950_v19 }
 0xd73   :  { %7809 = vmatprep.subr.bf16.mxu1 %v20956_v21 }
 0xd76   :  { %7810 = vmatpush1.bf16.msra.mxu1 %v20962_v36 }
 0xd77   :  { %7811 = vmatprep.subr.bf16.mxu1 %v20968_v13 }
 0xd78   :  { %v20980_v31 = vpop.f32.mrb[32].mxu0 }
 0xd79   :  { %v15661_v63 = vpop.f32.mrb[33].mxu0 }
 0xd7a   :  { %7812 = vmatpush1.bf16.msra.mxu1 %v20974_v24  ;;  %v20986_v38 = vpop.f32.mrb[34].mxu0 }
 0xd7b   :  { %7994 = vmatprep.subr.bf16.mxu1 %v16717_v3  ;;  %v15662_v18 = vpop.f32.mrb[35].mxu0  ;;  %v16721_v3 = vld [vmem:[%s22837_s7 + $0x1a0] ss:$8 sps:$4 sm:$0xff]  }
 0xd7d   :  { %7830 = vmatmul.mubr.bf16.vlgmr.msra.gmra.mrb[84].mxu1 %v7699_v34  ;;  %v16729_v34 = vld [vmem:[%s22837_s7 + $0x1c4] ss:$8 sps:$4 sm:$0xff]  }
 0xd7e   :  { %7995 = vmatpush1.bf16.msra.mxu1 %v16715_v9  ;;  %8026 = vmatprep.mubr.bf16.mxu1 %v22889_v58 }
 0xd7f   :  { %7996 = vmatprep.subr.bf16.mxu1 %v16720_v27  ;;  %v16727_v27 = vld [vmem:[%s22837_s7 + $0x1c0] ss:$8 sps:$4 sm:$0xff]  }
 0xd82   :  { %7997 = vmatpush1.bf16.msra.mxu1 %v16718_v56  ;;  %v16732_v56 = vld [vmem:[%s22837_s7 + $0x1d4] ss:$8 sps:$4 sm:$0xff]  }
 0xd83   :  { %7998 = vmatprep.subr.bf16.mxu1 %v16723_v0 }
 0xd86   :  { %7999 = vmatpush1.bf16.msra.mxu1 %v16721_v3 }
 0xd87   :  { %8000 = vmatprep.subr.bf16.mxu1 %v16726_v59  ;;  %v16730_v59 = vld [vmem:[%s22837_s7 + $0x1d0] ss:$8 sps:$4 sm:$0xff]  }
 0xd88   :  { %v21015_v63 = vpop.f32.mrb[36].mxu0 }
 0xd89   :  { %v15673_v9 = vpop.f32.mrb[37].mxu0 }
 0xd8a   :  { %8001 = vmatpush1.bf16.msra.mxu1 %v16724_v25  ;;  %v21020_v18 = vpop.f32.mrb[38].mxu0  ;;  %v16735_v25 = vld [vmem:[%s22837_s7 + $0x1e4] ss:$8 sps:$4 sm:$0xff]   ;;  %v16738_v9 = vld [vmem:[%s22837_s7 + $0x1f4] ss:$8 sps:$4 sm:$0xff]  }
 0xd8b   :  { %8002 = vmatprep.subr.bf16.mxu1 %v16729_v34  ;;  %v15674_v3 = vpop.f32.mrb[39].mxu0  ;;  %v16733_v34 = vld [vmem:[%s22837_s7 + $0x1e0] ss:$8 sps:$4 sm:$0xff]  }
 0xd8e   :  { %8003 = vmatpush1.bf16.msra.mxu1 %v16727_v27  ;;  %v16736_v27 = vld [vmem:[%s22837_s7 + $0x1f0] ss:$8 sps:$4 sm:$0xff]  }
 0xd8f   :  { %8004 = vmatprep.subr.bf16.mxu1 %v16732_v56  ;;  %v16741_v56 = vld [vmem:[%s22837_s7 + $0x204] ss:$8 sps:$4 sm:$0xff]  }
 0xd92   :  { %8005 = vmatpush1.bf16.msra.mxu1 %v16730_v59 }
 0xd93   :  { %8006 = vmatprep.subr.bf16.mxu1 %v16735_v25  ;;  %v16739_v25 = vld [vmem:[%s22837_s7 + $0x200] ss:$8 sps:$4 sm:$0xff]  }
 0xd96   :  { %8007 = vmatpush1.bf16.msra.mxu1 %v16733_v34  ;;  %v16744_v34 = vld [vmem:[%s22837_s7 + $0x214] ss:$8 sps:$4 sm:$0xff]  }
 0xd97   :  { %8008 = vmatprep.subr.bf16.mxu1 %v16738_v9 }
 0xd98   :  { %v21045_v3 = vpop.f32.mrb[40].mxu0 }
 0xd99   :  { %v15685_v59 = vpop.f32.mrb[41].mxu0 }
 0xd9a   :  { %8009 = vmatpush1.bf16.msra.mxu1 %v16736_v27  ;;  %v21050_v0 = vpop.f32.mrb[42].mxu0  ;;  %v16742_v27 = vld [vmem:[%s22837_s7 + $0x210] ss:$8 sps:$4 sm:$0xff]  }
 0xd9b   :  { %8191 = vmatprep.subr.bf16.mxu1 %v16741_v56  ;;  %v15686_v62 = vpop.f32.mrb[43].mxu0  ;;  %v16747_v56 = vld [vmem:[%s22837_s7 + $0x224] ss:$8 sps:$4 sm:$0xff]  }
 0xd9c   :  { %v16745_v62 = vld [vmem:[%s22837_s7 + $0x220] ss:$8 sps:$4 sm:$0xff]  }
 0xd9d   :  { %8027 = vmatmul.mubr.bf16.vlgmr.msra.gmra.mrb[84].mxu1 %v7896_v11  ;;  %v16753_v11 = vld [vmem:[%s22837_s7 + $0x244] ss:$8 sps:$4 sm:$0xff]  }
 0xd9e   :  { %8192 = vmatpush1.bf16.msra.mxu1 %v16739_v25  ;;  %8223 = vmatprep.mubr.bf16.mxu1 %v22889_v58 }
 0xd9f   :  { %8193 = vmatprep.subr.bf16.mxu1 %v16744_v34  ;;  %v16751_v34 = vld [vmem:[%s22837_s7 + $0x240] ss:$8 sps:$4 sm:$0xff]  }
 0xda2   :  { %8194 = vmatpush1.bf16.msra.mxu1 %v16742_v27 }
 0xda3   :  { %8195 = vmatprep.subr.bf16.mxu1 %v16747_v56  ;;  %v16756_v56 = vld [vmem:[%s22837_s7 + $0x254] ss:$8 sps:$4 sm:$0xff]  }
 0xda6   :  { %8196 = vmatpush1.bf16.msra.mxu1 %v16745_v62 }
 0xda7   :  { %8197 = vmatprep.subr.bf16.mxu1 %v16750_v57 }
 0xda8   :  { %v21079_v59 = vpop.f32.mrb[44].mxu0 }
 0xda9   :  { %v15697_v25 = vpop.f32.mrb[45].mxu0 }
 0xdaa   :  { %8198 = vmatpush1.bf16.msra.mxu1 %v16748_v43  ;;  %v21084_v27 = vpop.f32.mrb[46].mxu0  ;;  %v16754_v43 = vld [vmem:[%s22837_s7 + $0x250] ss:$8 sps:$4 sm:$0xff]   ;;  %v16759_v25 = vld [vmem:[%s22837_s7 + $0x264] ss:$8 sps:$4 sm:$0xff]  }
 0xdab   :  { %8199 = vmatprep.subr.bf16.mxu1 %v16753_v11  ;;  %v15698_v57 = vpop.f32.mrb[47].mxu0  ;;  %v16757_v11 = vld [vmem:[%s22837_s7 + $0x260] ss:$8 sps:$4 sm:$0xff]  }
 0xdac   :  { %v16762_v57 = vld [vmem:[%s22837_s7 + $0x274] ss:$8 sps:$4 sm:$0xff]  }
 0xdae   :  { %8200 = vmatpush1.bf16.msra.mxu1 %v16751_v34  ;;  %v16760_v34 = vld [vmem:[%s22837_s7 + $0x270] ss:$8 sps:$4 sm:$0xff]  }
 0xdaf   :  { %8201 = vmatprep.subr.bf16.mxu1 %v16756_v56  ;;  %v16765_v56 = vld [vmem:[%s22837_s7 + $0x284] ss:$8 sps:$4 sm:$0xff]  }
 0xdb2   :  { %8202 = vmatpush1.bf16.msra.mxu1 %v16754_v43 }
 0xdb3   :  { %8203 = vmatprep.subr.bf16.mxu1 %v16759_v25  ;;  %v16763_v25 = vld [vmem:[%s22837_s7 + $0x280] ss:$8 sps:$4 sm:$0xff]  }
 0xdb6   :  { %8204 = vmatpush1.bf16.msra.mxu1 %v16757_v11  ;;  %v16768_v11 = vld [vmem:[%s22837_s7 + $0x294] ss:$8 sps:$4 sm:$0xff]  }
 0xdb7   :  { %8205 = vmatprep.subr.bf16.mxu1 %v16762_v57 }
 0xdb8   :  { %v21109_v43 = vpop.f32.mrb[48].mxu0 }
 0xdb9   :  { %v15709_v62 = vpop.f32.mrb[49].mxu0 }
 0xdba   :  { %8206 = vmatpush1.bf16.msra.mxu1 %v16760_v34  ;;  %v21114_v9 = vpop.f32.mrb[50].mxu0  ;;  %v16766_v62 = vld [vmem:[%s22837_s7 + $0x290] ss:$8 sps:$4 sm:$0xff]   ;;  %v16771_v34 = vld [vmem:[%s22837_s7 + $0x2a4] ss:$8 sps:$4 sm:$0xff]  }
 0xdbb   :  { %8388 = vmatprep.subr.bf16.mxu1 %v16765_v56  ;;  %v15710_v49 = vpop.f32.mrb[51].mxu0 }
 0xdbc   :  { %v16769_v49 = vld [vmem:[%s22837_s7 + $0x2a0] ss:$8 sps:$4 sm:$0xff]  }
 0xdbd   :  { %8224 = vmatmul.mubr.bf16.vlgmr.msra.gmra.mrb[84].mxu1 %v8093_v2  ;;  %v16777_v2 = vld [vmem:[%s22837_s7 + $0x2c4] ss:$8 sps:$4 sm:$0xff]  }
 0xdbe   :  { %8389 = vmatpush1.bf16.msra.mxu1 %v16763_v25  ;;  %8420 = vmatprep.mubr.bf16.mxu1 %v22889_v58 }
 0xdbf   :  { %8390 = vmatprep.subr.bf16.mxu1 %v16768_v11  ;;  %v16775_v11 = vld [vmem:[%s22837_s7 + $0x2c0] ss:$8 sps:$4 sm:$0xff]  }
 0xdc2   :  { %8391 = vmatpush1.bf16.msra.mxu1 %v16766_v62 }
 0xdc3   :  { %8392 = vmatprep.subr.bf16.mxu1 %v16771_v34  ;;  %v16780_v34 = vld [vmem:[%s22837_s7 + $0x2d4] ss:$8 sps:$4 sm:$0xff]  }
 0xdc6   :  { %8393 = vmatpush1.bf16.msra.mxu1 %v16769_v49 }
 0xdc7   :  { %8394 = vmatprep.subr.bf16.mxu1 %v16774_v35 }
 0xdc8   :  { %v21143_v56 = vpop.f32.mrb[52].mxu0 }
 0xdc9   :  { %v15721_v25 = vpop.f32.mrb[53].mxu0 }
 0xdca   :  { %8395 = vmatpush1.bf16.msra.mxu1 %v16772_v51  ;;  %v21148_v62 = vpop.f32.mrb[54].mxu0  ;;  %v16778_v51 = vld [vmem:[%s22837_s7 + $0x2d0] ss:$8 sps:$4 sm:$0xff]   ;;  %v16783_v25 = vld [vmem:[%s22837_s7 + $0x2e4] ss:$8 sps:$4 sm:$0xff]  }
 0xdcb   :  { %8396 = vmatprep.subr.bf16.mxu1 %v16777_v2  ;;  %v15722_v35 = vpop.f32.mrb[55].mxu0  ;;  %v16781_v2 = vld [vmem:[%s22837_s7 + $0x2e0] ss:$8 sps:$4 sm:$0xff]  }
 0xdcc   :  { %v16786_v35 = vld [vmem:[%s22837_s7 + $0x2f4] ss:$8 sps:$4 sm:$0xff]  }
 0xdce   :  { %8397 = vmatpush1.bf16.msra.mxu1 %v16775_v11  ;;  %v16784_v11 = vld [vmem:[%s22837_s7 + $0x2f0] ss:$8 sps:$4 sm:$0xff]  }
 0xdcf   :  { %8398 = vmatprep.subr.bf16.mxu1 %v16780_v34  ;;  %v16789_v34 = vld [vmem:[%s22837_s7 + $0x304] ss:$8 sps:$4 sm:$0xff]  }
 0xdd2   :  { %8399 = vmatpush1.bf16.msra.mxu1 %v16778_v51 }
 0xdd3   :  { %8400 = vmatprep.subr.bf16.mxu1 %v16783_v25  ;;  %v16787_v25 = vld [vmem:[%s22837_s7 + $0x300] ss:$8 sps:$4 sm:$0xff]  }
 0xdd6   :  { %8401 = vmatpush1.bf16.msra.mxu1 %v16781_v2  ;;  %v16792_v2 = vld [vmem:[%s22837_s7 + $0x314] ss:$8 sps:$4 sm:$0xff]  }
 0xdd7   :  { %8402 = vmatprep.subr.bf16.mxu1 %v16786_v35 }
 0xdd8   :  { %v21173_v51 = vpop.f32.mrb[56].mxu0 }
 0xdd9   :  { %v15733_v49 = vpop.f32.mrb[57].mxu0 }
 0xdda   :  { %8403 = vmatpush1.bf16.msra.mxu1 %v16784_v11  ;;  %v21178_v57 = vpop.f32.mrb[58].mxu0  ;;  %v16790_v49 = vld [vmem:[%s22837_s7 + $0x310] ss:$8 sps:$4 sm:$0xff]   ;;  %v16795_v11 = vld [vmem:[%s22837_s7 + $0x324] ss:$8 sps:$4 sm:$0xff]  }
 0xddb   :  { %8585 = vmatprep.subr.bf16.mxu1 %v16789_v34  ;;  %v15734_v5 = vpop.f32.mrb[59].mxu0 }
 0xddc   :  { %v16793_v5 = vld [vmem:[%s22837_s7 + $0x320] ss:$8 sps:$4 sm:$0xff]  }
 0xddd   :  { %8421 = vmatmul.mubr.bf16.vlgmr.msra.gmra.mrb[84].mxu1 %v8290_v40  ;;  %v16801_v40 = vld [vmem:[%s22837_s7 + $0x344] ss:$8 sps:$4 sm:$0xff]  }
 0xdde   :  { %8586 = vmatpush1.bf16.msra.mxu1 %v16787_v25  ;;  %8617 = vmatprep.mubr.bf16.mxu1 %v22889_v58 }
 0xddf   :  { %8587 = vmatprep.subr.bf16.mxu1 %v16792_v2  ;;  %v16799_v2 = vld [vmem:[%s22837_s7 + $0x340] ss:$8 sps:$4 sm:$0xff]  }
 0xde2   :  { %8588 = vmatpush1.bf16.msra.mxu1 %v16790_v49 }
 0xde3   :  { %8589 = vmatprep.subr.bf16.mxu1 %v16795_v11  ;;  %v16804_v11 = vld [vmem:[%s22837_s7 + $0x354] ss:$8 sps:$4 sm:$0xff]  }
 0xde6   :  { %8590 = vmatpush1.bf16.msra.mxu1 %v16793_v5 }
 0xde7   :  { %8591 = vmatprep.subr.bf16.mxu1 %v16798_v7 }
 0xde8   :  { %v21207_v34 = vpop.f32.mrb[60].mxu0 }
 0xde9   :  { %v15745_v25 = vpop.f32.mrb[61].mxu0 }
 0xdea   :  { %8592 = vmatpush1.bf16.msra.mxu1 %v16796_v20  ;;  %v21212_v49 = vpop.f32.mrb[62].mxu0  ;;  %v16802_v20 = vld [vmem:[%s22837_s7 + $0x350] ss:$8 sps:$4 sm:$0xff]   ;;  %v16807_v25 = vld [vmem:[%s22837_s7 + $0x364] ss:$8 sps:$4 sm:$0xff]  }
 0xdeb   :  { %8593 = vmatprep.subr.bf16.mxu1 %v16801_v40  ;;  %v15746_v7 = vpop.f32.mrb[63].mxu0  ;;  %v16805_v40 = vld [vmem:[%s22837_s7 + $0x360] ss:$8 sps:$4 sm:$0xff]  }
 0xdec   :  { %v16810_v7 = vld [vmem:[%s22837_s7 + $0x374] ss:$8 sps:$4 sm:$0xff]  }
 0xdee   :  { %8594 = vmatpush1.bf16.msra.mxu1 %v16799_v2  ;;  %v16808_v2 = vld [vmem:[%s22837_s7 + $0x370] ss:$8 sps:$4 sm:$0xff]  }
 0xdef   :  { %8595 = vmatprep.subr.bf16.mxu1 %v16804_v11  ;;  %v16813_v11 = vld [vmem:[%s22837_s7 + $0x384] ss:$8 sps:$4 sm:$0xff]  }
 0xdf2   :  { %8596 = vmatpush1.bf16.msra.mxu1 %v16802_v20 }
 0xdf3   :  { %8597 = vmatprep.subr.bf16.mxu1 %v16807_v25  ;;  %v16811_v25 = vld [vmem:[%s22837_s7 + $0x380] ss:$8 sps:$4 sm:$0xff]  }
 0xdf6   :  { %8598 = vmatpush1.bf16.msra.mxu1 %v16805_v40  ;;  %v16816_v40 = vld [vmem:[%s22837_s7 + $0x394] ss:$8 sps:$4 sm:$0xff]  }
 0xdf7   :  { %8599 = vmatprep.subr.bf16.mxu1 %v16810_v7 }
 0xdf8   :  { %v21237_v20 = vpop.f32.mrb[64].mxu0 }
 0xdf9   :  { %23050 = vst [vmem:[#allocation7_spill] sm:$0xff] %v21237_v20  ;;  %v15757_v5 = vpop.f32.mrb[65].mxu0 }
 0xdfa   :  { %8600 = vmatpush1.bf16.msra.mxu1 %v16808_v2  ;;  %v21242_v35 = vpop.f32.mrb[66].mxu0  ;;  %v16814_v5 = vld [vmem:[%s22837_s7 + $0x390] ss:$8 sps:$4 sm:$0xff]   ;;  %v23053_v2 = vmov 0  }
 0xdfb   :  { %23051 = vst [vmem:[#allocation18_spill] sm:$0xff] %v21242_v35  ;;  %8782 = vmatprep.subr.bf16.mxu1 %v16813_v11  ;;  %v15758_v58 = vpop.f32.mrb[67].mxu0  ;;  %v16819_v11 = vld [vmem:[%s22837_s7 + $0x3a4] ss:$8 sps:$4 sm:$0xff]  }
 0xdfc   :  { %v16817_v58 = vld [vmem:[%s22837_s7 + $0x3a0] ss:$8 sps:$4 sm:$0xff]  }
 0xdfd   :  { %8618 = vmatmul.mubr.bf16.vlgmr.msra.gmra.mrb[84].mxu1 %v23052_v33  ;;  %v16822_v33 = vld [vmem:[%s22837_s7 + $0x3b4] ss:$8 sps:$4 sm:$0xff]  }
 0xdfe   :  { %8783 = vmatpush1.bf16.msra.mxu1 %v16811_v25  ;;  %8814 = vmatprep.mubr.bf16.mxu1 %v23053_v2 }
 0xdff   :  { %8784 = vmatprep.subr.bf16.mxu1 %v16816_v40 }
 0xe02   :  { %8785 = vmatpush1.bf16.msra.mxu1 %v16814_v5  ;;  %v16823_v5 = vld [vmem:[%s22837_s7 + $0x3c0] ss:$8 sps:$4 sm:$0xff]  }
 0xe03   :  { %8786 = vmatprep.subr.bf16.mxu1 %v16819_v11 }
 0xe06   :  { %8787 = vmatpush1.bf16.msra.mxu1 %v16817_v58  ;;  %v16828_v58 = vld [vmem:[%s22837_s7 + $0x3d4] ss:$8 sps:$4 sm:$0xff]  }
 0xe07   :  { %8788 = vmatprep.subr.bf16.mxu1 %v16822_v33 }
 0xe08   :  { %v21271_v25 = vpop.f32.mrb[68].mxu0 }
 0xe09   :  { %v15769_v40 = vpop.f32.mrb[69].mxu0 }
 0xe0a   :  { %8789 = vmatpush1.bf16.msra.mxu1 %v16820_v39  ;;  %v21276_v11 = vpop.f32.mrb[70].mxu0  ;;  %v16826_v39 = vld [vmem:[%s22837_s7 + $0x3d0] ss:$8 sps:$4 sm:$0xff]   ;;  %v16831_v40 = vld [vmem:[%s22837_s7 + $0x3e4] ss:$8 sps:$4 sm:$0xff]  }
 0xe0b   :  { %8790 = vmatprep.subr.bf16.mxu1 %v16825_v41  ;;  %v15770_v7 = vpop.f32.mrb[71].mxu0  ;;  %v16829_v41 = vld [vmem:[%s22837_s7 + $0x3e0] ss:$8 sps:$4 sm:$0xff]  }
 0xe0c   :  { %v16834_v7 = vld [vmem:[%s22837_s7 + $0x3f4] ss:$8 sps:$4 sm:$0xff]  }
 0xe0e   :  { %8791 = vmatpush1.bf16.msra.mxu1 %v16823_v5  ;;  %v16832_v5 = vld [vmem:[%s22837_s7 + $0x3f0] ss:$8 sps:$4 sm:$0xff]  }
 0xe0f   :  { %8792 = vmatprep.subr.bf16.mxu1 %v16828_v58  ;;  %v16837_v58 = vld [vmem:[%s22837_s7 + $0x404] ss:$8 sps:$4 sm:$0xff]  }
 0xe12   :  { %8793 = vmatpush1.bf16.msra.mxu1 %v16826_v39 }
 0xe13   :  { %8794 = vmatprep.subr.bf16.mxu1 %v16831_v40  ;;  %v16835_v40 = vld [vmem:[%s22837_s7 + $0x400] ss:$8 sps:$4 sm:$0xff]  }
 0xe16   :  { %8795 = vmatpush1.bf16.msra.mxu1 %v16829_v41  ;;  %v16840_v41 = vld [vmem:[%s22837_s7 + $0x414] ss:$8 sps:$4 sm:$0xff]  }
 0xe17   :  { %8796 = vmatprep.subr.bf16.mxu1 %v16834_v7  ;;  %v23054_v7 = vpack.c.bf16 %v20986_v38, %v20980_v31  ;;  %v16844_v31 = vld [vmem:[%s22837_s7 + $0x430] ss:$8 sps:$4 sm:$0xff]   ;;  %v16864_v38 = vld [vmem:[%s22837_s7 + $0x494] ss:$8 sps:$4 sm:$0xff]  }
 0xe18   :  { %v10481_v39 = vpop.f32.mrb[72].mxu0 }
 0xe19   :  { %v15781_v33 = vpop.f32.mrb[73].mxu0 }
 0xe1a   :  { %8797 = vmatpush1.bf16.msra.mxu1 %v16832_v5  ;;  %v10484_v30 = vpop.f32.mrb[74].mxu0  ;;  %v16838_v33 = vld [vmem:[%s22837_s7 + $0x410] ss:$8 sps:$4 sm:$0xff]   ;;  %v16871_v5 = vld [vmem:[%s22837_s7 + $0x4c0] ss:$8 sps:$4 sm:$0xff]  }
 0xe1b   :  { %v10488_v20 = vpack.c.bf16 %v10484_v30, %v10481_v39  ;;  %8979 = vmatprep.subr.bf16.mxu1 %v16837_v58  ;;  %v15782_v35 = vpop.f32.mrb[75].mxu0  ;;  %v16843_v30 = vld [vmem:[%s22837_s7 + $0x424] ss:$8 sps:$4 sm:$0xff]   ;;  %v16876_v58 = vld [vmem:[%s22837_s7 + $0x4d4] ss:$8 sps:$4 sm:$0xff]  }
 0xe1c   :  { %v23057_v35 = vpack.c.bf16 %v21276_v11, %v21271_v25  ;;  %v16868_v25 = vld [vmem:[%s22837_s7 + $0x4b0] ss:$8 sps:$4 sm:$0xff]   ;;  %v16873_v11 = vld [vmem:[%s22837_s7 + $0x4c4] ss:$8 sps:$4 sm:$0xff]  }
 0xe1d   :  { %8815 = vmatmul.mubr.bf16.vlgmr.msra.gmra.mrb[84].mxu1 %v23054_v7  ;;  %10522 = vmatmul.mubr.bf16.vlgmr.msra.gmra.mrb[76].mxu0 %v10488_v20  ;;  %v16867_v20 = vld [vmem:[%s22837_s7 + $0x4a4] ss:$8 sps:$4 sm:$0xff]   ;;  %v17233_v39 = vld [vmem:[%s22834_s6 + $0x10] sm:$0xff]  }
 0xe1e   :  { %8980 = vmatpush1.bf16.msra.mxu1 %v16835_v40  ;;  %10533 = vmatpush1.bf16.msra.mxu0 %v20744_v16  ;;  %v16841_v16 = vld [vmem:[%s22837_s7 + $0x420] ss:$8 sps:$4 sm:$0xff]   ;;  %v16874_v40 = vld [vmem:[%s22837_s7 + $0x4d0] ss:$8 sps:$4 sm:$0xff]   ;;  %v16885_v7 = vld [vmem:[%s22837_s7 + $0x504] ss:$8 sps:$4 sm:$0xff]  }
 0xe1f   :  { %8981 = vmatprep.subr.bf16.mxu1 %v16840_v41  ;;  %10534 = vmatprep.subr.bf16.mxu0 %v20752_v17  ;;  %v16846_v17 = vld [vmem:[%s22837_s7 + $0x434] ss:$8 sps:$4 sm:$0xff]   ;;  %v16879_v41 = vld [vmem:[%s22837_s7 + $0x4e4] ss:$8 sps:$4 sm:$0xff]  }
 0xe20   :  { %9011 = vmatprep.mubr.bf16.mxu1 %v23053_v2  ;;  %10564 = vmatprep.mubr.bf16.mxu0 %v23053_v2 }
 0xe22   :  { %8982 = vmatpush1.bf16.msra.mxu1 %v16838_v33  ;;  %10535 = vmatpush1.bf16.msra.mxu0 %v20761_v22  ;;  %v16849_v22 = vld [vmem:[%s22837_s7 + $0x444] ss:$8 sps:$4 sm:$0xff]   ;;  %v16904_v33 = vld [vmem:[%s22837_s7 + $0x570] ss:$8 sps:$4 sm:$0xff]  }
 0xe23   :  { %8983 = vmatprep.subr.bf16.mxu1 %v16843_v30  ;;  %10536 = vmatprep.subr.bf16.mxu0 %v20768_v1  ;;  %v16847_v1 = vld [vmem:[%s22837_s7 + $0x440] ss:$8 sps:$4 sm:$0xff]   ;;  %v16909_v30 = vld [vmem:[%s22837_s7 + $0x584] ss:$8 sps:$4 sm:$0xff]  }
 0xe26   :  { %8984 = vmatpush1.bf16.msra.mxu1 %v16841_v16  ;;  %10537 = vmatpush1.bf16.msra.mxu0 %v20776_v50  ;;  %v16852_v50 = vld [vmem:[%s22837_s7 + $0x454] ss:$8 sps:$4 sm:$0xff]   ;;  %v16907_v16 = vld [vmem:[%s22837_s7 + $0x580] ss:$8 sps:$4 sm:$0xff]  }
 0xe27   :  { %8985 = vmatprep.subr.bf16.mxu1 %v16846_v17  ;;  %10538 = vmatprep.subr.bf16.mxu0 %v20782_v42  ;;  %v16850_v42 = vld [vmem:[%s22837_s7 + $0x450] ss:$8 sps:$4 sm:$0xff]   ;;  %v16912_v17 = vld [vmem:[%s22837_s7 + $0x594] ss:$8 sps:$4 sm:$0xff]  }
 0xe2a   :  { %8986 = vmatpush1.bf16.msra.mxu1 %v16844_v31  ;;  %10539 = vmatpush1.bf16.msra.mxu0 %v20791_v4  ;;  %v16855_v4 = vld [vmem:[%s22837_s7 + $0x464] ss:$8 sps:$4 sm:$0xff]   ;;  %v23059_v31 = vpack.c.bf16 %v21084_v27, %v21079_v59  ;;  %v16918_v59 = vld [vmem:[%s22837_s7 + $0x5b4] ss:$8 sps:$4 sm:$0xff]   ;;  %v16916_v27 = vld [vmem:[%s22837_s7 + $0x5b0] ss:$8 sps:$4 sm:$0xff]  }
 0xe2b   :  { %8987 = vmatprep.subr.bf16.mxu1 %v16849_v22  ;;  %10540 = vmatprep.subr.bf16.mxu0 %v20798_v48  ;;  %v16853_v48 = vld [vmem:[%s22837_s7 + $0x460] ss:$8 sps:$4 sm:$0xff]   ;;  %v16910_v22 = vld [vmem:[%s22837_s7 + $0x590] ss:$8 sps:$4 sm:$0xff]  }
 0xe2e   :  { %8988 = vmatpush1.bf16.msra.mxu1 %v16847_v1  ;;  %10541 = vmatpush1.bf16.msra.mxu0 %v20808_v54  ;;  %v16858_v54 = vld [vmem:[%s22837_s7 + $0x474] ss:$8 sps:$4 sm:$0xff]   ;;  %v16915_v1 = vld [vmem:[%s22837_s7 + $0x5a4] ss:$8 sps:$4 sm:$0xff]  }
 0xe2f   :  { %8989 = vmatprep.subr.bf16.mxu1 %v16852_v50  ;;  %10542 = vmatprep.subr.bf16.mxu0 %v20817_v53  ;;  %v16856_v53 = vld [vmem:[%s22837_s7 + $0x470] ss:$8 sps:$4 sm:$0xff]   ;;  %v16913_v50 = vld [vmem:[%s22837_s7 + $0x5a0] ss:$8 sps:$4 sm:$0xff]  }
 0xe32   :  { %8990 = vmatpush1.bf16.msra.mxu1 %v16850_v42  ;;  %10543 = vmatpush1.bf16.msra.mxu0 %v20826_v32  ;;  %v16861_v32 = vld [vmem:[%s22837_s7 + $0x484] ss:$8 sps:$4 sm:$0xff]  }
 0xe33   :  { %8991 = vmatprep.subr.bf16.mxu1 %v16855_v4  ;;  %10544 = vmatprep.subr.bf16.mxu0 %v20833_v12  ;;  %v16859_v12 = vld [vmem:[%s22837_s7 + $0x480] ss:$8 sps:$4 sm:$0xff]   ;;  %v16921_v42 = vld [vmem:[%s22837_s7 + $0x5c4] ss:$8 sps:$4 sm:$0xff]  }
 0xe34   :  { %v16919_v4 = vld [vmem:[%s22837_s7 + $0x5c0] ss:$8 sps:$4 sm:$0xff]  }
 0xe36   :  { %8992 = vmatpush1.bf16.msra.mxu1 %v16853_v48  ;;  %10545 = vmatpush1.bf16.msra.mxu0 %v20840_v60  ;;  %v23055_v60 = vmov 0.0   ;;  %v16924_v48 = vld [vmem:[%s22837_s7 + $0x5d4] ss:$8 sps:$4 sm:$0xff]  }
 0xe37   :  { %8993 = vmatprep.subr.bf16.mxu1 %v16858_v54  ;;  %10546 = vmatprep.subr.bf16.mxu0 %v20847_v14  ;;  %v23056_v14 = vpack.c.bf16 %v21020_v18, %v21015_v63  ;;  %v16865_v63 = vld [vmem:[%s22837_s7 + $0x4a0] ss:$8 sps:$4 sm:$0xff]   ;;  %v16870_v18 = vld [vmem:[%s22837_s7 + $0x4b4] ss:$8 sps:$4 sm:$0xff]   ;;  %v21545_v54 = vld [vmem:[%s22837_s7 + $0x5d0] ss:$8 sps:$4 sm:$0xff]  }
 0xe3a   :  { %8994 = vmatpush1.bf16.msra.mxu1 %v16856_v53  ;;  %10547 = vmatpush1.bf16.msra.mxu0 %v20854_v15  ;;  %v16862_v15 = vld [vmem:[%s22837_s7 + $0x490] ss:$8 sps:$4 sm:$0xff]   ;;  %v21550_v53 = vld [vmem:[%s22837_s7 + $0x5e4] ss:$8 sps:$4 sm:$0xff]  }
 0xe3b   :  { %9176 = vmatprep.subr.bf16.mxu1 %v16861_v32  ;;  %15783 = vmatprep.subr.bf16.mxu0 %v23055_v60  ;;  %v21556_v32 = vld [vmem:[%s22837_s7 + $0x5e0] ss:$8 sps:$4 sm:$0xff]  }
 0xe3d   :  { %9012 = vmatmul.mubr.bf16.vlgmr.msra.gmra.mrb[84].mxu1 %v23056_v14  ;;  %10565 = vmatmul.mubr.bf16.vlgmr.msra.gmra.mrb[76].mxu0 %v23057_v35  ;;  %v21572_v14 = vld [vmem:[%s22837_s7 + $0x604] ss:$8 sps:$4 sm:$0xff]   ;;  %v21577_v35 = vld [vmem:[%s22837_s7 + $0x600] ss:$8 sps:$4 sm:$0xff]  }
 0xe3e   :  { %9177 = vmatpush1.bf16.msra.mxu1 %v16859_v12  ;;  %15784 = vmatpush3.bf16.msra.mxu0 %v20384_v52  ;;  %v21562_v12 = vld [vmem:[%s22837_s7 + $0x5f4] ss:$8 sps:$4 sm:$0xff]  }
 0xe3f   :  { %9178 = vmatprep.subr.bf16.mxu1 %v16864_v38  ;;  %15785 = vmatprep.subr.bf16.mxu0 %v23055_v60  ;;  %v16928_v38 = vld [vmem:[%s22837_s7 + $0x5f0] ss:$8 sps:$4 sm:$0xff]  }
 0xe40   :  { %15791 = vmatprep.mubr.msk.bf16.mxu0 %vm17388_vm1, %v23055_v60  ;;  %9208 = vmatprep.mubr.bf16.mxu1 %v23053_v2 }
 0xe42   :  { %9179 = vmatpush1.bf16.msra.mxu1 %v16862_v15  ;;  %15786 = vmatpush3.bf16.msra.mxu0 %v20388_v55  ;;  %v21583_v15 = vld [vmem:[%s22837_s7 + $0x614] ss:$8 sps:$4 sm:$0xff]  }
 0xe43   :  { %9180 = vmatprep.subr.bf16.mxu1 %v16867_v20  ;;  %15787 = vmatprep.subr.bf16.mxu0 %v23055_v60  ;;  %v23060_v20 = vpack.c.bf16 %v21114_v9, %v21109_v43  ;;  %v21605_v9 = vld [vmem:[%s22837_s7 + $0x620] ss:$8 sps:$4 sm:$0xff]   ;;  %v21611_v43 = vld [vmem:[%s22837_s7 + $0x634] ss:$8 sps:$4 sm:$0xff]  }
 0xe46   :  { %9181 = vmatpush1.bf16.msra.mxu1 %v16865_v63  ;;  %15788 = vmatpush3.bf16.msra.mxu0 %v20354_v10  ;;  %v21592_v63 = vld [vmem:[%s22837_s7 + $0x610] ss:$8 sps:$4 sm:$0xff]  }
 0xe47   :  { %9182 = vmatprep.subr.bf16.mxu1 %v16870_v18  ;;  %15789 = vmatprep.subr.bf16.mxu0 %v23055_v60  ;;  %v21599_v18 = vld [vmem:[%s22837_s7 + $0x624] ss:$8 sps:$4 sm:$0xff]  }
 0xe4a   :  { %9183 = vmatpush1.bf16.msra.mxu1 %v16868_v25  ;;  %15790 = vmatpush3.bf16.msra.mxu0 %v20404_v46  ;;  %v21617_v25 = vld [vmem:[%s22837_s7 + $0x630] ss:$8 sps:$4 sm:$0xff]  }
 0xe4b   :  { %9184 = vmatprep.subr.bf16.mxu1 %v16873_v11  ;;  %10617 = vmatprep.subr.bf16.mxu0 %v20861_v29  ;;  %v16877_v29 = vld [vmem:[%s22837_s7 + $0x4e0] ss:$8 sps:$4 sm:$0xff]   ;;  %v21623_v11 = vld [vmem:[%s22837_s7 + $0x644] ss:$8 sps:$4 sm:$0xff]  }
 0xe4d   :  { %15792 = vmatmul.mubr.msk.bf16.vlgmr.msra.gmra.mrb[80].mxu0 %vm1148_vm0, %v17233_v39  ;;  %v21641_v39 = vld [vmem:[%s22837_s7 + $0x650] ss:$8 sps:$4 sm:$0xff]  }
 0xe4e   :  { %9185 = vmatpush1.bf16.msra.mxu1 %v16871_v5  ;;  %10618 = vmatpush1.bf16.msra.mxu0 %v20870_v6  ;;  %v16882_v6 = vld [vmem:[%s22837_s7 + $0x4f4] ss:$8 sps:$4 sm:$0xff]   ;;  %v21629_v5 = vld [vmem:[%s22837_s7 + $0x640] ss:$8 sps:$4 sm:$0xff]  }
 0xe4f   :  { %9186 = vmatprep.subr.bf16.mxu1 %v16876_v58  ;;  %10619 = vmatprep.subr.bf16.mxu0 %v20879_v8  ;;  %v16880_v8 = vld [vmem:[%s22837_s7 + $0x4f0] ss:$8 sps:$4 sm:$0xff]   ;;  %v21635_v58 = vld [vmem:[%s22837_s7 + $0x654] ss:$8 sps:$4 sm:$0xff]  }
 0xe50   :  { %10649 = vmatprep.mubr.bf16.mxu0 %v23053_v2 }
 0xe52   :  { %9187 = vmatpush1.bf16.msra.mxu1 %v16874_v40  ;;  %10620 = vmatpush1.bf16.msra.mxu0 %v20891_v61  ;;  %v16883_v61 = vld [vmem:[%s22837_s7 + $0x500] ss:$8 sps:$4 sm:$0xff]   ;;  %v21647_v40 = vld [vmem:[%s22837_s7 + $0x664] ss:$8 sps:$4 sm:$0xff]  }
 0xe53   :  { %9188 = vmatprep.subr.bf16.mxu1 %v16879_v41  ;;  %10621 = vmatprep.subr.bf16.mxu0 %v20898_v23  ;;  %v16888_v23 = vld [vmem:[%s22837_s7 + $0x514] ss:$8 sps:$4 sm:$0xff]   ;;  %v21653_v41 = vld [vmem:[%s22837_s7 + $0x660] ss:$8 sps:$4 sm:$0xff]  }
 0xe56   :  { %9189 = vmatpush1.bf16.msra.mxu1 %v16877_v29  ;;  %10622 = vmatpush1.bf16.msra.mxu0 %v20906_v26  ;;  %v23058_v26 = vpack.c.bf16 %v21050_v0, %v21045_v3  ;;  %v16894_v0 = vld [vmem:[%s22837_s7 + $0x534] ss:$8 sps:$4 sm:$0xff]   ;;  %v16901_v3 = vld [vmem:[%s22837_s7 + $0x560] ss:$8 sps:$4 sm:$0xff]  }
 0xe57   :  { %9190 = vmatprep.subr.bf16.mxu1 %v16882_v6  ;;  %10623 = vmatprep.subr.bf16.mxu0 %v20912_v44  ;;  %v16886_v44 = vld [vmem:[%s22837_s7 + $0x510] ss:$8 sps:$4 sm:$0xff]   ;;  %v21659_v29 = vld [vmem:[%s22837_s7 + $0x674] ss:$8 sps:$4 sm:$0xff]  }
 0xe58   :  { %v21665_v6 = vld [vmem:[%s22837_s7 + $0x670] ss:$8 sps:$4 sm:$0xff]  }
 0xe5a   :  { %9191 = vmatpush1.bf16.msra.mxu1 %v16880_v8  ;;  %10624 = vmatpush1.bf16.msra.mxu0 %v20920_v47  ;;  %v16891_v47 = vld [vmem:[%s22837_s7 + $0x524] ss:$8 sps:$4 sm:$0xff]  }
 0xe5b   :  { %9373 = vmatprep.subr.bf16.mxu1 %v16885_v7  ;;  %10625 = vmatprep.subr.bf16.mxu0 %v20926_v37  ;;  %v16889_v37 = vld [vmem:[%s22837_s7 + $0x520] ss:$8 sps:$4 sm:$0xff]   ;;  %v21671_v8 = vld [vmem:[%s22837_s7 + $0x684] ss:$8 sps:$4 sm:$0xff]  }
 0xe5c   :  { %v21677_v7 = vld [vmem:[%s22837_s7 + $0x680] ss:$8 sps:$4 sm:$0xff]  }
 0xe5d   :  { %9209 = vmatmul.mubr.bf16.vlgmr.msra.gmra.mrb[84].mxu1 %v23058_v26  ;;  %v21692_v26 = vld [vmem:[%s22837_s7 + $0x690] ss:$8 sps:$4 sm:$0xff]  }
 0xe5e   :  { %9374 = vmatpush1.bf16.msra.mxu1 %v16883_v61  ;;  %9405 = vmatprep.mubr.bf16.mxu1 %v23053_v2  ;;  %v21683_v61 = vld [vmem:[%s22837_s7 + $0x694] ss:$8 sps:$4 sm:$0xff]  }
 0xe5f   :  { %9375 = vmatprep.subr.bf16.mxu1 %v16888_v23  ;;  %10626 = vmatpush1.bf16.msra.mxu0 %v20934_v28  ;;  %v16892_v28 = vld [vmem:[%s22837_s7 + $0x530] ss:$8 sps:$4 sm:$0xff]   ;;  %v23061_v23 = vpack.c.bf16 %v21148_v62, %v21143_v56  ;;  %v21705_v56 = vld [vmem:[%s22837_s7 + $0x6a0] ss:$8 sps:$4 sm:$0xff]   ;;  %v21711_v62 = vld [vmem:[%s22837_s7 + $0x6b4] ss:$8 sps:$4 sm:$0xff]  }
 0xe60   :  { %10627 = vmatprep.subr.bf16.mxu0 %v20942_v45  ;;  %v16897_v45 = vld [vmem:[%s22837_s7 + $0x544] ss:$8 sps:$4 sm:$0xff]  }
 0xe62   :  { %9376 = vmatpush1.bf16.msra.mxu1 %v16886_v44  ;;  %v21699_v44 = vld [vmem:[%s22837_s7 + $0x6a4] ss:$8 sps:$4 sm:$0xff]  }
 0xe63   :  { %9377 = vmatprep.subr.bf16.mxu1 %v16891_v47  ;;  %10628 = vmatpush1.bf16.msra.mxu0 %v20950_v19  ;;  %v16895_v19 = vld [vmem:[%s22837_s7 + $0x540] ss:$8 sps:$4 sm:$0xff]   ;;  %v21717_v47 = vld [vmem:[%s22837_s7 + $0x6b0] ss:$8 sps:$4 sm:$0xff]  }
 0xe64   :  { %10629 = vmatprep.subr.bf16.mxu0 %v20956_v21  ;;  %v16900_v21 = vld [vmem:[%s22837_s7 + $0x554] ss:$8 sps:$4 sm:$0xff]  }
 0xe66   :  { %9378 = vmatpush1.bf16.msra.mxu1 %v16889_v37  ;;  %v21723_v37 = vld [vmem:[%s22837_s7 + $0x6c4] ss:$8 sps:$4 sm:$0xff]  }
 0xe67   :  { %9379 = vmatprep.subr.bf16.mxu1 %v16894_v0  ;;  %10630 = vmatpush1.bf16.msra.mxu0 %v20962_v36  ;;  %v16898_v36 = vld [vmem:[%s22837_s7 + $0x550] ss:$8 sps:$4 sm:$0xff]   ;;  %v21729_v0 = vld [vmem:[%s22837_s7 + $0x6c0] ss:$8 sps:$4 sm:$0xff]  }
 0xe68   :  { %10631 = vmatprep.subr.bf16.mxu0 %v20968_v13  ;;  %v16903_v13 = vld [vmem:[%s22837_s7 + $0x564] ss:$8 sps:$4 sm:$0xff]  }
 0xe6a   :  { %9380 = vmatpush1.bf16.msra.mxu1 %v16892_v28  ;;  %v21735_v28 = vld [vmem:[%s22837_s7 + $0x6d4] ss:$8 sps:$4 sm:$0xff]  }
 0xe6b   :  { %9381 = vmatprep.subr.bf16.mxu1 %v16897_v45  ;;  %10632 = vmatpush1.bf16.msra.mxu0 %v20974_v24  ;;  %v16906_v24 = vld [vmem:[%s22837_s7 + $0x574] ss:$8 sps:$4 sm:$0xff]   ;;  %v21741_v45 = vld [vmem:[%s22837_s7 + $0x6d0] ss:$8 sps:$4 sm:$0xff]  }
 0xe6c   :  { %15795 = vmatprep.subr.bf16.mxu0 %v23055_v60 }
 0xe6e   :  { %9382 = vmatpush1.bf16.msra.mxu1 %v16895_v19  ;;  %v21747_v19 = vld [vmem:[%s22837_s7 + $0x6e4] ss:$8 sps:$4 sm:$0xff]  }
 0xe6f   :  { %9383 = vmatprep.subr.bf16.mxu1 %v16900_v21  ;;  %v21753_v21 = vld [vmem:[%s22837_s7 + $0x6e0] ss:$8 sps:$4 sm:$0xff]  }
 0xe72   :  { %9384 = vmatpush1.bf16.msra.mxu1 %v16898_v36  ;;  %v21759_v36 = vld [vmem:[%s22837_s7 + $0x6f4] ss:$8 sps:$4 sm:$0xff]  }
 0xe73   :  { %9385 = vmatprep.subr.bf16.mxu1 %v16903_v13  ;;  %v21765_v13 = vld [vmem:[%s22837_s7 + $0x6f0] ss:$8 sps:$4 sm:$0xff]  }
 0xe76   :  { %9386 = vmatpush1.bf16.msra.mxu1 %v16901_v3  ;;  %v21771_v3 = vld [vmem:[%s22837_s7 + $0x704] ss:$8 sps:$4 sm:$0xff]  }
 0xe77   :  { %9387 = vmatprep.subr.bf16.mxu1 %v16906_v24  ;;  %v21777_v24 = vld [vmem:[%s22837_s7 + $0x700] ss:$8 sps:$4 sm:$0xff]  }
 0xe7a   :  { %9388 = vmatpush1.bf16.msra.mxu1 %v16904_v33  ;;  %v21783_v33 = vld [vmem:[%s22837_s7 + $0x714] ss:$8 sps:$4 sm:$0xff]  }
 0xe7b   :  { %9570 = vmatprep.subr.bf16.mxu1 %v16909_v30  ;;  %v23062_v30 = vpack.c.bf16 %v21178_v57, %v21173_v51  ;;  %v21805_v57 = vld [vmem:[%s22837_s7 + $0x720] ss:$8 sps:$4 sm:$0xff]   ;;  %v21811_v51 = vld [vmem:[%s22837_s7 + $0x734] ss:$8 sps:$4 sm:$0xff]  }
 0xe7d   :  { %9406 = vmatmul.mubr.bf16.vlgmr.msra.gmra.mrb[84].mxu1 %v23059_v31  ;;  %v21817_v31 = vld [vmem:[%s22837_s7 + $0x730] ss:$8 sps:$4 sm:$0xff]  }
 0xe7e   :  { %9571 = vmatpush1.bf16.msra.mxu1 %v16907_v16  ;;  %9602 = vmatprep.mubr.bf16.mxu1 %v23053_v2  ;;  %v21792_v16 = vld [vmem:[%s22837_s7 + $0x710] ss:$8 sps:$4 sm:$0xff]  }
 0xe7f   :  { %9572 = vmatprep.subr.bf16.mxu1 %v16912_v17  ;;  %v21799_v17 = vld [vmem:[%s22837_s7 + $0x724] ss:$8 sps:$4 sm:$0xff]  }
 0xe82   :  { %9573 = vmatpush1.bf16.msra.mxu1 %v16910_v22  ;;  %v21823_v22 = vld [vmem:[%s22837_s7 + $0x744] ss:$8 sps:$4 sm:$0xff]  }
 0xe83   :  { %9574 = vmatprep.subr.bf16.mxu1 %v16915_v1  ;;  %23063 = vst [vmem:[#allocation10_spill] sm:$0xff] %v21823_v22  ;;  %v21829_v1 = vld [vmem:[%s22837_s7 + $0x740] ss:$8 sps:$4 sm:$0xff]  }
 0xe84   :  { %23064 = vst [vmem:[#allocation17_spill] sm:$0xff] %v21829_v1 }
 0xe86   :  { %9575 = vmatpush1.bf16.msra.mxu1 %v16913_v50  ;;  %v21835_v50 = vld [vmem:[%s22837_s7 + $0x754] ss:$8 sps:$4 sm:$0xff]  }
 0xe87   :  { %9576 = vmatprep.subr.bf16.mxu1 %v16918_v59  ;;  %23065 = vst [vmem:[#allocation9_spill] sm:$0xff] %v21835_v50  ;;  %v21841_v59 = vld [vmem:[%s22837_s7 + $0x750] ss:$8 sps:$4 sm:$0xff]  }
 0xe88   :  { %23066 = vst [vmem:[#allocation5_spill] sm:$0xff] %v21841_v59 }
 0xe8a   :  { %9577 = vmatpush1.bf16.msra.mxu1 %v16916_v27  ;;  %v21847_v27 = vld [vmem:[%s22837_s7 + $0x764] ss:$8 sps:$4 sm:$0xff]  }
 0xe8b   :  { %9578 = vmatprep.subr.bf16.mxu1 %v16921_v42  ;;  %23067 = vst [vmem:[#allocation16_spill] sm:$0xff] %v21847_v27  ;;  %v21853_v42 = vld [vmem:[%s22837_s7 + $0x760] ss:$8 sps:$4 sm:$0xff]  }
 0xe8c   :  { %23068 = vst [vmem:[#allocation12_spill] sm:$0xff] %v21853_v42 }
 0xe8e   :  { %9579 = vmatpush1.bf16.msra.mxu1 %v16919_v4  ;;  %v21859_v4 = vld [vmem:[%s22837_s7 + $0x774] ss:$8 sps:$4 sm:$0xff]  }
 0xe8f   :  { %9580 = vmatprep.subr.bf16.mxu1 %v16924_v48  ;;  %23069 = vst [vmem:[#allocation11_spill] sm:$0xff] %v21859_v4  ;;  %v21865_v48 = vld [vmem:[%s22837_s7 + $0x770] ss:$8 sps:$4 sm:$0xff]  }
 0xe90   :  { %23070 = vst [vmem:[#allocation2_spill] sm:$0xff] %v21865_v48 }
 0xe92   :  { %9581 = vmatpush1.bf16.msra.mxu1 %v21545_v54 }
 0xe93   :  { %9582 = vmatprep.subr.bf16.mxu1 %v21550_v53 }
 0xe96   :  { %9583 = vmatpush1.bf16.msra.mxu1 %v21556_v32 }
 0xe97   :  { %9584 = vmatprep.subr.bf16.mxu1 %v21562_v12 }
 0xe9a   :  { %9585 = vmatpush1.bf16.msra.mxu1 %v16928_v38  ;;  %v21871_v38 = vld [vmem:[%s22837_s7 + $0x784] ss:$8 sps:$4 sm:$0xff]  }
 0xe9b   :  { %9767 = vmatprep.subr.bf16.mxu1 %v21572_v14  ;;  %23071 = vst [vmem:[#allocation4_spill] sm:$0xff] %v21871_v38 }
 0xe9d   :  { %9603 = vmatmul.mubr.bf16.vlgmr.msra.gmra.mrb[84].mxu1 %v23060_v20  ;;  %v21877_v20 = vld [vmem:[%s22837_s7 + $0x780] ss:$8 sps:$4 sm:$0xff]  }
 0xe9e   :  { %9768 = vmatpush1.bf16.msra.mxu1 %v21577_v35  ;;  %9799 = vmatprep.mubr.bf16.mxu1 %v23053_v2  ;;  %23072 = vst [vmem:[#allocation14_spill] sm:$0xff] %v21877_v20 }
 0xe9f   :  { %9769 = vmatprep.subr.bf16.mxu1 %v21583_v15 }
 0xea2   :  { %9770 = vmatpush1.bf16.msra.mxu1 %v21592_v63 }
 0xea3   :  { %9771 = vmatprep.subr.bf16.mxu1 %v21599_v18 }
 0xea6   :  { %9772 = vmatpush1.bf16.msra.mxu1 %v21605_v9 }
 0xea7   :  { %9773 = vmatprep.subr.bf16.mxu1 %v21611_v43 }
 0xeaa   :  { %9774 = vmatpush1.bf16.msra.mxu1 %v21617_v25 }
 0xeab   :  { %9775 = vmatprep.subr.bf16.mxu1 %v21623_v11 }
 0xeae   :  { %9776 = vmatpush1.bf16.msra.mxu1 %v21629_v5 }
 0xeaf   :  { %9777 = vmatprep.subr.bf16.mxu1 %v21635_v58 }
 0xeb2   :  { %9778 = vmatpush1.bf16.msra.mxu1 %v21641_v39 }
 0xeb3   :  { %9779 = vmatprep.subr.bf16.mxu1 %v21647_v40 }
 0xeb6   :  { %9780 = vmatpush1.bf16.msra.mxu1 %v21653_v41 }
 0xeb7   :  { %9781 = vmatprep.subr.bf16.mxu1 %v21659_v29 }
 0xeba   :  { %9782 = vmatpush1.bf16.msra.mxu1 %v21665_v6 }
 0xebb   :  { %9964 = vmatprep.subr.bf16.mxu1 %v21671_v8 }
 0xebd   :  { %9800 = vmatmul.mubr.bf16.vlgmr.msra.gmra.mrb[84].mxu1 %v23061_v23  ;;  %v21883_v23 = vld [vmem:[%s22837_s7 + $0x794] ss:$8 sps:$4 sm:$0xff]  }
 0xebe   :  { %9965 = vmatpush1.bf16.msra.mxu1 %v21677_v7  ;;  %9996 = vmatprep.mubr.bf16.mxu1 %v23053_v2  ;;  %23073 = vst [vmem:[#allocation13_spill] sm:$0xff] %v21883_v23 }
 0xebf   :  { %9966 = vmatprep.subr.bf16.mxu1 %v21683_v61 }
 0xec2   :  { %9967 = vmatpush1.bf16.msra.mxu1 %v21692_v26 }
 0xec3   :  { %9968 = vmatprep.subr.bf16.mxu1 %v21699_v44 }
 0xec6   :  { %9969 = vmatpush1.bf16.msra.mxu1 %v21705_v56 }
 0xec7   :  { %9970 = vmatprep.subr.bf16.mxu1 %v21711_v62 }
 0xeca   :  { %9971 = vmatpush1.bf16.msra.mxu1 %v21717_v47 }
 0xecb   :  { %9972 = vmatprep.subr.bf16.mxu1 %v21723_v37 }
 0xece   :  { %9973 = vmatpush1.bf16.msra.mxu1 %v21729_v0 }
 0xecf   :  { %9974 = vmatprep.subr.bf16.mxu1 %v21735_v28 }
 0xed2   :  { %9975 = vmatpush1.bf16.msra.mxu1 %v21741_v45 }
 0xed3   :  { %9976 = vmatprep.subr.bf16.mxu1 %v21747_v19 }
 0xed6   :  { %9977 = vmatpush1.bf16.msra.mxu1 %v21753_v21 }
 0xed7   :  { %9978 = vmatprep.subr.bf16.mxu1 %v21759_v36 }
 0xeda   :  { %9979 = vmatpush1.bf16.msra.mxu1 %v21765_v13 }
 0xedb   :  { %10161 = vmatprep.subr.bf16.mxu1 %v21771_v3 }
 0xedd   :  { %9997 = vmatmul.mubr.bf16.vlgmr.msra.gmra.mrb[84].mxu1 %v23062_v30  ;;  %v23074_v30 = vpack.c.bf16 %v21212_v49, %v21207_v34  ;;  %v21905_v34 = vld [vmem:[%s22837_s7 + $0x7a0] ss:$8 sps:$4 sm:$0xff]   ;;  %v21911_v49 = vld [vmem:[%s22837_s7 + $0x7b4] ss:$8 sps:$4 sm:$0xff]  }
 0xede   :  { %10162 = vmatpush1.bf16.msra.mxu1 %v21777_v24  ;;  %10193 = vmatprep.mubr.bf16.mxu1 %v23053_v2  ;;  %23077 = vst [vmem:[#allocation19_spill] sm:$0xff] %v21905_v34  ;;  %23078 = vst [vmem:[#allocation20_spill] sm:$0xff] %v21911_v49 }
 0xedf   :  { %10163 = vmatprep.subr.bf16.mxu1 %v21783_v33 }
 0xee2   :  { %10164 = vmatpush1.bf16.msra.mxu1 %v21792_v16 }
 0xee3   :  { %10165 = vmatprep.subr.bf16.mxu1 %v21799_v17 }
 0xee6   :  { %10166 = vmatpush1.bf16.msra.mxu1 %v21805_v57 }
 0xee7   :  { %10167 = vmatprep.subr.bf16.mxu1 %v21811_v51 }
 0xeea   :  { %10168 = vmatpush1.bf16.msra.mxu1 %v21817_v31 }
 0xeeb   :  { %10169 = vmatprep.subr.bf16.mxu1 %v21823_v22 }
 0xeee   :  { %10170 = vmatpush1.bf16.msra.mxu1 %v21829_v1 }
 0xeef   :  { %10171 = vmatprep.subr.bf16.mxu1 %v21835_v50 }
 0xef2   :  { %10172 = vmatpush1.bf16.msra.mxu1 %v21841_v59 }
 0xef3   :  { %10173 = vmatprep.subr.bf16.mxu1 %v21847_v27 }
 0xef6   :  { %10174 = vmatpush1.bf16.msra.mxu1 %v21853_v42 }
 0xef7   :  { %10175 = vmatprep.subr.bf16.mxu1 %v21859_v4 }
 0xefa   :  { %10176 = vmatpush1.bf16.msra.mxu1 %v21865_v48  ;;  %v21892_v48 = vld [vmem:[%s22837_s7 + $0x790] ss:$8 sps:$4 sm:$0xff]  }
 0xefb   :  { %10358 = vmatprep.subr.bf16.mxu1 %v21871_v38  ;;  %23075 = vst [vmem:[#allocation3_spill] sm:$0xff] %v21892_v48  ;;  %v21899_v38 = vld [vmem:[%s22837_s7 + $0x7a4] ss:$8 sps:$4 sm:$0xff]  }
 0xefc   :  { %23076 = vst [vmem:[#allocation6_spill] sm:$0xff] %v21899_v38 }
 0xefd   :  { %10194 = vmatmul.mubr.bf16.vlgmr.msra.gmra.mrb[84].mxu1 %v23074_v30  ;;  %v21917_v30 = vld [vmem:[%s22837_s7 + $0x7b0] ss:$8 sps:$4 sm:$0xff]  }
 0xefe   :  { %10359 = vmatpush1.bf16.msra.mxu1 %v21877_v20  ;;  %10390 = vmatprep.mubr.bf16.mxu1 %v23053_v2  ;;  %23079 = vst [vmem:[#allocation21_spill] sm:$0xff] %v21917_v30 }
 0xeff   :  { %10360 = vmatprep.subr.bf16.mxu1 %v21883_v23 }
 0xf02   :  { %10361 = vmatpush1.bf16.msra.mxu1 %v21892_v48  ;;  %v21923_v48 = vld [vmem:[%s22837_s7 + $0x7c4] ss:$8 sps:$4 sm:$0xff]  }
 0xf03   :  { %10362 = vmatprep.subr.bf16.mxu1 %v21899_v38  ;;  %23080 = vst [vmem:[#allocation22_spill] sm:$0xff] %v21923_v48  ;;  %v21929_v38 = vld [vmem:[%s22837_s7 + $0x7c0] ss:$8 sps:$4 sm:$0xff]  }
 0xf04   :  { %23081 = vst [vmem:[#allocation23_spill] sm:$0xff] %v21929_v38 }
 0xf06   :  { %10363 = vmatpush1.bf16.msra.mxu1 %v21905_v34  ;;  %v21935_v34 = vld [vmem:[%s22837_s7 + $0x7d4] ss:$8 sps:$4 sm:$0xff]  }
 0xf07   :  { %10364 = vmatprep.subr.bf16.mxu1 %v21911_v49  ;;  %23082 = vst [vmem:[#allocation24_spill] sm:$0xff] %v21935_v34  ;;  %v21941_v49 = vld [vmem:[%s22837_s7 + $0x7d0] ss:$8 sps:$4 sm:$0xff]  }
 0xf08   :  { %23083 = vst [vmem:[#allocation25_spill] sm:$0xff] %v21941_v49 }
 0xf0a   :  { %10365 = vmatpush1.bf16.msra.mxu1 %v21917_v30  ;;  %v21947_v30 = vld [vmem:[%s22837_s7 + $0x7e4] ss:$8 sps:$4 sm:$0xff]  }
 0xf0b   :  { %10366 = vmatprep.subr.bf16.mxu1 %v21923_v48  ;;  %23084 = vst [vmem:[#allocation26_spill] sm:$0xff] %v21947_v30  ;;  %v21953_v48 = vld [vmem:[%s22837_s7 + $0x7e0] ss:$8 sps:$4 sm:$0xff]  }
 0xf0c   :  { %23085 = vst [vmem:[#allocation27_spill] sm:$0xff] %v21953_v48 }
 0xf0e   :  { %10367 = vmatpush1.bf16.msra.mxu1 %v21929_v38  ;;  %v21959_v38 = vld [vmem:[%s22837_s7 + $0x7f4] ss:$8 sps:$4 sm:$0xff]  }
 0xf0f   :  { %10368 = vmatprep.subr.bf16.mxu1 %v21935_v34  ;;  %23086 = vst [vmem:[#allocation28_spill] sm:$0xff] %v21959_v38  ;;  %v21965_v34 = vld [vmem:[%s22837_s7 + $0x7f0] ss:$8 sps:$4 sm:$0xff]  }
 0xf10   :  { %23087 = vst [vmem:[#allocation29_spill] sm:$0xff] %v21965_v34 }
 0xf12   :  { %10369 = vmatpush1.bf16.msra.mxu1 %v21941_v49  ;;  %v23088_v49 = vld [vmem:[#allocation18_spill] sm:$0xff] }
 0xf13   :  { %10370 = vmatprep.subr.bf16.mxu1 %v21947_v30  ;;  %v23089_v30 = vld [vmem:[#allocation7_spill] sm:$0xff] }
 0xf14   :  { %v23090_v23 = vpack.c.bf16 %v23088_v49, %v23089_v30  ;;  %v17240_v49 = vld [vmem:[%s22837_s7 + $0x1a4] ss:$8 sps:$4 sm:$0xff]   ;;  %v17241_v30 = vld [vmem:[%s22834_s6 + $0x38] sm:$0xff]  }
 0xf16   :  { %10371 = vmatpush1.bf16.msra.mxu1 %v21953_v48 }
 0xf17   :  { %10372 = vmatprep.subr.bf16.mxu1 %v21959_v38 }
 0xf1a   :  { %10373 = vmatpush1.bf16.msra.mxu1 %v21965_v34 }
 0xf1b   :  { %15831 = vmatprep.subr.bf16.mxu1 %v23055_v60 }
 0xf1d   :  { %10391 = vmatmul.mubr.bf16.vlgmr.msra.gmra.mrb[84].mxu1 %v23090_v23  ;;  %v17238_v23 = vld [vmem:[%s22837_s7 + $0x194] ss:$8 sps:$4 sm:$0xff]  }
 0xf1e   :  { %15832 = vmatpush3.bf16.msra.mxu1 %v20384_v52  ;;  %15839 = vmatprep.mubr.msk.bf16.mxu1 %vm17388_vm1, %v23055_v60 }
 0xf1f   :  { %15833 = vmatprep.subr.bf16.mxu1 %v23055_v60 }
 0xf20   :  { %v10609_v48 = vpop.f32.mrb[80].mxu0 }
 0xf21   :  { %v15793_v20 = vpop.f32.mrb[81].mxu0 }
 0xf22   :  { %v10612_v4 = vpop.f32.mrb[82].mxu0  ;;  %15834 = vmatpush3.bf16.msra.mxu1 %v20388_v55  ;;  %v17237_v20 = vld [vmem:[%s22837_s7 + $0x180] ss:$8 sps:$4 sm:$0xff]  }
 0xf23   :  { %v10616_v38 = vpack.c.bf16 %v10612_v4, %v10609_v48  ;;  %15835 = vmatprep.subr.bf16.mxu1 %v23055_v60  ;;  %v15794_v34 = vpop.f32.mrb[83].mxu0  ;;  %v17234_v4 = vld [vmem:[%s22834_s6 + $0x30] sm:$0xff]   ;;  %v17235_v48 = vld [vmem:[%s22837_s7 + $0x184] ss:$8 sps:$4 sm:$0xff]  }
 0xf24   :  { %v17239_v34 = vld [vmem:[%s22837_s7 + $0x190] ss:$8 sps:$4 sm:$0xff]  }
 0xf25   :  { %10650 = vmatmul.mubr.bf16.vlgmr.msra.gmra.mrb[76].mxu0 %v10616_v38  ;;  %v17236_v38 = vld [vmem:[%s22834_s6 + $0x18] sm:$0xff]  }
 0xf26   :  { %15796 = vmatpush3.bf16.msra.mxu0 %v20384_v52  ;;  %15836 = vmatpush3.bf16.msra.mxu1 %v20354_v10 }
 0xf27   :  { %15797 = vmatprep.subr.bf16.mxu0 %v23055_v60  ;;  %15837 = vmatprep.subr.bf16.mxu1 %v23055_v60 }
 0xf28   :  { %15803 = vmatprep.mubr.msk.bf16.mxu0 %vm17388_vm1, %v23055_v60 }
 0xf2a   :  { %15798 = vmatpush3.bf16.msra.mxu0 %v20388_v55  ;;  %15838 = vmatpush3.bf16.msra.mxu1 %v20404_v46 }
 0xf2b   :  { %15799 = vmatprep.subr.bf16.mxu0 %v23055_v60  ;;  %15843 = vmatprep.subr.bf16.mxu1 %v23055_v60 }
 0xf2d   :  { %15840 = vmatmul.mubr.msk.bf16.vlgmr.msra.gmra.mrb[88].mxu1 %vm1148_vm0, %v17234_v4  ;;  %v17242_v4 = vld [vmem:[%s22837_s7 + $0x1a0] ss:$8 sps:$4 sm:$0xff]  }
 0xf2e   :  { %15800 = vmatpush3.bf16.msra.mxu0 %v20354_v10  ;;  %15844 = vmatpush3.bf16.msra.mxu1 %v20384_v52 }
 0xf2f   :  { %15801 = vmatprep.subr.bf16.mxu0 %v23055_v60  ;;  %15845 = vmatprep.subr.bf16.mxu1 %v23055_v60 }
 0xf30   :  { %15851 = vmatprep.mubr.msk.bf16.mxu1 %vm17388_vm1, %v23055_v60 }
 0xf32   :  { %15802 = vmatpush3.bf16.msra.mxu0 %v20404_v46  ;;  %15846 = vmatpush3.bf16.msra.mxu1 %v20388_v55 }
 0xf33   :  { %15847 = vmatprep.subr.bf16.mxu1 %v23055_v60  ;;  %10706 = vmatprep.subr.bf16.mxu0 %v17235_v48  ;;  %v17243_v48 = vld [vmem:[%s22837_s7 + $0x1b4] ss:$8 sps:$4 sm:$0xff]  }
 0xf35   :  { %15804 = vmatmul.mubr.msk.bf16.vlgmr.msra.gmra.mrb[84].mxu0 %vm1148_vm0, %v17236_v38  ;;  %v17244_v38 = vld [vmem:[%s22837_s7 + $0x1b0] ss:$8 sps:$4 sm:$0xff]  }
 0xf36   :  { %15848 = vmatpush3.bf16.msra.mxu1 %v20354_v10  ;;  %10707 = vmatpush1.bf16.msra.mxu0 %v17237_v20  ;;  %v17245_v20 = vld [vmem:[%s22837_s7 + $0x1c4] ss:$8 sps:$4 sm:$0xff]  }
 0xf37   :  { %15849 = vmatprep.subr.bf16.mxu1 %v23055_v60  ;;  %10708 = vmatprep.subr.bf16.mxu0 %v17238_v23  ;;  %v17246_v23 = vld [vmem:[%s22837_s7 + $0x1c0] ss:$8 sps:$4 sm:$0xff]  }
 0xf38   :  { %10738 = vmatprep.mubr.bf16.mxu0 %v23053_v2 }
 0xf3a   :  { %15850 = vmatpush3.bf16.msra.mxu1 %v20404_v46  ;;  %10709 = vmatpush1.bf16.msra.mxu0 %v17239_v34  ;;  %v17247_v34 = vld [vmem:[%s22837_s7 + $0x1d4] ss:$8 sps:$4 sm:$0xff]  }
 0xf3b   :  { %15855 = vmatprep.subr.bf16.mxu1 %v23055_v60  ;;  %10710 = vmatprep.subr.bf16.mxu0 %v17240_v49  ;;  %v17248_v49 = vld [vmem:[%s22837_s7 + $0x1d0] ss:$8 sps:$4 sm:$0xff]  }
 0xf3d   :  { %15852 = vmatmul.mubr.msk.bf16.vlgmr.msra.gmra.mrb[92].mxu1 %vm1148_vm0, %v17241_v30  ;;  %v17249_v30 = vld [vmem:[%s22837_s7 + $0x1e4] ss:$8 sps:$4 sm:$0xff]  }
 0xf3e   :  { %15856 = vmatpush3.bf16.msra.mxu1 %v20384_v52  ;;  %15863 = vmatprep.mubr.msk.bf16.mxu1 %vm17388_vm1, %v23055_v60 }
 0xf3f   :  { %15857 = vmatprep.subr.bf16.mxu1 %v23055_v60  ;;  %10711 = vmatpush1.bf16.msra.mxu0 %v17242_v4  ;;  %v17250_v4 = vld [vmem:[%s22834_s6 + $0x40] sm:$0xff]  }
 0xf40   :  { %10712 = vmatprep.subr.bf16.mxu0 %v17243_v48  ;;  %v17251_v48 = vld [vmem:[%s22837_s7 + $0x1e0] ss:$8 sps:$4 sm:$0xff]  }
 0xf42   :  { %15858 = vmatpush3.bf16.msra.mxu1 %v20388_v55 }
 0xf43   :  { %15859 = vmatprep.subr.bf16.mxu1 %v23055_v60  ;;  %10713 = vmatpush1.bf16.msra.mxu0 %v17244_v38  ;;  %v17252_v38 = vld [vmem:[%s22837_s7 + $0x1f4] ss:$8 sps:$4 sm:$0xff]  }
 0xf44   :  { %10714 = vmatprep.subr.bf16.mxu0 %v17245_v20  ;;  %v17253_v20 = vld [vmem:[%s22837_s7 + $0x1f0] ss:$8 sps:$4 sm:$0xff]  }
 0xf46   :  { %15860 = vmatpush3.bf16.msra.mxu1 %v20354_v10 }
 0xf47   :  { %15861 = vmatprep.subr.bf16.mxu1 %v23055_v60  ;;  %10715 = vmatpush1.bf16.msra.mxu0 %v17246_v23  ;;  %v17254_v23 = vld [vmem:[%s22834_s6 + $0x48] sm:$0xff]  }
 0xf48   :  { %10716 = vmatprep.subr.bf16.mxu0 %v17247_v34  ;;  %v17255_v34 = vld [vmem:[%s22834_s6 + $0x50] sm:$0xff]  }
 0xf4a   :  { %15862 = vmatpush3.bf16.msra.mxu1 %v20404_v46 }
 0xf4b   :  { %15867 = vmatprep.subr.bf16.mxu1 %v23055_v60  ;;  %10717 = vmatpush1.bf16.msra.mxu0 %v17248_v49  ;;  %v17256_v49 = vld [vmem:[%s22834_s6 + $0x58] sm:$0xff]  }
 0xf4c   :  { %10718 = vmatprep.subr.bf16.mxu0 %v17249_v30  ;;  %v17257_v30 = vld [vmem:[%s22834_s6 + $0x60] sm:$0xff]  }
 0xf4d   :  { %15864 = vmatmul.mubr.msk.bf16.vlgmr.msra.gmra.mrb[96].mxu1 %vm1148_vm0, %v17250_v4  ;;  %v17258_v4 = vld [vmem:[%s22834_s6 + $0x68] sm:$0xff]  }
 0xf4e   :  { %15868 = vmatpush3.bf16.msra.mxu1 %v20384_v52  ;;  %15875 = vmatprep.mubr.msk.bf16.mxu1 %vm17388_vm1, %v23055_v60 }
 0xf4f   :  { %15869 = vmatprep.subr.bf16.mxu1 %v23055_v60  ;;  %10719 = vmatpush1.bf16.msra.mxu0 %v17251_v48  ;;  %v17259_v48 = vld [vmem:[%s22834_s6 + $0x70] sm:$0xff]  }
 0xf50   :  { %10720 = vmatprep.subr.bf16.mxu0 %v17252_v38  ;;  %v17260_v38 = vld [vmem:[%s22834_s6 + $0x78] sm:$0xff]  }
 0xf52   :  { %15870 = vmatpush3.bf16.msra.mxu1 %v20388_v55 }
 0xf53   :  { %15871 = vmatprep.subr.bf16.mxu1 %v23055_v60  ;;  %10721 = vmatpush1.bf16.msra.mxu0 %v17253_v20 }
 0xf54   :  { %15807 = vmatprep.subr.bf16.mxu0 %v23055_v60 }
 0xf56   :  { %15872 = vmatpush3.bf16.msra.mxu1 %v20354_v10 }
 0xf57   :  { %15873 = vmatprep.subr.bf16.mxu1 %v23055_v60 }
 0xf5a   :  { %15874 = vmatpush3.bf16.msra.mxu1 %v20404_v46 }
 0xf5b   :  { %15879 = vmatprep.subr.bf16.mxu1 %v23055_v60 }
 0xf5d   :  { %15876 = vmatmul.mubr.msk.bf16.vlgmr.msra.gmra.mrb[100].mxu1 %vm1148_vm0, %v17254_v23 }
 0xf5e   :  { %15880 = vmatpush3.bf16.msra.mxu1 %v20384_v52  ;;  %15887 = vmatprep.mubr.msk.bf16.mxu1 %vm17388_vm1, %v23055_v60 }
 0xf5f   :  { %15881 = vmatprep.subr.bf16.mxu1 %v23055_v60 }
 0xf62   :  { %15882 = vmatpush3.bf16.msra.mxu1 %v20388_v55 }
 0xf63   :  { %15883 = vmatprep.subr.bf16.mxu1 %v23055_v60 }
 0xf66   :  { %15884 = vmatpush3.bf16.msra.mxu1 %v20354_v10 }
 0xf67   :  { %15885 = vmatprep.subr.bf16.mxu1 %v23055_v60 }
 0xf6a   :  { %15886 = vmatpush3.bf16.msra.mxu1 %v20404_v46 }
 0xf6b   :  { %15891 = vmatprep.subr.bf16.mxu1 %v23055_v60 }
 0xf6d   :  { %15888 = vmatmul.mubr.msk.bf16.vlgmr.msra.gmra.mrb[104].mxu1 %vm1148_vm0, %v17255_v34 }
 0xf6e   :  { %15892 = vmatpush3.bf16.msra.mxu1 %v20384_v52  ;;  %15899 = vmatprep.mubr.msk.bf16.mxu1 %vm17388_vm1, %v23055_v60 }
 0xf6f   :  { %15893 = vmatprep.subr.bf16.mxu1 %v23055_v60 }
 0xf72   :  { %15894 = vmatpush3.bf16.msra.mxu1 %v20388_v55 }
 0xf73   :  { %15895 = vmatprep.subr.bf16.mxu1 %v23055_v60 }
 0xf76   :  { %15896 = vmatpush3.bf16.msra.mxu1 %v20354_v10 }
 0xf77   :  { %15897 = vmatprep.subr.bf16.mxu1 %v23055_v60 }
 0xf7a   :  { %15898 = vmatpush3.bf16.msra.mxu1 %v20404_v46 }
 0xf7b   :  { %15903 = vmatprep.subr.bf16.mxu1 %v23055_v60 }
 0xf7d   :  { %15900 = vmatmul.mubr.msk.bf16.vlgmr.msra.gmra.mrb[108].mxu1 %vm1148_vm0, %v17256_v49 }
 0xf7e   :  { %15904 = vmatpush3.bf16.msra.mxu1 %v20384_v52  ;;  %15911 = vmatprep.mubr.msk.bf16.mxu1 %vm17388_vm1, %v23055_v60 }
 0xf7f   :  { %15905 = vmatprep.subr.bf16.mxu1 %v23055_v60 }
 0xf82   :  { %15906 = vmatpush3.bf16.msra.mxu1 %v20388_v55 }
 0xf83   :  { %15907 = vmatprep.subr.bf16.mxu1 %v23055_v60 }
 0xf86   :  { %15908 = vmatpush3.bf16.msra.mxu1 %v20354_v10 }
 0xf87   :  { %15909 = vmatprep.subr.bf16.mxu1 %v23055_v60 }
 0xf8a   :  { %15910 = vmatpush3.bf16.msra.mxu1 %v20404_v46 }
 0xf8b   :  { %15915 = vmatprep.subr.bf16.mxu1 %v23055_v60 }
 0xf8d   :  { %15912 = vmatmul.mubr.msk.bf16.vlgmr.msra.gmra.mrb[112].mxu1 %vm1148_vm0, %v17257_v30 }
 0xf8e   :  { %15916 = vmatpush3.bf16.msra.mxu1 %v20384_v52  ;;  %15923 = vmatprep.mubr.msk.bf16.mxu1 %vm17388_vm1, %v23055_v60 }
 0xf8f   :  { %15917 = vmatprep.subr.bf16.mxu1 %v23055_v60 }
 0xf92   :  { %15918 = vmatpush3.bf16.msra.mxu1 %v20388_v55 }
 0xf93   :  { %15919 = vmatprep.subr.bf16.mxu1 %v23055_v60 }
 0xf96   :  { %15920 = vmatpush3.bf16.msra.mxu1 %v20354_v10 }
 0xf97   :  { %15921 = vmatprep.subr.bf16.mxu1 %v23055_v60 }
 0xf9a   :  { %15922 = vmatpush3.bf16.msra.mxu1 %v20404_v46 }
 0xf9b   :  { %15927 = vmatprep.subr.bf16.mxu1 %v23055_v60 }
 0xf9d   :  { %15924 = vmatmul.mubr.msk.bf16.vlgmr.msra.gmra.mrb[116].mxu1 %vm1148_vm0, %v17258_v4 }
 0xf9e   :  { %15928 = vmatpush3.bf16.msra.mxu1 %v20384_v52  ;;  %15935 = vmatprep.mubr.msk.bf16.mxu1 %vm17388_vm1, %v23055_v60 }
 0xf9f   :  { %15929 = vmatprep.subr.bf16.mxu1 %v23055_v60 }
 0xfa2   :  { %15930 = vmatpush3.bf16.msra.mxu1 %v20388_v55 }
 0xfa3   :  { %15931 = vmatprep.subr.bf16.mxu1 %v23055_v60 }
 0xfa6   :  { %15932 = vmatpush3.bf16.msra.mxu1 %v20354_v10 }
 0xfa7   :  { %15933 = vmatprep.subr.bf16.mxu1 %v23055_v60 }
 0xfaa   :  { %15934 = vmatpush3.bf16.msra.mxu1 %v20404_v46 }
 0xfab   :  { %15939 = vmatprep.subr.bf16.mxu1 %v23055_v60 }
 0xfad   :  { %15936 = vmatmul.mubr.msk.bf16.vlgmr.msra.gmra.mrb[120].mxu1 %vm1148_vm0, %v17259_v48 }
 0xfae   :  { %15940 = vmatpush3.bf16.msra.mxu1 %v20384_v52  ;;  %15947 = vmatprep.mubr.msk.bf16.mxu1 %vm17388_vm1, %v23055_v60 }
 0xfaf   :  { %15941 = vmatprep.subr.bf16.mxu1 %v23055_v60 }
 0xfb2   :  { %15942 = vmatpush3.bf16.msra.mxu1 %v20388_v55 }
 0xfb3   :  { %15943 = vmatprep.subr.bf16.mxu1 %v23055_v60 }
 0xfb6   :  { %15944 = vmatpush3.bf16.msra.mxu1 %v20354_v10 }
 0xfb7   :  { %15945 = vmatprep.subr.bf16.mxu1 %v23055_v60 }
 0xfba   :  { %15946 = vmatpush3.bf16.msra.mxu1 %v20404_v46 }
 0xfbd   :  { %15948 = vmatmul.mubr.msk.bf16.vlgmr.msra.gmra.mrb[124].mxu1 %vm1148_vm0, %v17260_v38 }
 0xff0   :  { %v22175_v20 = vpop.f32.mrb[84].mxu1 }
 0xff1   :  { %23091 = vst [vmem:[#allocation18_spill] sm:$0xff] %v22175_v20  ;;  %v22177_v23 = vpop.f32.mrb[85].mxu1  ;;  %v11855_v49 = vmul.f32 %v22175_v20, %v22175_v20 }
 0xff2   :  { %23092 = vst [vmem:[#allocation7_spill] sm:$0xff] %v22177_v23  ;;  %v22179_v34 = vpop.f32.mrb[86].mxu1  ;;  %v11856_v38 = vmul.f32 %v22177_v23, %v22177_v23 }
 0xff3   :  { %23093 = vst [vmem:[#allocation30_spill] sm:$0xff] %v22179_v34  ;;  %v22185_v30 = vadd.f32 %v22179_v34, %v22175_v20  ;;  %v11857_v4 = vmul.f32 %v22179_v34, %v22179_v34  ;;  %v22189_v48 = vpop.f32.mrb[87].mxu1 }
 0xff4   :  { %23095 = vst [vmem:[#allocation32_spill] sm:$0xff] %v22189_v48  ;;  %v22195_v42 = vadd.f32 %v22189_v48, %v22177_v23  ;;  %v11858_v27 = vmul.f32 %v22189_v48, %v22189_v48 }
 0xff5   :  { %23094 = vst [vmem:[#allocation31_spill] sm:$0xff] %v22185_v30  ;;  %v22199_v59 = vadd.f32 %v11857_v4, %v11855_v49  ;;  %v17266_v49 = vld [vmem:[%s22837_s7 + $0x224] ss:$8 sps:$4 sm:$0xff]   ;;  %v17268_v4 = vld [vmem:[%s22837_s7 + $0x234] ss:$8 sps:$4 sm:$0xff]  }
 0xff6   :  { %v22201_v50 = vadd.f32 %v11858_v27, %v11856_v38  ;;  %v17263_v27 = vld [vmem:[%s22837_s7 + $0x200] ss:$8 sps:$4 sm:$0xff]   ;;  %v17269_v38 = vld [vmem:[%s22837_s7 + $0x230] ss:$8 sps:$4 sm:$0xff]  }
 0xff8   :  { %23096 = vst [vmem:[#allocation33_spill] sm:$0xff] %v22201_v50 }
0x1008   :  { %v10698_v20 = vpop.f32.mrb[84].mxu0 }
0x1009   :  { %v15805_v30 = vpop.f32.mrb[85].mxu0 }
0x100a   :  { %v10701_v1 = vpop.f32.mrb[86].mxu0  ;;  %v17267_v30 = vld [vmem:[%s22837_s7 + $0x220] ss:$8 sps:$4 sm:$0xff]  }
0x100b   :  { %v10705_v34 = vpack.c.bf16 %v10701_v1, %v10698_v20  ;;  %v15806_v22 = vpop.f32.mrb[87].mxu0  ;;  %v17262_v1 = vld [vmem:[%s22834_s6 + $0x20] sm:$0xff]   ;;  %v17264_v20 = vld [vmem:[%s22837_s7 + $0x214] ss:$8 sps:$4 sm:$0xff]  }
0x100c   :  { %v17261_v22 = vld [vmem:[%s22837_s7 + $0x204] ss:$8 sps:$4 sm:$0xff]  }
0x100d   :  { %10739 = vmatmul.mubr.bf16.vlgmr.msra.gmra.mrb[76].mxu0 %v10705_v34  ;;  %v17265_v34 = vld [vmem:[%s22837_s7 + $0x210] ss:$8 sps:$4 sm:$0xff]  }
0x100e   :  { %15808 = vmatpush3.bf16.msra.mxu0 %v20384_v52  ;;  %15815 = vmatprep.mubr.msk.bf16.mxu0 %vm17388_vm1, %v23055_v60 }
0x100f   :  { %15809 = vmatprep.subr.bf16.mxu0 %v23055_v60 }
0x1012   :  { %15810 = vmatpush3.bf16.msra.mxu0 %v20388_v55 }
0x1013   :  { %15811 = vmatprep.subr.bf16.mxu0 %v23055_v60 }
0x1016   :  { %15812 = vmatpush3.bf16.msra.mxu0 %v20354_v10 }
0x1017   :  { %15813 = vmatprep.subr.bf16.mxu0 %v23055_v60 }
0x101a   :  { %15814 = vmatpush3.bf16.msra.mxu0 %v20404_v46 }
0x101b   :  { %10795 = vmatprep.subr.bf16.mxu0 %v17261_v22  ;;  %v17270_v22 = vld [vmem:[%s22837_s7 + $0x244] ss:$8 sps:$4 sm:$0xff]  }
0x101d   :  { %15816 = vmatmul.mubr.msk.bf16.vlgmr.msra.gmra.mrb[88].mxu0 %vm1148_vm0, %v17262_v1  ;;  %v17271_v1 = vld [vmem:[%s22837_s7 + $0x240] ss:$8 sps:$4 sm:$0xff]  }
0x101e   :  { %10796 = vmatpush1.bf16.msra.mxu0 %v17263_v27  ;;  %10827 = vmatprep.mubr.bf16.mxu0 %v23053_v2  ;;  %v17272_v27 = vld [vmem:[%s22837_s7 + $0x254] ss:$8 sps:$4 sm:$0xff]  }
0x101f   :  { %10797 = vmatprep.subr.bf16.mxu0 %v17264_v20  ;;  %v17273_v20 = vld [vmem:[%s22837_s7 + $0x250] ss:$8 sps:$4 sm:$0xff]  }
0x1022   :  { %10798 = vmatpush1.bf16.msra.mxu0 %v17265_v34  ;;  %v17274_v34 = vld [vmem:[%s22837_s7 + $0x264] ss:$8 sps:$4 sm:$0xff]  }
0x1023   :  { %10799 = vmatprep.subr.bf16.mxu0 %v17266_v49  ;;  %v17275_v49 = vld [vmem:[%s22837_s7 + $0x260] ss:$8 sps:$4 sm:$0xff]  }
0x1026   :  { %10800 = vmatpush1.bf16.msra.mxu0 %v17267_v30  ;;  %v17276_v30 = vld [vmem:[%s22837_s7 + $0x274] ss:$8 sps:$4 sm:$0xff]  }
0x1027   :  { %10801 = vmatprep.subr.bf16.mxu0 %v17268_v4  ;;  %v17277_v4 = vld [vmem:[%s22837_s7 + $0x270] ss:$8 sps:$4 sm:$0xff]  }
0x102a   :  { %10802 = vmatpush1.bf16.msra.mxu0 %v17269_v38 }
0x102b   :  { %10803 = vmatprep.subr.bf16.mxu0 %v17270_v22 }
0x102e   :  { %10804 = vmatpush1.bf16.msra.mxu0 %v17271_v1 }
0x102f   :  { %10805 = vmatprep.subr.bf16.mxu0 %v17272_v27 }
0x1032   :  { %10806 = vmatpush1.bf16.msra.mxu0 %v17273_v20 }
0x1033   :  { %10807 = vmatprep.subr.bf16.mxu0 %v17274_v34  ;;  %v17278_v34 = vld [vmem:[%s22837_s7 + $0x284] ss:$8 sps:$4 sm:$0xff]  }
0x1036   :  { %10808 = vmatpush1.bf16.msra.mxu0 %v17275_v49  ;;  %v17284_v49 = vld [vmem:[%s22837_s7 + $0x2a0] ss:$8 sps:$4 sm:$0xff]  }
0x1037   :  { %10809 = vmatprep.subr.bf16.mxu0 %v17276_v30  ;;  %v17285_v30 = vld [vmem:[%s22837_s7 + $0x2b4] ss:$8 sps:$4 sm:$0xff]  }
0x103a   :  { %10810 = vmatpush1.bf16.msra.mxu0 %v17277_v4  ;;  %v17286_v4 = vld [vmem:[%s22837_s7 + $0x2b0] ss:$8 sps:$4 sm:$0xff]  }
0x103b   :  { %15819 = vmatprep.subr.bf16.mxu0 %v23055_v60 }
0x10f0   :  { %v10787_v38 = vpop.f32.mrb[88].mxu0 }
0x10f1   :  { %v15817_v22 = vpop.f32.mrb[89].mxu0 }
0x10f2   :  { %v10790_v1 = vpop.f32.mrb[90].mxu0  ;;  %v17288_v22 = vld [vmem:[%s22837_s7 + $0x2c0] ss:$8 sps:$4 sm:$0xff]  }
0x10f3   :  { %v10794_v27 = vpack.c.bf16 %v10790_v1, %v10787_v38  ;;  %v15818_v20 = vpop.f32.mrb[91].mxu0  ;;  %v17287_v38 = vld [vmem:[%s22837_s7 + $0x2c4] ss:$8 sps:$4 sm:$0xff]   ;;  %v17289_v1 = vld [vmem:[%s22837_s7 + $0x2d4] ss:$8 sps:$4 sm:$0xff]  }
0x10f4   :  { %v17291_v20 = vld [vmem:[%s22837_s7 + $0x2e4] ss:$8 sps:$4 sm:$0xff]  }
0x10f5   :  { %10828 = vmatmul.mubr.bf16.vlgmr.msra.gmra.mrb[76].mxu0 %v10794_v27  ;;  %v17290_v27 = vld [vmem:[%s22837_s7 + $0x2d0] ss:$8 sps:$4 sm:$0xff]  }
0x10f6   :  { %15820 = vmatpush3.bf16.msra.mxu0 %v20384_v52  ;;  %15827 = vmatprep.mubr.msk.bf16.mxu0 %vm17388_vm1, %v23055_v60  ;;  %v17279_v52 = vld [vmem:[%s22834_s6 + $0x28] sm:$0xff]  }
0x10f7   :  { %15821 = vmatprep.subr.bf16.mxu0 %v23055_v60 }
0x10fa   :  { %15822 = vmatpush3.bf16.msra.mxu0 %v20388_v55  ;;  %v17280_v55 = vld [vmem:[%s22837_s7 + $0x280] ss:$8 sps:$4 sm:$0xff]  }
0x10fb   :  { %15823 = vmatprep.subr.bf16.mxu0 %v23055_v60 }
0x10fe   :  { %15824 = vmatpush3.bf16.msra.mxu0 %v20354_v10  ;;  %v17281_v10 = vld [vmem:[%s22837_s7 + $0x294] ss:$8 sps:$4 sm:$0xff]  }
0x10ff   :  { %15825 = vmatprep.subr.bf16.mxu0 %v23055_v60  ;;  %v17283_v60 = vld [vmem:[%s22837_s7 + $0x2a4] ss:$8 sps:$4 sm:$0xff]  }
0x1102   :  { %15826 = vmatpush3.bf16.msra.mxu0 %v20404_v46  ;;  %v17282_v46 = vld [vmem:[%s22837_s7 + $0x290] ss:$8 sps:$4 sm:$0xff]  }
0x1103   :  { %10884 = vmatprep.subr.bf16.mxu0 %v17278_v34  ;;  %v17292_v34 = vld [vmem:[%s22837_s7 + $0x2e0] ss:$8 sps:$4 sm:$0xff]  }
0x1105   :  { %15828 = vmatmul.mubr.msk.bf16.vlgmr.msra.gmra.mrb[92].mxu0 %vm1148_vm0, %v17279_v52  ;;  %v17293_v52 = vld [vmem:[%s22837_s7 + $0x2f4] ss:$8 sps:$4 sm:$0xff]  }
0x1106   :  { %10885 = vmatpush1.bf16.msra.mxu0 %v17280_v55  ;;  %10916 = vmatprep.mubr.bf16.mxu0 %v23053_v2  ;;  %v17294_v55 = vld [vmem:[%s22837_s7 + $0x2f0] ss:$8 sps:$4 sm:$0xff]  }
0x1107   :  { %10886 = vmatprep.subr.bf16.mxu0 %v17281_v10  ;;  %v17295_v10 = vld [vmem:[%s22837_s7 + $0x304] ss:$8 sps:$4 sm:$0xff]  }
0x110a   :  { %10887 = vmatpush1.bf16.msra.mxu0 %v17282_v46  ;;  %v22331_v46 = vpop.f32.mrb[88].mxu1 }
0x110b   :  { %10888 = vmatprep.subr.bf16.mxu0 %v17283_v60  ;;  %v15841_v60 = vpop.f32.mrb[89].mxu1 }
0x110e   :  { %10889 = vmatpush1.bf16.msra.mxu0 %v17284_v49  ;;  %v10968_v49 = vpop.f32.mrb[90].mxu1 }
0x110f   :  { %10890 = vmatprep.subr.bf16.mxu0 %v17285_v30  ;;  %v10972_v30 = vpack.c.bf16 %v10968_v49, %v22331_v46 }
0x1112   :  { %10891 = vmatpush1.bf16.msra.mxu0 %v17286_v4  ;;  %v15842_v4 = vpop.f32.mrb[91].mxu1 }
0x1113   :  { %10892 = vmatprep.subr.bf16.mxu0 %v17287_v38  ;;  %v22334_v38 = vpop.f32.mrb[92].mxu1 }
0x1116   :  { %10893 = vmatpush1.bf16.msra.mxu0 %v17288_v22  ;;  %v15853_v22 = vpop.f32.mrb[93].mxu1 }
0x1117   :  { %10894 = vmatprep.subr.bf16.mxu0 %v17289_v1  ;;  %v22336_v1 = vpop.f32.mrb[94].mxu1 }
0x111a   :  { %10895 = vmatpush1.bf16.msra.mxu0 %v17290_v27 }
0x111b   :  { %10896 = vmatprep.subr.bf16.mxu0 %v17291_v20  ;;  %v15854_v20 = vpop.f32.mrb[95].mxu1 }
0x111e   :  { %10897 = vmatpush1.bf16.msra.mxu0 %v17292_v34  ;;  %v22340_v34 = vpop.f32.mrb[96].mxu1 }
0x111f   :  { %10898 = vmatprep.subr.bf16.mxu0 %v17293_v52  ;;  %v15865_v52 = vpop.f32.mrb[97].mxu1 }
0x1122   :  { %10899 = vmatpush1.bf16.msra.mxu0 %v17294_v55  ;;  %v22342_v55 = vpop.f32.mrb[98].mxu1 }
0x1123   :  { %10973 = vmatprep.subr.bf16.mxu0 %v17295_v10  ;;  %v15866_v60 = vpop.f32.mrb[99].mxu1  ;;  %v17296_v10 = vld [vmem:[%s22837_s7 + $0x300] ss:$8 sps:$4 sm:$0xff]  }
0x1124   :  { %v22346_v46 = vpop.f32.mrb[100].mxu1  ;;  %v17297_v60 = vld [vmem:[%s22837_s7 + $0x314] ss:$8 sps:$4 sm:$0xff]  }
0x1125   :  { %v15877_v49 = vpop.f32.mrb[101].mxu1 }
0x1126   :  { %v22348_v23 = vpop.f32.mrb[102].mxu1  ;;  %v17302_v49 = vld [vmem:[%s22837_s7 + $0x330] ss:$8 sps:$4 sm:$0xff]  }
0x1127   :  { %v11239_v20 = vpack.c.bf16 %v22348_v23, %v22346_v46  ;;  %v15878_v52 = vpop.f32.mrb[103].mxu1  ;;  %v17363_v23 = vld [vmem:[%s22837_s7 + $0x524] ss:$8 sps:$4 sm:$0xff]   ;;  %v17364_v46 = vld [vmem:[%s22837_s7 + $0x520] ss:$8 sps:$4 sm:$0xff]  }
0x1128   :  { %v17305_v52 = vld [vmem:[%s22837_s7 + $0x354] ss:$8 sps:$4 sm:$0xff]  }
0x11d8   :  { %v10876_v4 = vpop.f32.mrb[92].mxu0 }
0x11d9   :  { %v15829_v22 = vpop.f32.mrb[93].mxu0 }
0x11da   :  { %v10879_v48 = vpop.f32.mrb[94].mxu0  ;;  %v17304_v22 = vld [vmem:[%s22837_s7 + $0x340] ss:$8 sps:$4 sm:$0xff]  }
0x11db   :  { %v10883_v50 = vpack.c.bf16 %v10879_v48, %v10876_v4  ;;  %v15830_v27 = vpop.f32.mrb[95].mxu0  ;;  %v17298_v48 = vld [vmem:[%s22837_s7 + $0x310] ss:$8 sps:$4 sm:$0xff]   ;;  %v17303_v4 = vld [vmem:[%s22837_s7 + $0x344] ss:$8 sps:$4 sm:$0xff]  }
0x11dc   :  { %v17300_v27 = vld [vmem:[%s22837_s7 + $0x320] ss:$8 sps:$4 sm:$0xff]  }
0x11dd   :  { %10917 = vmatmul.mubr.bf16.vlgmr.msra.gmra.mrb[76].mxu0 %v10883_v50  ;;  %v17299_v50 = vld [vmem:[%s22837_s7 + $0x324] ss:$8 sps:$4 sm:$0xff]  }
0x11de   :  { %10974 = vmatpush1.bf16.msra.mxu0 %v17296_v10  ;;  %11005 = vmatprep.mubr.bf16.mxu0 %v23053_v2  ;;  %v17301_v10 = vld [vmem:[%s22837_s7 + $0x334] ss:$8 sps:$4 sm:$0xff]  }
0x11df   :  { %10975 = vmatprep.subr.bf16.mxu0 %v17297_v60  ;;  %v17306_v60 = vld [vmem:[%s22837_s7 + $0x350] ss:$8 sps:$4 sm:$0xff]  }
0x11e2   :  { %10976 = vmatpush1.bf16.msra.mxu0 %v17298_v48  ;;  %v17307_v48 = vld [vmem:[%s22837_s7 + $0x364] ss:$8 sps:$4 sm:$0xff]  }
0x11e3   :  { %10977 = vmatprep.subr.bf16.mxu0 %v17299_v50  ;;  %v17308_v50 = vld [vmem:[%s22837_s7 + $0x360] ss:$8 sps:$4 sm:$0xff]  }
0x11e6   :  { %10978 = vmatpush1.bf16.msra.mxu0 %v17300_v27  ;;  %v22392_v27 = vpop.f32.mrb[104].mxu1 }
0x11e7   :  { %10979 = vmatprep.subr.bf16.mxu0 %v17301_v10  ;;  %v17309_v10 = vld [vmem:[%s22837_s7 + $0x374] ss:$8 sps:$4 sm:$0xff]  }
0x11ea   :  { %10980 = vmatpush1.bf16.msra.mxu0 %v17302_v49  ;;  %v15889_v49 = vpop.f32.mrb[105].mxu1 }
0x11eb   :  { %10981 = vmatprep.subr.bf16.mxu0 %v17303_v4  ;;  %v17310_v4 = vld [vmem:[%s22837_s7 + $0x370] ss:$8 sps:$4 sm:$0xff]  }
0x11ec   :  { %v17314_v49 = vld [vmem:[%s22837_s7 + $0x390] ss:$8 sps:$4 sm:$0xff]  }
0x11ee   :  { %10982 = vmatpush1.bf16.msra.mxu0 %v17304_v22  ;;  %v22400_v22 = vpop.f32.mrb[106].mxu1 }
0x11ef   :  { %10983 = vmatprep.subr.bf16.mxu0 %v17305_v52  ;;  %v17311_v52 = vld [vmem:[%s22837_s7 + $0x384] ss:$8 sps:$4 sm:$0xff]  }
0x11f2   :  { %10984 = vmatpush1.bf16.msra.mxu0 %v17306_v60 }
0x11f3   :  { %10985 = vmatprep.subr.bf16.mxu0 %v17307_v48  ;;  %v15890_v48 = vpop.f32.mrb[107].mxu1 }
0x11f4   :  { %v17318_v48 = vld [vmem:[%s22837_s7 + $0x3b0] ss:$8 sps:$4 sm:$0xff]  }
0x11f6   :  { %10986 = vmatpush1.bf16.msra.mxu0 %v17308_v50  ;;  %v17312_v50 = vld [vmem:[%s22837_s7 + $0x380] ss:$8 sps:$4 sm:$0xff]  }
0x11f7   :  { %10987 = vmatprep.subr.bf16.mxu0 %v17309_v10  ;;  %v17313_v10 = vld [vmem:[%s22837_s7 + $0x394] ss:$8 sps:$4 sm:$0xff]  }
0x11fa   :  { %10988 = vmatpush1.bf16.msra.mxu0 %v17310_v4  ;;  %v17316_v4 = vld [vmem:[%s22837_s7 + $0x3a0] ss:$8 sps:$4 sm:$0xff]  }
0x11fb   :  { %11062 = vmatprep.subr.bf16.mxu0 %v17311_v52  ;;  %v17317_v52 = vld [vmem:[%s22837_s7 + $0x3b4] ss:$8 sps:$4 sm:$0xff]  }
0x11fd   :  { %11006 = vmatmul.mubr.bf16.vlgmr.msra.gmra.mrb[76].mxu0 %v10972_v30  ;;  %v17315_v30 = vld [vmem:[%s22837_s7 + $0x3a4] ss:$8 sps:$4 sm:$0xff]  }
0x11fe   :  { %11063 = vmatpush1.bf16.msra.mxu0 %v17312_v50  ;;  %11094 = vmatprep.mubr.bf16.mxu0 %v23053_v2  ;;  %v17319_v50 = vld [vmem:[%s22837_s7 + $0x3c4] ss:$8 sps:$4 sm:$0xff]  }
0x11ff   :  { %11064 = vmatprep.subr.bf16.mxu0 %v17313_v10  ;;  %v17320_v10 = vld [vmem:[%s22837_s7 + $0x3c0] ss:$8 sps:$4 sm:$0xff]  }
0x1202   :  { %11065 = vmatpush1.bf16.msra.mxu0 %v17314_v49  ;;  %v17321_v49 = vld [vmem:[%s22837_s7 + $0x3d4] ss:$8 sps:$4 sm:$0xff]  }
0x1203   :  { %11066 = vmatprep.subr.bf16.mxu0 %v17315_v30  ;;  %v17322_v30 = vld [vmem:[%s22837_s7 + $0x3d0] ss:$8 sps:$4 sm:$0xff]  }
0x1206   :  { %11067 = vmatpush1.bf16.msra.mxu0 %v17316_v4  ;;  %v17323_v4 = vld [vmem:[%s22837_s7 + $0x3e4] ss:$8 sps:$4 sm:$0xff]  }
0x1207   :  { %11068 = vmatprep.subr.bf16.mxu0 %v17317_v52  ;;  %v17324_v52 = vld [vmem:[%s22837_s7 + $0x3e0] ss:$8 sps:$4 sm:$0xff]  }
0x120a   :  { %11069 = vmatpush1.bf16.msra.mxu0 %v17318_v48  ;;  %v22447_v48 = vpop.f32.mrb[108].mxu1 }
0x120b   :  { %11070 = vmatprep.subr.bf16.mxu0 %v17319_v50  ;;  %v17325_v50 = vld [vmem:[%s22837_s7 + $0x3f4] ss:$8 sps:$4 sm:$0xff]  }
0x120e   :  { %11071 = vmatpush1.bf16.msra.mxu0 %v17320_v10  ;;  %v15901_v10 = vpop.f32.mrb[109].mxu1 }
0x120f   :  { %11072 = vmatprep.subr.bf16.mxu0 %v17321_v49  ;;  %v17326_v49 = vld [vmem:[%s22837_s7 + $0x3f0] ss:$8 sps:$4 sm:$0xff]   ;;  %v17328_v10 = vld [vmem:[%s22837_s7 + $0x400] ss:$8 sps:$4 sm:$0xff]  }
0x1212   :  { %11073 = vmatpush1.bf16.msra.mxu0 %v17322_v30  ;;  %v22455_v30 = vpop.f32.mrb[110].mxu1 }
0x1213   :  { %11074 = vmatprep.subr.bf16.mxu0 %v17323_v4  ;;  %v17327_v4 = vld [vmem:[%s22837_s7 + $0x404] ss:$8 sps:$4 sm:$0xff]   ;;  %v15902_v60 = vpop.f32.mrb[111].mxu1 }
0x1214   :  { %v17330_v60 = vld [vmem:[%s22837_s7 + $0x410] ss:$8 sps:$4 sm:$0xff]  }
0x1216   :  { %11075 = vmatpush1.bf16.msra.mxu0 %v17324_v52 }
0x1217   :  { %11076 = vmatprep.subr.bf16.mxu0 %v17325_v50  ;;  %v23097_v50 = vpack.c.bf16 %v22336_v1, %v22334_v38  ;;  %v17331_v38 = vld [vmem:[%s22837_s7 + $0x424] ss:$8 sps:$4 sm:$0xff]   ;;  %v17332_v1 = vld [vmem:[%s22837_s7 + $0x420] ss:$8 sps:$4 sm:$0xff]  }
0x121a   :  { %11077 = vmatpush1.bf16.msra.mxu0 %v17326_v49  ;;  %v17329_v49 = vld [vmem:[%s22837_s7 + $0x414] ss:$8 sps:$4 sm:$0xff]  }
0x121b   :  { %11151 = vmatprep.subr.bf16.mxu0 %v17327_v4  ;;  %v17333_v4 = vld [vmem:[%s22837_s7 + $0x434] ss:$8 sps:$4 sm:$0xff]  }
0x121d   :  { %11095 = vmatmul.mubr.bf16.vlgmr.msra.gmra.mrb[76].mxu0 %v23097_v50  ;;  %v17334_v50 = vld [vmem:[%s22837_s7 + $0x430] ss:$8 sps:$4 sm:$0xff]  }
0x121e   :  { %11152 = vmatpush1.bf16.msra.mxu0 %v17328_v10  ;;  %11183 = vmatprep.mubr.bf16.mxu0 %v23053_v2  ;;  %v17335_v10 = vld [vmem:[%s22837_s7 + $0x444] ss:$8 sps:$4 sm:$0xff]  }
0x121f   :  { %11153 = vmatprep.subr.bf16.mxu0 %v17329_v49  ;;  %v17336_v49 = vld [vmem:[%s22837_s7 + $0x440] ss:$8 sps:$4 sm:$0xff]  }
0x1222   :  { %11154 = vmatpush1.bf16.msra.mxu0 %v17330_v60  ;;  %v17337_v60 = vld [vmem:[%s22837_s7 + $0x454] ss:$8 sps:$4 sm:$0xff]  }
0x1223   :  { %11155 = vmatprep.subr.bf16.mxu0 %v17331_v38  ;;  %v17338_v38 = vld [vmem:[%s22837_s7 + $0x450] ss:$8 sps:$4 sm:$0xff]  }
0x1226   :  { %11156 = vmatpush1.bf16.msra.mxu0 %v17332_v1  ;;  %v17339_v1 = vld [vmem:[%s22837_s7 + $0x464] ss:$8 sps:$4 sm:$0xff]  }
0x1227   :  { %11157 = vmatprep.subr.bf16.mxu0 %v17333_v4  ;;  %v17340_v4 = vld [vmem:[%s22837_s7 + $0x460] ss:$8 sps:$4 sm:$0xff]  }
0x122a   :  { %11158 = vmatpush1.bf16.msra.mxu0 %v17334_v50  ;;  %v22505_v50 = vpop.f32.mrb[112].mxu1 }
0x122b   :  { %11159 = vmatprep.subr.bf16.mxu0 %v17335_v10  ;;  %v17341_v10 = vld [vmem:[%s22837_s7 + $0x474] ss:$8 sps:$4 sm:$0xff]  }
0x122e   :  { %11160 = vmatpush1.bf16.msra.mxu0 %v17336_v49  ;;  %v15913_v49 = vpop.f32.mrb[113].mxu1 }
0x122f   :  { %11161 = vmatprep.subr.bf16.mxu0 %v17337_v60  ;;  %v17342_v60 = vld [vmem:[%s22837_s7 + $0x470] ss:$8 sps:$4 sm:$0xff]   ;;  %v17344_v49 = vld [vmem:[%s22837_s7 + $0x480] ss:$8 sps:$4 sm:$0xff]  }
0x1232   :  { %11162 = vmatpush1.bf16.msra.mxu0 %v17338_v38  ;;  %v22513_v38 = vpop.f32.mrb[114].mxu1 }
0x1233   :  { %11163 = vmatprep.subr.bf16.mxu0 %v17339_v1  ;;  %v17343_v1 = vld [vmem:[%s22837_s7 + $0x484] ss:$8 sps:$4 sm:$0xff]   ;;  %v15914_v52 = vpop.f32.mrb[115].mxu1 }
0x1234   :  { %v17346_v52 = vld [vmem:[%s22837_s7 + $0x490] ss:$8 sps:$4 sm:$0xff]  }
0x1236   :  { %11164 = vmatpush1.bf16.msra.mxu0 %v17340_v4 }
0x1237   :  { %11165 = vmatprep.subr.bf16.mxu0 %v17341_v10  ;;  %v23098_v10 = vpack.c.bf16 %v22342_v55, %v22340_v34  ;;  %v17347_v34 = vld [vmem:[%s22837_s7 + $0x4a4] ss:$8 sps:$4 sm:$0xff]   ;;  %v17348_v55 = vld [vmem:[%s22837_s7 + $0x4a0] ss:$8 sps:$4 sm:$0xff]  }
0x123a   :  { %11166 = vmatpush1.bf16.msra.mxu0 %v17342_v60  ;;  %v17345_v60 = vld [vmem:[%s22837_s7 + $0x494] ss:$8 sps:$4 sm:$0xff]  }
0x123b   :  { %11240 = vmatprep.subr.bf16.mxu0 %v17343_v1  ;;  %v17349_v1 = vld [vmem:[%s22837_s7 + $0x4b4] ss:$8 sps:$4 sm:$0xff]  }
0x123d   :  { %11184 = vmatmul.mubr.bf16.vlgmr.msra.gmra.mrb[76].mxu0 %v23098_v10  ;;  %v17350_v10 = vld [vmem:[%s22837_s7 + $0x4b0] ss:$8 sps:$4 sm:$0xff]  }
0x123e   :  { %11241 = vmatpush1.bf16.msra.mxu0 %v17344_v49  ;;  %11272 = vmatprep.mubr.bf16.mxu0 %v23053_v2  ;;  %v17351_v49 = vld [vmem:[%s22837_s7 + $0x4c4] ss:$8 sps:$4 sm:$0xff]  }
0x123f   :  { %11242 = vmatprep.subr.bf16.mxu0 %v17345_v60  ;;  %v17352_v60 = vld [vmem:[%s22837_s7 + $0x4c0] ss:$8 sps:$4 sm:$0xff]  }
0x1242   :  { %11243 = vmatpush1.bf16.msra.mxu0 %v17346_v52  ;;  %v17353_v52 = vld [vmem:[%s22837_s7 + $0x4d4] ss:$8 sps:$4 sm:$0xff]  }
0x1243   :  { %11244 = vmatprep.subr.bf16.mxu0 %v17347_v34  ;;  %v17354_v34 = vld [vmem:[%s22837_s7 + $0x4d0] ss:$8 sps:$4 sm:$0xff]  }
0x1246   :  { %11245 = vmatpush1.bf16.msra.mxu0 %v17348_v55  ;;  %v17355_v55 = vld [vmem:[%s22837_s7 + $0x4e4] ss:$8 sps:$4 sm:$0xff]  }
0x1247   :  { %11246 = vmatprep.subr.bf16.mxu0 %v17349_v1  ;;  %v17356_v1 = vld [vmem:[%s22837_s7 + $0x4e0] ss:$8 sps:$4 sm:$0xff]  }
0x124a   :  { %11247 = vmatpush1.bf16.msra.mxu0 %v17350_v10  ;;  %v22563_v10 = vpop.f32.mrb[116].mxu1 }
0x124b   :  { %11248 = vmatprep.subr.bf16.mxu0 %v17351_v49  ;;  %v17357_v49 = vld [vmem:[%s22837_s7 + $0x4f4] ss:$8 sps:$4 sm:$0xff]  }
0x124e   :  { %11249 = vmatpush1.bf16.msra.mxu0 %v17352_v60  ;;  %v15925_v60 = vpop.f32.mrb[117].mxu1 }
0x124f   :  { %11250 = vmatprep.subr.bf16.mxu0 %v17353_v52  ;;  %v17358_v52 = vld [vmem:[%s22837_s7 + $0x4f0] ss:$8 sps:$4 sm:$0xff]   ;;  %v17361_v60 = vld [vmem:[%s22837_s7 + $0x514] ss:$8 sps:$4 sm:$0xff]  }
0x1252   :  { %11251 = vmatpush1.bf16.msra.mxu0 %v17354_v34  ;;  %v22571_v34 = vpop.f32.mrb[118].mxu1 }
0x1253   :  { %11252 = vmatprep.subr.bf16.mxu0 %v17355_v55  ;;  %v17359_v55 = vld [vmem:[%s22837_s7 + $0x504] ss:$8 sps:$4 sm:$0xff]   ;;  %v15926_v4 = vpop.f32.mrb[119].mxu1 }
0x1254   :  { %v17362_v4 = vld [vmem:[%s22837_s7 + $0x510] ss:$8 sps:$4 sm:$0xff]  }
0x1256   :  { %11253 = vmatpush1.bf16.msra.mxu0 %v17356_v1  ;;  %v11595_v1 = vpack.c.bf16 %v22571_v34, %v22563_v10 }
0x1257   :  { %11254 = vmatprep.subr.bf16.mxu0 %v17357_v49  ;;  %v17360_v49 = vld [vmem:[%s22837_s7 + $0x500] ss:$8 sps:$4 sm:$0xff]  }
0x125a   :  { %11255 = vmatpush1.bf16.msra.mxu0 %v17358_v52  ;;  %v17366_v52 = vld [vmem:[%s22837_s7 + $0x530] ss:$8 sps:$4 sm:$0xff]  }
0x125b   :  { %11329 = vmatprep.subr.bf16.mxu0 %v17359_v55  ;;  %v17367_v55 = vld [vmem:[%s22837_s7 + $0x544] ss:$8 sps:$4 sm:$0xff]  }
0x125d   :  { %11273 = vmatmul.mubr.bf16.vlgmr.msra.gmra.mrb[76].mxu0 %v11239_v20  ;;  %v17365_v20 = vld [vmem:[%s22837_s7 + $0x534] ss:$8 sps:$4 sm:$0xff]  }
0x125e   :  { %11330 = vmatpush1.bf16.msra.mxu0 %v17360_v49  ;;  %11361 = vmatprep.mubr.bf16.mxu0 %v23053_v2  ;;  %v17368_v49 = vld [vmem:[%s22837_s7 + $0x540] ss:$8 sps:$4 sm:$0xff]  }
0x125f   :  { %11331 = vmatprep.subr.bf16.mxu0 %v17361_v60  ;;  %v17369_v60 = vld [vmem:[%s22837_s7 + $0x554] ss:$8 sps:$4 sm:$0xff]  }
0x1262   :  { %11332 = vmatpush1.bf16.msra.mxu0 %v17362_v4  ;;  %v17370_v4 = vld [vmem:[%s22837_s7 + $0x550] ss:$8 sps:$4 sm:$0xff]  }
0x1263   :  { %11333 = vmatprep.subr.bf16.mxu0 %v17363_v23  ;;  %v17371_v23 = vld [vmem:[%s22837_s7 + $0x564] ss:$8 sps:$4 sm:$0xff]  }
0x1266   :  { %11334 = vmatpush1.bf16.msra.mxu0 %v17364_v46  ;;  %v17372_v46 = vld [vmem:[%s22837_s7 + $0x560] ss:$8 sps:$4 sm:$0xff]  }
0x1267   :  { %11335 = vmatprep.subr.bf16.mxu0 %v17365_v20  ;;  %v22621_v20 = vpop.f32.mrb[120].mxu1 }
0x126a   :  { %11336 = vmatpush1.bf16.msra.mxu0 %v17366_v52  ;;  %v17373_v52 = vld [vmem:[%s22837_s7 + $0x574] ss:$8 sps:$4 sm:$0xff]  }
0x126b   :  { %11337 = vmatprep.subr.bf16.mxu0 %v17367_v55  ;;  %v15937_v55 = vpop.f32.mrb[121].mxu1 }
0x126c   :  { %v17376_v55 = vld [vmem:[%s22837_s7 + $0x580] ss:$8 sps:$4 sm:$0xff]  }
0x126e   :  { %11338 = vmatpush1.bf16.msra.mxu0 %v17368_v49  ;;  %v17374_v49 = vld [vmem:[%s22837_s7 + $0x570] ss:$8 sps:$4 sm:$0xff]  }
0x126f   :  { %11339 = vmatprep.subr.bf16.mxu0 %v17369_v60  ;;  %v22629_v60 = vpop.f32.mrb[122].mxu1 }
0x1272   :  { %11340 = vmatpush1.bf16.msra.mxu0 %v17370_v4  ;;  %v17375_v4 = vld [vmem:[%s22837_s7 + $0x584] ss:$8 sps:$4 sm:$0xff]  }
0x1273   :  { %11341 = vmatprep.subr.bf16.mxu0 %v17371_v23  ;;  %v11684_v23 = vpack.c.bf16 %v22629_v60, %v22621_v20 }
0x1276   :  { %11342 = vmatpush1.bf16.msra.mxu0 %v17372_v46  ;;  %v15938_v46 = vpop.f32.mrb[123].mxu1 }
0x1277   :  { %11343 = vmatprep.subr.bf16.mxu0 %v17373_v52  ;;  %v23099_v52 = vpack.c.bf16 %v22400_v22, %v22392_v27  ;;  %v17379_v27 = vld [vmem:[%s22837_s7 + $0x5a4] ss:$8 sps:$4 sm:$0xff]   ;;  %v17380_v22 = vld [vmem:[%s22837_s7 + $0x5a0] ss:$8 sps:$4 sm:$0xff]   ;;  %v17381_v46 = vld [vmem:[%s22837_s7 + $0x5b4] ss:$8 sps:$4 sm:$0xff]  }
0x127a   :  { %11344 = vmatpush1.bf16.msra.mxu0 %v17374_v49  ;;  %v17377_v49 = vld [vmem:[%s22837_s7 + $0x594] ss:$8 sps:$4 sm:$0xff]  }
0x127b   :  { %11418 = vmatprep.subr.bf16.mxu0 %v17375_v4  ;;  %v17378_v4 = vld [vmem:[%s22837_s7 + $0x590] ss:$8 sps:$4 sm:$0xff]  }
0x127d   :  { %11362 = vmatmul.mubr.bf16.vlgmr.msra.gmra.mrb[76].mxu0 %v23099_v52  ;;  %v17382_v52 = vld [vmem:[%s22837_s7 + $0x5b0] ss:$8 sps:$4 sm:$0xff]  }
0x127e   :  { %11419 = vmatpush1.bf16.msra.mxu0 %v17376_v55  ;;  %11450 = vmatprep.mubr.bf16.mxu0 %v23053_v2  ;;  %v17383_v55 = vld [vmem:[%s22837_s7 + $0x5c4] ss:$8 sps:$4 sm:$0xff]  }
0x127f   :  { %11420 = vmatprep.subr.bf16.mxu0 %v17377_v49  ;;  %v17384_v49 = vld [vmem:[%s22837_s7 + $0x5c0] ss:$8 sps:$4 sm:$0xff]  }
0x1282   :  { %11421 = vmatpush1.bf16.msra.mxu0 %v17378_v4  ;;  %v17385_v4 = vld [vmem:[%s22837_s7 + $0x5d4] ss:$8 sps:$4 sm:$0xff]  }
0x1283   :  { %11422 = vmatprep.subr.bf16.mxu0 %v17379_v27  ;;  %v22673_v27 = vpop.f32.mrb[124].mxu1 }
0x1286   :  { %11423 = vmatpush1.bf16.msra.mxu0 %v17380_v22  ;;  %v15949_v22 = vpop.f32.mrb[125].mxu1 }
0x1287   :  { %11424 = vmatprep.subr.bf16.mxu0 %v17381_v46  ;;  %v22676_v46 = vpop.f32.mrb[126].mxu1 }
0x128a   :  { %11425 = vmatpush1.bf16.msra.mxu0 %v17382_v52  ;;  %v11773_v52 = vpack.c.bf16 %v22676_v46, %v22673_v27 }
0x128b   :  { %11426 = vmatprep.subr.bf16.mxu0 %v17383_v55  ;;  %v15950_v55 = vpop.f32.mrb[127].mxu1 }
0x128e   :  { %11427 = vmatpush1.bf16.msra.mxu0 %v17384_v49  ;;  %v17386_v49 = vld [vmem:[%s22837_s7 + $0x5f0] ss:$8 sps:$4 sm:$0xff]  }
0x128f   :  { %11428 = vmatprep.subr.bf16.mxu0 %v17385_v4 }
0x1292   :  { %11429 = vmatpush1.bf16.msra.mxu0 %v21545_v54  ;;  %v23100_v54 = vpack.c.bf16 %v22455_v30, %v22447_v48 }
0x1293   :  { %11430 = vmatprep.subr.bf16.mxu0 %v21550_v53  ;;  %v23101_v53 = vpack.c.bf16 %v22513_v38, %v22505_v50 }
0x1296   :  { %11431 = vmatpush1.bf16.msra.mxu0 %v21556_v32  ;;  %v23102_v32 = vld [vmem:[#allocation10_spill] sm:$0xff] }
0x1297   :  { %11432 = vmatprep.subr.bf16.mxu0 %v21562_v12  ;;  %v23103_v12 = vld [vmem:[#allocation17_spill] sm:$0xff] }
0x129a   :  { %11433 = vmatpush1.bf16.msra.mxu0 %v17386_v49 }
0x129b   :  { %11507 = vmatprep.subr.bf16.mxu0 %v21572_v14  ;;  %v23104_v14 = vld [vmem:[#allocation9_spill] sm:$0xff] }
0x129d   :  { %11451 = vmatmul.mubr.bf16.vlgmr.msra.gmra.mrb[76].mxu0 %v23100_v54 }
0x129e   :  { %11508 = vmatpush1.bf16.msra.mxu0 %v21577_v35  ;;  %11539 = vmatprep.mubr.bf16.mxu0 %v23053_v2  ;;  %v23105_v35 = vld [vmem:[#allocation5_spill] sm:$0xff] }
0x129f   :  { %11509 = vmatprep.subr.bf16.mxu0 %v21583_v15  ;;  %v23106_v15 = vld [vmem:[#allocation16_spill] sm:$0xff] }
0x12a2   :  { %11510 = vmatpush1.bf16.msra.mxu0 %v21592_v63  ;;  %v23107_v63 = vld [vmem:[#allocation12_spill] sm:$0xff] }
0x12a3   :  { %11511 = vmatprep.subr.bf16.mxu0 %v21599_v18  ;;  %v23108_v18 = vld [vmem:[#allocation11_spill] sm:$0xff] }
0x12a6   :  { %11512 = vmatpush1.bf16.msra.mxu0 %v21605_v9  ;;  %v23109_v9 = vld [vmem:[#allocation2_spill] sm:$0xff] }
0x12a7   :  { %11513 = vmatprep.subr.bf16.mxu0 %v21611_v43  ;;  %v23110_v43 = vld [vmem:[#allocation4_spill] sm:$0xff] }
0x12aa   :  { %11514 = vmatpush1.bf16.msra.mxu0 %v21617_v25  ;;  %v23111_v25 = vld [vmem:[#allocation14_spill] sm:$0xff] }
0x12ab   :  { %11515 = vmatprep.subr.bf16.mxu0 %v21623_v11  ;;  %v23112_v11 = vld [vmem:[#allocation13_spill] sm:$0xff] }
0x12ae   :  { %11516 = vmatpush1.bf16.msra.mxu0 %v21629_v5  ;;  %v23113_v5 = vld [vmem:[#allocation3_spill] sm:$0xff] }
0x12af   :  { %11517 = vmatprep.subr.bf16.mxu0 %v21635_v58  ;;  %v23114_v58 = vld [vmem:[#allocation6_spill] sm:$0xff] }
0x12b2   :  { %11518 = vmatpush1.bf16.msra.mxu0 %v21641_v39  ;;  %v23115_v39 = vld [vmem:[#allocation19_spill] sm:$0xff] }
0x12b3   :  { %11519 = vmatprep.subr.bf16.mxu0 %v21647_v40  ;;  %v23116_v40 = vld [vmem:[#allocation20_spill] sm:$0xff] }
0x12b6   :  { %11520 = vmatpush1.bf16.msra.mxu0 %v21653_v41  ;;  %v23117_v41 = vld [vmem:[#allocation21_spill] sm:$0xff] }
0x12b7   :  { %11521 = vmatprep.subr.bf16.mxu0 %v21659_v29  ;;  %v23118_v29 = vld [vmem:[#allocation22_spill] sm:$0xff] }
0x12ba   :  { %11522 = vmatpush1.bf16.msra.mxu0 %v21665_v6  ;;  %v23119_v6 = vld [vmem:[#allocation23_spill] sm:$0xff] }
0x12bb   :  { %11596 = vmatprep.subr.bf16.mxu0 %v21671_v8  ;;  %v23120_v8 = vld [vmem:[#allocation24_spill] sm:$0xff] }
0x12bd   :  { %11540 = vmatmul.mubr.bf16.vlgmr.msra.gmra.mrb[76].mxu0 %v23101_v53 }
0x12be   :  { %11597 = vmatpush1.bf16.msra.mxu0 %v21677_v7  ;;  %11628 = vmatprep.mubr.bf16.mxu0 %v23053_v2  ;;  %v23121_v7 = vld [vmem:[#allocation25_spill] sm:$0xff] }
0x12bf   :  { %11598 = vmatprep.subr.bf16.mxu0 %v21683_v61  ;;  %v23123_v61 = vld [vmem:[#allocation27_spill] sm:$0xff] }
0x12c2   :  { %11599 = vmatpush1.bf16.msra.mxu0 %v21692_v26  ;;  %v23124_v26 = vld [vmem:[#allocation28_spill] sm:$0xff] }
0x12c3   :  { %11600 = vmatprep.subr.bf16.mxu0 %v21699_v44  ;;  %v23125_v44 = vld [vmem:[#allocation29_spill] sm:$0xff] }
0x12c6   :  { %11601 = vmatpush1.bf16.msra.mxu0 %v21705_v56  ;;  %v23126_v56 = vld [vmem:[#allocation31_spill] sm:$0xff] }
0x12c7   :  { %11602 = vmatprep.subr.bf16.mxu0 %v21711_v62  ;;  %v11824_v62 = vrot.slane %v23126_v56, 4 }
0x12ca   :  { %11603 = vmatpush1.bf16.msra.mxu0 %v21717_v47  ;;  %v11831_v47 = vrot.slane %v22195_v42, 4 }
0x12cb   :  { %11604 = vmatprep.subr.bf16.mxu0 %v21723_v37  ;;  %v11860_v37 = vrot.slane %v22199_v59, 4 }
0x12ce   :  { %11605 = vmatpush1.bf16.msra.mxu0 %v21729_v0  ;;  %v23127_v0 = vld [vmem:[#allocation33_spill] sm:$0xff] }
0x12cf   :  { %11606 = vmatprep.subr.bf16.mxu0 %v21735_v28  ;;  %v11867_v28 = vrot.slane %v23127_v0, 4 }
0x12d2   :  { %11607 = vmatpush1.bf16.msra.mxu0 %v21741_v45  ;;  %v11825_v45 = vadd.f32 %v11824_v62, %v23126_v56 }
0x12d3   :  { %11608 = vmatprep.subr.bf16.mxu0 %v21747_v19  ;;  %v11832_v19 = vadd.f32 %v11831_v47, %v22195_v42 }
0x12d6   :  { %11609 = vmatpush1.bf16.msra.mxu0 %v21753_v21 }
0x12d7   :  { %11610 = vmatprep.subr.bf16.mxu0 %v21759_v36  ;;  %v11861_v36 = vadd.f32 %v11860_v37, %v22199_v59 }
0x12d9   :  { %v11862_v30 = vrot.slane %v11861_v36, 2 }
0x12da   :  { %11611 = vmatpush1.bf16.msra.mxu0 %v21765_v13 }
0x12db   :  { %11685 = vmatprep.subr.bf16.mxu0 %v21771_v3  ;;  %v11868_v3 = vadd.f32 %v11867_v28, %v23127_v0  ;;  %v11863_v46 = vadd.f32 %v11862_v30, %v11861_v36  ;;  %v23128_v30 = vld [vmem:[#allocation8_spill] sm:$0xff] }
0x12dd   :  { %11629 = vmatmul.mubr.bf16.vlgmr.msra.gmra.mrb[76].mxu0 %v11595_v1  ;;  %v11869_v10 = vrot.slane %v11868_v3, 2 }
0x12de   :  { %11686 = vmatpush1.bf16.msra.mxu0 %v21777_v24  ;;  %11717 = vmatprep.mubr.bf16.mxu0 %v23053_v2 }
0x12df   :  { %11687 = vmatprep.subr.bf16.mxu0 %v21783_v33  ;;  %v11826_v33 = vrot.slane %v11825_v45, 2  ;;  %v11870_v49 = vadd.f32 %v11869_v10, %v11868_v3 }
0x12e1   :  { %v11827_v20 = vadd.f32 %v11826_v33, %v11825_v45 }
0x12e2   :  { %11688 = vmatpush1.bf16.msra.mxu0 %v21792_v16 }
0x12e3   :  { %11689 = vmatprep.subr.bf16.mxu0 %v21799_v17 }
0x12e6   :  { %11690 = vmatpush1.bf16.msra.mxu0 %v21805_v57 }
0x12e7   :  { %11691 = vmatprep.subr.bf16.mxu0 %v21811_v51 }
0x12ea   :  { %11692 = vmatpush1.bf16.msra.mxu0 %v21817_v31  ;;  %v11833_v31 = vrot.slane %v11832_v19, 2 }
0x12eb   :  { %11693 = vmatprep.subr.bf16.mxu0 %v23102_v32  ;;  %v11828_v32 = vrot.slane %v11827_v20, 1 }
0x12ec   :  { %v11834_v4 = vadd.f32 %v11833_v31, %v11832_v19  ;;  %v17390_v31 = vmov 1966171168  }
0x12ee   :  { %11694 = vmatpush1.bf16.msra.mxu0 %v23103_v12 }
0x12ef   :  { %11695 = vmatprep.subr.bf16.mxu0 %v23104_v14 }
0x12f2   :  { %11696 = vmatpush1.bf16.msra.mxu0 %v23105_v35  ;;  %v11835_v35 = vrot.slane %v11834_v4, 1 }
0x12f3   :  { %11697 = vmatprep.subr.bf16.mxu0 %v23106_v15 }
0x12f6   :  { %11698 = vmatpush1.bf16.msra.mxu0 %v23107_v63 }
0x12f7   :  { %11699 = vmatprep.subr.bf16.mxu0 %v23108_v18  ;;  %v11864_v18 = vrot.slane %v11863_v46, 1 }
0x12fa   :  { %11700 = vmatpush1.bf16.msra.mxu0 %v23109_v9 }
0x12fb   :  { %11774 = vmatprep.subr.bf16.mxu0 %v23110_v43 }
0x12fd   :  { %11718 = vmatmul.mubr.bf16.vlgmr.msra.gmra.mrb[76].mxu0 %v11684_v23 }
0x12fe   :  { %11775 = vmatpush1.bf16.msra.mxu0 %v23111_v25  ;;  %11806 = vmatprep.mubr.bf16.mxu0 %v23053_v2  ;;  %v23122_v2 = vld [vmem:[#allocation26_spill] sm:$0xff]  ;;  %v11871_v25 = vrot.slane %v11870_v49, 1 }
0x12ff   :  { %11776 = vmatprep.subr.bf16.mxu0 %v23112_v11 }
0x1302   :  { %11777 = vmatpush1.bf16.msra.mxu0 %v23113_v5 }
0x1303   :  { %11778 = vmatprep.subr.bf16.mxu0 %v23114_v58  ;;  %v11829_v58 = vadd.f32 %v11828_v32, %v11827_v20 }
0x1306   :  { %11779 = vmatpush1.bf16.msra.mxu0 %v23115_v39 }
0x1307   :  { %11780 = vmatprep.subr.bf16.mxu0 %v23116_v40 }
0x130a   :  { %11781 = vmatpush1.bf16.msra.mxu0 %v23117_v41  ;;  %v11836_v41 = vadd.f32 %v11835_v35, %v11834_v4  ;;  %v23129_v4 = vld [vmem:[#allocation15_spill] sm:$0xff] }
0x130b   :  { %11782 = vmatprep.subr.bf16.mxu0 %v23118_v29 }
0x130e   :  { %11783 = vmatpush1.bf16.msra.mxu0 %v23119_v6 }
0x130f   :  { %11784 = vmatprep.subr.bf16.mxu0 %v23120_v8  ;;  %v11865_v8 = vadd.f32 %v11864_v18, %v11863_v46 }
0x1312   :  { %11785 = vmatpush1.bf16.msra.mxu0 %v23121_v7 }
0x1313   :  { %11786 = vmatprep.subr.bf16.mxu0 %v23122_v2 }
0x1316   :  { %11787 = vmatpush1.bf16.msra.mxu0 %v23123_v61  ;;  %v11872_v61 = vadd.f32 %v11871_v25, %v11870_v49 }
0x1317   :  { %11788 = vmatprep.subr.bf16.mxu0 %v23124_v26 }
0x131a   :  { %11789 = vmatpush1.bf16.msra.mxu0 %v23125_v44 }
0x131d   :  { %11807 = vmatmul.mubr.bf16.vlgmr.msra.gmra.mrb[76].mxu0 %v11773_v52 }
0x13f0   :  { %v22772_v21 = vpop.f32.mrb[76].mxu0 }
0x13f1   :  { %v22775_v13 = vpop.f32.mrb[77].mxu0  ;;  %v11875_v16 = vmul.f32 %v22772_v21, %v22772_v21 }
0x13f2   :  { %v22778_v24 = vpop.f32.mrb[78].mxu0  ;;  %v11876_v59 = vmul.f32 %v22775_v13, %v22775_v13 }
0x13f3   :  { %v11839_v17 = vadd.f32 %v22778_v24, %v22772_v21  ;;  %v11877_v57 = vmul.f32 %v22778_v24, %v22778_v24  ;;  %v22786_v51 = vpop.f32.mrb[79].mxu0 }
0x13f4   :  { %v11846_v42 = vadd.f32 %v22786_v51, %v22775_v13  ;;  %v11878_v48 = vmul.f32 %v22786_v51, %v22786_v51 }
0x13f5   :  { %v11840_v50 = vrot.slane %v11839_v17, 4  ;;  %v11879_v38 = vadd.f32 %v11877_v57, %v11875_v16 }
0x13f6   :  { %v11847_v34 = vrot.slane %v11846_v42, 4  ;;  %v11886_v1 = vadd.f32 %v11878_v48, %v11876_v59  ;;  %v11913_v59 = vunpack.c.l.s4 %v17390_v31 }
0x13f7   :  { %v11841_v60 = vadd.f32 %v11840_v50, %v11839_v17  ;;  %v11880_v23 = vrot.slane %v11879_v38, 4 }
0x13f8   :  { %v11848_v27 = vadd.f32 %v11847_v34, %v11846_v42  ;;  %v11887_v22 = vrot.slane %v11886_v1, 4  ;;  %v11914_v42 = vunpack.c.0.s8 %v11913_v59 }
0x13f9   :  { %v11842_v52 = vrot.slane %v11841_v60, 2  ;;  %v11881_v55 = vadd.f32 %v11880_v23, %v11879_v38 }
0x13fa   :  { %v11849_v54 = vrot.slane %v11848_v27, 2  ;;  %v11888_v53 = vadd.f32 %v11887_v22, %v11886_v1  ;;  %v11917_v50 = vsub.s32 %v11914_v42, %v23128_v30  ;;  %v11821_v1 = vld [vmem:[%s22838_s8] sm:$0x3] }
0x13fb   :  { %v11843_v12 = vadd.f32 %v11842_v52, %v11841_v60  ;;  %v11882_v14 = vrot.slane %v11881_v55, 2  ;;  %v11935_v60 = vsub.s32 1, %v23128_v30 }
0x13fc   :  { %v11850_v15 = vadd.f32 %v11849_v54, %v11848_v27  ;;  %v11889_v63 = vrot.slane %v11888_v53, 2 }
0x13fd   :  { %v11844_v9 = vrot.slane %v11843_v12, 1  ;;  %v11883_v43 = vadd.f32 %v11882_v14, %v11881_v55 }
0x13fe   :  { %v11851_v11 = vrot.slane %v11850_v15, 1  ;;  %v11890_v5 = vadd.f32 %v11889_v63, %v11888_v53  ;;  %v23130_v53 = vld [vmem:[#allocation18_spill] sm:$0xff] }
0x13ff   :  { %v11845_v39 = vadd.f32 %v11844_v9, %v11843_v12  ;;  %v11884_v40 = vrot.slane %v11883_v43, 1  ;;  %v23131_v12 = vld [vmem:[#allocation7_spill] sm:$0xff]  ;;  %v23132_v63 = vld [vmem:[#allocation30_spill] sm:$0xff]  ;;  %v23133_v9 = vld [vmem:[#allocation32_spill] sm:$0xff] }
0x1400   :  { %v11852_v29 = vadd.f32 %v11851_v11, %v11850_v15  ;;  %v11891_v6 = vrot.slane %v11890_v5, 1 }
0x1401   :  { %v11853_v7 = vadd.f32 %v11845_v39, %v11829_v58  ;;  %v11885_v2 = vadd.f32 %v11884_v40, %v11883_v43 }
0x1402   :  { %v11854_v26 = vadd.f32 %v11852_v29, %v11836_v41  ;;  %v11892_v44 = vadd.f32 %v11891_v6, %v11890_v5  ;;  %v12012_v29 = vld [vmem:[%s22840_s10 + $0x8] sm:$0xff] }
0x1403   :  { %v11893_v56 = vadd.f32 %v11885_v2, %v11865_v8  ;;  %v11895_v62 = vmul.f32 0.03125, %v11853_v7 }
0x1404   :  { %v11894_v47 = vadd.f32 %v11892_v44, %v11872_v61  ;;  %v11896_v37 = vmul.f32 0.03125, %v11854_v26 }
0x1405   :  { %v11897_v0 = vmul.f32 0.03125, %v11893_v56  ;;  %v11899_v28 = vmul.f32 %v11895_v62, %v11895_v62 }
0x1406   :  { %v11898_v45 = vmul.f32 0.03125, %v11894_v47  ;;  %v11900_v19 = vmul.f32 %v11896_v37, %v11896_v37 }
0x1407   :  { %v11901_v36 = vsub.f32 %v11897_v0, %v11899_v28 }
0x1408   :  { %v11902_v3 = vsub.f32 %v11898_v45, %v11900_v19 }
0x1409   :  { %v11903_v33 = vmax.f32 %v11901_v36, 0.0  ;;  %v12013_v36 = vld [vmem:[%s22840_s10 + $0x10] sm:$0xff] }
0x140a   :  { %v11904_v16 = vmax.f32 %v11902_v3, 0.0 }
0x140b   :  { %v11905_v17 = vadd.f32 1e-05, %v11903_v33 }
0x140c   :  { %v11906_v57 = vadd.f32 1e-05, %v11904_v16 }
0x140d   :  { %17029 = vrsqrt.f32 %v11905_v17 }
0x140e   :  { %17031 = vrsqrt.f32 %v11906_v57 }
0x1417   :  { %v17030_v48 = vpop.eup %17029 }
0x1418   :  { %v17032_v38 = vpop.eup %17031 }
0x1419   :  { %v11911_v10 = vcombine.low %v17030_v48, %v17032_v38 }
0x141b   :  { %v11918_v34 = vrot.slane %v11911_v10, %v11917_v50 }
0x141d   :  { %v11925_v20 = vrot.slane %v11918_v34, %v11917_v50 }
0x141f   :  { %v11927_v23 = vmul.f32 %v11925_v20, %v11821_v1 }
0x1421   :  { %v11932_v27 = vrot.slane %v11927_v23, %v23129_v4  ;;  %v11936_v22 = vrot.slane %v11927_v23, %v11935_v60 }
0x1423   :  { %v11939_v46 = vmul.f32 %v11932_v27, %v11895_v62  ;;  %v11940_v52 = vmul.f32 %v11936_v22, %v11896_v37  ;;  %v11994_v55 = vmul.f32 %v11936_v22, %v22786_v51  ;;  %v11991_v49 = vmul.f32 %v11932_v27, %v22772_v21  ;;  %v11822_v51 = vld [vmem:[%s22839_s9] sm:$0x3]  ;;  %v12014_v37 = vld [vmem:[%s22840_s10 + $0x18] sm:$0xff] }
0x1424   :  { %v11992_v54 = vmul.f32 %v11936_v22, %v22775_v13  ;;  %v11960_v32 = vmul.f32 %v11932_v27, %v23130_v53  ;;  %v11961_v14 = vmul.f32 %v11936_v22, %v23131_v12  ;;  %v11993_v35 = vmul.f32 %v11932_v27, %v22778_v24  ;;  %v12011_v24 = vld [vmem:[%s22840_s10] sm:$0xff] }
0x1425   :  { %v11943_v15 = vcombine.low %v11939_v46, %v11940_v52  ;;  %v11962_v18 = vmul.f32 %v11932_v27, %v23132_v63  ;;  %v11963_v43 = vmul.f32 %v11936_v22, %v23133_v9 }
0x1427   :  { %v11950_v25 = vrot.slane %v11943_v15, %v11917_v50 }
0x1429   :  { %v11957_v11 = vrot.slane %v11950_v25, %v11917_v50 }
0x142b   :  { %v11959_v21 = vsub.f32 %v11822_v51, %v11957_v11 }
0x142d   :  { %v11972_v5 = vrot.slane %v11959_v21, %v11935_v60  ;;  %v11968_v13 = vrot.slane %v11959_v21, %v23129_v4 }
0x142f   :  { %v11998_v58 = vadd.f32 %v11994_v55, %v11972_v5  ;;  %v11995_v39 = vadd.f32 %v11991_v49, %v11968_v13  ;;  %v11996_v40 = vadd.f32 %v11992_v54, %v11972_v5  ;;  %v11975_v41 = vadd.f32 %v11968_v13, %v11960_v32 }
0x1430   :  { %v11976_v6 = vadd.f32 %v11972_v5, %v11961_v14  ;;  %v11997_v8 = vadd.f32 %v11993_v35, %v11968_v13  ;;  %v11977_v7 = vadd.f32 %v11968_v13, %v11962_v18  ;;  %v11978_v2 = vadd.f32 %v11972_v5, %v11963_v43 }
0x1431   :  { %v12006_v61 = vmul.f32 0.2, %v11998_v58  ;;  %vm11999_vm0 = vcmp.gt.f32.partialorder %v11995_v39, 0.0  ;;  %vm12000_vm1 = vcmp.gt.f32.partialorder %v11996_v40, 0.0  ;;  %v12003_v26 = vmul.f32 0.2, %v11995_v39 }
0x1432   :  { %v12004_v44 = vmul.f32 0.2, %v11996_v40  ;;  %vm11979_vm4 = vcmp.gt.f32.partialorder %v11975_v41, 0.0  ;;  %vm11980_vm5 = vcmp.gt.f32.partialorder %v11976_v6, 0.0  ;;  %v11983_v56 = vmul.f32 0.2, %v11975_v41 }
0x1433   :  { %v12007_v62 = vsel %vm11999_vm0, %v11995_v39, %v12003_v26  ;;  %v11984_v47 = vmul.f32 0.2, %v11976_v6  ;;  %vm12001_vm6 = vcmp.gt.f32.partialorder %v11997_v8, 0.0  ;;  %vm12002_vm7 = vcmp.gt.f32.partialorder %v11998_v58, 0.0 }
0x1434   :  { %v12008_v0 = vsel %vm12000_vm1, %v11996_v40, %v12004_v44  ;;  %v12038_v28 = vmul.f32 %v12011_v24, %v12007_v62  ;;  %v11987_v45 = vsel %vm11979_vm4, %v11975_v41, %v11983_v56  ;;  %v12005_v19 = vmul.f32 0.2, %v11997_v8 }
0x1435   :  { %v12039_v3 = vmul.f32 %v12012_v29, %v12008_v0  ;;  %v11988_v33 = vsel %vm11980_vm5, %v11976_v6, %v11984_v47  ;;  %v12015_v16 = vmul.f32 %v12011_v24, %v11987_v45  ;;  %v12010_v17 = vsel %vm12002_vm7, %v11998_v58, %v12006_v61 }
0x1436   :  { %v12016_v57 = vmul.f32 %v12012_v29, %v11988_v33  ;;  %v12009_v31 = vsel %vm12001_vm6, %v11997_v8, %v12005_v19  ;;  %v12041_v59 = vmul.f32 %v12014_v37, %v12010_v17  ;;  %vm11981_vm8 = vcmp.gt.f32.partialorder %v11977_v7, 0.0 }
0x1437   :  { %v12042_v42 = vadd.f32 %v12039_v3, %v12038_v28  ;;  %v12040_v48 = vmul.f32 %v12013_v36, %v12009_v31  ;;  %vm11982_vm9 = vcmp.gt.f32.partialorder %v11978_v2, 0.0  ;;  %v11985_v30 = vmul.f32 0.2, %v11977_v7 }
0x1438   :  { %v12019_v50 = vadd.f32 %v12016_v57, %v12015_v16  ;;  %v11986_v38 = vmul.f32 0.2, %v11978_v2 }
0x1439   :  { %12043 = vadd.xlane.f32.xlu1 %v12042_v42  ;;  %v12045_v10 = vadd.f32 %v12041_v59, %v12040_v48  ;;  %v11989_v34 = vsel %vm11981_vm8, %v11977_v7, %v11985_v30 }
0x143a   :  { %12020 = vadd.xlane.f32.xlu0 %v12019_v50  ;;  %v11990_v1 = vsel %vm11982_vm9, %v11978_v2, %v11986_v38  ;;  %v12017_v20 = vmul.f32 %v12013_v36, %v11989_v34 }
0x143b   :  { %v12018_v60 = vmul.f32 %v12014_v37, %v11990_v1 }
0x143d   :  { %12046 = vadd.xlane.f32.xlu1 %v12045_v10  ;;  %v12022_v23 = vadd.f32 %v12018_v60, %v12017_v20 }
0x143f   :  { %12023 = vadd.xlane.f32.xlu0 %v12022_v23 }
0x14c6   :  { %v12044_v4 = vpop.xlane.xlu1 %12043 }
0x14c7   :  { %v12021_v27 = vpop.xlane.xlu0 %12020 }
0x14ca   :  { %v12047_v22 = vpop.xlane.xlu1 %12046 }
0x14cb   :  { %v12048_v46 = vadd.f32 %v12047_v22, %v12044_v4 }
0x14cc   :  { %v12024_v52 = vpop.xlane.xlu0 %12023 }
0x14cd   :  { %v12049_v55 = vrot.slane %v12048_v46, 4  ;;  %v12025_v49 = vadd.f32 %v12024_v52, %v12021_v27 }
0x14cf   :  { %v12050_v54 = vadd.f32 %v12049_v55, %v12048_v46  ;;  %v12026_v53 = vrot.slane %v12025_v49, 4 }
0x14d1   :  { %v12051_v32 = vrot.slane %v12050_v54, 2  ;;  %v12027_v12 = vadd.f32 %v12026_v53, %v12025_v49 }
0x14d3   :  { %v12052_v14 = vadd.f32 %v12051_v32, %v12050_v54  ;;  %v12028_v35 = vrot.slane %v12027_v12, 2 }
0x14d5   :  { %v12053_v15 = vrot.slane %v12052_v14, 1  ;;  %v12029_v63 = vadd.f32 %v12028_v35, %v12027_v12 }
0x14d7   :  { %v12054_v18 = vadd.f32 %v12053_v15, %v12052_v14  ;;  %v12030_v9 = vrot.slane %v12029_v63, 1 }
0x14d9   :  { %v12055_v43 = vsub.f32 0.0, %v12054_v18  ;;  %v12031_v25 = vadd.f32 %v12030_v9, %v12029_v63 }
0x14db   :  { %v12056_v51 = vmul.f32 1.442695, %v12055_v43  ;;  %v12032_v11 = vsub.f32 0.0, %v12031_v25 }
0x14dd   :  { %17033 = vpow2.f32 %v12056_v51  ;;  %v12033_v21 = vmul.f32 1.442695, %v12032_v11 }
0x14df   :  { %17035 = vpow2.f32 %v12033_v21 }
0x14e7   :  { %v17034_v5 = vpop.eup %17033 }
0x14e8   :  { %v12058_v13 = vadd.f32 1.0, %v17034_v5 }
0x14e9   :  { %v17036_v58 = vpop.eup %17035 }
0x14ea   :  { %17037 = vrcp.f32 %v12058_v13  ;;  %v12035_v39 = vadd.f32 1.0, %v17036_v58 }
0x14ec   :  { %17039 = vrcp.f32 %v12035_v39 }
0x14f4   :  { %v17038_v40 = vpop.eup %17037 }
0x14f5   :  { %12060 = vst [vmem:[%s22841_s11 + $0x1] sm:$0x1] %v17038_v40 }
0x14f6   :  { %v17040_v41 = vpop.eup %17039 }
0x14f7   :  { %12037 = vst [vmem:[%s22841_s11] sm:$0x1] %v17040_v41 }

</bundles_post_ra>
